<compile_context>
chip_gen: v7x
topology: tpu7x:2x2x1
jax: 0.10.0
libtpu: 0.0.40
codegen_flags: <defaults>
</compile_context>

<pallas_src>
import functools

import numpy as np
import jax
import jax.numpy as jnp
from jax.experimental import pallas as pl
from jax.experimental.pallas import tpu as pltpu


_TILE_M = 1024          # multiple of 128; only the no-norm convs tile M


def _cparams(n_parallel_axes):
    return pltpu.CompilerParams(
        dimension_semantics=("parallel",) * n_parallel_axes,
        vmem_limit_bytes=48 * 1024 * 1024,       # <= v7x physical VMEM (64 MiB)
    )


# ----------------------------------------------------------------------------
# Pallas kernels
# ----------------------------------------------------------------------------
def _conv_fused_kernel(*refs, apply_norm, apply_lrelu, eps, slope):
    """(cout,K)@(K,TILE_M) MXU matmul + bias | InstanceNorm + LeakyReLU.

    M (=H*W) sits on the lane axis: stores are dense and the InstanceNorm
    reductions are lane reductions over fully dense vregs.
    """
    if apply_norm:
        x_ref, w_ref, o_ref = refs
    else:
        x_ref, w_ref, b_ref, o_ref = refs
    p = x_ref[0]                                                  # (K, TILE_M) bf16
    acc = jnp.dot(w_ref[...], p, preferred_element_type=jnp.float32)  # (cout, TILE_M)
    if apply_norm:
        # conv bias cancels exactly under the mean subtraction -> never added
        mean = jnp.mean(acc, axis=-1, keepdims=True)              # lane reduce
        cen = acc - mean
        var = jnp.mean(cen * cen, axis=-1, keepdims=True)         # biased variance
        acc = cen * jax.lax.rsqrt(var + eps)
    else:
        acc = acc + b_ref[...]                                    # (cout,1) bcast
    if apply_lrelu:
        acc = jnp.where(acc >= 0.0, acc, slope * acc)             # LeakyReLU(0.2)
    o_ref[0] = acc.astype(o_ref.dtype)


def _patch_head_kernel(p_ref, w_ref, b_ref, m_ref, lb_ref, patch_ref, head_ref):
    """Fused model4 + model5 + model6:
    patch = w4 @ patches + b4 ; head = sigmoid(<patch, folded pool/linear> + b)."""
    p = p_ref[0]                                                  # (K, M) bf16
    patch = jnp.dot(w_ref[...], p, preferred_element_type=jnp.float32)  # (1, M)
    patch = patch + b_ref[...]
    patch_ref[0] = patch
    s = jnp.sum(patch * m_ref[...], axis=-1, keepdims=True) + lb_ref[...]
    head_ref[0] = jax.nn.sigmoid(s)


# ----------------------------------------------------------------------------
# Layer wrappers (XLA glue + Pallas calls)
# ----------------------------------------------------------------------------
def _im2col_nchw(x, k, stride):
    """x: (N,C,H,W) -> K-major patches (N, k*k*C, Ho*Wo), Ho, Wo.

    K ordering is (tap dh*k+dw major, channel minor), matching the HWIO
    weight flattened as (k*k*cin, cout)."""
    N, C, H, W = x.shape
    Ho = (H - k) // stride + 1
    Wo = (W - k) // stride + 1
    taps = []
    for dh in range(k):
        for dw in range(k):
            taps.append(x[:, :, dh:dh + stride * (Ho - 1) + 1:stride,
                             dw:dw + stride * (Wo - 1) + 1:stride])
    p = jnp.stack(taps, axis=1)                       # (N, k*k, C, Ho, Wo)
    return p.reshape(N, k * k * C, Ho * Wo), Ho, Wo


def conv_block(x, w, b, *, stride, apply_norm=False, apply_lrelu=False):
    """Conv2d(k=4, pad=0) [+InstanceNorm2d] [+LeakyReLU(0.2)].  NCHW in/out, bf16 out."""
    N, C, H, W = x.shape
    k, cout = w.shape[0], w.shape[-1]
    K = k * k * C
    patches, Ho, Wo = _im2col_nchw(x.astype(jnp.bfloat16), k, stride)
    M = Ho * Wo
    w_mat = w.reshape(K, cout).T.astype(jnp.bfloat16)             # (cout, K)

    kern = functools.partial(_conv_fused_kernel, apply_norm=apply_norm,
                             apply_lrelu=apply_lrelu, eps=1e-5, slope=0.2)

    if apply_norm or M <= _TILE_M:
        # whole image per grid step (InstanceNorm needs full H*W statistics)
        grid = (N,)
        in_specs = [pl.BlockSpec((1, K, M), lambda n: (n, 0, 0)),
                    pl.BlockSpec((cout, K), lambda n: (0, 0))]
        inputs = [patches, w_mat]
        if not apply_norm:
            in_specs.append(pl.BlockSpec((cout, 1), lambda n: (0, 0)))
            inputs.append(b.reshape(cout, 1).astype(jnp.float32))
        out_spec = pl.BlockSpec((1, cout, M), lambda n: (n, 0, 0))
    else:
        # no-norm layer with large M: tile M so prefetch of tile i+1 hides
        # under compute of tile i and both v7x TensorCores get work.
        grid = (N, pl.cdiv(M, _TILE_M))
        in_specs = [pl.BlockSpec((1, K, _TILE_M), lambda n, m: (n, 0, m)),
                    pl.BlockSpec((cout, K), lambda n, m: (0, 0)),
                    pl.BlockSpec((cout, 1), lambda n, m: (0, 0))]
        inputs = [patches, w_mat, b.reshape(cout, 1).astype(jnp.float32)]
        out_spec = pl.BlockSpec((1, cout, _TILE_M), lambda n, m: (n, 0, m))

    out = pl.pallas_call(
        kern,
        out_shape=jax.ShapeDtypeStruct((N, cout, M), jnp.bfloat16),
        grid=grid,
        in_specs=in_specs,
        out_specs=out_spec,
        compiler_params=_cparams(len(grid)),
    )(*inputs)
    return out.reshape(N, cout, Ho, Wo)               # already NCHW


def _adaptive_pool_matrix(in_size, out_size=7):
    """Exact PyTorch adaptive_avg_pool averaging matrix (out_size, in_size)."""
    m = np.zeros((out_size, in_size), np.float32)
    for i in range(out_size):
        s = (i * in_size) // out_size
        e = ((i + 1) * in_size + out_size - 1) // out_size
        m[i, s:e] = 1.0 / (e - s)
    return jnp.asarray(m)


def patch_head_block(x, w, b, lin_w, lin_b):
    """model4 (Conv2d(nf,1,k=4,s=1,p=0)) fused with model5+model6
    (AdaptiveAvgPool2d((7,7)) -> Flatten -> Linear(49,1) -> Sigmoid).

    The pool+linear are linear, so they fold exactly into one (H*W,) weight
    map; one pallas_call emits both the patch map and the head scalar."""
    N, C, H, W = x.shape
    k = w.shape[0]
    patches, Ho, Wo = _im2col_nchw(x.astype(jnp.bfloat16), k, 1)
    K, M = k * k * C, Ho * Wo
    w_mat = w.reshape(K, 1).T.astype(jnp.bfloat16)                # (1, K)
    bias = b.reshape(1, 1).astype(jnp.float32)
    R = _adaptive_pool_matrix(Ho)                                 # (7, Ho)
    Cm = _adaptive_pool_matrix(Wo)                                # (7, Wo)
    meff = (R.T @ lin_w.reshape(7, 7) @ Cm).reshape(1, M).astype(jnp.float32)
    lb = lin_b.reshape(1, 1).astype(jnp.float32)

    patch, head = pl.pallas_call(
        _patch_head_kernel,
        out_shape=(jax.ShapeDtypeStruct((N, 1, M), jnp.float32),
                   jax.ShapeDtypeStruct((N, 1, 1), jnp.float32)),
        grid=(N,),
        in_specs=[pl.BlockSpec((1, K, M), lambda n: (n, 0, 0)),
                  pl.BlockSpec((1, K), lambda n: (0, 0)),
                  pl.BlockSpec((1, 1), lambda n: (0, 0)),
                  pl.BlockSpec((1, M), lambda n: (0, 0)),
                  pl.BlockSpec((1, 1), lambda n: (0, 0))],
        out_specs=(pl.BlockSpec((1, 1, M), lambda n: (n, 0, 0)),
                   pl.BlockSpec((1, 1, 1), lambda n: (n, 0, 0))),
        compiler_params=_cparams(1),
    )(patches, w_mat, bias, meff, lb)
    return patch.reshape(N, 1, Ho, Wo), head.reshape(N, 1)


def avg_pool_3x3_s2(x):
    """AvgPool2d(3, stride=2, padding=1, count_include_pad=False), NCHW."""
    # TODO(synk): kept as XLA shifted-add glue (<1% of total HBM traffic).
    def win_sum(t):
        H, W = t.shape[-2], t.shape[-1]
        Ho = (H - 3) // 2 + 1
        Wo = (W - 3) // 2 + 1
        s = None
        for dh in range(3):
            for dw in range(3):
                sl = t[..., dh:dh + 2 * (Ho - 1) + 1:2, dw:dw + 2 * (Wo - 1) + 1:2]
                s = sl if s is None else s + sl
        return s

    xp = jnp.pad(x, ((0, 0), (0, 0), (1, 1), (1, 1)))
    cnt = jnp.pad(jnp.ones((1, 1) + x.shape[2:], x.dtype),
                  ((0, 0), (0, 0), (1, 1), (1, 1)))
    return win_sum(xp) / win_sum(cnt)


# ----------------------------------------------------------------------------
# Model
# ----------------------------------------------------------------------------
def discriminator_forward(x, P):
    """Single-scale Discriminator; NCHW in.  Returns the 6 outputs of result[1:]."""
    # TODO(synk): c2->c3->c4->head could be fused into a single pallas_call
    # (all tail weights + activations fit VMEM) but needs in-kernel
    # non-tile-aligned reshapes for the tap gather; kept as separate calls
    # plus the fused c4+head kernel.
    h0 = conv_block(x, *P["c0"], stride=2, apply_lrelu=True)                     # model0
    h1 = conv_block(h0, *P["c1"], stride=2, apply_norm=True, apply_lrelu=True)   # model1
    h2 = conv_block(h1, *P["c2"], stride=2, apply_norm=True, apply_lrelu=True)   # model2
    h3 = conv_block(h2, *P["c3"], stride=1, apply_norm=True, apply_lrelu=True)   # model3
    patch, head = patch_head_block(h3, *P["c4"], P["lin_w"], P["lin_b"])         # model4-6
    return [h0.astype(jnp.float32), h1.astype(jnp.float32),
            h2.astype(jnp.float32), h3.astype(jnp.float32), patch, head]


def multiscale_discriminator_forward(x_nchw, params):
    x = x_nchw.astype(jnp.float32)
    ds = avg_pool_3x3_s2(x)                                 # self.downsample
    r1 = discriminator_forward(ds, params["D1"])            # D_1(down(x))
    r2 = discriminator_forward(x, params["D2"])             # D_2(x)
    return (tuple(r1), tuple(r2))


# ----------------------------------------------------------------------------
# Deterministic parameter init
# ----------------------------------------------------------------------------
class KeyGen:
    def __init__(self, seed):
        self.key = jax.random.PRNGKey(seed)

    def __call__(self):
        self.key, sub = jax.random.split(self.key)
        return sub


def init_discriminator_params(kg, input_nc, ndf):
    def conv_p(cin, cout, k=4, scale=0.05):
        w = scale * jax.random.normal(kg(), (k, k, cin, cout), dtype=jnp.float32)
        b = 0.01 * jax.random.normal(kg(), (cout,), dtype=jnp.float32)
        return (w, b)

    P = {}
    nf = ndf
    P["c0"] = conv_p(input_nc, nf)
    for n in range(1, 3):
        nf_prev, nf = nf, min(nf * 2, 512)
        P[f"c{n}"] = conv_p(nf_prev, nf)
    nf_prev, nf = nf, min(nf * 2, 512)
    P["c3"] = conv_p(nf_prev, nf)
    P["c4"] = conv_p(nf, 1)
    P["lin_w"] = 0.1 * jax.random.normal(kg(), (1, 49), dtype=jnp.float32)
    P["lin_b"] = 0.01 * jax.random.normal(kg(), (1,), dtype=jnp.float32)
    return P


if __name__ == "__main__":
    INPUT_NC, NDF = 3, 8
    # kernel_size=4 / padding=0 convs force spatial >= ~140 so the half-res
    # branch still has >= 1 pixel after model4 (smallest valid even size).
    N, H = 2, 140

    kg = KeyGen(0)
    params = {"D1": init_discriminator_params(kg, INPUT_NC, NDF),
              "D2": init_discriminator_params(kg, INPUT_NC, NDF)}
    x = jax.random.normal(jax.random.PRNGKey(0), (N, INPUT_NC, H, H),
                          dtype=jnp.float32)

    fwd = jax.jit(multiscale_discriminator_forward)
    out = jax.block_until_ready(fwd(x, params))

    d1, d2 = out                               # [D_1(down(x)), D_2(x)]
    assert len(d1) == 6 and len(d2) == 6
    assert d1[0].shape == (N, NDF, 34, 34), d1[0].shape
    assert d1[3].shape == (N, 8 * NDF, 4, 4), d1[3].shape
    assert d1[4].shape == (N, 1, 1, 1), d1[4].shape
    assert d1[5].shape == (N, 1), d1[5].shape
    assert d2[0].shape == (N, NDF, 69, 69), d2[0].shape
    assert d2[3].shape == (N, 8 * NDF, 12, 12), d2[3].shape
    assert d2[4].shape == (N, 1, 9, 9), d2[4].shape
    assert d2[5].shape == (N, 1), d2[5].shape
    for res in (d1, d2):
        for t in res:
            assert bool(jnp.all(jnp.isfinite(t)))
        assert bool(jnp.all((res[5] >= 0.0) & (res[5] <= 1.0)))
    print("KERNEL_OK")
</pallas_src>

<mosaic_0001>
module attributes {stable_mosaic.version = 11 : i64} {
  func.func @_conv_fused_kernel(%arg0: i32, %arg1: i32, %arg2: memref<1x48x1024xbf16, #tpu.memory_space<vmem>>, %arg3: memref<8x48xbf16, #tpu.memory_space<vmem>>, %arg4: memref<8x1xf32, #tpu.memory_space<vmem>>, %arg5: memref<1x8x1024xbf16, #tpu.memory_space<vmem>>) attributes {dimension_semantics = [#tpu.dimension_semantics<parallel>, #tpu.dimension_semantics<parallel>], iteration_bounds = array<i64: 2, 5>, scalar_prefetch = 0 : i64, scratch_operands = 0 : i64, tpu.core_type = #tpu.core_type<tc>, window_params = [{transform_indices = @transform_0, window_bounds = array<i64: 1, 48, 1024>}, {pipeline_mode = #tpu.pipeline_mode<synchronous>, transform_indices = @transform_1, window_bounds = array<i64: 8, 48>}, {pipeline_mode = #tpu.pipeline_mode<synchronous>, transform_indices = @transform_2, window_bounds = array<i64: 8, 1>}, {transform_indices = @transform_3, window_bounds = array<i64: 1, 8, 1024>}]} {
    %c0 = arith.constant 0 : index
    %c0_0 = arith.constant 0 : index
    %c0_1 = arith.constant 0 : index
    %0 = vector.load %arg2[%c0, %c0_0, %c0_1] : memref<1x48x1024xbf16, #tpu.memory_space<vmem>>, vector<1x48x1024xbf16>
    %1 = vector.shape_cast %0 : vector<1x48x1024xbf16> to vector<48x1024xbf16>
    %c0_2 = arith.constant 0 : index
    %c0_3 = arith.constant 0 : index
    %2 = vector.load %arg3[%c0_2, %c0_3] : memref<8x48xbf16, #tpu.memory_space<vmem>>, vector<8x48xbf16>
    %cst = arith.constant dense<0.000000e+00> : vector<8x1024xf32>
    %3 = tpu.matmul %2, %1, %cst {dimension_numbers = #tpu.dot_dimension_numbers<[1], [0], [0], [1], [0, 0, 1, 1], [], []>} : vector<8x48xbf16>, vector<48x1024xbf16>, vector<8x1024xf32> -> vector<8x1024xf32>
    %c0_4 = arith.constant 0 : index
    %c0_5 = arith.constant 0 : index
    %4 = vector.load %arg4[%c0_4, %c0_5] : memref<8x1xf32, #tpu.memory_space<vmem>>, vector<8x1xf32>
    %5 = vector.broadcast %4 : vector<8x1xf32> to vector<8x1024xf32>
    %6 = arith.addf %3, %5 : vector<8x1024xf32>
    %cst_6 = arith.constant 0.000000e+00 : f32
    %7 = vector.broadcast %cst_6 : f32 to vector<8x1024xf32>
    %8 = arith.cmpf oge, %6, %7 : vector<8x1024xf32>
    %cst_7 = arith.constant 2.000000e-01 : f32
    %9 = vector.broadcast %cst_7 : f32 to vector<8x1024xf32>
    %10 = arith.mulf %9, %6 : vector<8x1024xf32>
    %11 = arith.select %8, %6, %10 : vector<8x1024xi1>, vector<8x1024xf32>
    %12 = arith.truncf %11 : vector<8x1024xf32> to vector<8x1024xbf16>
    %c0_8 = arith.constant 0 : index
    %c0_9 = arith.constant 0 : index
    %c0_10 = arith.constant 0 : index
    %13 = vector.load %arg5[%c0_8, %c0_9, %c0_10] : memref<1x8x1024xbf16, #tpu.memory_space<vmem>>, vector<1x8x1024xbf16>
    %14 = vector.shape_cast %13 : vector<1x8x1024xbf16> to vector<8x1024xbf16>
    %15 = vector.shape_cast %12 : vector<8x1024xbf16> to vector<1x8x1024xbf16>
    tpu.vector_store %arg5[%c0_8, %c0_9, %c0_10], %15 {strides = array<i32>} : memref<1x8x1024xbf16, #tpu.memory_space<vmem>>, vector<1x8x1024xbf16>,
    return
  }
  func.func @transform_0(%arg0: i32, %arg1: i32) -> (i32, i32, i32) {
    %c0_i32 = arith.constant 0 : i32
    %c0_i32_0 = arith.constant 0 : i32
    return %arg0, %c0_i32, %arg1 : i32, i32, i32
  }
  func.func @transform_1(%arg0: i32, %arg1: i32) -> (i32, i32) {
    %c0_i32 = arith.constant 0 : i32
    %c0_i32_0 = arith.constant 0 : i32
    %c0_i32_1 = arith.constant 0 : i32
    return %c0_i32, %c0_i32_0 : i32, i32
  }
  func.func @transform_2(%arg0: i32, %arg1: i32) -> (i32, i32) {
    %c0_i32 = arith.constant 0 : i32
    %c0_i32_0 = arith.constant 0 : i32
    %c0_i32_1 = arith.constant 0 : i32
    return %c0_i32, %c0_i32_0 : i32, i32
  }
  func.func @transform_3(%arg0: i32, %arg1: i32) -> (i32, i32, i32) {
    %c0_i32 = arith.constant 0 : i32
    %c0_i32_0 = arith.constant 0 : i32
    return %arg0, %c0_i32, %arg1 : i32, i32, i32
  }
}

module attributes {stable_mosaic.version = 11 : i64} {
  func.func @_conv_fused_kernel(%arg0: i32, %arg1: memref<1x128x1089xbf16, #tpu.memory_space<vmem>>, %arg2: memref<16x128xbf16, #tpu.memory_space<vmem>>, %arg3: memref<1x16x1089xbf16, #tpu.memory_space<vmem>>) attributes {dimension_semantics = [#tpu.dimension_semantics<parallel>], iteration_bounds = array<i64: 2>, scalar_prefetch = 0 : i64, scratch_operands = 0 : i64, tpu.core_type = #tpu.core_type<tc>, window_params = [{transform_indices = @transform_0, window_bounds = array<i64: 1, 128, 1089>}, {pipeline_mode = #tpu.pipeline_mode<synchronous>, transform_indices = @transform_1, window_bounds = array<i64: 16, 128>}, {transform_indices = @transform_2, window_bounds = array<i64: 1, 16, 1089>}]} {
    %c0 = arith.constant 0 : index
    %c0_0 = arith.constant 0 : index
    %c0_1 = arith.constant 0 : index
    %0 = vector.load %arg1[%c0, %c0_0, %c0_1] : memref<1x128x1089xbf16, #tpu.memory_space<vmem>>, vector<1x128x1089xbf16>
    %1 = vector.shape_cast %0 : vector<1x128x1089xbf16> to vector<128x1089xbf16>
    %c0_2 = arith.constant 0 : index
    %c0_3 = arith.constant 0 : index
    %2 = vector.load %arg2[%c0_2, %c0_3] : memref<16x128xbf16, #tpu.memory_space<vmem>>, vector<16x128xbf16>
    %cst = arith.constant dense<0.000000e+00> : vector<16x1089xf32>
    %3 = tpu.matmul %2, %1, %cst {dimension_numbers = #tpu.dot_dimension_numbers<[1], [0], [0], [1], [0, 0, 1, 1], [], []>} : vector<16x128xbf16>, vector<128x1089xbf16>, vector<16x1089xf32> -> vector<16x1089xf32>
    %cst_4 = arith.constant dense<0.000000e+00> : vector<16xf32>
    %4 = vector.multi_reduction <add>, %3, %cst_4 [1] : vector<16x1089xf32> to vector<16xf32>
    %5 = vector.shape_cast %4 : vector<16xf32> to vector<16x1xf32>
    %cst_5 = arith.constant 1.089000e+03 : f32
    %6 = vector.broadcast %cst_5 : f32 to vector<16x1xf32>
    %7 = arith.divf %5, %6 : vector<16x1xf32>
    %8 = vector.broadcast %7 : vector<16x1xf32> to vector<16x1089xf32>
    %9 = arith.subf %3, %8 : vector<16x1089xf32>
    %10 = arith.mulf %9, %9 : vector<16x1089xf32>
    %cst_6 = arith.constant dense<0.000000e+00> : vector<16xf32>
    %11 = vector.multi_reduction <add>, %10, %cst_6 [1] : vector<16x1089xf32> to vector<16xf32>
    %12 = vector.shape_cast %11 : vector<16xf32> to vector<16x1xf32>
    %cst_7 = arith.constant 1.089000e+03 : f32
    %13 = vector.broadcast %cst_7 : f32 to vector<16x1xf32>
    %14 = arith.divf %12, %13 : vector<16x1xf32>
    %cst_8 = arith.constant 9.99999974E-6 : f32
    %15 = vector.broadcast %cst_8 : f32 to vector<16x1xf32>
    %16 = arith.addf %14, %15 : vector<16x1xf32>
    %17 = math.rsqrt %16 : vector<16x1xf32>
    %18 = vector.broadcast %17 : vector<16x1xf32> to vector<16x1089xf32>
    %19 = arith.mulf %9, %18 : vector<16x1089xf32>
    %cst_9 = arith.constant 0.000000e+00 : f32
    %20 = vector.broadcast %cst_9 : f32 to vector<16x1089xf32>
    %21 = arith.cmpf oge, %19, %20 : vector<16x1089xf32>
    %cst_10 = arith.constant 2.000000e-01 : f32
    %22 = vector.broadcast %cst_10 : f32 to vector<16x1089xf32>
    %23 = arith.mulf %22, %19 : vector<16x1089xf32>
    %24 = arith.select %21, %19, %23 : vector<16x1089xi1>, vector<16x1089xf32>
    %25 = arith.truncf %24 : vector<16x1089xf32> to vector<16x1089xbf16>
    %c0_11 = arith.constant 0 : index
    %c0_12 = arith.constant 0 : index
    %c0_13 = arith.constant 0 : index
    %26 = vector.load %arg3[%c0_11, %c0_12, %c0_13] : memref<1x16x1089xbf16, #tpu.memory_space<vmem>>, vector<1x16x1089xbf16>
    %27 = vector.shape_cast %26 : vector<1x16x1089xbf16> to vector<16x1089xbf16>
    %28 = vector.shape_cast %25 : vector<16x1089xbf16> to vector<1x16x1089xbf16>
    tpu.vector_store %arg3[%c0_11, %c0_12, %c0_13], %28 {strides = array<i32>} : memref<1x16x1089xbf16, #tpu.memory_space<vmem>>, vector<1x16x1089xbf16>,
    return
  }
  func.func @transform_0(%arg0: i32) -> (i32, i32, i32) {
    %c0_i32 = arith.constant 0 : i32
    %c0_i32_0 = arith.constant 0 : i32
    %c0_i32_1 = arith.constant 0 : i32
    return %arg0, %c0_i32, %c0_i32_0 : i32, i32, i32
  }
  func.func @transform_1(%arg0: i32) -> (i32, i32) {
    %c0_i32 = arith.constant 0 : i32
    %c0_i32_0 = arith.constant 0 : i32
    %c0_i32_1 = arith.constant 0 : i32
    return %c0_i32, %c0_i32_0 : i32, i32
  }
  func.func @transform_2(%arg0: i32) -> (i32, i32, i32) {
    %c0_i32 = arith.constant 0 : i32
    %c0_i32_0 = arith.constant 0 : i32
    %c0_i32_1 = arith.constant 0 : i32
    return %arg0, %c0_i32, %c0_i32_0 : i32, i32, i32
  }
}

module attributes {stable_mosaic.version = 11 : i64} {
  func.func @_conv_fused_kernel(%arg0: i32, %arg1: memref<1x256x225xbf16, #tpu.memory_space<vmem>>, %arg2: memref<32x256xbf16, #tpu.memory_space<vmem>>, %arg3: memref<1x32x225xbf16, #tpu.memory_space<vmem>>) attributes {dimension_semantics = [#tpu.dimension_semantics<parallel>], iteration_bounds = array<i64: 2>, scalar_prefetch = 0 : i64, scratch_operands = 0 : i64, tpu.core_type = #tpu.core_type<tc>, window_params = [{transform_indices = @transform_0, window_bounds = array<i64: 1, 256, 225>}, {pipeline_mode = #tpu.pipeline_mode<synchronous>, transform_indices = @transform_1, window_bounds = array<i64: 32, 256>}, {transform_indices = @transform_2, window_bounds = array<i64: 1, 32, 225>}]} {
    %c0 = arith.constant 0 : index
    %c0_0 = arith.constant 0 : index
    %c0_1 = arith.constant 0 : index
    %0 = vector.load %arg1[%c0, %c0_0, %c0_1] : memref<1x256x225xbf16, #tpu.memory_space<vmem>>, vector<1x256x225xbf16>
    %1 = vector.shape_cast %0 : vector<1x256x225xbf16> to vector<256x225xbf16>
    %c0_2 = arith.constant 0 : index
    %c0_3 = arith.constant 0 : index
    %2 = vector.load %arg2[%c0_2, %c0_3] : memref<32x256xbf16, #tpu.memory_space<vmem>>, vector<32x256xbf16>
    %cst = arith.constant dense<0.000000e+00> : vector<32x225xf32>
    %3 = tpu.matmul %2, %1, %cst {dimension_numbers = #tpu.dot_dimension_numbers<[1], [0], [0], [1], [0, 0, 1, 1], [], []>} : vector<32x256xbf16>, vector<256x225xbf16>, vector<32x225xf32> -> vector<32x225xf32>
    %cst_4 = arith.constant dense<0.000000e+00> : vector<32xf32>
    %4 = vector.multi_reduction <add>, %3, %cst_4 [1] : vector<32x225xf32> to vector<32xf32>
    %5 = vector.shape_cast %4 : vector<32xf32> to vector<32x1xf32>
    %cst_5 = arith.constant 2.250000e+02 : f32
    %6 = vector.broadcast %cst_5 : f32 to vector<32x1xf32>
    %7 = arith.divf %5, %6 : vector<32x1xf32>
    %8 = vector.broadcast %7 : vector<32x1xf32> to vector<32x225xf32>
    %9 = arith.subf %3, %8 : vector<32x225xf32>
    %10 = arith.mulf %9, %9 : vector<32x225xf32>
    %cst_6 = arith.constant dense<0.000000e+00> : vector<32xf32>
    %11 = vector.multi_reduction <add>, %10, %cst_6 [1] : vector<32x225xf32> to vector<32xf32>
    %12 = vector.shape_cast %11 : vector<32xf32> to vector<32x1xf32>
    %cst_7 = arith.constant 2.250000e+02 : f32
    %13 = vector.broadcast %cst_7 : f32 to vector<32x1xf32>
    %14 = arith.divf %12, %13 : vector<32x1xf32>
    %cst_8 = arith.constant 9.99999974E-6 : f32
    %15 = vector.broadcast %cst_8 : f32 to vector<32x1xf32>
    %16 = arith.addf %14, %15 : vector<32x1xf32>
    %17 = math.rsqrt %16 : vector<32x1xf32>
    %18 = vector.broadcast %17 : vector<32x1xf32> to vector<32x225xf32>
    %19 = arith.mulf %9, %18 : vector<32x225xf32>
    %cst_9 = arith.constant 0.000000e+00 : f32
    %20 = vector.broadcast %cst_9 : f32 to vector<32x225xf32>
    %21 = arith.cmpf oge, %19, %20 : vector<32x225xf32>
    %cst_10 = arith.constant 2.000000e-01 : f32
    %22 = vector.broadcast %cst_10 : f32 to vector<32x225xf32>
    %23 = arith.mulf %22, %19 : vector<32x225xf32>
    %24 = arith.select %21, %19, %23 : vector<32x225xi1>, vector<32x225xf32>
    %25 = arith.truncf %24 : vector<32x225xf32> to vector<32x225xbf16>
    %c0_11 = arith.constant 0 : index
    %c0_12 = arith.constant 0 : index
    %c0_13 = arith.constant 0 : index
    %26 = vector.load %arg3[%c0_11, %c0_12, %c0_13] : memref<1x32x225xbf16, #tpu.memory_space<vmem>>, vector<1x32x225xbf16>
    %27 = vector.shape_cast %26 : vector<1x32x225xbf16> to vector<32x225xbf16>
    %28 = vector.shape_cast %25 : vector<32x225xbf16> to vector<1x32x225xbf16>
    tpu.vector_store %arg3[%c0_11, %c0_12, %c0_13], %28 {strides = array<i32>} : memref<1x32x225xbf16, #tpu.memory_space<vmem>>, vector<1x32x225xbf16>,
    return
  }
  func.func @transform_0(%arg0: i32) -> (i32, i32, i32) {
    %c0_i32 = arith.constant 0 : i32
    %c0_i32_0 = arith.constant 0 : i32
    %c0_i32_1 = arith.constant 0 : i32
    return %arg0, %c0_i32, %c0_i32_0 : i32, i32, i32
  }
  func.func @transform_1(%arg0: i32) -> (i32, i32) {
    %c0_i32 = arith.constant 0 : i32
    %c0_i32_0 = arith.constant 0 : i32
    %c0_i32_1 = arith.constant 0 : i32
    return %c0_i32, %c0_i32_0 : i32, i32
  }
  func.func @transform_2(%arg0: i32) -> (i32, i32, i32) {
    %c0_i32 = arith.constant 0 : i32
    %c0_i32_0 = arith.constant 0 : i32
    %c0_i32_1 = arith.constant 0 : i32
    return %arg0, %c0_i32, %c0_i32_0 : i32, i32, i32
  }
}

module attributes {stable_mosaic.version = 11 : i64} {
  func.func @_conv_fused_kernel(%arg0: i32, %arg1: memref<1x512x144xbf16, #tpu.memory_space<vmem>>, %arg2: memref<64x512xbf16, #tpu.memory_space<vmem>>, %arg3: memref<1x64x144xbf16, #tpu.memory_space<vmem>>) attributes {dimension_semantics = [#tpu.dimension_semantics<parallel>], iteration_bounds = array<i64: 2>, scalar_prefetch = 0 : i64, scratch_operands = 0 : i64, tpu.core_type = #tpu.core_type<tc>, window_params = [{transform_indices = @transform_0, window_bounds = array<i64: 1, 512, 144>}, {pipeline_mode = #tpu.pipeline_mode<synchronous>, transform_indices = @transform_1, window_bounds = array<i64: 64, 512>}, {transform_indices = @transform_2, window_bounds = array<i64: 1, 64, 144>}]} {
    %c0 = arith.constant 0 : index
    %c0_0 = arith.constant 0 : index
    %c0_1 = arith.constant 0 : index
    %0 = vector.load %arg1[%c0, %c0_0, %c0_1] : memref<1x512x144xbf16, #tpu.memory_space<vmem>>, vector<1x512x144xbf16>
    %1 = vector.shape_cast %0 : vector<1x512x144xbf16> to vector<512x144xbf16>
    %c0_2 = arith.constant 0 : index
    %c0_3 = arith.constant 0 : index
    %2 = vector.load %arg2[%c0_2, %c0_3] : memref<64x512xbf16, #tpu.memory_space<vmem>>, vector<64x512xbf16>
    %cst = arith.constant dense<0.000000e+00> : vector<64x144xf32>
    %3 = tpu.matmul %2, %1, %cst {dimension_numbers = #tpu.dot_dimension_numbers<[1], [0], [0], [1], [0, 0, 1, 1], [], []>} : vector<64x512xbf16>, vector<512x144xbf16>, vector<64x144xf32> -> vector<64x144xf32>
    %cst_4 = arith.constant dense<0.000000e+00> : vector<64xf32>
    %4 = vector.multi_reduction <add>, %3, %cst_4 [1] : vector<64x144xf32> to vector<64xf32>
    %5 = vector.shape_cast %4 : vector<64xf32> to vector<64x1xf32>
    %cst_5 = arith.constant 1.440000e+02 : f32
    %6 = vector.broadcast %cst_5 : f32 to vector<64x1xf32>
    %7 = arith.divf %5, %6 : vector<64x1xf32>
    %8 = vector.broadcast %7 : vector<64x1xf32> to vector<64x144xf32>
    %9 = arith.subf %3, %8 : vector<64x144xf32>
    %10 = arith.mulf %9, %9 : vector<64x144xf32>
    %cst_6 = arith.constant dense<0.000000e+00> : vector<64xf32>
    %11 = vector.multi_reduction <add>, %10, %cst_6 [1] : vector<64x144xf32> to vector<64xf32>
    %12 = vector.shape_cast %11 : vector<64xf32> to vector<64x1xf32>
    %cst_7 = arith.constant 1.440000e+02 : f32
    %13 = vector.broadcast %cst_7 : f32 to vector<64x1xf32>
    %14 = arith.divf %12, %13 : vector<64x1xf32>
    %cst_8 = arith.constant 9.99999974E-6 : f32
    %15 = vector.broadcast %cst_8 : f32 to vector<64x1xf32>
    %16 = arith.addf %14, %15 : vector<64x1xf32>
    %17 = math.rsqrt %16 : vector<64x1xf32>
    %18 = vector.broadcast %17 : vector<64x1xf32> to vector<64x144xf32>
    %19 = arith.mulf %9, %18 : vector<64x144xf32>
    %cst_9 = arith.constant 0.000000e+00 : f32
    %20 = vector.broadcast %cst_9 : f32 to vector<64x144xf32>
    %21 = arith.cmpf oge, %19, %20 : vector<64x144xf32>
    %cst_10 = arith.constant 2.000000e-01 : f32
    %22 = vector.broadcast %cst_10 : f32 to vector<64x144xf32>
    %23 = arith.mulf %22, %19 : vector<64x144xf32>
    %24 = arith.select %21, %19, %23 : vector<64x144xi1>, vector<64x144xf32>
    %25 = arith.truncf %24 : vector<64x144xf32> to vector<64x144xbf16>
    %c0_11 = arith.constant 0 : index
    %c0_12 = arith.constant 0 : index
    %c0_13 = arith.constant 0 : index
    %26 = vector.load %arg3[%c0_11, %c0_12, %c0_13] : memref<1x64x144xbf16, #tpu.memory_space<vmem>>, vector<1x64x144xbf16>
    %27 = vector.shape_cast %26 : vector<1x64x144xbf16> to vector<64x144xbf16>
    %28 = vector.shape_cast %25 : vector<64x144xbf16> to vector<1x64x144xbf16>
    tpu.vector_store %arg3[%c0_11, %c0_12, %c0_13], %28 {strides = array<i32>} : memref<1x64x144xbf16, #tpu.memory_space<vmem>>, vector<1x64x144xbf16>,
    return
  }
  func.func @transform_0(%arg0: i32) -> (i32, i32, i32) {
    %c0_i32 = arith.constant 0 : i32
    %c0_i32_0 = arith.constant 0 : i32
    %c0_i32_1 = arith.constant 0 : i32
    return %arg0, %c0_i32, %c0_i32_0 : i32, i32, i32
  }
  func.func @transform_1(%arg0: i32) -> (i32, i32) {
    %c0_i32 = arith.constant 0 : i32
    %c0_i32_0 = arith.constant 0 : i32
    %c0_i32_1 = arith.constant 0 : i32
    return %c0_i32, %c0_i32_0 : i32, i32
  }
  func.func @transform_2(%arg0: i32) -> (i32, i32, i32) {
    %c0_i32 = arith.constant 0 : i32
    %c0_i32_0 = arith.constant 0 : i32
    %c0_i32_1 = arith.constant 0 : i32
    return %arg0, %c0_i32, %c0_i32_0 : i32, i32, i32
  }
}

module attributes {stable_mosaic.version = 11 : i64} {
  func.func @_patch_head_kernel(%arg0: i32, %arg1: memref<1x1024x81xbf16, #tpu.memory_space<vmem>>, %arg2: memref<1x1024xbf16, #tpu.memory_space<vmem>>, %arg3: memref<1x1xf32, #tpu.memory_space<vmem>>, %arg4: memref<1x81xf32, #tpu.memory_space<vmem>>, %arg5: memref<1x1xf32, #tpu.memory_space<vmem>>, %arg6: memref<1x1x81xf32, #tpu.memory_space<vmem>>, %arg7: memref<1x1x1xf32, #tpu.memory_space<vmem>>) attributes {dimension_semantics = [#tpu.dimension_semantics<parallel>], iteration_bounds = array<i64: 2>, scalar_prefetch = 0 : i64, scratch_operands = 0 : i64, tpu.core_type = #tpu.core_type<tc>, window_params = [{transform_indices = @transform_0, window_bounds = array<i64: 1, 1024, 81>}, {pipeline_mode = #tpu.pipeline_mode<synchronous>, transform_indices = @transform_1, window_bounds = array<i64: 1, 1024>}, {pipeline_mode = #tpu.pipeline_mode<synchronous>, transform_indices = @transform_2, window_bounds = array<i64: 1, 1>}, {pipeline_mode = #tpu.pipeline_mode<synchronous>, transform_indices = @transform_3, window_bounds = array<i64: 1, 81>}, {pipeline_mode = #tpu.pipeline_mode<synchronous>, transform_indices = @transform_4, window_bounds = array<i64: 1, 1>}, {transform_indices = @transform_5, window_bounds = array<i64: 1, 1, 81>}, {transform_indices = @transform_6, window_bounds = array<i64: 1, 1, 1>}]} {
    %c0 = arith.constant 0 : index
    %c0_0 = arith.constant 0 : index
    %c0_1 = arith.constant 0 : index
    %0 = vector.load %arg1[%c0, %c0_0, %c0_1] : memref<1x1024x81xbf16, #tpu.memory_space<vmem>>, vector<1x1024x81xbf16>
    %1 = vector.shape_cast %0 : vector<1x1024x81xbf16> to vector<1024x81xbf16>
    %c0_2 = arith.constant 0 : index
    %c0_3 = arith.constant 0 : index
    %2 = vector.load %arg2[%c0_2, %c0_3] : memref<1x1024xbf16, #tpu.memory_space<vmem>>, vector<1x1024xbf16>
    %cst = arith.constant dense<0.000000e+00> : vector<1x81xf32>
    %3 = tpu.matmul %2, %1, %cst {dimension_numbers = #tpu.dot_dimension_numbers<[1], [0], [0], [1], [0, 0, 1, 1], [], []>} : vector<1x1024xbf16>, vector<1024x81xbf16>, vector<1x81xf32> -> vector<1x81xf32>
    %c0_4 = arith.constant 0 : index
    %c0_5 = arith.constant 0 : index
    %4 = vector.load %arg3[%c0_4, %c0_5] : memref<1x1xf32, #tpu.memory_space<vmem>>, vector<1x1xf32>
    %5 = vector.broadcast %4 : vector<1x1xf32> to vector<1x81xf32>
    %6 = arith.addf %3, %5 : vector<1x81xf32>
    %c0_6 = arith.constant 0 : index
    %c0_7 = arith.constant 0 : index
    %c0_8 = arith.constant 0 : index
    %7 = vector.load %arg6[%c0_6, %c0_7, %c0_8] : memref<1x1x81xf32, #tpu.memory_space<vmem>>, vector<1x1x81xf32>
    %8 = vector.shape_cast %7 : vector<1x1x81xf32> to vector<1x81xf32>
    %9 = vector.shape_cast %6 : vector<1x81xf32> to vector<1x1x81xf32>
    tpu.vector_store %arg6[%c0_6, %c0_7, %c0_8], %9 {strides = array<i32>} : memref<1x1x81xf32, #tpu.memory_space<vmem>>, vector<1x1x81xf32>,
    %c0_9 = arith.constant 0 : index
    %c0_10 = arith.constant 0 : index
    %10 = vector.load %arg4[%c0_9, %c0_10] : memref<1x81xf32, #tpu.memory_space<vmem>>, vector<1x81xf32>
    %11 = arith.mulf %6, %10 : vector<1x81xf32>
    %cst_11 = arith.constant dense<0.000000e+00> : vector<1xf32>
    %12 = vector.multi_reduction <add>, %11, %cst_11 [1] : vector<1x81xf32> to vector<1xf32>
    %13 = vector.shape_cast %12 : vector<1xf32> to vector<1x1xf32>
    %c0_12 = arith.constant 0 : index
    %c0_13 = arith.constant 0 : index
    %14 = vector.load %arg5[%c0_12, %c0_13] : memref<1x1xf32, #tpu.memory_space<vmem>>, vector<1x1xf32>
    %15 = arith.addf %13, %14 : vector<1x1xf32>
    %16 = arith.negf %15 : vector<1x1xf32>
    %17 = math.exp %16 : vector<1x1xf32>
    %cst_14 = arith.constant 1.000000e+00 : f32
    %18 = vector.broadcast %cst_14 : f32 to vector<1x1xf32>
    %19 = arith.addf %18, %17 : vector<1x1xf32>
    %20 = arith.divf %18, %19 : vector<1x1xf32>
    %c0_15 = arith.constant 0 : index
    %c0_16 = arith.constant 0 : index
    %c0_17 = arith.constant 0 : index
    %21 = vector.load %arg7[%c0_15, %c0_16, %c0_17] : memref<1x1x1xf32, #tpu.memory_space<vmem>>, vector<1x1x1xf32>
    %22 = vector.shape_cast %21 : vector<1x1x1xf32> to vector<1x1xf32>
    %23 = vector.shape_cast %20 : vector<1x1xf32> to vector<1x1x1xf32>
    tpu.vector_store %arg7[%c0_15, %c0_16, %c0_17], %23 {strides = array<i32>} : memref<1x1x1xf32, #tpu.memory_space<vmem>>, vector<1x1x1xf32>,
    return
  }
  func.func @transform_0(%arg0: i32) -> (i32, i32, i32) {
    %c0_i32 = arith.constant 0 : i32
    %c0_i32_0 = arith.constant 0 : i32
    %c0_i32_1 = arith.constant 0 : i32
    return %arg0, %c0_i32, %c0_i32_0 : i32, i32, i32
  }
  func.func @transform_1(%arg0: i32) -> (i32, i32) {
    %c0_i32 = arith.constant 0 : i32
    %c0_i32_0 = arith.constant 0 : i32
    %c0_i32_1 = arith.constant 0 : i32
    return %c0_i32, %c0_i32_0 : i32, i32
  }
  func.func @transform_2(%arg0: i32) -> (i32, i32) {
    %c0_i32 = arith.constant 0 : i32
    %c0_i32_0 = arith.constant 0 : i32
    %c0_i32_1 = arith.constant 0 : i32
    return %c0_i32, %c0_i32_0 : i32, i32
  }
  func.func @transform_3(%arg0: i32) -> (i32, i32) {
    %c0_i32 = arith.constant 0 : i32
    %c0_i32_0 = arith.constant 0 : i32
    %c0_i32_1 = arith.constant 0 : i32
    return %c0_i32, %c0_i32_0 : i32, i32
  }
  func.func @transform_4(%arg0: i32) -> (i32, i32) {
    %c0_i32 = arith.constant 0 : i32
    %c0_i32_0 = arith.constant 0 : i32
    %c0_i32_1 = arith.constant 0 : i32
    return %c0_i32, %c0_i32_0 : i32, i32
  }
  func.func @transform_5(%arg0: i32) -> (i32, i32, i32) {
    %c0_i32 = arith.constant 0 : i32
    %c0_i32_0 = arith.constant 0 : i32
    %c0_i32_1 = arith.constant 0 : i32
    return %arg0, %c0_i32, %c0_i32_0 : i32, i32, i32
  }
  func.func @transform_6(%arg0: i32) -> (i32, i32, i32) {
    %c0_i32 = arith.constant 0 : i32
    %c0_i32_0 = arith.constant 0 : i32
    %c0_i32_1 = arith.constant 0 : i32
    return %arg0, %c0_i32, %c0_i32_0 : i32, i32, i32
  }
}

module attributes {stable_mosaic.version = 11 : i64} {
  func.func @_conv_fused_kernel(%arg0: i32, %arg1: i32, %arg2: memref<1x48x1024xbf16, #tpu.memory_space<vmem>>, %arg3: memref<8x48xbf16, #tpu.memory_space<vmem>>, %arg4: memref<8x1xf32, #tpu.memory_space<vmem>>, %arg5: memref<1x8x1024xbf16, #tpu.memory_space<vmem>>) attributes {dimension_semantics = [#tpu.dimension_semantics<parallel>, #tpu.dimension_semantics<parallel>], iteration_bounds = array<i64: 2, 2>, scalar_prefetch = 0 : i64, scratch_operands = 0 : i64, tpu.core_type = #tpu.core_type<tc>, window_params = [{transform_indices = @transform_0, window_bounds = array<i64: 1, 48, 1024>}, {pipeline_mode = #tpu.pipeline_mode<synchronous>, transform_indices = @transform_1, window_bounds = array<i64: 8, 48>}, {pipeline_mode = #tpu.pipeline_mode<synchronous>, transform_indices = @transform_2, window_bounds = array<i64: 8, 1>}, {transform_indices = @transform_3, window_bounds = array<i64: 1, 8, 1024>}]} {
    %c0 = arith.constant 0 : index
    %c0_0 = arith.constant 0 : index
    %c0_1 = arith.constant 0 : index
    %0 = vector.load %arg2[%c0, %c0_0, %c0_1] : memref<1x48x1024xbf16, #tpu.memory_space<vmem>>, vector<1x48x1024xbf16>
    %1 = vector.shape_cast %0 : vector<1x48x1024xbf16> to vector<48x1024xbf16>
    %c0_2 = arith.constant 0 : index
    %c0_3 = arith.constant 0 : index
    %2 = vector.load %arg3[%c0_2, %c0_3] : memref<8x48xbf16, #tpu.memory_space<vmem>>, vector<8x48xbf16>
    %cst = arith.constant dense<0.000000e+00> : vector<8x1024xf32>
    %3 = tpu.matmul %2, %1, %cst {dimension_numbers = #tpu.dot_dimension_numbers<[1], [0], [0], [1], [0, 0, 1, 1], [], []>} : vector<8x48xbf16>, vector<48x1024xbf16>, vector<8x1024xf32> -> vector<8x1024xf32>
    %c0_4 = arith.constant 0 : index
    %c0_5 = arith.constant 0 : index
    %4 = vector.load %arg4[%c0_4, %c0_5] : memref<8x1xf32, #tpu.memory_space<vmem>>, vector<8x1xf32>
    %5 = vector.broadcast %4 : vector<8x1xf32> to vector<8x1024xf32>
    %6 = arith.addf %3, %5 : vector<8x1024xf32>
    %cst_6 = arith.constant 0.000000e+00 : f32
    %7 = vector.broadcast %cst_6 : f32 to vector<8x1024xf32>
    %8 = arith.cmpf oge, %6, %7 : vector<8x1024xf32>
    %cst_7 = arith.constant 2.000000e-01 : f32
    %9 = vector.broadcast %cst_7 : f32 to vector<8x1024xf32>
    %10 = arith.mulf %9, %6 : vector<8x1024xf32>
    %11 = arith.select %8, %6, %10 : vector<8x1024xi1>, vector<8x1024xf32>
    %12 = arith.truncf %11 : vector<8x1024xf32> to vector<8x1024xbf16>
    %c0_8 = arith.constant 0 : index
    %c0_9 = arith.constant 0 : index
    %c0_10 = arith.constant 0 : index
    %13 = vector.load %arg5[%c0_8, %c0_9, %c0_10] : memref<1x8x1024xbf16, #tpu.memory_space<vmem>>, vector<1x8x1024xbf16>
    %14 = vector.shape_cast %13 : vector<1x8x1024xbf16> to vector<8x1024xbf16>
    %15 = vector.shape_cast %12 : vector<8x1024xbf16> to vector<1x8x1024xbf16>
    tpu.vector_store %arg5[%c0_8, %c0_9, %c0_10], %15 {strides = array<i32>} : memref<1x8x1024xbf16, #tpu.memory_space<vmem>>, vector<1x8x1024xbf16>,
    return
  }
  func.func @transform_0(%arg0: i32, %arg1: i32) -> (i32, i32, i32) {
    %c0_i32 = arith.constant 0 : i32
    %c0_i32_0 = arith.constant 0 : i32
    return %arg0, %c0_i32, %arg1 : i32, i32, i32
  }
  func.func @transform_1(%arg0: i32, %arg1: i32) -> (i32, i32) {
    %c0_i32 = arith.constant 0 : i32
    %c0_i32_0 = arith.constant 0 : i32
    %c0_i32_1 = arith.constant 0 : i32
    return %c0_i32, %c0_i32_0 : i32, i32
  }
  func.func @transform_2(%arg0: i32, %arg1: i32) -> (i32, i32) {
    %c0_i32 = arith.constant 0 : i32
    %c0_i32_0 = arith.constant 0 : i32
    %c0_i32_1 = arith.constant 0 : i32
    return %c0_i32, %c0_i32_0 : i32, i32
  }
  func.func @transform_3(%arg0: i32, %arg1: i32) -> (i32, i32, i32) {
    %c0_i32 = arith.constant 0 : i32
    %c0_i32_0 = arith.constant 0 : i32
    return %arg0, %c0_i32, %arg1 : i32, i32, i32
  }
}

module attributes {stable_mosaic.version = 11 : i64} {
  func.func @_conv_fused_kernel(%arg0: i32, %arg1: memref<1x128x256xbf16, #tpu.memory_space<vmem>>, %arg2: memref<16x128xbf16, #tpu.memory_space<vmem>>, %arg3: memref<1x16x256xbf16, #tpu.memory_space<vmem>>) attributes {dimension_semantics = [#tpu.dimension_semantics<parallel>], iteration_bounds = array<i64: 2>, scalar_prefetch = 0 : i64, scratch_operands = 0 : i64, tpu.core_type = #tpu.core_type<tc>, window_params = [{transform_indices = @transform_0, window_bounds = array<i64: 1, 128, 256>}, {pipeline_mode = #tpu.pipeline_mode<synchronous>, transform_indices = @transform_1, window_bounds = array<i64: 16, 128>}, {transform_indices = @transform_2, window_bounds = array<i64: 1, 16, 256>}]} {
    %c0 = arith.constant 0 : index
    %c0_0 = arith.constant 0 : index
    %c0_1 = arith.constant 0 : index
    %0 = vector.load %arg1[%c0, %c0_0, %c0_1] : memref<1x128x256xbf16, #tpu.memory_space<vmem>>, vector<1x128x256xbf16>
    %1 = vector.shape_cast %0 : vector<1x128x256xbf16> to vector<128x256xbf16>
    %c0_2 = arith.constant 0 : index
    %c0_3 = arith.constant 0 : index
    %2 = vector.load %arg2[%c0_2, %c0_3] : memref<16x128xbf16, #tpu.memory_space<vmem>>, vector<16x128xbf16>
    %cst = arith.constant dense<0.000000e+00> : vector<16x256xf32>
    %3 = tpu.matmul %2, %1, %cst {dimension_numbers = #tpu.dot_dimension_numbers<[1], [0], [0], [1], [0, 0, 1, 1], [], []>} : vector<16x128xbf16>, vector<128x256xbf16>, vector<16x256xf32> -> vector<16x256xf32>
    %cst_4 = arith.constant dense<0.000000e+00> : vector<16xf32>
    %4 = vector.multi_reduction <add>, %3, %cst_4 [1] : vector<16x256xf32> to vector<16xf32>
    %5 = vector.shape_cast %4 : vector<16xf32> to vector<16x1xf32>
    %cst_5 = arith.constant 2.560000e+02 : f32
    %6 = vector.broadcast %cst_5 : f32 to vector<16x1xf32>
    %7 = arith.divf %5, %6 : vector<16x1xf32>
    %8 = vector.broadcast %7 : vector<16x1xf32> to vector<16x256xf32>
    %9 = arith.subf %3, %8 : vector<16x256xf32>
    %10 = arith.mulf %9, %9 : vector<16x256xf32>
    %cst_6 = arith.constant dense<0.000000e+00> : vector<16xf32>
    %11 = vector.multi_reduction <add>, %10, %cst_6 [1] : vector<16x256xf32> to vector<16xf32>
    %12 = vector.shape_cast %11 : vector<16xf32> to vector<16x1xf32>
    %cst_7 = arith.constant 2.560000e+02 : f32
    %13 = vector.broadcast %cst_7 : f32 to vector<16x1xf32>
    %14 = arith.divf %12, %13 : vector<16x1xf32>
    %cst_8 = arith.constant 9.99999974E-6 : f32
    %15 = vector.broadcast %cst_8 : f32 to vector<16x1xf32>
    %16 = arith.addf %14, %15 : vector<16x1xf32>
    %17 = math.rsqrt %16 : vector<16x1xf32>
    %18 = vector.broadcast %17 : vector<16x1xf32> to vector<16x256xf32>
    %19 = arith.mulf %9, %18 : vector<16x256xf32>
    %cst_9 = arith.constant 0.000000e+00 : f32
    %20 = vector.broadcast %cst_9 : f32 to vector<16x256xf32>
    %21 = arith.cmpf oge, %19, %20 : vector<16x256xf32>
    %cst_10 = arith.constant 2.000000e-01 : f32
    %22 = vector.broadcast %cst_10 : f32 to vector<16x256xf32>
    %23 = arith.mulf %22, %19 : vector<16x256xf32>
    %24 = arith.select %21, %19, %23 : vector<16x256xi1>, vector<16x256xf32>
    %25 = arith.truncf %24 : vector<16x256xf32> to vector<16x256xbf16>
    %c0_11 = arith.constant 0 : index
    %c0_12 = arith.constant 0 : index
    %c0_13 = arith.constant 0 : index
    %26 = vector.load %arg3[%c0_11, %c0_12, %c0_13] : memref<1x16x256xbf16, #tpu.memory_space<vmem>>, vector<1x16x256xbf16>
    %27 = vector.shape_cast %26 : vector<1x16x256xbf16> to vector<16x256xbf16>
    %28 = vector.shape_cast %25 : vector<16x256xbf16> to vector<1x16x256xbf16>
    tpu.vector_store %arg3[%c0_11, %c0_12, %c0_13], %28 {strides = array<i32>} : memref<1x16x256xbf16, #tpu.memory_space<vmem>>, vector<1x16x256xbf16>,
    return
  }
  func.func @transform_0(%arg0: i32) -> (i32, i32, i32) {
    %c0_i32 = arith.constant 0 : i32
    %c0_i32_0 = arith.constant 0 : i32
    %c0_i32_1 = arith.constant 0 : i32
    return %arg0, %c0_i32, %c0_i32_0 : i32, i32, i32
  }
  func.func @transform_1(%arg0: i32) -> (i32, i32) {
    %c0_i32 = arith.constant 0 : i32
    %c0_i32_0 = arith.constant 0 : i32
    %c0_i32_1 = arith.constant 0 : i32
    return %c0_i32, %c0_i32_0 : i32, i32
  }
  func.func @transform_2(%arg0: i32) -> (i32, i32, i32) {
    %c0_i32 = arith.constant 0 : i32
    %c0_i32_0 = arith.constant 0 : i32
    %c0_i32_1 = arith.constant 0 : i32
    return %arg0, %c0_i32, %c0_i32_0 : i32, i32, i32
  }
}

module attributes {stable_mosaic.version = 11 : i64} {
  func.func @_conv_fused_kernel(%arg0: i32, %arg1: memref<1x256x49xbf16, #tpu.memory_space<vmem>>, %arg2: memref<32x256xbf16, #tpu.memory_space<vmem>>, %arg3: memref<1x32x49xbf16, #tpu.memory_space<vmem>>) attributes {dimension_semantics = [#tpu.dimension_semantics<parallel>], iteration_bounds = array<i64: 2>, scalar_prefetch = 0 : i64, scratch_operands = 0 : i64, tpu.core_type = #tpu.core_type<tc>, window_params = [{transform_indices = @transform_0, window_bounds = array<i64: 1, 256, 49>}, {pipeline_mode = #tpu.pipeline_mode<synchronous>, transform_indices = @transform_1, window_bounds = array<i64: 32, 256>}, {transform_indices = @transform_2, window_bounds = array<i64: 1, 32, 49>}]} {
    %c0 = arith.constant 0 : index
    %c0_0 = arith.constant 0 : index
    %c0_1 = arith.constant 0 : index
    %0 = vector.load %arg1[%c0, %c0_0, %c0_1] : memref<1x256x49xbf16, #tpu.memory_space<vmem>>, vector<1x256x49xbf16>
    %1 = vector.shape_cast %0 : vector<1x256x49xbf16> to vector<256x49xbf16>
    %c0_2 = arith.constant 0 : index
    %c0_3 = arith.constant 0 : index
    %2 = vector.load %arg2[%c0_2, %c0_3] : memref<32x256xbf16, #tpu.memory_space<vmem>>, vector<32x256xbf16>
    %cst = arith.constant dense<0.000000e+00> : vector<32x49xf32>
    %3 = tpu.matmul %2, %1, %cst {dimension_numbers = #tpu.dot_dimension_numbers<[1], [0], [0], [1], [0, 0, 1, 1], [], []>} : vector<32x256xbf16>, vector<256x49xbf16>, vector<32x49xf32> -> vector<32x49xf32>
    %cst_4 = arith.constant dense<0.000000e+00> : vector<32xf32>
    %4 = vector.multi_reduction <add>, %3, %cst_4 [1] : vector<32x49xf32> to vector<32xf32>
    %5 = vector.shape_cast %4 : vector<32xf32> to vector<32x1xf32>
    %cst_5 = arith.constant 4.900000e+01 : f32
    %6 = vector.broadcast %cst_5 : f32 to vector<32x1xf32>
    %7 = arith.divf %5, %6 : vector<32x1xf32>
    %8 = vector.broadcast %7 : vector<32x1xf32> to vector<32x49xf32>
    %9 = arith.subf %3, %8 : vector<32x49xf32>
    %10 = arith.mulf %9, %9 : vector<32x49xf32>
    %cst_6 = arith.constant dense<0.000000e+00> : vector<32xf32>
    %11 = vector.multi_reduction <add>, %10, %cst_6 [1] : vector<32x49xf32> to vector<32xf32>
    %12 = vector.shape_cast %11 : vector<32xf32> to vector<32x1xf32>
    %cst_7 = arith.constant 4.900000e+01 : f32
    %13 = vector.broadcast %cst_7 : f32 to vector<32x1xf32>
    %14 = arith.divf %12, %13 : vector<32x1xf32>
    %cst_8 = arith.constant 9.99999974E-6 : f32
    %15 = vector.broadcast %cst_8 : f32 to vector<32x1xf32>
    %16 = arith.addf %14, %15 : vector<32x1xf32>
    %17 = math.rsqrt %16 : vector<32x1xf32>
    %18 = vector.broadcast %17 : vector<32x1xf32> to vector<32x49xf32>
    %19 = arith.mulf %9, %18 : vector<32x49xf32>
    %cst_9 = arith.constant 0.000000e+00 : f32
    %20 = vector.broadcast %cst_9 : f32 to vector<32x49xf32>
    %21 = arith.cmpf oge, %19, %20 : vector<32x49xf32>
    %cst_10 = arith.constant 2.000000e-01 : f32
    %22 = vector.broadcast %cst_10 : f32 to vector<32x49xf32>
    %23 = arith.mulf %22, %19 : vector<32x49xf32>
    %24 = arith.select %21, %19, %23 : vector<32x49xi1>, vector<32x49xf32>
    %25 = arith.truncf %24 : vector<32x49xf32> to vector<32x49xbf16>
    %c0_11 = arith.constant 0 : index
    %c0_12 = arith.constant 0 : index
    %c0_13 = arith.constant 0 : index
    %26 = vector.load %arg3[%c0_11, %c0_12, %c0_13] : memref<1x32x49xbf16, #tpu.memory_space<vmem>>, vector<1x32x49xbf16>
    %27 = vector.shape_cast %26 : vector<1x32x49xbf16> to vector<32x49xbf16>
    %28 = vector.shape_cast %25 : vector<32x49xbf16> to vector<1x32x49xbf16>
    tpu.vector_store %arg3[%c0_11, %c0_12, %c0_13], %28 {strides = array<i32>} : memref<1x32x49xbf16, #tpu.memory_space<vmem>>, vector<1x32x49xbf16>,
    return
  }
  func.func @transform_0(%arg0: i32) -> (i32, i32, i32) {
    %c0_i32 = arith.constant 0 : i32
    %c0_i32_0 = arith.constant 0 : i32
    %c0_i32_1 = arith.constant 0 : i32
    return %arg0, %c0_i32, %c0_i32_0 : i32, i32, i32
  }
  func.func @transform_1(%arg0: i32) -> (i32, i32) {
    %c0_i32 = arith.constant 0 : i32
    %c0_i32_0 = arith.constant 0 : i32
    %c0_i32_1 = arith.constant 0 : i32
    return %c0_i32, %c0_i32_0 : i32, i32
  }
  func.func @transform_2(%arg0: i32) -> (i32, i32, i32) {
    %c0_i32 = arith.constant 0 : i32
    %c0_i32_0 = arith.constant 0 : i32
    %c0_i32_1 = arith.constant 0 : i32
    return %arg0, %c0_i32, %c0_i32_0 : i32, i32, i32
  }
}

module attributes {stable_mosaic.version = 11 : i64} {
  func.func @_conv_fused_kernel(%arg0: i32, %arg1: memref<1x512x16xbf16, #tpu.memory_space<vmem>>, %arg2: memref<64x512xbf16, #tpu.memory_space<vmem>>, %arg3: memref<1x64x16xbf16, #tpu.memory_space<vmem>>) attributes {dimension_semantics = [#tpu.dimension_semantics<parallel>], iteration_bounds = array<i64: 2>, scalar_prefetch = 0 : i64, scratch_operands = 0 : i64, tpu.core_type = #tpu.core_type<tc>, window_params = [{transform_indices = @transform_0, window_bounds = array<i64: 1, 512, 16>}, {pipeline_mode = #tpu.pipeline_mode<synchronous>, transform_indices = @transform_1, window_bounds = array<i64: 64, 512>}, {transform_indices = @transform_2, window_bounds = array<i64: 1, 64, 16>}]} {
    %c0 = arith.constant 0 : index
    %c0_0 = arith.constant 0 : index
    %c0_1 = arith.constant 0 : index
    %0 = vector.load %arg1[%c0, %c0_0, %c0_1] : memref<1x512x16xbf16, #tpu.memory_space<vmem>>, vector<1x512x16xbf16>
    %1 = vector.shape_cast %0 : vector<1x512x16xbf16> to vector<512x16xbf16>
    %c0_2 = arith.constant 0 : index
    %c0_3 = arith.constant 0 : index
    %2 = vector.load %arg2[%c0_2, %c0_3] : memref<64x512xbf16, #tpu.memory_space<vmem>>, vector<64x512xbf16>
    %cst = arith.constant dense<0.000000e+00> : vector<64x16xf32>
    %3 = tpu.matmul %2, %1, %cst {dimension_numbers = #tpu.dot_dimension_numbers<[1], [0], [0], [1], [0, 0, 1, 1], [], []>} : vector<64x512xbf16>, vector<512x16xbf16>, vector<64x16xf32> -> vector<64x16xf32>
    %cst_4 = arith.constant dense<0.000000e+00> : vector<64xf32>
    %4 = vector.multi_reduction <add>, %3, %cst_4 [1] : vector<64x16xf32> to vector<64xf32>
    %5 = vector.shape_cast %4 : vector<64xf32> to vector<64x1xf32>
    %cst_5 = arith.constant 1.600000e+01 : f32
    %6 = vector.broadcast %cst_5 : f32 to vector<64x1xf32>
    %7 = arith.divf %5, %6 : vector<64x1xf32>
    %8 = vector.broadcast %7 : vector<64x1xf32> to vector<64x16xf32>
    %9 = arith.subf %3, %8 : vector<64x16xf32>
    %10 = arith.mulf %9, %9 : vector<64x16xf32>
    %cst_6 = arith.constant dense<0.000000e+00> : vector<64xf32>
    %11 = vector.multi_reduction <add>, %10, %cst_6 [1] : vector<64x16xf32> to vector<64xf32>
    %12 = vector.shape_cast %11 : vector<64xf32> to vector<64x1xf32>
    %cst_7 = arith.constant 1.600000e+01 : f32
    %13 = vector.broadcast %cst_7 : f32 to vector<64x1xf32>
    %14 = arith.divf %12, %13 : vector<64x1xf32>
    %cst_8 = arith.constant 9.99999974E-6 : f32
    %15 = vector.broadcast %cst_8 : f32 to vector<64x1xf32>
    %16 = arith.addf %14, %15 : vector<64x1xf32>
    %17 = math.rsqrt %16 : vector<64x1xf32>
    %18 = vector.broadcast %17 : vector<64x1xf32> to vector<64x16xf32>
    %19 = arith.mulf %9, %18 : vector<64x16xf32>
    %cst_9 = arith.constant 0.000000e+00 : f32
    %20 = vector.broadcast %cst_9 : f32 to vector<64x16xf32>
    %21 = arith.cmpf oge, %19, %20 : vector<64x16xf32>
    %cst_10 = arith.constant 2.000000e-01 : f32
    %22 = vector.broadcast %cst_10 : f32 to vector<64x16xf32>
    %23 = arith.mulf %22, %19 : vector<64x16xf32>
    %24 = arith.select %21, %19, %23 : vector<64x16xi1>, vector<64x16xf32>
    %25 = arith.truncf %24 : vector<64x16xf32> to vector<64x16xbf16>
    %c0_11 = arith.constant 0 : index
    %c0_12 = arith.constant 0 : index
    %c0_13 = arith.constant 0 : index
    %26 = vector.load %arg3[%c0_11, %c0_12, %c0_13] : memref<1x64x16xbf16, #tpu.memory_space<vmem>>, vector<1x64x16xbf16>
    %27 = vector.shape_cast %26 : vector<1x64x16xbf16> to vector<64x16xbf16>
    %28 = vector.shape_cast %25 : vector<64x16xbf16> to vector<1x64x16xbf16>
    tpu.vector_store %arg3[%c0_11, %c0_12, %c0_13], %28 {strides = array<i32>} : memref<1x64x16xbf16, #tpu.memory_space<vmem>>, vector<1x64x16xbf16>,
    return
  }
  func.func @transform_0(%arg0: i32) -> (i32, i32, i32) {
    %c0_i32 = arith.constant 0 : i32
    %c0_i32_0 = arith.constant 0 : i32
    %c0_i32_1 = arith.constant 0 : i32
    return %arg0, %c0_i32, %c0_i32_0 : i32, i32, i32
  }
  func.func @transform_1(%arg0: i32) -> (i32, i32) {
    %c0_i32 = arith.constant 0 : i32
    %c0_i32_0 = arith.constant 0 : i32
    %c0_i32_1 = arith.constant 0 : i32
    return %c0_i32, %c0_i32_0 : i32, i32
  }
  func.func @transform_2(%arg0: i32) -> (i32, i32, i32) {
    %c0_i32 = arith.constant 0 : i32
    %c0_i32_0 = arith.constant 0 : i32
    %c0_i32_1 = arith.constant 0 : i32
    return %arg0, %c0_i32, %c0_i32_0 : i32, i32, i32
  }
}

module attributes {stable_mosaic.version = 11 : i64} {
  func.func @_patch_head_kernel(%arg0: i32, %arg1: memref<1x1024x1xbf16, #tpu.memory_space<vmem>>, %arg2: memref<1x1024xbf16, #tpu.memory_space<vmem>>, %arg3: memref<1x1xf32, #tpu.memory_space<vmem>>, %arg4: memref<1x1xf32, #tpu.memory_space<vmem>>, %arg5: memref<1x1xf32, #tpu.memory_space<vmem>>, %arg6: memref<1x1x1xf32, #tpu.memory_space<vmem>>, %arg7: memref<1x1x1xf32, #tpu.memory_space<vmem>>) attributes {dimension_semantics = [#tpu.dimension_semantics<parallel>], iteration_bounds = array<i64: 2>, scalar_prefetch = 0 : i64, scratch_operands = 0 : i64, tpu.core_type = #tpu.core_type<tc>, window_params = [{transform_indices = @transform_0, window_bounds = array<i64: 1, 1024, 1>}, {pipeline_mode = #tpu.pipeline_mode<synchronous>, transform_indices = @transform_1, window_bounds = array<i64: 1, 1024>}, {pipeline_mode = #tpu.pipeline_mode<synchronous>, transform_indices = @transform_2, window_bounds = array<i64: 1, 1>}, {pipeline_mode = #tpu.pipeline_mode<synchronous>, transform_indices = @transform_3, window_bounds = array<i64: 1, 1>}, {pipeline_mode = #tpu.pipeline_mode<synchronous>, transform_indices = @transform_4, window_bounds = array<i64: 1, 1>}, {transform_indices = @transform_5, window_bounds = array<i64: 1, 1, 1>}, {transform_indices = @transform_6, window_bounds = array<i64: 1, 1, 1>}]} {
    %c0 = arith.constant 0 : index
    %c0_0 = arith.constant 0 : index
    %c0_1 = arith.constant 0 : index
    %0 = vector.load %arg1[%c0, %c0_0, %c0_1] : memref<1x1024x1xbf16, #tpu.memory_space<vmem>>, vector<1x1024x1xbf16>
    %1 = vector.shape_cast %0 : vector<1x1024x1xbf16> to vector<1024x1xbf16>
    %c0_2 = arith.constant 0 : index
    %c0_3 = arith.constant 0 : index
    %2 = vector.load %arg2[%c0_2, %c0_3] : memref<1x1024xbf16, #tpu.memory_space<vmem>>, vector<1x1024xbf16>
    %cst = arith.constant dense<0.000000e+00> : vector<1x1xf32>
    %3 = tpu.matmul %2, %1, %cst {dimension_numbers = #tpu.dot_dimension_numbers<[1], [0], [0], [1], [0, 0, 1, 1], [], []>} : vector<1x1024xbf16>, vector<1024x1xbf16>, vector<1x1xf32> -> vector<1x1xf32>
    %c0_4 = arith.constant 0 : index
    %c0_5 = arith.constant 0 : index
    %4 = vector.load %arg3[%c0_4, %c0_5] : memref<1x1xf32, #tpu.memory_space<vmem>>, vector<1x1xf32>
    %5 = arith.addf %3, %4 : vector<1x1xf32>
    %c0_6 = arith.constant 0 : index
    %c0_7 = arith.constant 0 : index
    %c0_8 = arith.constant 0 : index
    %6 = vector.load %arg6[%c0_6, %c0_7, %c0_8] : memref<1x1x1xf32, #tpu.memory_space<vmem>>, vector<1x1x1xf32>
    %7 = vector.shape_cast %6 : vector<1x1x1xf32> to vector<1x1xf32>
    %8 = vector.shape_cast %5 : vector<1x1xf32> to vector<1x1x1xf32>
    tpu.vector_store %arg6[%c0_6, %c0_7, %c0_8], %8 {strides = array<i32>} : memref<1x1x1xf32, #tpu.memory_space<vmem>>, vector<1x1x1xf32>,
    %c0_9 = arith.constant 0 : index
    %c0_10 = arith.constant 0 : index
    %9 = vector.load %arg4[%c0_9, %c0_10] : memref<1x1xf32, #tpu.memory_space<vmem>>, vector<1x1xf32>
    %10 = arith.mulf %5, %9 : vector<1x1xf32>
    %cst_11 = arith.constant dense<0.000000e+00> : vector<1xf32>
    %11 = vector.multi_reduction <add>, %10, %cst_11 [1] : vector<1x1xf32> to vector<1xf32>
    %12 = vector.shape_cast %11 : vector<1xf32> to vector<1x1xf32>
    %c0_12 = arith.constant 0 : index
    %c0_13 = arith.constant 0 : index
    %13 = vector.load %arg5[%c0_12, %c0_13] : memref<1x1xf32, #tpu.memory_space<vmem>>, vector<1x1xf32>
    %14 = arith.addf %12, %13 : vector<1x1xf32>
    %15 = arith.negf %14 : vector<1x1xf32>
    %16 = math.exp %15 : vector<1x1xf32>
    %cst_14 = arith.constant 1.000000e+00 : f32
    %17 = vector.broadcast %cst_14 : f32 to vector<1x1xf32>
    %18 = arith.addf %17, %16 : vector<1x1xf32>
    %19 = arith.divf %17, %18 : vector<1x1xf32>
    %c0_15 = arith.constant 0 : index
    %c0_16 = arith.constant 0 : index
    %c0_17 = arith.constant 0 : index
    %20 = vector.load %arg7[%c0_15, %c0_16, %c0_17] : memref<1x1x1xf32, #tpu.memory_space<vmem>>, vector<1x1x1xf32>
    %21 = vector.shape_cast %20 : vector<1x1x1xf32> to vector<1x1xf32>
    %22 = vector.shape_cast %19 : vector<1x1xf32> to vector<1x1x1xf32>
    tpu.vector_store %arg7[%c0_15, %c0_16, %c0_17], %22 {strides = array<i32>} : memref<1x1x1xf32, #tpu.memory_space<vmem>>, vector<1x1x1xf32>,
    return
  }
  func.func @transform_0(%arg0: i32) -> (i32, i32, i32) {
    %c0_i32 = arith.constant 0 : i32
    %c0_i32_0 = arith.constant 0 : i32
    %c0_i32_1 = arith.constant 0 : i32
    return %arg0, %c0_i32, %c0_i32_0 : i32, i32, i32
  }
  func.func @transform_1(%arg0: i32) -> (i32, i32) {
    %c0_i32 = arith.constant 0 : i32
    %c0_i32_0 = arith.constant 0 : i32
    %c0_i32_1 = arith.constant 0 : i32
    return %c0_i32, %c0_i32_0 : i32, i32
  }
  func.func @transform_2(%arg0: i32) -> (i32, i32) {
    %c0_i32 = arith.constant 0 : i32
    %c0_i32_0 = arith.constant 0 : i32
    %c0_i32_1 = arith.constant 0 : i32
    return %c0_i32, %c0_i32_0 : i32, i32
  }
  func.func @transform_3(%arg0: i32) -> (i32, i32) {
    %c0_i32 = arith.constant 0 : i32
    %c0_i32_0 = arith.constant 0 : i32
    %c0_i32_1 = arith.constant 0 : i32
    return %c0_i32, %c0_i32_0 : i32, i32
  }
  func.func @transform_4(%arg0: i32) -> (i32, i32) {
    %c0_i32 = arith.constant 0 : i32
    %c0_i32_0 = arith.constant 0 : i32
    %c0_i32_1 = arith.constant 0 : i32
    return %c0_i32, %c0_i32_0 : i32, i32
  }
  func.func @transform_5(%arg0: i32) -> (i32, i32, i32) {
    %c0_i32 = arith.constant 0 : i32
    %c0_i32_0 = arith.constant 0 : i32
    %c0_i32_1 = arith.constant 0 : i32
    return %arg0, %c0_i32, %c0_i32_0 : i32, i32, i32
  }
  func.func @transform_6(%arg0: i32) -> (i32, i32, i32) {
    %c0_i32 = arith.constant 0 : i32
    %c0_i32_0 = arith.constant 0 : i32
    %c0_i32_1 = arith.constant 0 : i32
    return %arg0, %c0_i32, %c0_i32_0 : i32, i32, i32
  }
}

</mosaic_0001>

<bundles_post_ra>
// kernel: multiscale_discriminator_forward.15
= control target key start
LH: loop header
LB: loop body
LE: loop exit
PB: predicated region body
PF: predicated region fallthrough
CT: control target
= control target key end

     0   :  { %s3372_s0 = inlined_call_operand.vmem [shape: bf16[2,48,4761], index: 0, kind: input, shape index: {}]   ;;  %s3373_s1 = inlined_call_operand.vmem [shape: bf16[8,48], index: 1, kind: input, shape index: {}]   ;;  %s3374_s2 = inlined_call_operand.vmem [shape: f32[8,1], index: 2, kind: input, shape index: {}]   ;;  %s3375_s3 = inlined_call_operand.vmem [shape: bf16[2,8,4761], index: 3, kind: output, shape index: {}]  }
   0x1   :  { %3378 = sst [smem:[#allocation6_spill]] %s3372_s0 }
   0x2   :  { %s2475_s12 = smov 0   ;;  %s2477_s13 = smov 0  }
   0x3   :  { %s2479_s14 = smov 0   ;;  %s2481_s15 = smov 0  }
   0x4   :  { %s2483_s16 = smov 0   ;;  %s2485_s17 = smov 0  }
   0x5   :  { %s2487_s18 = smov 0  }
   0x6 LB: > { %s22_s19 = sadd.s32 1, %s2312_s16  ;;  %s25_s20 = sadd.s32 1, %s2316_s17  ;;  %s2320_s18 = sphi %s2487_s18, %s13_s18   ;;  %s2316_s17 = sphi %s2485_s17, %s3416_s17   ;;  %s2312_s16 = sphi %s2483_s16, %s3415_s16   ;;  %s2308_s15 = sphi %s2481_s15, %s3414_s15   ;;  %s2304_s14 = sphi %s2479_s14, %s3413_s14   ;;  %s2300_s13 = sphi %s2477_s13, %s3412_s13   ;;  %s2296_s12 = sphi %s2475_s12, %s3411_s12  }
   0x7   : > { %p23_p0 = scmp.ge.s32.totalorder %s22_s19, 5  ;;  %s1712_s21 = sadd.s32 4294967295, %s2320_s18  }
   0x8   : > { %p41_p1 = scmp.ne.s32.totalorder %s2300_s13, %s2296_s12  ;;  %p42_p2 = scmp.eq.s32.totalorder %s2320_s18, 0 }
   0x9   : > { %s3418_s19 = smov (%p23_p0, %s22_s19), 0  ;;  %s3420_s20 = smov (!%p23_p0, %s25_s20), %s2316_s17 }
   0xa   : > { %3379 = sst [smem:[#allocation4_spill]] %s3418_s19  ;;  %p27_p3 = scmp.ge.s32.totalorder %s3420_s20, 2 }
   0xb   : > { %p115_p4 = scmp.eq.s32.totalorder %s1712_s21, 9  ;;  %s30_s22 = ssub.s32 %s2312_s16, %s3418_s19 }
   0xc   : > { %p43_p5 = por %p42_p2, %p41_p1  ;;  %s3422_s20 = smov (%p27_p3, %s3420_s20), 0 }
   0xd   : > { %3380 = sst [smem:[#allocation5_spill]] %s3422_s20  ;;  %p2523_p6 = por %p115_p4, %p41_p1 }
   0xe   : > { %s29_s24 = ssub.s32 %s2316_s17, %s3422_s20  ;;  %s34_s26 = sadd.s32 1, %s2300_s13 }
   0xf   : > { %s31_s25 = sor.u32 %s30_s22, %s29_s24  ;;  %p1715_p8 = scmp.ge.s32.totalorder %s2320_s18, 10 }
  0x10   : > { %p32_p7 = scmp.eq.s32.totalorder %s31_s25, 0 }
  0x11   : > { %143 = sbr.rel (%p1715_p8) target bundleno = 200 (0xc8), region = 24 }
  0x12   : > { %s2531_s27 = scalar_select %p32_p7, %s2300_s13, %s34_s26  }
  0x18   : > { %146 = sbr.rel (!%p43_p5) target bundleno = 200 (0xc8), region = 28  ;;  %s148_s28 = sand.u32 (%p43_p5), 1, %s2300_s13  }
  0x19   : > { %s1716_s29 = sshll.u32 (%p43_p5), %s2312_s16, 3  ;;  %s1806_s30 = smul.u32 (%p43_p5), 192, %s148_s28 }
  0x1a   : > { %s152_s4 = ssub.s32 (%p43_p5), 38, %s1716_s29  ;;  %s1807_s5 = smul.u32 (%p43_p5), 228, %s2316_s17 }
  0x1b   : > { %p153_p9 = scmp.lt.s32.totalorder (%p43_p5), %s152_s4, 8  ;;  %s3382_s0 = sld [smem:[#allocation6_spill]] (%p43_p5) }
  0x1c   : > { %s158_s6 = sadd.s32 (%p43_p5), %s1807_s5, %s1716_s29  ;;  %s2544_s22 = scalar_lea.vmem (%p43_p5), [#allocation2], %s1806_s30  }
  0x1d   : > { %s1718_s8 = sshll.u32 (%p43_p5), %s158_s6, 2 }
  0x1f   : > { %s3424_s4 = smov (!%p153_p9, %s152_s4), 8 }
  0x20   : > { %s155_s7 = smul.u32 384, %s3424_s4  ;;  %s2542_s21 = sshll.u32 %s3424_s4, 2 }
  0x21   : > { %s2540_s11 = scalar_lea.vmem %s3382_s0, %s1718_s8  }
  0x22   : > { %p1720_p10 = scmp.eq.s32.totalorder %s155_s7, 0 }
  0x23   : > { %p165_p11 = scmp.lt.u32.totalorder (!%p1720_p10), %s2542_s21, 8 }
  0x24   : > { %164 = sbr.rel (%p1720_p10) target bundleno = 200 (0xc8), region = 32 }
  0x2b   : > { %168 = sbr.rel (%p165_p11) target bundleno = 191 (0xbf), region = 36  ;;  %s2548_s24 = sand.u32 (!%p165_p11), 7, %s2542_s21  }
  0x2c   : > { %p194_p12 = scmp.eq.s32.totalorder (!%p165_p11), %s2548_s24, 0  ;;  %p1721_p13 = scmp.ne.s32.totalorder (!%p165_p11), %s2548_s24, 0 }
  0x32   : > { %197 = sbr.rel (%p1721_p13) target bundleno = 116 (0x74), region = 51  ;;  %s198_s25 = sshrl.u32 (!%p1721_p13), %s2542_s21, 3 }
  0x33   : > { %2129 = sdivrem.u32 (!%p1721_p13), %s198_s25, 12 }
  0x3c   : > { %s2555_s26 = spop.drf %2129 }
  0x3d   : > { %p1722_p0 = scmp.le.s32.totalorder %s2555_s26, 0 }
  0x3e   : > { %s3383_s28 = smov (!%p1722_p0), %s2544_s22  ;;  %s3384_s29 = smov (!%p1722_p0), %s2540_s11 }
  0x3f   : > { %1573 = sbr.rel (%p1722_p0) target bundleno = 87 (0x57), region = 229  ;;  %s2564_s30 = smov (!%p1722_p0), 0  }
  0x40   : > { %s2566_s4 = smov (!%p1722_p0), 0  }
  0x46 LB: >> { %v212_v0 = vld [vmem:[%s2328_s29] sm:$0xff]  ;;  %v214_v1 = vld [vmem:[%s2328_s29 + $0x8] sm:$0xff]  ;;  %v216_v2 = vld [vmem:[%s2328_s29 + $0x10] sm:$0xff]  ;;  %s356_s5 = sadd.s32 1, %s2332_s30  ;;  %s206_s4 = sadd.s32 1, %s2336_s4   ;;  %s2336_s4 = sphi %s2566_s4, %s206_s4   ;;  %s2332_s30 = sphi %s2564_s30, %s3387_s30   ;;  %s2328_s29 = sphi %s3384_s29, %s3386_s29   ;;  %s2324_s28 = sphi %s3383_s28, %s3385_s28  }
  0x47   : >> { %213 = vst [vmem:[%s2324_s28] sm:$0xff] %v212_v0  ;;  %215 = vst [vmem:[%s2324_s28 + $0x8] sm:$0xff] %v214_v1  ;;  %v218_v3 = vld [vmem:[%s2328_s29 + $0x18] sm:$0xff]  ;;  %v238_v5 = vld [vmem:[%s2328_s29 + $0xa0] sm:$0xff]  ;;  %p357_p1 = scmp.ge.s32.totalorder %s356_s5, %s2555_s26  ;;  %p205_p2 = scmp.ge.s32.totalorder %s206_s4, %s2555_s26 }
  0x48   : >> { %217 = vst [vmem:[%s2324_s28 + $0x10] sm:$0xff] %v216_v2  ;;  %v236_v4 = vld [vmem:[%s2328_s29 + $0x98] sm:$0xff]  ;;  %219 = vst [vmem:[%s2324_s28 + $0x18] sm:$0xff] %v218_v3  ;;  %v240_v6 = vld [vmem:[%s2328_s29 + $0xa8] sm:$0xff] }
  0x49   : >> { %237 = vst [vmem:[%s2324_s28 + $0x20] sm:$0xff] %v236_v4  ;;  %239 = vst [vmem:[%s2324_s28 + $0x28] sm:$0xff] %v238_v5  ;;  %v242_v7 = vld [vmem:[%s2328_s29 + $0xb0] sm:$0xff]  ;;  %v262_v9 = vld [vmem:[%s2328_s29 + $0x138] sm:$0xff]  ;;  %s3426_s5 = smov (%p357_p1, %s356_s5), 0 }
  0x4a   : >> { %v260_v8 = vld [vmem:[%s2328_s29 + $0x130] sm:$0xff]  ;;  %241 = vst [vmem:[%s2324_s28 + $0x30] sm:$0xff] %v240_v6  ;;  %243 = vst [vmem:[%s2324_s28 + $0x38] sm:$0xff] %v242_v7  ;;  %v264_v10 = vld [vmem:[%s2328_s29 + $0x140] sm:$0xff]  ;;  %s359_s6 = smul.u32 96, %s3426_s5  ;;  %s3387_s30 = smov %s3426_s5 }
  0x4b   : >> { %261 = vst [vmem:[%s2324_s28 + $0x40] sm:$0xff] %v260_v8  ;;  %v266_v11 = vld [vmem:[%s2328_s29 + $0x148] sm:$0xff]  ;;  %263 = vst [vmem:[%s2324_s28 + $0x48] sm:$0xff] %v262_v9  ;;  %v286_v13 = vld [vmem:[%s2328_s29 + $0x1d0] sm:$0xff] }
  0x4c   : >> { %265 = vst [vmem:[%s2324_s28 + $0x50] sm:$0xff] %v264_v10  ;;  %267 = vst [vmem:[%s2324_s28 + $0x58] sm:$0xff] %v266_v11  ;;  %v284_v12 = vld [vmem:[%s2328_s29 + $0x1c8] sm:$0xff]  ;;  %v288_v14 = vld [vmem:[%s2328_s29 + $0x1d8] sm:$0xff]  ;;  %s361_s7 = scalar_lea.vmem %s2540_s11, %s359_s6   ;;  %s362_s8 = scalar_lea.vmem %s2544_s22, %s359_s6 [#allocation2]  }
  0x4d   : >> { %285 = vst [vmem:[%s2324_s28 + $0x60] sm:$0xff] %v284_v12  ;;  %287 = vst [vmem:[%s2324_s28 + $0x68] sm:$0xff] %v286_v13  ;;  %v290_v15 = vld [vmem:[%s2328_s29 + $0x1e0] sm:$0xff]  ;;  %v310_v17 = vld [vmem:[%s2328_s29 + $0x268] sm:$0xff] }
  0x4e   : >> { %289 = vst [vmem:[%s2324_s28 + $0x70] sm:$0xff] %v288_v14  ;;  %v308_v16 = vld [vmem:[%s2328_s29 + $0x260] sm:$0xff]  ;;  %291 = vst [vmem:[%s2324_s28 + $0x78] sm:$0xff] %v290_v15  ;;  %v312_v18 = vld [vmem:[%s2328_s29 + $0x270] sm:$0xff] }
  0x4f   : >> { %309 = vst [vmem:[%s2324_s28 + $0x80] sm:$0xff] %v308_v16  ;;  %311 = vst [vmem:[%s2324_s28 + $0x88] sm:$0xff] %v310_v17  ;;  %v314_v19 = vld [vmem:[%s2328_s29 + $0x278] sm:$0xff]  ;;  %v334_v21 = vld [vmem:[%s2328_s29 + $0x300] sm:$0xff] }
  0x50   : >> { %v332_v20 = vld [vmem:[%s2328_s29 + $0x2f8] sm:$0xff]  ;;  %313 = vst [vmem:[%s2324_s28 + $0x90] sm:$0xff] %v312_v18  ;;  %315 = vst [vmem:[%s2324_s28 + $0x98] sm:$0xff] %v314_v19  ;;  %v336_v22 = vld [vmem:[%s2328_s29 + $0x308] sm:$0xff]  ;;  %208 = sbr.rel (!%p205_p2) target bundleno = 70 (0x46), region = 235 }
  0x51   : >> { %333 = vst [vmem:[%s2324_s28 + $0xa0] sm:$0xff] %v332_v20  ;;  %v338_v23 = vld [vmem:[%s2328_s29 + $0x310] sm:$0xff]  ;;  %335 = vst [vmem:[%s2324_s28 + $0xa8] sm:$0xff] %v334_v21  ;;  %v340_v24 = vld [vmem:[%s2328_s29 + $0x318] sm:$0xff] }
  0x52   : >> { %337 = vst [vmem:[%s2324_s28 + $0xb0] sm:$0xff] %v336_v22  ;;  %339 = vst [vmem:[%s2324_s28 + $0xb8] sm:$0xff] %v338_v23  ;;  %v342_v25 = vld [vmem:[%s2328_s29 + $0x320] sm:$0xff]  ;;  %v344_v26 = vld [vmem:[%s2328_s29 + $0x328] sm:$0xff] }
  0x53   : >> { %341 = vst [vmem:[%s2324_s28 + $0xc0] sm:$0xff] %v340_v24  ;;  %343 = vst [vmem:[%s2324_s28 + $0xc8] sm:$0xff] %v342_v25  ;;  %v346_v27 = vld [vmem:[%s2328_s29 + $0x330] sm:$0xff]  ;;  %v348_v28 = vld [vmem:[%s2328_s29 + $0x338] sm:$0xff] }
  0x54   : >> { %345 = vst [vmem:[%s2324_s28 + $0xd0] sm:$0xff] %v344_v26  ;;  %v350_v29 = vld [vmem:[%s2328_s29 + $0x340] sm:$0xff]  ;;  %347 = vst [vmem:[%s2324_s28 + $0xd8] sm:$0xff] %v346_v27  ;;  %v352_v30 = vld [vmem:[%s2328_s29 + $0x348] sm:$0xff] }
  0x55   : >> { %349 = vst [vmem:[%s2324_s28 + $0xe0] sm:$0xff] %v348_v28  ;;  %351 = vst [vmem:[%s2324_s28 + $0xe8] sm:$0xff] %v350_v29  ;;  %v354_v31 = vld [vmem:[%s2328_s29 + $0x350] sm:$0xff]  ;;  %s3386_s29 = smov %s361_s7 }
  0x56   : >> { %353 = vst [vmem:[%s2324_s28 + $0xf0] sm:$0xff] %v352_v30  ;;  %355 = vst [vmem:[%s2324_s28 + $0xf8] sm:$0xff] %v354_v31  ;;  %s3385_s28 = smov %s362_s8 }
  0x57 PF: > { %2131 = sdivrem.u32 %s198_s25, 12 }
  0x58   : > { %s1723_s9 = smul.u32 1536, %s2555_s26 }
  0x5a   : > { %s367_s10 = sshra.s32 %s1723_s9, 4 }
  0x5b   : > { %s2666_s6 = scalar_lea.vmem %s2540_s11, %s367_s10   ;;  %s2669_s0 = scalar_lea.vmem %s2544_s22, %s367_s10 [#allocation2]  }
  0x60   : > { %s2671_s8 = spop.drf %2131 }
  0x61   : > { %p1725_p3 = scmp.le.s32.totalorder %s2671_s8, 0 }
  0x62   : > { %s3388_s28 = smov (!%p1725_p3), %s2669_s0  ;;  %s3389_s29 = smov (!%p1725_p3), %s2666_s6 }
  0x63   : > { %1587 = sbr.rel (%p1725_p3) target bundleno = 116 (0x74), region = 240  ;;  %s2680_s30 = smov (!%p1725_p3), 0  }
  0x64   : > { %s2682_s25 = smov (!%p1725_p3), 0  }
  0x6a LB: >> { %v383_v32 = vld [vmem:[%s2344_s29] sm:$0xff]  ;;  %v385_v33 = vld [vmem:[%s2344_s29 + $0x98] sm:$0xff]  ;;  %v387_v34 = vld [vmem:[%s2344_s29 + $0x130] sm:$0xff]  ;;  %s395_s26 = sadd.s32 1, %s2348_s30  ;;  %s377_s25 = sadd.s32 1, %s2352_s25   ;;  %s2352_s25 = sphi %s2682_s25, %s377_s25   ;;  %s2348_s30 = sphi %s2680_s30, %s3390_s30   ;;  %s2344_s29 = sphi %s3389_s29, %s400_s29   ;;  %s2340_s28 = sphi %s3388_s28, %s401_s28  }
  0x6b   : >> { %384 = vst [vmem:[%s2340_s28] sm:$0xff] %v383_v32  ;;  %386 = vst [vmem:[%s2340_s28 + $0x20] sm:$0xff] %v385_v33  ;;  %v389_v35 = vld [vmem:[%s2344_s29 + $0x1c8] sm:$0xff]  ;;  %v391_v36 = vld [vmem:[%s2344_s29 + $0x260] sm:$0xff]  ;;  %p396_p4 = scmp.ge.s32.totalorder %s395_s26, %s2671_s8  ;;  %p376_p5 = scmp.ge.s32.totalorder %s377_s25, %s2671_s8 }
  0x6c   : >> { %388 = vst [vmem:[%s2340_s28 + $0x40] sm:$0xff] %v387_v34  ;;  %v393_v37 = vld [vmem:[%s2344_s29 + $0x2f8] sm:$0xff]  ;;  %390 = vst [vmem:[%s2340_s28 + $0x60] sm:$0xff] %v389_v35 }
  0x6d   : >> { %392 = vst [vmem:[%s2340_s28 + $0x80] sm:$0xff] %v391_v36  ;;  %394 = vst [vmem:[%s2340_s28 + $0xa0] sm:$0xff] %v393_v37  ;;  %s3428_s26 = smov (%p396_p4, %s395_s26), 0  ;;  %379 = sbr.rel (!%p376_p5) target bundleno = 106 (0x6a), region = 246 }
  0x6e   : >> { %s1726_s4 = sshll.u32 %s3428_s26, 3  ;;  %s3390_s30 = smov %s3428_s26 }
  0x6f   : >> { %s400_s29 = scalar_lea.vmem %s2666_s6, %s1726_s4   ;;  %s401_s28 = scalar_lea.vmem %s2669_s0, %s1726_s4 [#allocation2]  }
  0x74 PF: > { %404 = sbr.rel (%p194_p12) target bundleno = 191 (0xbf), region = 69  ;;  %s406_s5 = ssub.s32 (!%p194_p12), %s2542_s21, %s2548_s24 }
  0x75   : > { %s410_s7 = sshrl.u32 (!%p194_p12), %s2542_s21, 3  ;;  %s2706_s9 = scalar_lea.vmem (!%p194_p12), %s2540_s11, %s406_s5 }
  0x76   : > { %s2709_s10 = scalar_lea.vmem (!%p194_p12), %s2544_s22, %s406_s5 [#allocation2]  ;;  %2133 = sdivrem.u32 (!%p194_p12), %s410_s7, 12 }
  0x7f   : > { %s2713_s25 = spop.drf %2133 }
  0x80   : > { %p1728_p7 = scmp.le.s32.totalorder %s2713_s25, 0 }
  0x81   : > { %s3391_s0 = smov (!%p1728_p7), %s2544_s22  ;;  %s3392_s6 = smov (!%p1728_p7), %s2540_s11 }
  0x82   : > { %1601 = sbr.rel (%p1728_p7) target bundleno = 154 (0x9a), region = 251  ;;  %s2722_s8 = smov (!%p1728_p7), 0  }
  0x83   : > { %s2724_s28 = smov (!%p1728_p7), 0  }
  0x89 LB: >> { %v424_v38 = vld [vmem:[%s2360_s6] sm:$0xff]  ;;  %v426_v39 = vld [vmem:[%s2360_s6 + $0x8] sm:$0xff]  ;;  %v428_v40 = vld [vmem:[%s2360_s6 + $0x10] sm:$0xff]  ;;  %s568_s29 = sadd.s32 1, %s2364_s8  ;;  %s418_s28 = sadd.s32 1, %s2368_s28   ;;  %s2368_s28 = sphi %s2724_s28, %s418_s28   ;;  %s2364_s8 = sphi %s2722_s8, %s3395_s8   ;;  %s2360_s6 = sphi %s3392_s6, %s3394_s6   ;;  %s2356_s0 = sphi %s3391_s0, %s3393_s0  }
  0x8a   : >> { %425 = vst [vmem:[%s2356_s0] sm:$0xff] %v424_v38  ;;  %427 = vst [vmem:[%s2356_s0 + $0x8] sm:$0xff] %v426_v39  ;;  %v430_v41 = vld [vmem:[%s2360_s6 + $0x18] sm:$0xff]  ;;  %v450_v43 = vld [vmem:[%s2360_s6 + $0xa0] sm:$0xff]  ;;  %p569_p8 = scmp.ge.s32.totalorder %s568_s29, %s2713_s25  ;;  %p417_p9 = scmp.ge.s32.totalorder %s418_s28, %s2713_s25 }
  0x8b   : >> { %429 = vst [vmem:[%s2356_s0 + $0x10] sm:$0xff] %v428_v40  ;;  %v448_v42 = vld [vmem:[%s2360_s6 + $0x98] sm:$0xff]  ;;  %431 = vst [vmem:[%s2356_s0 + $0x18] sm:$0xff] %v430_v41  ;;  %v452_v44 = vld [vmem:[%s2360_s6 + $0xa8] sm:$0xff] }
  0x8c   : >> { %449 = vst [vmem:[%s2356_s0 + $0x20] sm:$0xff] %v448_v42  ;;  %451 = vst [vmem:[%s2356_s0 + $0x28] sm:$0xff] %v450_v43  ;;  %v454_v45 = vld [vmem:[%s2360_s6 + $0xb0] sm:$0xff]  ;;  %v474_v47 = vld [vmem:[%s2360_s6 + $0x138] sm:$0xff]  ;;  %s3430_s29 = smov (%p569_p8, %s568_s29), 0 }
  0x8d   : >> { %v472_v46 = vld [vmem:[%s2360_s6 + $0x130] sm:$0xff]  ;;  %453 = vst [vmem:[%s2356_s0 + $0x30] sm:$0xff] %v452_v44  ;;  %455 = vst [vmem:[%s2356_s0 + $0x38] sm:$0xff] %v454_v45  ;;  %v476_v48 = vld [vmem:[%s2360_s6 + $0x140] sm:$0xff]  ;;  %s571_s30 = smul.u32 96, %s3430_s29  ;;  %s3395_s8 = smov %s3430_s29 }
  0x8e   : >> { %473 = vst [vmem:[%s2356_s0 + $0x40] sm:$0xff] %v472_v46  ;;  %v478_v49 = vld [vmem:[%s2360_s6 + $0x148] sm:$0xff]  ;;  %475 = vst [vmem:[%s2356_s0 + $0x48] sm:$0xff] %v474_v47  ;;  %v498_v51 = vld [vmem:[%s2360_s6 + $0x1d0] sm:$0xff] }
  0x8f   : >> { %477 = vst [vmem:[%s2356_s0 + $0x50] sm:$0xff] %v476_v48  ;;  %479 = vst [vmem:[%s2356_s0 + $0x58] sm:$0xff] %v478_v49  ;;  %v496_v50 = vld [vmem:[%s2360_s6 + $0x1c8] sm:$0xff]  ;;  %v500_v52 = vld [vmem:[%s2360_s6 + $0x1d8] sm:$0xff]  ;;  %s573_s26 = scalar_lea.vmem %s2540_s11, %s571_s30   ;;  %s574_s4 = scalar_lea.vmem %s2544_s22, %s571_s30 [#allocation2]  }
  0x90   : >> { %497 = vst [vmem:[%s2356_s0 + $0x60] sm:$0xff] %v496_v50  ;;  %499 = vst [vmem:[%s2356_s0 + $0x68] sm:$0xff] %v498_v51  ;;  %v502_v53 = vld [vmem:[%s2360_s6 + $0x1e0] sm:$0xff]  ;;  %v522_v55 = vld [vmem:[%s2360_s6 + $0x268] sm:$0xff] }
  0x91   : >> { %501 = vst [vmem:[%s2356_s0 + $0x70] sm:$0xff] %v500_v52  ;;  %v520_v54 = vld [vmem:[%s2360_s6 + $0x260] sm:$0xff]  ;;  %503 = vst [vmem:[%s2356_s0 + $0x78] sm:$0xff] %v502_v53  ;;  %v524_v56 = vld [vmem:[%s2360_s6 + $0x270] sm:$0xff] }
  0x92   : >> { %521 = vst [vmem:[%s2356_s0 + $0x80] sm:$0xff] %v520_v54  ;;  %523 = vst [vmem:[%s2356_s0 + $0x88] sm:$0xff] %v522_v55  ;;  %v526_v57 = vld [vmem:[%s2360_s6 + $0x278] sm:$0xff]  ;;  %v546_v59 = vld [vmem:[%s2360_s6 + $0x300] sm:$0xff] }
  0x93   : >> { %v544_v58 = vld [vmem:[%s2360_s6 + $0x2f8] sm:$0xff]  ;;  %525 = vst [vmem:[%s2356_s0 + $0x90] sm:$0xff] %v524_v56  ;;  %527 = vst [vmem:[%s2356_s0 + $0x98] sm:$0xff] %v526_v57  ;;  %v548_v60 = vld [vmem:[%s2360_s6 + $0x308] sm:$0xff]  ;;  %420 = sbr.rel (!%p417_p9) target bundleno = 137 (0x89), region = 257 }
  0x94   : >> { %545 = vst [vmem:[%s2356_s0 + $0xa0] sm:$0xff] %v544_v58  ;;  %v550_v61 = vld [vmem:[%s2360_s6 + $0x310] sm:$0xff]  ;;  %547 = vst [vmem:[%s2356_s0 + $0xa8] sm:$0xff] %v546_v59  ;;  %v552_v62 = vld [vmem:[%s2360_s6 + $0x318] sm:$0xff] }
  0x95   : >> { %549 = vst [vmem:[%s2356_s0 + $0xb0] sm:$0xff] %v548_v60  ;;  %551 = vst [vmem:[%s2356_s0 + $0xb8] sm:$0xff] %v550_v61  ;;  %v554_v63 = vld [vmem:[%s2360_s6 + $0x320] sm:$0xff]  ;;  %v556_v0 = vld [vmem:[%s2360_s6 + $0x328] sm:$0xff] }
  0x96   : >> { %553 = vst [vmem:[%s2356_s0 + $0xc0] sm:$0xff] %v552_v62  ;;  %555 = vst [vmem:[%s2356_s0 + $0xc8] sm:$0xff] %v554_v63  ;;  %v558_v1 = vld [vmem:[%s2360_s6 + $0x330] sm:$0xff]  ;;  %v560_v2 = vld [vmem:[%s2360_s6 + $0x338] sm:$0xff] }
  0x97   : >> { %557 = vst [vmem:[%s2356_s0 + $0xd0] sm:$0xff] %v556_v0  ;;  %v562_v3 = vld [vmem:[%s2360_s6 + $0x340] sm:$0xff]  ;;  %559 = vst [vmem:[%s2356_s0 + $0xd8] sm:$0xff] %v558_v1  ;;  %v564_v4 = vld [vmem:[%s2360_s6 + $0x348] sm:$0xff] }
  0x98   : >> { %561 = vst [vmem:[%s2356_s0 + $0xe0] sm:$0xff] %v560_v2  ;;  %563 = vst [vmem:[%s2356_s0 + $0xe8] sm:$0xff] %v562_v3  ;;  %v566_v5 = vld [vmem:[%s2360_s6 + $0x350] sm:$0xff]  ;;  %s3394_s6 = smov %s573_s26 }
  0x99   : >> { %565 = vst [vmem:[%s2356_s0 + $0xf0] sm:$0xff] %v564_v4  ;;  %567 = vst [vmem:[%s2356_s0 + $0xf8] sm:$0xff] %v566_v5  ;;  %s3393_s0 = smov %s574_s4 }
  0x9a PF: > { %2135 = sdivrem.u32 %s410_s7, 12 }
  0x9b   : > { %s1729_s5 = smul.u32 1536, %s2713_s25 }
  0x9d   : > { %s579_s30 = sshra.s32 %s1729_s5, 4 }
  0x9e   : > { %s2824_s20 = scalar_lea.vmem %s2540_s11, %s579_s30   ;;  %s2827_s19 = scalar_lea.vmem %s2544_s22, %s579_s30 [#allocation2]  }
  0xa3   : > { %s2829_s4 = spop.drf %2135 }
  0xa4   : > { %p1731_p10 = scmp.le.s32.totalorder %s2829_s4, 0 }
  0xa5   : > { %s3396_s0 = smov (!%p1731_p10), %s2827_s19  ;;  %s3397_s6 = smov (!%p1731_p10), %s2824_s20 }
  0xa6   : > { %1615 = sbr.rel (%p1731_p10) target bundleno = 183 (0xb7), region = 262  ;;  %s2838_s8 = smov (!%p1731_p10), 0  }
  0xa7   : > { %s2840_s7 = smov (!%p1731_p10), 0  }
  0xad LB: >> { %v595_v6 = vld [vmem:[%s2376_s6] sm:$0xff]  ;;  %v597_v7 = vld [vmem:[%s2376_s6 + $0x98] sm:$0xff]  ;;  %v599_v8 = vld [vmem:[%s2376_s6 + $0x130] sm:$0xff]  ;;  %s607_s25 = sadd.s32 1, %s2380_s8  ;;  %s589_s7 = sadd.s32 1, %s2384_s7   ;;  %s2384_s7 = sphi %s2840_s7, %s589_s7   ;;  %s2380_s8 = sphi %s2838_s8, %s3398_s8   ;;  %s2376_s6 = sphi %s3397_s6, %s612_s6   ;;  %s2372_s0 = sphi %s3396_s0, %s613_s0  }
  0xae   : >> { %596 = vst [vmem:[%s2372_s0] sm:$0xff] %v595_v6  ;;  %598 = vst [vmem:[%s2372_s0 + $0x20] sm:$0xff] %v597_v7  ;;  %v601_v9 = vld [vmem:[%s2376_s6 + $0x1c8] sm:$0xff]  ;;  %v603_v10 = vld [vmem:[%s2376_s6 + $0x260] sm:$0xff]  ;;  %p608_p11 = scmp.ge.s32.totalorder %s607_s25, %s2829_s4  ;;  %p588_p12 = scmp.ge.s32.totalorder %s589_s7, %s2829_s4 }
  0xaf   : >> { %600 = vst [vmem:[%s2372_s0 + $0x40] sm:$0xff] %v599_v8  ;;  %v605_v11 = vld [vmem:[%s2376_s6 + $0x2f8] sm:$0xff]  ;;  %602 = vst [vmem:[%s2372_s0 + $0x60] sm:$0xff] %v601_v9 }
  0xb0   : >> { %604 = vst [vmem:[%s2372_s0 + $0x80] sm:$0xff] %v603_v10  ;;  %606 = vst [vmem:[%s2372_s0 + $0xa0] sm:$0xff] %v605_v11  ;;  %s3432_s25 = smov (%p608_p11, %s607_s25), 0  ;;  %591 = sbr.rel (!%p588_p12) target bundleno = 173 (0xad), region = 268 }
  0xb1   : >> { %s1732_s28 = sshll.u32 %s3432_s25, 3  ;;  %s3398_s8 = smov %s3432_s25 }
  0xb2   : >> { %s612_s6 = scalar_lea.vmem %s2824_s20, %s1732_s28   ;;  %s613_s0 = scalar_lea.vmem %s2827_s19, %s1732_s28 [#allocation2]  }
  0xb7 PF: > { %s2450_s29 = smov 0  }
  0xb8   : > { %s614_s26 = sshllo.u32 %s2450_s29, %s2548_s24 }
  0xb9   : > { %v623_v12 = vld [vmem:[%s2706_s9] sm:%s614_s26]  ;;  %v625_v13 = vld [vmem:[%s2706_s9 + $0x98] sm:%s614_s26] }
  0xba   : > { %624 = vst [vmem:[%s2709_s10] sm:%s614_s26] %v623_v12  ;;  %626 = vst [vmem:[%s2709_s10 + $0x20] sm:%s614_s26] %v625_v13 }
  0xbb   : > { %v627_v14 = vld [vmem:[%s2706_s9 + $0x130] sm:%s614_s26]  ;;  %v629_v15 = vld [vmem:[%s2706_s9 + $0x1c8] sm:%s614_s26] }
  0xbc   : > { %628 = vst [vmem:[%s2709_s10 + $0x40] sm:%s614_s26] %v627_v14  ;;  %630 = vst [vmem:[%s2709_s10 + $0x60] sm:%s614_s26] %v629_v15 }
  0xbd   : > { %v631_v16 = vld [vmem:[%s2706_s9 + $0x260] sm:%s614_s26]  ;;  %v633_v17 = vld [vmem:[%s2706_s9 + $0x2f8] sm:%s614_s26] }
  0xbe   : > { %632 = vst [vmem:[%s2709_s10 + $0x80] sm:%s614_s26] %v631_v16  ;;  %634 = vst [vmem:[%s2709_s10 + $0xa0] sm:%s614_s26] %v633_v17 }
  0xbf PF: > { %p1734_p13 = scmp.ge.u32.totalorder %s2542_s21, 8 }
  0xc0   : > { %s2451_s19 = smov (!%p1734_p13), 0  }
  0xc1   : > { %171 = sbr.rel (%p1734_p13) target bundleno = 200 (0xc8), region = 40  ;;  %s172_s20 = sshllo.u32 (!%p1734_p13), %s2451_s19, %s2542_s21 }
  0xc2   : > { %v181_v18 = vld [vmem:[%s2540_s11] sm:%s172_s20] (!%p1734_p13)  ;;  %v183_v19 = vld [vmem:[%s2540_s11 + $0x98] sm:%s172_s20] (!%p1734_p13) }
  0xc3   : > { %182 = vst [vmem:[%s2544_s22] sm:%s172_s20] (!%p1734_p13), %v181_v18  ;;  %184 = vst [vmem:[%s2544_s22 + $0x20] sm:%s172_s20] (!%p1734_p13), %v183_v19 }
  0xc4   : > { %v185_v20 = vld [vmem:[%s2540_s11 + $0x130] sm:%s172_s20] (!%p1734_p13)  ;;  %v187_v21 = vld [vmem:[%s2540_s11 + $0x1c8] sm:%s172_s20] (!%p1734_p13) }
  0xc5   : > { %186 = vst [vmem:[%s2544_s22 + $0x40] sm:%s172_s20] (!%p1734_p13), %v185_v20  ;;  %188 = vst [vmem:[%s2544_s22 + $0x60] sm:%s172_s20] (!%p1734_p13), %v187_v21 }
  0xc6   : > { %v189_v22 = vld [vmem:[%s2540_s11 + $0x260] sm:%s172_s20] (!%p1734_p13)  ;;  %v191_v23 = vld [vmem:[%s2540_s11 + $0x2f8] sm:%s172_s20] (!%p1734_p13) }
  0xc7   : > { %190 = vst [vmem:[%s2544_s22 + $0x80] sm:%s172_s20] (!%p1734_p13), %v189_v22  ;;  %192 = vst [vmem:[%s2544_s22 + $0xa0] sm:%s172_s20] (!%p1734_p13), %v191_v23 }
  0xc8 PF: > { %p1735_p0 = scmp.ge.s32.totalorder %s2320_s18, 1  ;;  %p637_p1 = scmp.lt.s32.totalorder %s2320_s18, 11 }
  0xca   : > { %p638_p2 = pnand %p1735_p0, %p637_p1 }
  0xcb   : > { %s644_s21 = sand.u32 (!%p638_p2), 1, %s2296_s12   ;;  %v702_v24 = vld [vmem:[%s3374_s2] sm:$0xff] (!%p638_p2)  ;;  %v2452_v25 = vmov (!%p638_p2), 0   ;;  %vm828_vm0 = vcmask (!%p638_p2), 392192  }
  0xcc   : > { %641 = sbr.rel (%p638_p2) target bundleno = 624 (0x270), region = 94  ;;  %864 = vmatprep.mubr.bf16.mxu0 (!%p638_p2), %v2452_v25  ;;  %905 = vmatprep.mubr.bf16.mxu1 (!%p638_p2), %v2452_v25  ;;  %v701_v60 = vld [vmem:[%s3373_s1] sm:$0xf] (!%p638_p2)  ;;  %s1736_s30 = sshll.u32 (!%p638_p2), %s644_s21, 5 }
  0xcd   : > { %s1808_s11 = smul.u32 (!%p638_p2), 192, %s644_s21  ;;  %2137 = vset.pattern.permute.xlu0 (!%p638_p2), %v2452_v25  ;;  %s2933_s4 = scalar_lea.vmem (!%p638_p2), [#allocation3], %s1736_s30  }
  0xce   : > { %705 = vperm.xlu0 (!%p638_p2), %2137, %v702_v24  }
  0xcf   : > { %s2896_s22 = scalar_lea.vmem (!%p638_p2), [#allocation2], %s1808_s11 }
  0xd0   : > { %v677_v26 = vld [vmem:[%s2896_s22] sm:$0xff] (!%p638_p2)  ;;  %v678_v28 = vld [vmem:[%s2896_s22 + $0x8] sm:$0xff] (!%p638_p2)  ;;  %v679_v48 = vld [vmem:[%s2896_s22 + $0x10] sm:$0xff] (!%p638_p2) }
  0xd1   : > { %v681_v27 = vld [vmem:[%s2896_s22 + $0x20] sm:$0xff] (!%p638_p2)  ;;  %v682_v30 = vld [vmem:[%s2896_s22 + $0x28] sm:$0xff] (!%p638_p2)  ;;  %v683_v49 = vld [vmem:[%s2896_s22 + $0x30] sm:$0xff] (!%p638_p2) }
  0xd2   : > { %v1738_v29 = vcombine.high (!%p638_p2), %v677_v26, %v681_v27  ;;  %v1737_v31 = vcombine.low (!%p638_p2), %v677_v26, %v681_v27  ;;  %v685_v32 = vld [vmem:[%s2896_s22 + $0x40] sm:$0xff] (!%p638_p2)  ;;  %v1740_v34 = vcombine.high (!%p638_p2), %v678_v28, %v682_v30  ;;  %v1739_v35 = vcombine.low (!%p638_p2), %v678_v28, %v682_v30  ;;  %v686_v37 = vld [vmem:[%s2896_s22 + $0x48] sm:$0xff] (!%p638_p2)  ;;  %v680_v50 = vld [vmem:[%s2896_s22 + $0x18] sm:$0xff] (!%p638_p2) }
  0xd3   : > { %v689_v33 = vld [vmem:[%s2896_s22 + $0x60] sm:$0xff]  ;;  %v690_v38 = vld [vmem:[%s2896_s22 + $0x68] sm:$0xff]  ;;  %v684_v51 = vld [vmem:[%s2896_s22 + $0x38] sm:$0xff]  ;;  %v1742_v54 = vcombine.high %v679_v48, %v683_v49  ;;  %v1741_v61 = vcombine.low %v679_v48, %v683_v49  ;;  %s1770_s12 = sshll.u32 (%p2523_p6), %s2304_s14, 3  ;;  %s1809_s0 = smul.u32 (%p2523_p6), 38, %s2308_s15 }
  0xd4   : > { %v1746_v36 = vcombine.high %v685_v32, %v689_v33  ;;  %v693_v39 = vld [vmem:[%s2896_s22 + $0x80] sm:$0xff]  ;;  %832 = vmatprep.subr.bf16.mxu0 %v1738_v29  ;;  %v1748_v40 = vcombine.high %v686_v37, %v690_v38  ;;  %v694_v42 = vld [vmem:[%s2896_s22 + $0x88] sm:$0xff]  ;;  %873 = vmatprep.subr.bf16.mxu1 %v1740_v34  ;;  %v1745_v44 = vcombine.low %v685_v32, %v689_v33  ;;  %v687_v56 = vld [vmem:[%s2896_s22 + $0x50] sm:$0xff]  ;;  %s1064_s6 = ssub.s32 (%p2523_p6), 38, %s1770_s12 }
  0xd5   : > { %v697_v41 = vld [vmem:[%s2896_s22 + $0xa0] sm:$0xff]  ;;  %v698_v43 = vld [vmem:[%s2896_s22 + $0xa8] sm:$0xff]  ;;  %833 = vmatpush1.bf16.msra.mxu0 %v1737_v31  ;;  %874 = vmatpush1.bf16.msra.mxu1 %v1739_v35  ;;  %v1747_v45 = vcombine.low %v686_v37, %v690_v38  ;;  %v1744_v55 = vcombine.high %v680_v50, %v684_v51  ;;  %v691_v57 = vld [vmem:[%s2896_s22 + $0x70] sm:$0xff]  ;;  %v1743_v62 = vcombine.low %v680_v50, %v684_v51  ;;  %p1065_p3 = scmp.lt.s32.totalorder (%p2523_p6), %s1064_s6, 8  ;;  %s1070_s8 = sadd.s32 (%p2523_p6), %s1809_s0, %s1770_s12 }
  0xd6   : > { %834 = vmatprep.subr.bf16.mxu0 %v1746_v36  ;;  %v1754_v46 = vcombine.high %v693_v39, %v697_v41  ;;  %875 = vmatprep.subr.bf16.mxu1 %v1748_v40  ;;  %v1756_v47 = vcombine.high %v694_v42, %v698_v43  ;;  %v1753_v52 = vcombine.low %v693_v39, %v697_v41  ;;  %v688_v58 = vld [vmem:[%s2896_s22 + $0x58] sm:$0xff]  ;;  %v695_v1 = vld [vmem:[%s2896_s22 + $0x90] sm:$0xff]  ;;  %s1773_s7 = sshll.u32 (%p2523_p6), %s1070_s8, 2 }
  0xd7   : > { %v1755_v53 = vcombine.low %v694_v42, %v698_v43  ;;  %v692_v59 = vld [vmem:[%s2896_s22 + $0x78] sm:$0xff]  ;;  %v1750_v63 = vcombine.high %v687_v56, %v691_v57  ;;  %v699_v2 = vld [vmem:[%s2896_s22 + $0xb0] sm:$0xff]  ;;  %v1749_v5 = vcombine.low %v687_v56, %v691_v57  ;;  %s2946_s29 = scalar_lea.vmem (%p2523_p6), %s3375_s3, %s1773_s7  }
  0xd8   : > { %v1752_v0 = vcombine.high %v688_v58, %v692_v59  ;;  %v696_v3 = vld [vmem:[%s2896_s22 + $0x98] sm:$0xff]  ;;  %v1751_v6 = vcombine.low %v688_v58, %v692_v59  ;;  %v1758_v7 = vcombine.high %v695_v1, %v699_v2  ;;  %v1757_v9 = vcombine.low %v695_v1, %v699_v2 }
  0xd9   : > { %835 = vmatpush1.bf16.msra.mxu0 %v1745_v44  ;;  %876 = vmatpush1.bf16.msra.mxu1 %v1747_v45  ;;  %v700_v4 = vld [vmem:[%s2896_s22 + $0xb8] sm:$0xff] }
  0xda   : > { %836 = vmatprep.subr.bf16.mxu0 %v1754_v46  ;;  %877 = vmatprep.subr.bf16.mxu1 %v1756_v47  ;;  %v1760_v8 = vcombine.high %v696_v3, %v700_v4  ;;  %v1759_v10 = vcombine.low %v696_v3, %v700_v4 }
  0xdd   : > { %837 = vmatpush1.bf16.msra.mxu0 %v1753_v52  ;;  %878 = vmatpush1.bf16.msra.mxu1 %v1755_v53 }
  0xde   : > { %914 = vmatprep.subr.bf16.mxu0 %v1742_v54  ;;  %955 = vmatprep.subr.bf16.mxu1 %v1744_v55 }
  0xe0   : > { %1761 = vmatmul.mubr.msk.bf16.vlgmr.msra.gmra.mrb[0].mxu0 %vm828_vm0, %v701_v60  ;;  %1762 = vmatmul.mubr.msk.bf16.vlgmr.msra.gmra.mrb[0].mxu1 %vm828_vm0, %v701_v60 }
  0xe1   : > { %915 = vmatpush1.bf16.msra.mxu0 %v1741_v61  ;;  %956 = vmatpush1.bf16.msra.mxu1 %v1743_v62 }
  0xe2   : > { %916 = vmatprep.subr.bf16.mxu0 %v1750_v63  ;;  %957 = vmatprep.subr.bf16.mxu1 %v1752_v0 }
  0xe3   : > { %946 = vmatprep.mubr.bf16.mxu0 %v2452_v25  ;;  %987 = vmatprep.mubr.bf16.mxu1 %v2452_v25 }
  0xe5   : > { %917 = vmatpush1.bf16.msra.mxu0 %v1749_v5  ;;  %958 = vmatpush1.bf16.msra.mxu1 %v1751_v6 }
  0xe6   : > { %918 = vmatprep.subr.bf16.mxu0 %v1758_v7  ;;  %959 = vmatprep.subr.bf16.mxu1 %v1760_v8 }
  0xe9   : > { %919 = vmatpush1.bf16.msra.mxu0 %v1757_v9  ;;  %960 = vmatpush1.bf16.msra.mxu1 %v1759_v10 }
  0xec   : > { %1763 = vmatmul.mubr.msk.bf16.vlgmr.msra.gmra.mrb[4].mxu0 %vm828_vm0, %v701_v60  ;;  %1764 = vmatmul.mubr.msk.bf16.vlgmr.msra.gmra.mrb[4].mxu1 %vm828_vm0, %v701_v60 }
 0x14d   : > { %v706_v11 = vpop.permute.xlu0 %705 }
 0x1b3   : > { %v866_v12 = vpop.f32.mrb[0].mxu0  ;;  %v907_v14 = vpop.f32.mrb[0].mxu1 }
 0x1b4   : > { %v867_v13 = vadd.f32 %v866_v12, %v706_v11  ;;  %v868_v15 = vpop.f32.mrb[1].mxu0  ;;  %v908_v16 = vadd.f32 %v907_v14, %v706_v11  ;;  %v909_v18 = vpop.f32.mrb[1].mxu1 }
 0x1b5   : > { %v869_v17 = vadd.f32 %v868_v15, %v706_v11  ;;  %v870_v19 = vpop.f32.mrb[2].mxu0  ;;  %v910_v21 = vadd.f32 %v909_v18, %v706_v11  ;;  %v911_v22 = vpop.f32.mrb[2].mxu1 }
 0x1b6   : > { %vm996_vm1 = vcmp.ge.f32.partialorder %v867_v13, 0.0  ;;  %v1004_v20 = vmul.f32 0.2, %v867_v13  ;;  %v871_v23 = vpop.f32.mrb[3].mxu0  ;;  %vm998_vm2 = vcmp.ge.f32.partialorder %v908_v16, 0.0  ;;  %v912_v28 = vpop.f32.mrb[3].mxu1 }
 0x1b7   : > { %v1006_v24 = vmul.f32 0.2, %v908_v16  ;;  %vm997_vm3 = vcmp.ge.f32.partialorder %v869_v17, 0.0  ;;  %v1005_v25 = vmul.f32 0.2, %v869_v17  ;;  %vm999_vm4 = vcmp.ge.f32.partialorder %v910_v21, 0.0 }
 0x1b8   : > { %v1012_v26 = vsel %vm996_vm1, %v867_v13, %v1004_v20  ;;  %v1007_v27 = vmul.f32 0.2, %v910_v21 }
 0x1b9   : > { %v1014_v29 = vsel %vm998_vm2, %v908_v16, %v1006_v24  ;;  %v1013_v30 = vsel %vm997_vm3, %v869_v17, %v1005_v25 }
 0x1ba   : > { %v1798_v31 = vpack.c.bf16 %v1013_v30, %v1012_v26  ;;  %v1015_v32 = vsel %vm999_vm4, %v910_v21, %v1007_v27 }
 0x1bb   : > { %v1799_v33 = vpack.c.bf16 %v1015_v32, %v1014_v29 }
 0x1bc   : > { %1052 = vst [vmem:[%s2933_s4] sm:$0xff] %v1798_v31 }
 0x1bd   : > { %1053 = vst [vmem:[%s2933_s4 + $0x8] sm:$0xff] %v1799_v33 }
 0x1bf   : > { %v948_v34 = vpop.f32.mrb[4].mxu0  ;;  %v989_v36 = vpop.f32.mrb[4].mxu1 }
 0x1c0   : > { %v949_v35 = vadd.f32 %v948_v34, %v706_v11  ;;  %v950_v37 = vpop.f32.mrb[5].mxu0  ;;  %v990_v38 = vadd.f32 %v989_v36, %v706_v11  ;;  %v991_v40 = vpop.f32.mrb[5].mxu1 }
 0x1c1   : > { %v951_v39 = vadd.f32 %v950_v37, %v706_v11  ;;  %v952_v41 = vpop.f32.mrb[6].mxu0  ;;  %v992_v43 = vadd.f32 %v991_v40, %v706_v11  ;;  %v993_v44 = vpop.f32.mrb[6].mxu1 }
 0x1c2   : > { %vm1000_vm5 = vcmp.ge.f32.partialorder %v949_v35, 0.0  ;;  %v1008_v42 = vmul.f32 0.2, %v949_v35  ;;  %v953_v45 = vpop.f32.mrb[7].mxu0  ;;  %vm1002_vm6 = vcmp.ge.f32.partialorder %v990_v38, 0.0  ;;  %v994_v50 = vpop.f32.mrb[7].mxu1 }
 0x1c3   : > { %v1010_v46 = vmul.f32 0.2, %v990_v38  ;;  %vm1001_vm7 = vcmp.ge.f32.partialorder %v951_v39, 0.0  ;;  %v1009_v47 = vmul.f32 0.2, %v951_v39  ;;  %vm1003_vm8 = vcmp.ge.f32.partialorder %v992_v43, 0.0 }
 0x1c4   : > { %v1016_v48 = vsel %vm1000_vm5, %v949_v35, %v1008_v42  ;;  %v1011_v49 = vmul.f32 0.2, %v992_v43  ;;  %1062 = sbr.rel (!%p2523_p6) target bundleno = 624 (0x270), region = 102 }
 0x1c5   : > { %v1018_v51 = vsel %vm1002_vm6, %v990_v38, %v1010_v46  ;;  %v1017_v52 = vsel %vm1001_vm7, %v951_v39, %v1009_v47 }
 0x1c6   : > { %v1800_v53 = vpack.c.bf16 %v1017_v52, %v1016_v48  ;;  %v1019_v54 = vsel %vm1003_vm8, %v992_v43, %v1011_v49 }
 0x1c7   : > { %v1801_v55 = vpack.c.bf16 %v1019_v54, %v1018_v51 }
 0x1c8   : > { %1054 = vst [vmem:[%s2933_s4 + $0x10] sm:$0xff] %v1800_v53 }
 0x1c9   : > { %1055 = vst [vmem:[%s2933_s4 + $0x18] sm:$0xff] %v1801_v55 }
 0x1cb   : > { %s3434_s6 = smov (!%p1065_p3, %s1064_s6), 8 }
 0x1cc   : > { %s1771_s26 = sshll.u32 %s3434_s6, 6  ;;  %s2948_s19 = sshll.u32 %s3434_s6, 2 }
 0x1cd   : > { %p1775_p4 = scmp.eq.s32.totalorder %s1771_s26, 0 }
 0x1ce   : > { %p1077_p6 = scmp.lt.u32.totalorder (!%p1775_p4), %s2948_s19, 8 }
 0x1cf   : > { %1076 = sbr.rel (%p1775_p4) target bundleno = 624 (0x270), region = 106 }
 0x1d6   : > { %1080 = sbr.rel (%p1077_p6) target bundleno = 615 (0x267), region = 110  ;;  %s2952_s14 = sand.u32 (!%p1077_p6), 7, %s2948_s19  }
 0x1d7   : > { %p1096_p5 = scmp.eq.s32.totalorder (!%p1077_p6), %s2952_s14, 0  ;;  %p1776_p7 = scmp.ne.s32.totalorder (!%p1077_p6), %s2952_s14, 0 }
 0x1dd   : > { %1099 = sbr.rel (%p1776_p7) target bundleno = 544 (0x220), region = 125  ;;  %s1100_s15 = sshrl.u32 (!%p1776_p7), %s2948_s19, 3 }
 0x1de   : > { %s2959_s23 = sshrl.u32 (!%p1776_p7), %s1100_s15, 6 }
 0x1df   : > { %p1777_p8 = scmp.le.s32.totalorder (!%p1776_p7), %s2959_s23, 0 }
 0x1e4   : > { %1629 = sbr.rel (%p1777_p8) target bundleno = 524 (0x20c), region = 273  ;;  %s3399_s20 = smov (!%p1777_p8), %s2946_s29 }
 0x1e5   : > { %s3400_s21 = smov (!%p1777_p8), %s2933_s4  ;;  %s2968_s24 = smov (!%p1777_p8), 0  }
 0x1e6   : > { %s2970_s9 = smov (!%p1777_p8), 0  }
 0x1eb LB: >> { %v1113_v56 = vld [vmem:[%s2392_s21] sm:$0xff]  ;;  %v1115_v57 = vld [vmem:[%s2392_s21 + $0x8] sm:$0xff]  ;;  %v1117_v58 = vld [vmem:[%s2392_s21 + $0x10] sm:$0xff]  ;;  %s1241_s11 = sadd.s32 1, %s2396_s24  ;;  %s1107_s9 = sadd.s32 1, %s2400_s9   ;;  %s2400_s9 = sphi %s2970_s9, %s1107_s9   ;;  %s2396_s24 = sphi %s2968_s24, %s3403_s24   ;;  %s2392_s21 = sphi %s3400_s21, %s3402_s21   ;;  %s2388_s20 = sphi %s3399_s20, %s3401_s20  }
 0x1ec   : >> { %1114 = vst [vmem:[%s2388_s20] sm:$0xff] %v1113_v56  ;;  %1116 = vst [vmem:[%s2388_s20 + $0x8] sm:$0xff] %v1115_v57  ;;  %v1119_v59 = vld [vmem:[%s2392_s21 + $0x18] sm:$0xff]  ;;  %v1121_v60 = vld [vmem:[%s2392_s21 + $0x20] sm:$0xff]  ;;  %p1242_p9 = scmp.ge.s32.totalorder %s1241_s11, %s2959_s23  ;;  %p1106_p10 = scmp.ge.s32.totalorder %s1107_s9, %s2959_s23 }
 0x1ed   : >> { %1118 = vst [vmem:[%s2388_s20 + $0x10] sm:$0xff] %v1117_v58  ;;  %v1123_v61 = vld [vmem:[%s2392_s21 + $0x28] sm:$0xff]  ;;  %1120 = vst [vmem:[%s2388_s20 + $0x18] sm:$0xff] %v1119_v59  ;;  %v1125_v62 = vld [vmem:[%s2392_s21 + $0x30] sm:$0xff] }
 0x1ee   : >> { %1122 = vst [vmem:[%s2388_s20 + $0x20] sm:$0xff] %v1121_v60  ;;  %1124 = vst [vmem:[%s2388_s20 + $0x28] sm:$0xff] %v1123_v61  ;;  %v1127_v63 = vld [vmem:[%s2392_s21 + $0x38] sm:$0xff]  ;;  %v1129_v0 = vld [vmem:[%s2392_s21 + $0x40] sm:$0xff]  ;;  %s3436_s11 = smov (%p1242_p9, %s1241_s11), 0 }
 0x1ef   : >> { %1126 = vst [vmem:[%s2388_s20 + $0x30] sm:$0xff] %v1125_v62  ;;  %1128 = vst [vmem:[%s2388_s20 + $0x38] sm:$0xff] %v1127_v63  ;;  %v1131_v1 = vld [vmem:[%s2392_s21 + $0x48] sm:$0xff]  ;;  %v1133_v2 = vld [vmem:[%s2392_s21 + $0x50] sm:$0xff]  ;;  %s1778_s22 = sshll.u32 %s3436_s11, 9  ;;  %s3403_s24 = smov %s3436_s11 }
 0x1f0   : >> { %1130 = vst [vmem:[%s2388_s20 + $0x40] sm:$0xff] %v1129_v0  ;;  %v1135_v3 = vld [vmem:[%s2392_s21 + $0x58] sm:$0xff]  ;;  %1132 = vst [vmem:[%s2388_s20 + $0x48] sm:$0xff] %v1131_v1  ;;  %v1137_v4 = vld [vmem:[%s2392_s21 + $0x60] sm:$0xff]  ;;  %s3026_s10 = scalar_lea.vmem %s2933_s4, %s1778_s22 [#allocation3]   ;;  %s3029_s5 = scalar_lea.vmem %s2946_s29, %s1778_s22  }
 0x1f1   : >> { %1134 = vst [vmem:[%s2388_s20 + $0x50] sm:$0xff] %v1133_v2  ;;  %1136 = vst [vmem:[%s2388_s20 + $0x58] sm:$0xff] %v1135_v3  ;;  %v1139_v5 = vld [vmem:[%s2392_s21 + $0x68] sm:$0xff]  ;;  %v1141_v6 = vld [vmem:[%s2392_s21 + $0x70] sm:$0xff] }
 0x1f2   : >> { %1138 = vst [vmem:[%s2388_s20 + $0x60] sm:$0xff] %v1137_v4  ;;  %1140 = vst [vmem:[%s2388_s20 + $0x68] sm:$0xff] %v1139_v5  ;;  %v1143_v7 = vld [vmem:[%s2392_s21 + $0x78] sm:$0xff]  ;;  %v1145_v8 = vld [vmem:[%s2392_s21 + $0x80] sm:$0xff] }
 0x1f3   : >> { %1142 = vst [vmem:[%s2388_s20 + $0x70] sm:$0xff] %v1141_v6  ;;  %v1147_v9 = vld [vmem:[%s2392_s21 + $0x88] sm:$0xff]  ;;  %1144 = vst [vmem:[%s2388_s20 + $0x78] sm:$0xff] %v1143_v7  ;;  %v1149_v10 = vld [vmem:[%s2392_s21 + $0x90] sm:$0xff] }
 0x1f4   : >> { %1146 = vst [vmem:[%s2388_s20 + $0x80] sm:$0xff] %v1145_v8  ;;  %1148 = vst [vmem:[%s2388_s20 + $0x88] sm:$0xff] %v1147_v9  ;;  %v1151_v11 = vld [vmem:[%s2392_s21 + $0x98] sm:$0xff]  ;;  %v1153_v12 = vld [vmem:[%s2392_s21 + $0xa0] sm:$0xff] }
 0x1f5   : >> { %1150 = vst [vmem:[%s2388_s20 + $0x90] sm:$0xff] %v1149_v10  ;;  %1152 = vst [vmem:[%s2388_s20 + $0x98] sm:$0xff] %v1151_v11  ;;  %v1155_v13 = vld [vmem:[%s2392_s21 + $0xa8] sm:$0xff]  ;;  %v1157_v14 = vld [vmem:[%s2392_s21 + $0xb0] sm:$0xff] }
 0x1f6   : >> { %1154 = vst [vmem:[%s2388_s20 + $0xa0] sm:$0xff] %v1153_v12  ;;  %v1159_v15 = vld [vmem:[%s2392_s21 + $0xb8] sm:$0xff]  ;;  %1156 = vst [vmem:[%s2388_s20 + $0xa8] sm:$0xff] %v1155_v13  ;;  %v1161_v16 = vld [vmem:[%s2392_s21 + $0xc0] sm:$0xff] }
 0x1f7   : >> { %1158 = vst [vmem:[%s2388_s20 + $0xb0] sm:$0xff] %v1157_v14  ;;  %1160 = vst [vmem:[%s2388_s20 + $0xb8] sm:$0xff] %v1159_v15  ;;  %v1163_v17 = vld [vmem:[%s2392_s21 + $0xc8] sm:$0xff]  ;;  %v1165_v18 = vld [vmem:[%s2392_s21 + $0xd0] sm:$0xff] }
 0x1f8   : >> { %1162 = vst [vmem:[%s2388_s20 + $0xc0] sm:$0xff] %v1161_v16  ;;  %1164 = vst [vmem:[%s2388_s20 + $0xc8] sm:$0xff] %v1163_v17  ;;  %v1167_v19 = vld [vmem:[%s2392_s21 + $0xd8] sm:$0xff]  ;;  %v1169_v20 = vld [vmem:[%s2392_s21 + $0xe0] sm:$0xff] }
 0x1f9   : >> { %1166 = vst [vmem:[%s2388_s20 + $0xd0] sm:$0xff] %v1165_v18  ;;  %v1171_v21 = vld [vmem:[%s2392_s21 + $0xe8] sm:$0xff]  ;;  %1168 = vst [vmem:[%s2388_s20 + $0xd8] sm:$0xff] %v1167_v19  ;;  %v1173_v22 = vld [vmem:[%s2392_s21 + $0xf0] sm:$0xff] }
 0x1fa   : >> { %1170 = vst [vmem:[%s2388_s20 + $0xe0] sm:$0xff] %v1169_v20  ;;  %1172 = vst [vmem:[%s2388_s20 + $0xe8] sm:$0xff] %v1171_v21  ;;  %v1175_v23 = vld [vmem:[%s2392_s21 + $0xf8] sm:$0xff]  ;;  %v1177_v24 = vld [vmem:[%s2392_s21 + $0x100] sm:$0xff] }
 0x1fb   : >> { %1174 = vst [vmem:[%s2388_s20 + $0xf0] sm:$0xff] %v1173_v22  ;;  %1176 = vst [vmem:[%s2388_s20 + $0xf8] sm:$0xff] %v1175_v23  ;;  %v1179_v25 = vld [vmem:[%s2392_s21 + $0x108] sm:$0xff]  ;;  %v1181_v26 = vld [vmem:[%s2392_s21 + $0x110] sm:$0xff] }
 0x1fc   : >> { %1178 = vst [vmem:[%s2388_s20 + $0x100] sm:$0xff] %v1177_v24  ;;  %v1183_v27 = vld [vmem:[%s2392_s21 + $0x118] sm:$0xff]  ;;  %1180 = vst [vmem:[%s2388_s20 + $0x108] sm:$0xff] %v1179_v25  ;;  %v1185_v28 = vld [vmem:[%s2392_s21 + $0x120] sm:$0xff] }
 0x1fd   : >> { %1182 = vst [vmem:[%s2388_s20 + $0x110] sm:$0xff] %v1181_v26  ;;  %1184 = vst [vmem:[%s2388_s20 + $0x118] sm:$0xff] %v1183_v27  ;;  %v1187_v29 = vld [vmem:[%s2392_s21 + $0x128] sm:$0xff]  ;;  %v1189_v30 = vld [vmem:[%s2392_s21 + $0x130] sm:$0xff] }
 0x1fe   : >> { %1186 = vst [vmem:[%s2388_s20 + $0x120] sm:$0xff] %v1185_v28  ;;  %1188 = vst [vmem:[%s2388_s20 + $0x128] sm:$0xff] %v1187_v29  ;;  %v1191_v31 = vld [vmem:[%s2392_s21 + $0x138] sm:$0xff]  ;;  %v1193_v32 = vld [vmem:[%s2392_s21 + $0x140] sm:$0xff] }
 0x1ff   : >> { %1190 = vst [vmem:[%s2388_s20 + $0x130] sm:$0xff] %v1189_v30  ;;  %v1195_v33 = vld [vmem:[%s2392_s21 + $0x148] sm:$0xff]  ;;  %1192 = vst [vmem:[%s2388_s20 + $0x138] sm:$0xff] %v1191_v31  ;;  %v1197_v34 = vld [vmem:[%s2392_s21 + $0x150] sm:$0xff] }
 0x200   : >> { %1194 = vst [vmem:[%s2388_s20 + $0x140] sm:$0xff] %v1193_v32  ;;  %1196 = vst [vmem:[%s2388_s20 + $0x148] sm:$0xff] %v1195_v33  ;;  %v1199_v35 = vld [vmem:[%s2392_s21 + $0x158] sm:$0xff]  ;;  %v1201_v36 = vld [vmem:[%s2392_s21 + $0x160] sm:$0xff] }
 0x201   : >> { %1198 = vst [vmem:[%s2388_s20 + $0x150] sm:$0xff] %v1197_v34  ;;  %1200 = vst [vmem:[%s2388_s20 + $0x158] sm:$0xff] %v1199_v35  ;;  %v1203_v37 = vld [vmem:[%s2392_s21 + $0x168] sm:$0xff]  ;;  %v1205_v38 = vld [vmem:[%s2392_s21 + $0x170] sm:$0xff] }
 0x202   : >> { %1202 = vst [vmem:[%s2388_s20 + $0x160] sm:$0xff] %v1201_v36  ;;  %v1207_v39 = vld [vmem:[%s2392_s21 + $0x178] sm:$0xff]  ;;  %1204 = vst [vmem:[%s2388_s20 + $0x168] sm:$0xff] %v1203_v37  ;;  %v1209_v40 = vld [vmem:[%s2392_s21 + $0x180] sm:$0xff] }
 0x203   : >> { %1206 = vst [vmem:[%s2388_s20 + $0x170] sm:$0xff] %v1205_v38  ;;  %1208 = vst [vmem:[%s2388_s20 + $0x178] sm:$0xff] %v1207_v39  ;;  %v1211_v41 = vld [vmem:[%s2392_s21 + $0x188] sm:$0xff]  ;;  %v1213_v42 = vld [vmem:[%s2392_s21 + $0x190] sm:$0xff] }
 0x204   : >> { %1210 = vst [vmem:[%s2388_s20 + $0x180] sm:$0xff] %v1209_v40  ;;  %1212 = vst [vmem:[%s2388_s20 + $0x188] sm:$0xff] %v1211_v41  ;;  %v1215_v43 = vld [vmem:[%s2392_s21 + $0x198] sm:$0xff]  ;;  %v1217_v44 = vld [vmem:[%s2392_s21 + $0x1a0] sm:$0xff] }
 0x205   : >> { %1214 = vst [vmem:[%s2388_s20 + $0x190] sm:$0xff] %v1213_v42  ;;  %v1219_v45 = vld [vmem:[%s2392_s21 + $0x1a8] sm:$0xff]  ;;  %1216 = vst [vmem:[%s2388_s20 + $0x198] sm:$0xff] %v1215_v43  ;;  %v1221_v46 = vld [vmem:[%s2392_s21 + $0x1b0] sm:$0xff]  ;;  %1109 = sbr.rel (!%p1106_p10) target bundleno = 491 (0x1eb), region = 279 }
 0x206   : >> { %1218 = vst [vmem:[%s2388_s20 + $0x1a0] sm:$0xff] %v1217_v44  ;;  %1220 = vst [vmem:[%s2388_s20 + $0x1a8] sm:$0xff] %v1219_v45  ;;  %v1223_v47 = vld [vmem:[%s2392_s21 + $0x1b8] sm:$0xff]  ;;  %v1225_v48 = vld [vmem:[%s2392_s21 + $0x1c0] sm:$0xff] }
 0x207   : >> { %1222 = vst [vmem:[%s2388_s20 + $0x1b0] sm:$0xff] %v1221_v46  ;;  %1224 = vst [vmem:[%s2388_s20 + $0x1b8] sm:$0xff] %v1223_v47  ;;  %v1227_v49 = vld [vmem:[%s2392_s21 + $0x1c8] sm:$0xff]  ;;  %v1229_v50 = vld [vmem:[%s2392_s21 + $0x1d0] sm:$0xff] }
 0x208   : >> { %1226 = vst [vmem:[%s2388_s20 + $0x1c0] sm:$0xff] %v1225_v48  ;;  %v1231_v51 = vld [vmem:[%s2392_s21 + $0x1d8] sm:$0xff]  ;;  %1228 = vst [vmem:[%s2388_s20 + $0x1c8] sm:$0xff] %v1227_v49  ;;  %v1233_v52 = vld [vmem:[%s2392_s21 + $0x1e0] sm:$0xff] }
 0x209   : >> { %1230 = vst [vmem:[%s2388_s20 + $0x1d0] sm:$0xff] %v1229_v50  ;;  %1232 = vst [vmem:[%s2388_s20 + $0x1d8] sm:$0xff] %v1231_v51  ;;  %v1235_v53 = vld [vmem:[%s2392_s21 + $0x1e8] sm:$0xff]  ;;  %v1237_v54 = vld [vmem:[%s2392_s21 + $0x1f0] sm:$0xff] }
 0x20a   : >> { %1234 = vst [vmem:[%s2388_s20 + $0x1e0] sm:$0xff] %v1233_v52  ;;  %1236 = vst [vmem:[%s2388_s20 + $0x1e8] sm:$0xff] %v1235_v53  ;;  %v1239_v55 = vld [vmem:[%s2392_s21 + $0x1f8] sm:$0xff]  ;;  %s3402_s21 = smov %s3026_s10 }
 0x20b   : >> { %1238 = vst [vmem:[%s2388_s20 + $0x1f0] sm:$0xff] %v1237_v54  ;;  %1240 = vst [vmem:[%s2388_s20 + $0x1f8] sm:$0xff] %v1239_v55  ;;  %s3401_s20 = smov %s3029_s5 }
 0x20c PF: > { %s3135_s30 = sand.u32 63, %s1100_s15   ;;  %s1802_s12 = sshll.u32 %s2959_s23, 13 }
 0x20d   : > { %s1252_s0 = sshra.s32 %s1802_s12, 4  ;;  %p1783_p11 = scmp.le.s32.totalorder %s3135_s30, 0 }
 0x20e   : > { %s1253_s6 = scalar_lea.vmem %s2933_s4, %s1252_s0 [#allocation3]   ;;  %s1256_s8 = scalar_lea.vmem %s2946_s29, %s1252_s0  }
 0x20f   : > { %1643 = sbr.rel (%p1783_p11) target bundleno = 544 (0x220), region = 284  ;;  %s2402_s7 = smov (!%p1783_p11), %s1256_s8  }
 0x210   : > { %s2406_s25 = smov (!%p1783_p11), %s1253_s6   ;;  %s2410_s28 = smov (!%p1783_p11), 0  }
 0x211   : > { %s2414_s26 = smov (!%p1783_p11), 0  }
 0x216 LB: >> { %v1268_v56 = vld [vmem:[%s2408_s25] sm:$0xff]  ;;  %s1270_s15 = sadd.s32 1, %s2412_s28  ;;  %s1262_s26 = sadd.s32 1, %s2416_s26   ;;  %s2416_s26 = sphi %s2414_s26, %s1262_s26   ;;  %s2412_s28 = sphi %s2410_s28, %s2411_s28   ;;  %s2408_s25 = sphi %s2406_s25, %s1275_s25   ;;  %s2404_s7 = sphi %s2402_s7, %s1276_s7  }
 0x217   : >> { %1269 = vst [vmem:[%s2404_s7] sm:$0xff] %v1268_v56  ;;  %p1271_p12 = scmp.ge.s32.totalorder %s1270_s15, %s3135_s30  ;;  %p1261_p13 = scmp.ge.s32.totalorder %s1262_s26, %s3135_s30 }
 0x219   : >> { %s3438_s15 = smov (%p1271_p12, %s1270_s15), 0  ;;  %1264 = sbr.rel (!%p1261_p13) target bundleno = 534 (0x216), region = 290 }
 0x21a   : >> { %s1784_s23 = sshll.u32 %s3438_s15, 3  ;;  %s2411_s28 = smov %s3438_s15  }
 0x21b   : >> { %s1275_s25 = scalar_lea.vmem %s1253_s6, %s1784_s23 [#allocation3]   ;;  %s1276_s7 = scalar_lea.vmem %s1256_s8, %s1784_s23  }
 0x220 PF: > { %1279 = sbr.rel (%p1096_p5) target bundleno = 615 (0x267), region = 143  ;;  %s3147_s20 = ssub.s32 (!%p1096_p5), %s2948_s19, %s2952_s14 }
 0x221   : > { %s1285_s21 = sshrl.u32 (!%p1096_p5), %s2948_s19, 3  ;;  %s1282_s24 = scalar_lea.vmem (!%p1096_p5), %s2933_s4, %s3147_s20 [#allocation3] }
 0x222   : > { %s1284_s9 = scalar_lea.vmem (!%p1096_p5), %s2946_s29, %s3147_s20  ;;  %s3156_s11 = sshrl.u32 (!%p1096_p5), %s1285_s21, 6 }
 0x223   : > { %p1786_p0 = scmp.le.s32.totalorder (!%p1096_p5), %s3156_s11, 0 }
 0x227   : > { %1657 = sbr.rel (%p1786_p0) target bundleno = 591 (0x24f), region = 295  ;;  %s3404_s22 = smov (!%p1786_p0), %s2946_s29 }
 0x228   : > { %s3405_s10 = smov (!%p1786_p0), %s2933_s4  ;;  %s3165_s5 = smov (!%p1786_p0), 0  }
 0x229   : > { %s3167_s30 = smov (!%p1786_p0), 0  }
 0x22e LB: >> { %v1298_v57 = vld [vmem:[%s2424_s10] sm:$0xff]  ;;  %v1300_v58 = vld [vmem:[%s2424_s10 + $0x8] sm:$0xff]  ;;  %v1302_v59 = vld [vmem:[%s2424_s10 + $0x10] sm:$0xff]  ;;  %s1426_s12 = sadd.s32 1, %s2428_s5  ;;  %s1292_s30 = sadd.s32 1, %s2432_s30   ;;  %s2432_s30 = sphi %s3167_s30, %s1292_s30   ;;  %s2428_s5 = sphi %s3165_s5, %s3408_s5   ;;  %s2424_s10 = sphi %s3405_s10, %s3407_s10   ;;  %s2420_s22 = sphi %s3404_s22, %s3406_s22  }
 0x22f   : >> { %1299 = vst [vmem:[%s2420_s22] sm:$0xff] %v1298_v57  ;;  %1301 = vst [vmem:[%s2420_s22 + $0x8] sm:$0xff] %v1300_v58  ;;  %v1304_v60 = vld [vmem:[%s2424_s10 + $0x18] sm:$0xff]  ;;  %v1306_v61 = vld [vmem:[%s2424_s10 + $0x20] sm:$0xff]  ;;  %p1427_p1 = scmp.ge.s32.totalorder %s1426_s12, %s3156_s11  ;;  %p1291_p2 = scmp.ge.s32.totalorder %s1292_s30, %s3156_s11 }
 0x230   : >> { %1303 = vst [vmem:[%s2420_s22 + $0x10] sm:$0xff] %v1302_v59  ;;  %v1308_v62 = vld [vmem:[%s2424_s10 + $0x28] sm:$0xff]  ;;  %1305 = vst [vmem:[%s2420_s22 + $0x18] sm:$0xff] %v1304_v60  ;;  %v1310_v63 = vld [vmem:[%s2424_s10 + $0x30] sm:$0xff] }
 0x231   : >> { %1307 = vst [vmem:[%s2420_s22 + $0x20] sm:$0xff] %v1306_v61  ;;  %1309 = vst [vmem:[%s2420_s22 + $0x28] sm:$0xff] %v1308_v62  ;;  %v1312_v0 = vld [vmem:[%s2424_s10 + $0x38] sm:$0xff]  ;;  %v1314_v1 = vld [vmem:[%s2424_s10 + $0x40] sm:$0xff]  ;;  %s3440_s12 = smov (%p1427_p1, %s1426_s12), 0 }
 0x232   : >> { %1311 = vst [vmem:[%s2420_s22 + $0x30] sm:$0xff] %v1310_v63  ;;  %1313 = vst [vmem:[%s2420_s22 + $0x38] sm:$0xff] %v1312_v0  ;;  %v1316_v2 = vld [vmem:[%s2424_s10 + $0x48] sm:$0xff]  ;;  %v1318_v3 = vld [vmem:[%s2424_s10 + $0x50] sm:$0xff]  ;;  %s1787_s0 = sshll.u32 %s3440_s12, 9  ;;  %s3408_s5 = smov %s3440_s12 }
 0x233   : >> { %1315 = vst [vmem:[%s2420_s22 + $0x40] sm:$0xff] %v1314_v1  ;;  %v1320_v4 = vld [vmem:[%s2424_s10 + $0x58] sm:$0xff]  ;;  %1317 = vst [vmem:[%s2420_s22 + $0x48] sm:$0xff] %v1316_v2  ;;  %v1322_v5 = vld [vmem:[%s2424_s10 + $0x60] sm:$0xff]  ;;  %s3223_s6 = scalar_lea.vmem %s2933_s4, %s1787_s0 [#allocation3]   ;;  %s3226_s8 = scalar_lea.vmem %s2946_s29, %s1787_s0  }
 0x234   : >> { %1319 = vst [vmem:[%s2420_s22 + $0x50] sm:$0xff] %v1318_v3  ;;  %1321 = vst [vmem:[%s2420_s22 + $0x58] sm:$0xff] %v1320_v4  ;;  %v1324_v6 = vld [vmem:[%s2424_s10 + $0x68] sm:$0xff]  ;;  %v1326_v7 = vld [vmem:[%s2424_s10 + $0x70] sm:$0xff] }
 0x235   : >> { %1323 = vst [vmem:[%s2420_s22 + $0x60] sm:$0xff] %v1322_v5  ;;  %1325 = vst [vmem:[%s2420_s22 + $0x68] sm:$0xff] %v1324_v6  ;;  %v1328_v8 = vld [vmem:[%s2424_s10 + $0x78] sm:$0xff]  ;;  %v1330_v9 = vld [vmem:[%s2424_s10 + $0x80] sm:$0xff] }
 0x236   : >> { %1327 = vst [vmem:[%s2420_s22 + $0x70] sm:$0xff] %v1326_v7  ;;  %v1332_v10 = vld [vmem:[%s2424_s10 + $0x88] sm:$0xff]  ;;  %1329 = vst [vmem:[%s2420_s22 + $0x78] sm:$0xff] %v1328_v8  ;;  %v1334_v11 = vld [vmem:[%s2424_s10 + $0x90] sm:$0xff] }
 0x237   : >> { %1331 = vst [vmem:[%s2420_s22 + $0x80] sm:$0xff] %v1330_v9  ;;  %1333 = vst [vmem:[%s2420_s22 + $0x88] sm:$0xff] %v1332_v10  ;;  %v1336_v12 = vld [vmem:[%s2424_s10 + $0x98] sm:$0xff]  ;;  %v1338_v13 = vld [vmem:[%s2424_s10 + $0xa0] sm:$0xff] }
 0x238   : >> { %1335 = vst [vmem:[%s2420_s22 + $0x90] sm:$0xff] %v1334_v11  ;;  %1337 = vst [vmem:[%s2420_s22 + $0x98] sm:$0xff] %v1336_v12  ;;  %v1340_v14 = vld [vmem:[%s2424_s10 + $0xa8] sm:$0xff]  ;;  %v1342_v15 = vld [vmem:[%s2424_s10 + $0xb0] sm:$0xff] }
 0x239   : >> { %1339 = vst [vmem:[%s2420_s22 + $0xa0] sm:$0xff] %v1338_v13  ;;  %v1344_v16 = vld [vmem:[%s2424_s10 + $0xb8] sm:$0xff]  ;;  %1341 = vst [vmem:[%s2420_s22 + $0xa8] sm:$0xff] %v1340_v14  ;;  %v1346_v17 = vld [vmem:[%s2424_s10 + $0xc0] sm:$0xff] }
 0x23a   : >> { %1343 = vst [vmem:[%s2420_s22 + $0xb0] sm:$0xff] %v1342_v15  ;;  %1345 = vst [vmem:[%s2420_s22 + $0xb8] sm:$0xff] %v1344_v16  ;;  %v1348_v18 = vld [vmem:[%s2424_s10 + $0xc8] sm:$0xff]  ;;  %v1350_v19 = vld [vmem:[%s2424_s10 + $0xd0] sm:$0xff] }
 0x23b   : >> { %1347 = vst [vmem:[%s2420_s22 + $0xc0] sm:$0xff] %v1346_v17  ;;  %1349 = vst [vmem:[%s2420_s22 + $0xc8] sm:$0xff] %v1348_v18  ;;  %v1352_v20 = vld [vmem:[%s2424_s10 + $0xd8] sm:$0xff]  ;;  %v1354_v21 = vld [vmem:[%s2424_s10 + $0xe0] sm:$0xff] }
 0x23c   : >> { %1351 = vst [vmem:[%s2420_s22 + $0xd0] sm:$0xff] %v1350_v19  ;;  %v1356_v22 = vld [vmem:[%s2424_s10 + $0xe8] sm:$0xff]  ;;  %1353 = vst [vmem:[%s2420_s22 + $0xd8] sm:$0xff] %v1352_v20  ;;  %v1358_v23 = vld [vmem:[%s2424_s10 + $0xf0] sm:$0xff] }
 0x23d   : >> { %1355 = vst [vmem:[%s2420_s22 + $0xe0] sm:$0xff] %v1354_v21  ;;  %1357 = vst [vmem:[%s2420_s22 + $0xe8] sm:$0xff] %v1356_v22  ;;  %v1360_v24 = vld [vmem:[%s2424_s10 + $0xf8] sm:$0xff]  ;;  %v1362_v25 = vld [vmem:[%s2424_s10 + $0x100] sm:$0xff] }
 0x23e   : >> { %1359 = vst [vmem:[%s2420_s22 + $0xf0] sm:$0xff] %v1358_v23  ;;  %1361 = vst [vmem:[%s2420_s22 + $0xf8] sm:$0xff] %v1360_v24  ;;  %v1364_v26 = vld [vmem:[%s2424_s10 + $0x108] sm:$0xff]  ;;  %v1366_v27 = vld [vmem:[%s2424_s10 + $0x110] sm:$0xff] }
 0x23f   : >> { %1363 = vst [vmem:[%s2420_s22 + $0x100] sm:$0xff] %v1362_v25  ;;  %v1368_v28 = vld [vmem:[%s2424_s10 + $0x118] sm:$0xff]  ;;  %1365 = vst [vmem:[%s2420_s22 + $0x108] sm:$0xff] %v1364_v26  ;;  %v1370_v29 = vld [vmem:[%s2424_s10 + $0x120] sm:$0xff] }
 0x240   : >> { %1367 = vst [vmem:[%s2420_s22 + $0x110] sm:$0xff] %v1366_v27  ;;  %1369 = vst [vmem:[%s2420_s22 + $0x118] sm:$0xff] %v1368_v28  ;;  %v1372_v30 = vld [vmem:[%s2424_s10 + $0x128] sm:$0xff]  ;;  %v1374_v31 = vld [vmem:[%s2424_s10 + $0x130] sm:$0xff] }
 0x241   : >> { %1371 = vst [vmem:[%s2420_s22 + $0x120] sm:$0xff] %v1370_v29  ;;  %1373 = vst [vmem:[%s2420_s22 + $0x128] sm:$0xff] %v1372_v30  ;;  %v1376_v32 = vld [vmem:[%s2424_s10 + $0x138] sm:$0xff]  ;;  %v1378_v33 = vld [vmem:[%s2424_s10 + $0x140] sm:$0xff] }
 0x242   : >> { %1375 = vst [vmem:[%s2420_s22 + $0x130] sm:$0xff] %v1374_v31  ;;  %v1380_v34 = vld [vmem:[%s2424_s10 + $0x148] sm:$0xff]  ;;  %1377 = vst [vmem:[%s2420_s22 + $0x138] sm:$0xff] %v1376_v32  ;;  %v1382_v35 = vld [vmem:[%s2424_s10 + $0x150] sm:$0xff] }
 0x243   : >> { %1379 = vst [vmem:[%s2420_s22 + $0x140] sm:$0xff] %v1378_v33  ;;  %1381 = vst [vmem:[%s2420_s22 + $0x148] sm:$0xff] %v1380_v34  ;;  %v1384_v36 = vld [vmem:[%s2424_s10 + $0x158] sm:$0xff]  ;;  %v1386_v37 = vld [vmem:[%s2424_s10 + $0x160] sm:$0xff] }
 0x244   : >> { %1383 = vst [vmem:[%s2420_s22 + $0x150] sm:$0xff] %v1382_v35  ;;  %1385 = vst [vmem:[%s2420_s22 + $0x158] sm:$0xff] %v1384_v36  ;;  %v1388_v38 = vld [vmem:[%s2424_s10 + $0x168] sm:$0xff]  ;;  %v1390_v39 = vld [vmem:[%s2424_s10 + $0x170] sm:$0xff] }
 0x245   : >> { %1387 = vst [vmem:[%s2420_s22 + $0x160] sm:$0xff] %v1386_v37  ;;  %v1392_v40 = vld [vmem:[%s2424_s10 + $0x178] sm:$0xff]  ;;  %1389 = vst [vmem:[%s2420_s22 + $0x168] sm:$0xff] %v1388_v38  ;;  %v1394_v41 = vld [vmem:[%s2424_s10 + $0x180] sm:$0xff] }
 0x246   : >> { %1391 = vst [vmem:[%s2420_s22 + $0x170] sm:$0xff] %v1390_v39  ;;  %1393 = vst [vmem:[%s2420_s22 + $0x178] sm:$0xff] %v1392_v40  ;;  %v1396_v42 = vld [vmem:[%s2424_s10 + $0x188] sm:$0xff]  ;;  %v1398_v43 = vld [vmem:[%s2424_s10 + $0x190] sm:$0xff] }
 0x247   : >> { %1395 = vst [vmem:[%s2420_s22 + $0x180] sm:$0xff] %v1394_v41  ;;  %1397 = vst [vmem:[%s2420_s22 + $0x188] sm:$0xff] %v1396_v42  ;;  %v1400_v44 = vld [vmem:[%s2424_s10 + $0x198] sm:$0xff]  ;;  %v1402_v45 = vld [vmem:[%s2424_s10 + $0x1a0] sm:$0xff] }
 0x248   : >> { %1399 = vst [vmem:[%s2420_s22 + $0x190] sm:$0xff] %v1398_v43  ;;  %v1404_v46 = vld [vmem:[%s2424_s10 + $0x1a8] sm:$0xff]  ;;  %1401 = vst [vmem:[%s2420_s22 + $0x198] sm:$0xff] %v1400_v44  ;;  %v1406_v47 = vld [vmem:[%s2424_s10 + $0x1b0] sm:$0xff]  ;;  %1294 = sbr.rel (!%p1291_p2) target bundleno = 558 (0x22e), region = 301 }
 0x249   : >> { %1403 = vst [vmem:[%s2420_s22 + $0x1a0] sm:$0xff] %v1402_v45  ;;  %1405 = vst [vmem:[%s2420_s22 + $0x1a8] sm:$0xff] %v1404_v46  ;;  %v1408_v48 = vld [vmem:[%s2424_s10 + $0x1b8] sm:$0xff]  ;;  %v1410_v49 = vld [vmem:[%s2424_s10 + $0x1c0] sm:$0xff] }
 0x24a   : >> { %1407 = vst [vmem:[%s2420_s22 + $0x1b0] sm:$0xff] %v1406_v47  ;;  %1409 = vst [vmem:[%s2420_s22 + $0x1b8] sm:$0xff] %v1408_v48  ;;  %v1412_v50 = vld [vmem:[%s2424_s10 + $0x1c8] sm:$0xff]  ;;  %v1414_v51 = vld [vmem:[%s2424_s10 + $0x1d0] sm:$0xff] }
 0x24b   : >> { %1411 = vst [vmem:[%s2420_s22 + $0x1c0] sm:$0xff] %v1410_v49  ;;  %v1416_v52 = vld [vmem:[%s2424_s10 + $0x1d8] sm:$0xff]  ;;  %1413 = vst [vmem:[%s2420_s22 + $0x1c8] sm:$0xff] %v1412_v50  ;;  %v1418_v53 = vld [vmem:[%s2424_s10 + $0x1e0] sm:$0xff] }
 0x24c   : >> { %1415 = vst [vmem:[%s2420_s22 + $0x1d0] sm:$0xff] %v1414_v51  ;;  %1417 = vst [vmem:[%s2420_s22 + $0x1d8] sm:$0xff] %v1416_v52  ;;  %v1420_v54 = vld [vmem:[%s2424_s10 + $0x1e8] sm:$0xff]  ;;  %v1422_v55 = vld [vmem:[%s2424_s10 + $0x1f0] sm:$0xff] }
 0x24d   : >> { %1419 = vst [vmem:[%s2420_s22 + $0x1e0] sm:$0xff] %v1418_v53  ;;  %1421 = vst [vmem:[%s2420_s22 + $0x1e8] sm:$0xff] %v1420_v54  ;;  %v1424_v56 = vld [vmem:[%s2424_s10 + $0x1f8] sm:$0xff]  ;;  %s3407_s10 = smov %s3223_s6 }
 0x24e   : >> { %1423 = vst [vmem:[%s2420_s22 + $0x1f0] sm:$0xff] %v1422_v55  ;;  %1425 = vst [vmem:[%s2420_s22 + $0x1f8] sm:$0xff] %v1424_v56  ;;  %s3406_s22 = smov %s3226_s8 }
 0x24f PF: > { %s3332_s7 = sand.u32 63, %s1285_s21   ;;  %s1804_s25 = sshll.u32 %s3156_s11, 13 }
 0x250   : > { %s1437_s28 = sshra.s32 %s1804_s25, 4  ;;  %p1792_p3 = scmp.le.s32.totalorder %s3332_s7, 0 }
 0x251   : > { %s1438_s26 = scalar_lea.vmem %s2933_s4, %s1437_s28 [#allocation3]   ;;  %s1441_s15 = scalar_lea.vmem %s2946_s29, %s1437_s28  }
 0x252   : > { %1671 = sbr.rel (%p1792_p3) target bundleno = 611 (0x263), region = 306  ;;  %s2434_s23 = smov (!%p1792_p3), %s1441_s15  }
 0x253   : > { %s2438_s12 = smov (!%p1792_p3), %s1438_s26   ;;  %s2442_s0 = smov (!%p1792_p3), 0  }
 0x254   : > { %s2446_s30 = smov (!%p1792_p3), 0  }
 0x259 LB: >> { %v1453_v57 = vld [vmem:[%s2440_s12] sm:$0xff]  ;;  %s1455_s21 = sadd.s32 1, %s2444_s0  ;;  %s1447_s30 = sadd.s32 1, %s2448_s30   ;;  %s2448_s30 = sphi %s2446_s30, %s1447_s30   ;;  %s2444_s0 = sphi %s2442_s0, %s2443_s0   ;;  %s2440_s12 = sphi %s2438_s12, %s1460_s12   ;;  %s2436_s23 = sphi %s2434_s23, %s1461_s23  }
 0x25a   : >> { %1454 = vst [vmem:[%s2436_s23] sm:$0xff] %v1453_v57  ;;  %p1456_p4 = scmp.ge.s32.totalorder %s1455_s21, %s3332_s7  ;;  %p1446_p6 = scmp.ge.s32.totalorder %s1447_s30, %s3332_s7 }
 0x25c   : >> { %s3442_s21 = smov (%p1456_p4, %s1455_s21), 0  ;;  %1449 = sbr.rel (!%p1446_p6) target bundleno = 601 (0x259), region = 312 }
 0x25d   : >> { %s1793_s11 = sshll.u32 %s3442_s21, 3  ;;  %s2443_s0 = smov %s3442_s21  }
 0x25e   : >> { %s1460_s12 = scalar_lea.vmem %s1438_s26, %s1793_s11 [#allocation3]   ;;  %s1461_s23 = scalar_lea.vmem %s1441_s15, %s1793_s11  }
 0x263 PF: > { %s2453_s22 = smov 0  }
 0x264   : > { %s1462_s10 = sshllo.u32 %s2453_s22, %s2952_s14 }
 0x265   : > { %v1471_v58 = vld [vmem:[%s1282_s24] sm:%s1462_s10] }
 0x266   : > { %1472 = vst [vmem:[%s1284_s9] sm:%s1462_s10] %v1471_v58 }
 0x267 PF: > { %p1795_p5 = scmp.ge.u32.totalorder %s2948_s19, 8 }
 0x268   : > { %s2454_s5 = smov (!%p1795_p5), 0  }
 0x269   : > { %1083 = sbr.rel (%p1795_p5) target bundleno = 624 (0x270), region = 114  ;;  %s1084_s6 = sshllo.u32 (!%p1795_p5), %s2454_s5, %s2948_s19 }
 0x26a   : > { %v1093_v59 = vld [vmem:[%s2933_s4] sm:%s1084_s6] (!%p1795_p5) }
 0x26b   : > { %1094 = vst [vmem:[%s2946_s29] sm:%s1084_s6] (!%p1795_p5), %v1093_v59 }
 0x270 PF: > { %s13_s18 = sadd.s32 1, %s2320_s18   ;;  %s3409_s20 = sld [smem:[#allocation4_spill]] }
 0x271   : > { %p10_p7 = scmp.ge.s32.totalorder %s13_s18, 12   ;;  %s3410_s24 = sld [smem:[#allocation5_spill]] }
 0x272   : > { %s3411_s12 = smov %s2300_s13  ;;  %s3412_s13 = smov %s2531_s27 }
 0x273   : > { %s3413_s14 = smov %s2312_s16  ;;  %s3414_s15 = smov %s2316_s17 }
 0x274   :  { %12 = sbr.rel (!%p10_p7) target bundleno = 6 (0x6), region = 323 }
 0x276   : > { %s3415_s16 = smov %s3409_s20 }
 0x277   : > { %s3416_s17 = smov %s3410_s24 }

// kernel: multiscale_discriminator_forward.16
= control target key start
LH: loop header
LB: loop body
LE: loop exit
PB: predicated region body
PF: predicated region fallthrough
CT: control target
= control target key end

     0   :  { %s1377_s9 = smov 0   ;;  %s1592_s0 = inlined_call_operand.vmem [shape: bf16[2,128,1089], index: 0, kind: input, shape index: {}]   ;;  %s1593_s1 = inlined_call_operand.vmem [shape: bf16[16,128], index: 1, kind: input, shape index: {}]   ;;  %s1594_s2 = inlined_call_operand.vmem [shape: bf16[2,16,1089], index: 2, kind: output, shape index: {}]  }
   0x1 LB: > { %s1098_s10 = sadd.s32 4294967295, %s1357_s9   ;;  %p1102_p0 = scmp.ge.s32.totalorder %s1357_s9, 1  ;;  %s1357_s9 = sphi %s1377_s9, %s12_s9  }
   0x2   : > { %p112_p1 = scmp.lt.s32.totalorder %s1357_s9, 3 }
   0x4   : > { %p113_p2 = pnand %p1102_p0, %p112_p1 }
   0x5   : > { %p134_p3 = scmp.lt.s32.totalorder (!%p113_p2), %s1098_s10, 1  ;;  %v1359_v0 = vmov (!%p113_p2), 0   ;;  %v1431_v34 = vld [vmem:[%s1593_s1] sm:$0xff] (!%p113_p2)   ;;  %vm1361_vm0 = vmmov (!%p113_p2), 0   ;;  %vm821_vm1 = vcmask (!%p113_p2), 531456   ;;  %vm1036_vm2 = vcmask (!%p113_p2), 527360  }
   0x6   : > { %116 = sbr.rel (%p113_p2) target bundleno = 674 (0x2a2), region = 28  ;;  %633 = vmatprep.mubr.bf16.mxu0 (!%p113_p2), %v1359_v0  ;;  %676 = vmatprep.mubr.bf16.mxu1 (!%p113_p2), %v1359_v0 }
   0xd   : > { %s1596_s10 = smov (!%p134_p3, %s1098_s10), 1 }
   0xe   : > { %s1229_s11 = smul.u32 576, %s1596_s10 }
   0xf   : > { %s1230_s17 = smul.u32 72, %s1596_s10 }
  0x10   : > { %s1393_s14 = scalar_lea.vmem %s1592_s0, %s1229_s11 }
  0x11   : > { %v1242_v1 = vld [vmem:[%s1393_s14 + $0x4] ss:$36 sps:$4 sm:$0xff]   ;;  %v1245_v3 = vld [vmem:[%s1393_s14 + $0xc] ss:$36 sps:$4 sm:$0xff]   ;;  %v1251_v7 = vld [vmem:[%s1393_s14 + $0x54] ss:$36 sps:$4 sm:$0xff]   ;;  %s1552_s20 = scalar_lea.vmem %s1594_s2, %s1230_s17 }
  0x12   : > { %v1244_v2 = vld [vmem:[%s1393_s14] ss:$36 sps:$4 sm:$0xff]   ;;  %601 = vmatprep.subr.bf16.mxu0 %v1242_v1  ;;  %v1247_v4 = vld [vmem:[%s1393_s14 + $0x4c] ss:$36 sps:$4 sm:$0xff]   ;;  %644 = vmatprep.subr.bf16.mxu1 %v1245_v3  ;;  %v1253_v8 = vld [vmem:[%s1393_s14 + $0x94] ss:$36 sps:$4 sm:$0xff]  }
  0x13   : > { %602 = vmatpush1.bf16.msra.mxu0 %v1244_v2  ;;  %v1249_v5 = vld [vmem:[%s1393_s14 + $0x8] ss:$36 sps:$4 sm:$0xff]   ;;  %v1255_v9 = vld [vmem:[%s1393_s14 + $0x50] ss:$36 sps:$4 sm:$0xff]   ;;  %v1257_v11 = vld [vmem:[%s1393_s14 + $0x9c] ss:$36 sps:$4 sm:$0xff]  }
  0x14   : > { %v1250_v6 = vld [vmem:[%s1393_s14 + $0x48] ss:$36 sps:$4 sm:$0xff]   ;;  %603 = vmatprep.subr.bf16.mxu0 %v1247_v4  ;;  %645 = vmatpush1.bf16.msra.mxu1 %v1249_v5  ;;  %v1256_v10 = vld [vmem:[%s1393_s14 + $0x90] ss:$36 sps:$4 sm:$0xff]   ;;  %v1259_v12 = vld [vmem:[%s1393_s14 + $0xdc] ss:$36 sps:$4 sm:$0xff]  }
  0x15   : > { %646 = vmatprep.subr.bf16.mxu1 %v1251_v7  ;;  %v1261_v13 = vld [vmem:[%s1393_s14 + $0x98] ss:$36 sps:$4 sm:$0xff]   ;;  %v1263_v14 = vld [vmem:[%s1393_s14 + $0xe4] ss:$36 sps:$4 sm:$0xff]   ;;  %v1269_v18 = vld [vmem:[%s1393_s14 + $0x12c] ss:$36 sps:$4 sm:$0xff]  }
  0x16   : > { %v1262_v15 = vld [vmem:[%s1393_s14 + $0xd8] ss:$36 sps:$4 sm:$0xff]   ;;  %v1265_v16 = vld [vmem:[%s1393_s14 + $0x124] ss:$36 sps:$4 sm:$0xff]   ;;  %v1271_v20 = vld [vmem:[%s1393_s14 + $0x16c] ss:$36 sps:$4 sm:$0xff]  }
  0x17   : > { %604 = vmatpush1.bf16.msra.mxu0 %v1250_v6  ;;  %v1267_v17 = vld [vmem:[%s1393_s14 + $0xe0] ss:$36 sps:$4 sm:$0xff]   ;;  %v1273_v21 = vld [vmem:[%s1393_s14 + $0x128] ss:$36 sps:$4 sm:$0xff]   ;;  %v1275_v22 = vld [vmem:[%s1393_s14 + $0x174] ss:$36 sps:$4 sm:$0xff]  }
  0x18   : > { %605 = vmatprep.subr.bf16.mxu0 %v1253_v8  ;;  %647 = vmatpush1.bf16.msra.mxu1 %v1255_v9  ;;  %v1268_v19 = vld [vmem:[%s1393_s14 + $0x120] ss:$36 sps:$4 sm:$0xff]   ;;  %v1274_v23 = vld [vmem:[%s1393_s14 + $0x168] ss:$36 sps:$4 sm:$0xff]   ;;  %v1277_v24 = vld [vmem:[%s1393_s14 + $0x1b4] ss:$36 sps:$4 sm:$0xff]  }
  0x19   : > { %648 = vmatprep.subr.bf16.mxu1 %v1257_v11  ;;  %v1279_v25 = vld [vmem:[%s1393_s14 + $0x170] ss:$36 sps:$4 sm:$0xff]   ;;  %v1281_v26 = vld [vmem:[%s1393_s14 + $0x1bc] ss:$36 sps:$4 sm:$0xff]   ;;  %v1287_v30 = vld [vmem:[%s1393_s14 + $0x204] ss:$36 sps:$4 sm:$0xff]  }
  0x1a   : > { %v1280_v27 = vld [vmem:[%s1393_s14 + $0x1b0] ss:$36 sps:$4 sm:$0xff]   ;;  %v1283_v28 = vld [vmem:[%s1393_s14 + $0x1fc] ss:$36 sps:$4 sm:$0xff]   ;;  %v1305_v39 = vld [vmem:[%s1393_s14 + $0x64] ss:$36 sps:$4 sm:$0xff]  }
  0x1b   : > { %606 = vmatpush1.bf16.msra.mxu0 %v1256_v10  ;;  %v1285_v29 = vld [vmem:[%s1393_s14 + $0x1b8] ss:$36 sps:$4 sm:$0xff]   ;;  %v1290_v33 = vld [vmem:[%s1393_s14 + $0x200] ss:$36 sps:$4 sm:$0xff]   ;;  %v1291_v36 = vld [vmem:[%s1393_s14 + $0x10] ss:$36 sps:$4 sm:$0xff]  }
  0x1c   : > { %607 = vmatprep.subr.bf16.mxu0 %v1259_v12  ;;  %649 = vmatpush1.bf16.msra.mxu1 %v1261_v13  ;;  %v1286_v31 = vld [vmem:[%s1393_s14 + $0x1f8] ss:$36 sps:$4 sm:$0xff]   ;;  %v1302_v41 = vld [vmem:[%s1393_s14 + $0xa4] ss:$36 sps:$4 sm:$0xff]   ;;  %v1311_v43 = vld [vmem:[%s1393_s14 + $0xac] ss:$36 sps:$4 sm:$0xff]  }
  0x1d   : > { %650 = vmatprep.subr.bf16.mxu1 %v1263_v14  ;;  %v1293_v32 = vld [vmem:[%s1393_s14 + $0x14] ss:$36 sps:$4 sm:$0xff]   ;;  %v1299_v35 = vld [vmem:[%s1393_s14 + $0x1c] ss:$36 sps:$4 sm:$0xff]   ;;  %v1308_v45 = vld [vmem:[%s1393_s14 + $0xec] ss:$36 sps:$4 sm:$0xff]  }
  0x1e   : > { %v1296_v37 = vld [vmem:[%s1393_s14 + $0x5c] ss:$36 sps:$4 sm:$0xff]   ;;  %v1309_v46 = vld [vmem:[%s1393_s14 + $0xa8] ss:$36 sps:$4 sm:$0xff]   ;;  %v1317_v47 = vld [vmem:[%s1393_s14 + $0xf4] ss:$36 sps:$4 sm:$0xff]  }
  0x1f   : > { %608 = vmatpush1.bf16.msra.mxu0 %v1262_v15  ;;  %v1297_v38 = vld [vmem:[%s1393_s14 + $0x18] ss:$36 sps:$4 sm:$0xff]   ;;  %v1303_v42 = vld [vmem:[%s1393_s14 + $0x60] ss:$36 sps:$4 sm:$0xff]   ;;  %v1306_v48 = vld [vmem:[%s1393_s14 + $0xe8] ss:$36 sps:$4 sm:$0xff]  }
  0x20   : > { %609 = vmatprep.subr.bf16.mxu0 %v1265_v16  ;;  %651 = vmatpush1.bf16.msra.mxu1 %v1267_v17  ;;  %v1294_v40 = vld [vmem:[%s1393_s14 + $0x58] ss:$36 sps:$4 sm:$0xff]   ;;  %v1300_v44 = vld [vmem:[%s1393_s14 + $0xa0] ss:$36 sps:$4 sm:$0xff]   ;;  %v1315_v50 = vld [vmem:[%s1393_s14 + $0xf0] ss:$36 sps:$4 sm:$0xff]  }
  0x21   : > { %652 = vmatprep.subr.bf16.mxu1 %v1269_v18  ;;  %v1314_v49 = vld [vmem:[%s1393_s14 + $0x134] ss:$36 sps:$4 sm:$0xff]   ;;  %v1323_v51 = vld [vmem:[%s1393_s14 + $0x13c] ss:$36 sps:$4 sm:$0xff]   ;;  %v1329_v55 = vld [vmem:[%s1393_s14 + $0x184] ss:$36 sps:$4 sm:$0xff]  }
  0x22   : > { %v1312_v52 = vld [vmem:[%s1393_s14 + $0x130] ss:$36 sps:$4 sm:$0xff]   ;;  %v1320_v53 = vld [vmem:[%s1393_s14 + $0x17c] ss:$36 sps:$4 sm:$0xff]   ;;  %v1326_v57 = vld [vmem:[%s1393_s14 + $0x1c4] ss:$36 sps:$4 sm:$0xff]  }
  0x23   : > { %610 = vmatpush1.bf16.msra.mxu0 %v1268_v19  ;;  %v1321_v54 = vld [vmem:[%s1393_s14 + $0x138] ss:$36 sps:$4 sm:$0xff]   ;;  %v1327_v58 = vld [vmem:[%s1393_s14 + $0x180] ss:$36 sps:$4 sm:$0xff]   ;;  %v1335_v59 = vld [vmem:[%s1393_s14 + $0x1cc] ss:$36 sps:$4 sm:$0xff]  }
  0x24   : > { %611 = vmatprep.subr.bf16.mxu0 %v1271_v20  ;;  %653 = vmatpush1.bf16.msra.mxu1 %v1273_v21  ;;  %v1318_v56 = vld [vmem:[%s1393_s14 + $0x178] ss:$36 sps:$4 sm:$0xff]   ;;  %v1324_v60 = vld [vmem:[%s1393_s14 + $0x1c0] ss:$36 sps:$4 sm:$0xff]   ;;  %v1332_v61 = vld [vmem:[%s1393_s14 + $0x20c] ss:$36 sps:$4 sm:$0xff]  }
  0x25   : > { %654 = vmatprep.subr.bf16.mxu1 %v1275_v22  ;;  %v1333_v62 = vld [vmem:[%s1393_s14 + $0x1c8] ss:$36 sps:$4 sm:$0xff]   ;;  %v1338_v63 = vld [vmem:[%s1393_s14 + $0x214] ss:$36 sps:$4 sm:$0xff]   ;;  %v1339_v2 = vld [vmem:[%s1393_s14 + $0x20] ss:$36 sps:$4 sm:$0xff]  }
  0x26   : > { %v1336_v1 = vld [vmem:[%s1393_s14 + $0x210] ss:$36 sps:$4 sm:$0xff]   ;;  %v1360_v3 = vmov 0.0   ;;  %v1340_v4 = vld [vmem:[%s1393_s14 + $0x68] ss:$36 sps:$4 sm:$0xff]  }
  0x27   : > { %612 = vmatpush1.bf16.msra.mxu0 %v1274_v23  ;;  %v1341_v5 = vld [vmem:[%s1393_s14 + $0xb0] ss:$36 sps:$4 sm:$0xff]   ;;  %v1342_v6 = vld [vmem:[%s1393_s14 + $0xf8] ss:$36 sps:$4 sm:$0xff]   ;;  %v1343_v7 = vld [vmem:[%s1393_s14 + $0x140] ss:$36 sps:$4 sm:$0xff]  }
  0x28   : > { %613 = vmatprep.subr.bf16.mxu0 %v1277_v24  ;;  %655 = vmatpush1.bf16.msra.mxu1 %v1279_v25  ;;  %v1344_v8 = vld [vmem:[%s1393_s14 + $0x188] ss:$36 sps:$4 sm:$0xff]   ;;  %v1345_v9 = vld [vmem:[%s1393_s14 + $0x1d0] ss:$36 sps:$4 sm:$0xff]   ;;  %v1346_v10 = vld [vmem:[%s1393_s14 + $0x218] ss:$36 sps:$4 sm:$0xff]  }
  0x29   : > { %656 = vmatprep.subr.bf16.mxu1 %v1281_v26 }
  0x2b   : > { %614 = vmatpush1.bf16.msra.mxu0 %v1280_v27 }
  0x2c   : > { %615 = vmatprep.subr.bf16.mxu0 %v1283_v28  ;;  %657 = vmatpush1.bf16.msra.mxu1 %v1285_v29 }
  0x2d   : > { %658 = vmatprep.subr.bf16.mxu1 %v1287_v30 }
  0x2f   : > { %616 = vmatpush1.bf16.msra.mxu0 %v1286_v31 }
  0x30   : > { %687 = vmatprep.subr.bf16.mxu0 %v1293_v32  ;;  %659 = vmatpush1.bf16.msra.mxu1 %v1290_v33 }
  0x31   : > { %730 = vmatprep.subr.bf16.mxu1 %v1299_v35 }
  0x32   : > { %634 = vmatmul.mubr.bf16.vlgmr.msra.gmra.mrb[0].mxu0 %v1431_v34 }
  0x33   : > { %688 = vmatpush1.bf16.msra.mxu0 %v1291_v36  ;;  %719 = vmatprep.mubr.bf16.mxu0 %v1359_v0 }
  0x34   : > { %677 = vmatmul.mubr.bf16.vlgmr.msra.gmra.mrb[0].mxu1 %v1431_v34  ;;  %689 = vmatprep.subr.bf16.mxu0 %v1296_v37 }
  0x35   : > { %731 = vmatpush1.bf16.msra.mxu1 %v1297_v38  ;;  %762 = vmatprep.mubr.bf16.mxu1 %v1359_v0  ;;  %v1330_v0 = vld [vmem:[%s1393_s14 + $0x208] ss:$36 sps:$4 sm:$0xff]  }
  0x36   : > { %732 = vmatprep.subr.bf16.mxu1 %v1305_v39 }
  0x37   : > { %690 = vmatpush1.bf16.msra.mxu0 %v1294_v40 }
  0x38   : > { %691 = vmatprep.subr.bf16.mxu0 %v1302_v41 }
  0x39   : > { %733 = vmatpush1.bf16.msra.mxu1 %v1303_v42 }
  0x3a   : > { %734 = vmatprep.subr.bf16.mxu1 %v1311_v43 }
  0x3b   : > { %692 = vmatpush1.bf16.msra.mxu0 %v1300_v44 }
  0x3c   : > { %693 = vmatprep.subr.bf16.mxu0 %v1308_v45 }
  0x3d   : > { %735 = vmatpush1.bf16.msra.mxu1 %v1309_v46 }
  0x3e   : > { %736 = vmatprep.subr.bf16.mxu1 %v1317_v47 }
  0x3f   : > { %694 = vmatpush1.bf16.msra.mxu0 %v1306_v48 }
  0x40   : > { %695 = vmatprep.subr.bf16.mxu0 %v1314_v49 }
  0x41   : > { %737 = vmatpush1.bf16.msra.mxu1 %v1315_v50 }
  0x42   : > { %738 = vmatprep.subr.bf16.mxu1 %v1323_v51 }
  0x43   : > { %696 = vmatpush1.bf16.msra.mxu0 %v1312_v52 }
  0x44   : > { %697 = vmatprep.subr.bf16.mxu0 %v1320_v53 }
  0x45   : > { %739 = vmatpush1.bf16.msra.mxu1 %v1321_v54 }
  0x46   : > { %740 = vmatprep.subr.bf16.mxu1 %v1329_v55 }
  0x47   : > { %698 = vmatpush1.bf16.msra.mxu0 %v1318_v56 }
  0x48   : > { %699 = vmatprep.subr.bf16.mxu0 %v1326_v57 }
  0x49   : > { %741 = vmatpush1.bf16.msra.mxu1 %v1327_v58 }
  0x4a   : > { %742 = vmatprep.subr.bf16.mxu1 %v1335_v59 }
  0x4b   : > { %700 = vmatpush1.bf16.msra.mxu0 %v1324_v60 }
  0x4c   : > { %701 = vmatprep.subr.bf16.mxu0 %v1332_v61 }
  0x4d   : > { %743 = vmatpush1.bf16.msra.mxu1 %v1333_v62 }
  0x4e   : > { %744 = vmatprep.subr.bf16.mxu1 %v1338_v63 }
  0x4f   : > { %702 = vmatpush1.bf16.msra.mxu0 %v1330_v0 }
  0x50   : > { %1209 = vmatprep.subr.bf16.mxu0 %v1360_v3 }
  0x51   : > { %745 = vmatpush1.bf16.msra.mxu1 %v1336_v1 }
  0x52   : > { %720 = vmatmul.mubr.bf16.vlgmr.msra.gmra.mrb[4].mxu0 %v1431_v34 }
  0x53   : > { %1210 = vmatpush3.bf16.msra.mxu0 %v1339_v2  ;;  %1225 = vmatprep.mubr.msk.bf16.mxu0 %vm1361_vm0, %v1360_v3 }
  0x54   : > { %763 = vmatmul.mubr.bf16.vlgmr.msra.gmra.mrb[4].mxu1 %v1431_v34  ;;  %1211 = vmatprep.subr.bf16.mxu0 %v1360_v3 }
  0x57   : > { %1212 = vmatpush3.bf16.msra.mxu0 %v1340_v4 }
  0x58   : > { %1213 = vmatprep.subr.bf16.mxu0 %v1360_v3 }
  0x5b   : > { %1214 = vmatpush3.bf16.msra.mxu0 %v1341_v5 }
  0x5c   : > { %1215 = vmatprep.subr.bf16.mxu0 %v1360_v3 }
  0x5f   : > { %1216 = vmatpush3.bf16.msra.mxu0 %v1342_v6 }
  0x60   : > { %1217 = vmatprep.subr.bf16.mxu0 %v1360_v3 }
  0x63   : > { %1218 = vmatpush3.bf16.msra.mxu0 %v1343_v7 }
  0x64   : > { %1219 = vmatprep.subr.bf16.mxu0 %v1360_v3 }
  0x67   : > { %1220 = vmatpush3.bf16.msra.mxu0 %v1344_v8 }
  0x68   : > { %1221 = vmatprep.subr.bf16.mxu0 %v1360_v3 }
  0x6b   : > { %1222 = vmatpush3.bf16.msra.mxu0 %v1345_v9 }
  0x6c   : > { %1223 = vmatprep.subr.bf16.mxu0 %v1360_v3 }
  0x6f   : > { %1224 = vmatpush3.bf16.msra.mxu0 %v1346_v10 }
  0x72   : > { %1226 = vmatmul.mubr.bf16.vlgmr.msra.gmra.mrb[8].mxu0 %v1431_v34 }
 0x105   : > { %v635_v11 = vpop.f32.mrb[0].mxu0 }
 0x106   : > { %v637_v12 = vpop.f32.mrb[1].mxu0 }
 0x107   : > { %v814_v13 = vadd.f32 %v637_v12, %v635_v11  ;;  %v639_v14 = vpop.f32.mrb[2].mxu0  ;;  %v678_v15 = vpop.f32.mrb[0].mxu1 }
 0x108   : > { %v641_v16 = vpop.f32.mrb[3].mxu0  ;;  %v680_v17 = vpop.f32.mrb[1].mxu1 }
 0x109   : > { %v826_v18 = vadd.f32 %v641_v16, %v639_v14  ;;  %v815_v19 = vadd.f32 %v814_v13, %v678_v15  ;;  %v682_v20 = vpop.f32.mrb[2].mxu1 }
 0x10a   : > { %v684_v21 = vpop.f32.mrb[3].mxu1 }
 0x10b   : > { %v816_v22 = vadd.f32 %v815_v19, %v680_v17  ;;  %v827_v23 = vadd.f32 %v826_v18, %v682_v20 }
 0x10d   : > { %v828_v24 = vadd.f32 %v827_v23, %v684_v21 }
 0x125   : > { %v721_v25 = vpop.f32.mrb[4].mxu0 }
 0x126   : > { %v817_v26 = vadd.f32 %v816_v22, %v721_v25  ;;  %v723_v27 = vpop.f32.mrb[5].mxu0 }
 0x127   : > { %v725_v28 = vpop.f32.mrb[6].mxu0  ;;  %v764_v29 = vpop.f32.mrb[4].mxu1 }
 0x128   : > { %v818_v30 = vadd.f32 %v817_v26, %v723_v27  ;;  %v829_v31 = vadd.f32 %v828_v24, %v725_v28  ;;  %v727_v32 = vpop.f32.mrb[7].mxu0  ;;  %v766_v33 = vpop.f32.mrb[5].mxu1 }
 0x129   : > { %v768_v34 = vpop.f32.mrb[6].mxu1 }
 0x12a   : > { %v830_v35 = vadd.f32 %v829_v31, %v727_v32  ;;  %v819_v36 = vadd.f32 %v818_v30, %v764_v29  ;;  %v770_v37 = vpop.f32.mrb[7].mxu1 }
 0x12c   : > { %v820_v38 = vadd.f32 %v819_v36, %v766_v33  ;;  %v831_v39 = vadd.f32 %v830_v35, %v768_v34 }
 0x12e   : > { %v832_v40 = vadd.f32 %v831_v39, %v770_v37 }
 0x145   : > { %v807_v41 = vpop.f32.mrb[8].mxu0 }
 0x146   : > { %v1227_v42 = vpop.f32.mrb[9].mxu0  ;;  %v822_v43 = vsel %vm821_vm1, %v807_v41, 0.0 }
 0x147   : > { %v810_v44 = vpop.f32.mrb[10].mxu0  ;;  %v823_v45 = vadd.f32 %v822_v43, %v820_v38 }
 0x148   : > { %v833_v46 = vsel %vm821_vm1, %v810_v44, 0.0  ;;  %v1228_v47 = vpop.f32.mrb[11].mxu0 }
 0x149   : > { %824 = vadd.xlane.f32.xlu0 %v823_v45  ;;  %v834_v48 = vadd.f32 %v833_v46, %v832_v40 }
 0x14d   : > { %835 = vadd.xlane.f32.xlu0 %v834_v48 }
 0x1d6   : > { %v825_v49 = vpop.xlane.xlu0 %824 }
 0x1d7   : > { %v838_v50 = vmul.f32 0.00091827364, %v825_v49 }
 0x1d9   : > { %v1481_v51 = vsub.f32 %v635_v11, %v838_v50  ;;  %v1483_v52 = vsub.f32 %v637_v12, %v838_v50  ;;  %v1485_v53 = vsub.f32 %v678_v15, %v838_v50  ;;  %v1487_v56 = vsub.f32 %v680_v17, %v838_v50 }
 0x1da   : > { %v836_v54 = vpop.xlane.xlu0 %835  ;;  %v1493_v59 = vsub.f32 %v721_v25, %v838_v50  ;;  %v845_v62 = vsub.f32 %v723_v27, %v838_v50  ;;  %v846_v4 = vsub.f32 %v764_v29, %v838_v50  ;;  %v847_v10 = vsub.f32 %v766_v33, %v838_v50 }
 0x1db   : > { %v839_v55 = vmul.f32 0.00091827364, %v836_v54  ;;  %v858_v57 = vmul.f32 %v1481_v51, %v1481_v51  ;;  %v859_v58 = vmul.f32 %v1483_v52, %v1483_v52  ;;  %v860_v60 = vmul.f32 %v1485_v53, %v1485_v53 }
 0x1dc   : > { %v861_v1 = vmul.f32 %v1487_v56, %v1487_v56  ;;  %v862_v6 = vmul.f32 %v1493_v59, %v1493_v59  ;;  %v848_v11 = vsub.f32 %v807_v41, %v838_v50  ;;  %v863_v12 = vmul.f32 %v845_v62, %v845_v62 }
 0x1dd   : > { %v876_v61 = vadd.f32 %v859_v58, %v858_v57  ;;  %v1497_v63 = vsub.f32 %v639_v14, %v839_v55  ;;  %v1499_v0 = vsub.f32 %v641_v16, %v839_v55  ;;  %v1503_v3 = vsub.f32 %v682_v20, %v839_v55 }
 0x1de   : > { %v1509_v8 = vsub.f32 %v684_v21, %v839_v55  ;;  %v1513_v14 = vsub.f32 %v725_v28, %v839_v55  ;;  %v864_v17 = vmul.f32 %v846_v4, %v846_v4  ;;  %v1517_v19 = vsub.f32 %v727_v32, %v839_v55 }
 0x1df   : > { %v877_v2 = vadd.f32 %v876_v61, %v860_v60  ;;  %v867_v5 = vmul.f32 %v1497_v63, %v1497_v63  ;;  %v868_v9 = vmul.f32 %v1499_v0, %v1499_v0  ;;  %v869_v15 = vmul.f32 %v1503_v3, %v1503_v3 }
 0x1e0   : > { %v870_v20 = vmul.f32 %v1509_v8, %v1509_v8  ;;  %v865_v22 = vmul.f32 %v847_v10, %v847_v10  ;;  %v866_v23 = vmul.f32 %v848_v11, %v848_v11  ;;  %v1521_v25 = vsub.f32 %v768_v34, %v839_v55 }
 0x1e1   : > { %v878_v7 = vadd.f32 %v877_v2, %v861_v1  ;;  %v887_v16 = vadd.f32 %v868_v9, %v867_v5  ;;  %v871_v26 = vmul.f32 %v1513_v14, %v1513_v14  ;;  %v1525_v28 = vsub.f32 %v810_v44, %v839_v55 }
 0x1e2   : > { %v1527_v30 = vsub.f32 %v770_v37, %v839_v55  ;;  %v872_v31 = vmul.f32 %v1517_v19, %v1517_v19  ;;  %v883_v33 = vsel %vm821_vm1, %v866_v23, 0.0  ;;  %v873_v34 = vmul.f32 %v1521_v25, %v1521_v25 }
 0x1e3   : > { %v879_v13 = vadd.f32 %v878_v7, %v862_v6  ;;  %v888_v21 = vadd.f32 %v887_v16, %v869_v15  ;;  %v875_v38 = vmul.f32 %v1525_v28, %v1525_v28 }
 0x1e4   : > { %v874_v39 = vmul.f32 %v1527_v30, %v1527_v30 }
 0x1e5   : > { %v880_v18 = vadd.f32 %v879_v13, %v863_v12  ;;  %v889_v27 = vadd.f32 %v888_v21, %v870_v20  ;;  %v894_v41 = vsel %vm821_vm1, %v875_v38, 0.0 }
 0x1e7   : > { %v881_v24 = vadd.f32 %v880_v18, %v864_v17  ;;  %v890_v32 = vadd.f32 %v889_v27, %v871_v26 }
 0x1e9   : > { %v882_v29 = vadd.f32 %v881_v24, %v865_v22  ;;  %v891_v36 = vadd.f32 %v890_v32, %v872_v31 }
 0x1eb   : > { %v884_v35 = vadd.f32 %v883_v33, %v882_v29  ;;  %v892_v37 = vadd.f32 %v891_v36, %v873_v34 }
 0x1ed   : > { %885 = vadd.xlane.f32.xlu1 %v884_v35  ;;  %v893_v40 = vadd.f32 %v892_v37, %v874_v39 }
 0x1ef   : > { %v895_v42 = vadd.f32 %v894_v41, %v893_v40 }
 0x1f1   : > { %896 = vadd.xlane.f32.xlu1 %v895_v42 }
 0x27a   : > { %v886_v43 = vpop.xlane.xlu1 %885 }
 0x27b   : > { %v898_v44 = vmul.f32 0.00091827364, %v886_v43 }
 0x27d   : > { %v900_v45 = vadd.f32 1e-05, %v898_v44 }
 0x27e   : > { %v897_v46 = vpop.xlane.xlu1 %896 }
 0x27f   : > { %1347 = vrsqrt.f32 %v900_v45  ;;  %v899_v47 = vmul.f32 0.00091827364, %v897_v46 }
 0x281   : > { %v901_v48 = vadd.f32 1e-05, %v899_v47 }
 0x283   : > { %1349 = vrsqrt.f32 %v901_v48 }
 0x289   : > { %v1348_v49 = vpop.eup %1347 }
 0x28a   : > { %v904_v50 = vmul.f32 %v1348_v49, %v1481_v51  ;;  %v905_v54 = vmul.f32 %v1348_v49, %v1483_v52  ;;  %v906_v55 = vmul.f32 %v1348_v49, %v1485_v53  ;;  %v907_v57 = vmul.f32 %v1348_v49, %v1487_v56 }
 0x28b   : > { %v908_v58 = vmul.f32 %v1348_v49, %v1493_v59  ;;  %v909_v60 = vmul.f32 %v1348_v49, %v845_v62  ;;  %v910_v61 = vmul.f32 %v1348_v49, %v846_v4  ;;  %v911_v1 = vmul.f32 %v1348_v49, %v847_v10 }
 0x28c   : > { %v912_v2 = vmul.f32 %v1348_v49, %v848_v11  ;;  %vm922_vm3 = vcmp.ge.f32.partialorder %v904_v50, 0.0  ;;  %vm923_vm4 = vcmp.ge.f32.partialorder %v905_v54, 0.0  ;;  %vm924_vm5 = vcmp.ge.f32.partialorder %v906_v55, 0.0 }
 0x28d   : > { %vm925_vm6 = vcmp.ge.f32.partialorder %v907_v57, 0.0  ;;  %vm926_vm7 = vcmp.ge.f32.partialorder %v908_v58, 0.0  ;;  %vm927_vm8 = vcmp.ge.f32.partialorder %v909_v60, 0.0  ;;  %vm928_vm9 = vcmp.ge.f32.partialorder %v910_v61, 0.0  ;;  %v1350_v7 = vpop.eup %1349 }
 0x28e   : > { %vm929_vm10 = vcmp.ge.f32.partialorder %v911_v1, 0.0  ;;  %vm930_vm11 = vcmp.ge.f32.partialorder %v912_v2, 0.0  ;;  %v940_v51 = vmul.f32 0.2, %v904_v50  ;;  %v941_v52 = vmul.f32 0.2, %v905_v54 }
 0x28f   : > { %v942_v53 = vmul.f32 0.2, %v906_v55  ;;  %v943_v56 = vmul.f32 0.2, %v907_v57  ;;  %v944_v5 = vmul.f32 0.2, %v908_v58  ;;  %v913_v26 = vmul.f32 %v1350_v7, %v1497_v63 }
 0x290   : > { %v945_v59 = vmul.f32 0.2, %v909_v60  ;;  %v946_v62 = vmul.f32 0.2, %v910_v61  ;;  %v947_v4 = vmul.f32 0.2, %v911_v1  ;;  %v958_v6 = vsel %vm922_vm3, %v904_v50, %v940_v51 }
 0x291   : > { %v948_v9 = vmul.f32 0.2, %v912_v2  ;;  %v959_v10 = vsel %vm923_vm4, %v905_v54, %v941_v52  ;;  %v960_v11 = vsel %vm924_vm5, %v906_v55, %v942_v53  ;;  %v961_v12 = vsel %vm925_vm6, %v907_v57, %v943_v56 }
 0x292   : > { %v962_v13 = vsel %vm926_vm7, %v908_v58, %v944_v5  ;;  %v963_v15 = vsel %vm927_vm8, %v909_v60, %v945_v59  ;;  %v964_v16 = vsel %vm928_vm9, %v910_v61, %v946_v62  ;;  %v965_v17 = vsel %vm929_vm10, %v911_v1, %v947_v4 }
 0x293   : > { %v966_v18 = vsel %vm930_vm11, %v912_v2, %v948_v9  ;;  %v1190_v20 = vpack.c.bf16 %v959_v10, %v958_v6  ;;  %v1191_v21 = vpack.c.bf16 %v961_v12, %v960_v11  ;;  %v1192_v22 = vpack.c.bf16 %v963_v15, %v962_v13 }
 0x294   : > { %v1193_v23 = vpack.c.bf16 %v965_v17, %v964_v16  ;;  %v1194_v24 = vpack.c.bf16 %v966_v18, %v966_v18  ;;  %v914_v27 = vmul.f32 %v1350_v7, %v1499_v0  ;;  %v915_v29 = vmul.f32 %v1350_v7, %v1503_v3 }
 0x295   : > { %1032 = vst [vmem:[%s1552_s20] sm:$0xff] %v1190_v20  ;;  %1033 = vst [vmem:[%s1552_s20 + $0x8] sm:$0xff] %v1191_v21  ;;  %v916_v31 = vmul.f32 %v1350_v7, %v1509_v8  ;;  %v917_v32 = vmul.f32 %v1350_v7, %v1513_v14  ;;  %v918_v33 = vmul.f32 %v1350_v7, %v1517_v19  ;;  %vm931_vm12 = vcmp.ge.f32.partialorder %v913_v26, 0.0 }
 0x296   : > { %1034 = vst [vmem:[%s1552_s20 + $0x10] sm:$0xff] %v1192_v22  ;;  %1035 = vst [vmem:[%s1552_s20 + $0x18] sm:$0xff] %v1193_v23  ;;  %v919_v35 = vmul.f32 %v1350_v7, %v1521_v25  ;;  %v920_v63 = vmul.f32 %v1350_v7, %v1527_v30  ;;  %v921_v0 = vmul.f32 %v1350_v7, %v1525_v28  ;;  %vm932_vm13 = vcmp.ge.f32.partialorder %v914_v27, 0.0 }
 0x297   : > { %1037 = vst.msk [vmem:[%s1552_s20 + $0x20] sm:$0xf] %vm1036_vm2, %v1194_v24  ;;  %vm933_vm14 = vcmp.ge.f32.partialorder %v915_v29, 0.0  ;;  %vm934_vm15 = vcmp.ge.f32.partialorder %v916_v31, 0.0  ;;  %vm935_vm0 = vcmp.ge.f32.partialorder %v917_v32, 0.0  ;;  %vm936_vm1 = vcmp.ge.f32.partialorder %v918_v33, 0.0 }
 0x298   : > { %vm937_vm3 = vcmp.ge.f32.partialorder %v919_v35, 0.0  ;;  %vm938_vm4 = vcmp.ge.f32.partialorder %v920_v63, 0.0  ;;  %vm939_vm5 = vcmp.ge.f32.partialorder %v921_v0, 0.0  ;;  %v949_v3 = vmul.f32 0.2, %v913_v26 }
 0x299   : > { %v950_v8 = vmul.f32 0.2, %v914_v27  ;;  %v951_v14 = vmul.f32 0.2, %v915_v29  ;;  %v952_v19 = vmul.f32 0.2, %v916_v31 }
 0x29a   : > { %v953_v34 = vmul.f32 0.2, %v917_v32  ;;  %v954_v36 = vmul.f32 0.2, %v918_v33  ;;  %v955_v25 = vmul.f32 0.2, %v919_v35  ;;  %v967_v28 = vsel %vm931_vm12, %v913_v26, %v949_v3 }
 0x29b   : > { %v956_v38 = vmul.f32 0.2, %v920_v63  ;;  %v957_v30 = vmul.f32 0.2, %v921_v0  ;;  %v968_v39 = vsel %vm932_vm13, %v914_v27, %v950_v8  ;;  %v969_v37 = vsel %vm933_vm14, %v915_v29, %v951_v14 }
 0x29c   : > { %v970_v40 = vsel %vm934_vm15, %v916_v31, %v952_v19  ;;  %v971_v41 = vsel %vm935_vm0, %v917_v32, %v953_v34  ;;  %v972_v42 = vsel %vm936_vm1, %v918_v33, %v954_v36  ;;  %v973_v43 = vsel %vm937_vm3, %v919_v35, %v955_v25 }
 0x29d   : > { %v974_v44 = vsel %vm938_vm4, %v920_v63, %v956_v38  ;;  %v975_v45 = vsel %vm939_vm5, %v921_v0, %v957_v30  ;;  %v1195_v46 = vpack.c.bf16 %v968_v39, %v967_v28  ;;  %v1196_v47 = vpack.c.bf16 %v970_v40, %v969_v37 }
 0x29e   : > { %v1197_v48 = vpack.c.bf16 %v972_v42, %v971_v41  ;;  %v1198_v49 = vpack.c.bf16 %v974_v44, %v973_v43  ;;  %v1199_v50 = vpack.c.bf16 %v975_v45, %v975_v45 }
 0x29f   : > { %1038 = vst [vmem:[%s1552_s20 + $0x24] sm:$0xff] %v1195_v46  ;;  %1039 = vst [vmem:[%s1552_s20 + $0x2c] sm:$0xff] %v1196_v47 }
 0x2a0   : > { %1040 = vst [vmem:[%s1552_s20 + $0x34] sm:$0xff] %v1197_v48  ;;  %1041 = vst [vmem:[%s1552_s20 + $0x3c] sm:$0xff] %v1198_v49 }
 0x2a1   : > { %1042 = vst.msk [vmem:[%s1552_s20 + $0x44] sm:$0xf] %vm1036_vm2, %v1199_v50 }
 0x2a2 PF: > { %s12_s9 = sadd.s32 1, %s1357_s9  }
 0x2a3   : > { %p9_p4 = scmp.ge.s32.totalorder %s12_s9, 4  }
 0x2a5   :  { %11 = sbr.rel (!%p9_p4) target bundleno = 1 (0x1), region = 58 }

// kernel: multiscale_discriminator_forward.17
= control target key start
LH: loop header
LB: loop body
LE: loop exit
PB: predicated region body
PF: predicated region fallthrough
CT: control target
= control target key end

     0   :  { %s779_s9 = smov 0   ;;  %s892_s0 = inlined_call_operand.vmem [shape: bf16[2,256,225], index: 0, kind: input, shape index: {}]   ;;  %s893_s1 = inlined_call_operand.vmem [shape: bf16[32,256], index: 1, kind: input, shape index: {}]   ;;  %s894_s2 = inlined_call_operand.vmem [shape: bf16[2,32,225], index: 2, kind: output, shape index: {}]  }
   0x1 LB: > { %s597_s10 = sadd.s32 4294967295, %s762_s9   ;;  %p601_p0 = scmp.ge.s32.totalorder %s762_s9, 1  ;;  %s762_s9 = sphi %s779_s9, %s12_s9  }
   0x2   : > { %p112_p1 = scmp.lt.s32.totalorder %s762_s9, 3 }
   0x4   : > { %p113_p2 = pnand %p601_p0, %p112_p1 }
   0x5   : > { %p134_p3 = scmp.lt.s32.totalorder (!%p113_p2), %s597_s10, 1  ;;  %v744_v0 = vld [vmem:[%s893_s1 + $0x4] ss:$8 sps:$4 sm:$0xff] (!%p113_p2)   ;;  %v747_v1 = vld [vmem:[%s893_s1 + $0x14] ss:$8 sps:$4 sm:$0xff] (!%p113_p2)   ;;  %vm413_vm0 = vcmask (!%p113_p2), 793600  }
   0x6   : > { %116 = sbr.rel (%p113_p2) target bundleno = 622 (0x26e), region = 28  ;;  %392 = vmatprep.mubr.bf16.mxu0 (!%p113_p2), %v744_v0  ;;  %402 = vmatprep.mubr.bf16.mxu1 (!%p113_p2), %v747_v1  ;;  %v742_v34 = vld [vmem:[%s893_s1] ss:$8 sps:$4 sm:$0xff] (!%p113_p2)   ;;  %v745_v35 = vld [vmem:[%s893_s1 + $0x10] ss:$8 sps:$4 sm:$0xff] (!%p113_p2)   ;;  %vm535_vm1 = vcmask (!%p113_p2), 1043456  }
   0x7   : > { %vm536_vm2 = vcmask (!%p113_p2), 793604  }
   0x8   : > { %vm869_vm5 = vmor (!%p113_p2), %vm536_vm2, %vm535_vm1 }
   0xd   : > { %s898_s10 = smov (!%p134_p3, %s597_s10), 1 }
   0xe   : > { %s648_s15 = sshll.u32 %s898_s10, 8  ;;  %s649_s23 = sshll.u32 %s898_s10, 5 }
   0xf   : > { %s799_s18 = scalar_lea.vmem %s892_s0, %s648_s15  ;;  %s867_s26 = scalar_lea.vmem %s894_s2, %s649_s23 }
  0x10   : > { %v694_v2 = vld [vmem:[%s799_s18 + $0x4] ss:$8 sps:$4 sm:$0xff]   ;;  %v696_v3 = vld [vmem:[%s799_s18] ss:$8 sps:$4 sm:$0xff]   ;;  %v697_v4 = vld [vmem:[%s799_s18 + $0x14] ss:$8 sps:$4 sm:$0xff]  }
  0x11   : > { %360 = vmatprep.subr.bf16.mxu0 %v694_v2  ;;  %654 = vmatprep.subr.bf16.mxu1 %v694_v2  ;;  %v699_v5 = vld [vmem:[%s799_s18 + $0x10] ss:$8 sps:$4 sm:$0xff]   ;;  %v700_v6 = vld [vmem:[%s799_s18 + $0x24] ss:$8 sps:$4 sm:$0xff]   ;;  %v702_v7 = vld [vmem:[%s799_s18 + $0x20] ss:$8 sps:$4 sm:$0xff]  }
  0x12   : > { %361 = vmatpush1.bf16.msra.mxu0 %v696_v3  ;;  %670 = vmatpush1.bf16.msra.mxu1 %v696_v3  ;;  %v703_v8 = vld [vmem:[%s799_s18 + $0x34] ss:$8 sps:$4 sm:$0xff]   ;;  %v705_v9 = vld [vmem:[%s799_s18 + $0x30] ss:$8 sps:$4 sm:$0xff]   ;;  %v706_v10 = vld [vmem:[%s799_s18 + $0x44] ss:$8 sps:$4 sm:$0xff]  }
  0x13   : > { %362 = vmatprep.subr.bf16.mxu0 %v697_v4  ;;  %655 = vmatprep.subr.bf16.mxu1 %v697_v4  ;;  %v708_v11 = vld [vmem:[%s799_s18 + $0x40] ss:$8 sps:$4 sm:$0xff]   ;;  %v709_v12 = vld [vmem:[%s799_s18 + $0x54] ss:$8 sps:$4 sm:$0xff]   ;;  %v711_v13 = vld [vmem:[%s799_s18 + $0x50] ss:$8 sps:$4 sm:$0xff]  }
  0x14   : > { %v712_v14 = vld [vmem:[%s799_s18 + $0x64] ss:$8 sps:$4 sm:$0xff]   ;;  %v714_v15 = vld [vmem:[%s799_s18 + $0x60] ss:$8 sps:$4 sm:$0xff]   ;;  %v715_v16 = vld [vmem:[%s799_s18 + $0x74] ss:$8 sps:$4 sm:$0xff]  }
  0x15   : > { %v717_v17 = vld [vmem:[%s799_s18 + $0x70] ss:$8 sps:$4 sm:$0xff]   ;;  %v718_v18 = vld [vmem:[%s799_s18 + $0x84] ss:$8 sps:$4 sm:$0xff]   ;;  %v720_v19 = vld [vmem:[%s799_s18 + $0x80] ss:$8 sps:$4 sm:$0xff]  }
  0x16   : > { %363 = vmatpush1.bf16.msra.mxu0 %v699_v5  ;;  %671 = vmatpush1.bf16.msra.mxu1 %v699_v5  ;;  %v721_v20 = vld [vmem:[%s799_s18 + $0x94] ss:$8 sps:$4 sm:$0xff]   ;;  %v723_v21 = vld [vmem:[%s799_s18 + $0x90] ss:$8 sps:$4 sm:$0xff]   ;;  %v724_v22 = vld [vmem:[%s799_s18 + $0xa4] ss:$8 sps:$4 sm:$0xff]  }
  0x17   : > { %364 = vmatprep.subr.bf16.mxu0 %v700_v6  ;;  %656 = vmatprep.subr.bf16.mxu1 %v700_v6  ;;  %v726_v23 = vld [vmem:[%s799_s18 + $0xa0] ss:$8 sps:$4 sm:$0xff]   ;;  %v727_v24 = vld [vmem:[%s799_s18 + $0xb4] ss:$8 sps:$4 sm:$0xff]   ;;  %v729_v25 = vld [vmem:[%s799_s18 + $0xb0] ss:$8 sps:$4 sm:$0xff]  }
  0x18   : > { %v730_v26 = vld [vmem:[%s799_s18 + $0xc4] ss:$8 sps:$4 sm:$0xff]   ;;  %v732_v27 = vld [vmem:[%s799_s18 + $0xc0] ss:$8 sps:$4 sm:$0xff]   ;;  %v733_v28 = vld [vmem:[%s799_s18 + $0xd4] ss:$8 sps:$4 sm:$0xff]  }
  0x19   : > { %v735_v29 = vld [vmem:[%s799_s18 + $0xd0] ss:$8 sps:$4 sm:$0xff]   ;;  %v736_v30 = vld [vmem:[%s799_s18 + $0xe4] ss:$8 sps:$4 sm:$0xff]   ;;  %v738_v31 = vld [vmem:[%s799_s18 + $0xe0] ss:$8 sps:$4 sm:$0xff]  }
  0x1a   : > { %365 = vmatpush1.bf16.msra.mxu0 %v702_v7  ;;  %672 = vmatpush1.bf16.msra.mxu1 %v702_v7  ;;  %v739_v32 = vld [vmem:[%s799_s18 + $0xf4] ss:$8 sps:$4 sm:$0xff]   ;;  %v741_v33 = vld [vmem:[%s799_s18 + $0xf0] ss:$8 sps:$4 sm:$0xff]  }
  0x1b   : > { %366 = vmatprep.subr.bf16.mxu0 %v703_v8  ;;  %657 = vmatprep.subr.bf16.mxu1 %v703_v8 }
  0x1e   : > { %367 = vmatpush1.bf16.msra.mxu0 %v705_v9  ;;  %673 = vmatpush1.bf16.msra.mxu1 %v705_v9 }
  0x1f   : > { %368 = vmatprep.subr.bf16.mxu0 %v706_v10  ;;  %658 = vmatprep.subr.bf16.mxu1 %v706_v10 }
  0x22   : > { %369 = vmatpush1.bf16.msra.mxu0 %v708_v11  ;;  %674 = vmatpush1.bf16.msra.mxu1 %v708_v11 }
  0x23   : > { %370 = vmatprep.subr.bf16.mxu0 %v709_v12  ;;  %659 = vmatprep.subr.bf16.mxu1 %v709_v12 }
  0x26   : > { %371 = vmatpush1.bf16.msra.mxu0 %v711_v13  ;;  %675 = vmatpush1.bf16.msra.mxu1 %v711_v13 }
  0x27   : > { %372 = vmatprep.subr.bf16.mxu0 %v712_v14  ;;  %660 = vmatprep.subr.bf16.mxu1 %v712_v14 }
  0x2a   : > { %373 = vmatpush1.bf16.msra.mxu0 %v714_v15  ;;  %676 = vmatpush1.bf16.msra.mxu1 %v714_v15 }
  0x2b   : > { %374 = vmatprep.subr.bf16.mxu0 %v715_v16  ;;  %661 = vmatprep.subr.bf16.mxu1 %v715_v16 }
  0x2e   : > { %375 = vmatpush1.bf16.msra.mxu0 %v717_v17  ;;  %677 = vmatpush1.bf16.msra.mxu1 %v717_v17 }
  0x2f   : > { %376 = vmatprep.subr.bf16.mxu0 %v718_v18  ;;  %662 = vmatprep.subr.bf16.mxu1 %v718_v18 }
  0x32   : > { %377 = vmatpush1.bf16.msra.mxu0 %v720_v19  ;;  %678 = vmatpush1.bf16.msra.mxu1 %v720_v19 }
  0x33   : > { %378 = vmatprep.subr.bf16.mxu0 %v721_v20  ;;  %663 = vmatprep.subr.bf16.mxu1 %v721_v20 }
  0x36   : > { %379 = vmatpush1.bf16.msra.mxu0 %v723_v21  ;;  %679 = vmatpush1.bf16.msra.mxu1 %v723_v21 }
  0x37   : > { %380 = vmatprep.subr.bf16.mxu0 %v724_v22  ;;  %664 = vmatprep.subr.bf16.mxu1 %v724_v22 }
  0x3a   : > { %381 = vmatpush1.bf16.msra.mxu0 %v726_v23  ;;  %680 = vmatpush1.bf16.msra.mxu1 %v726_v23 }
  0x3b   : > { %382 = vmatprep.subr.bf16.mxu0 %v727_v24  ;;  %665 = vmatprep.subr.bf16.mxu1 %v727_v24 }
  0x3e   : > { %383 = vmatpush1.bf16.msra.mxu0 %v729_v25  ;;  %681 = vmatpush1.bf16.msra.mxu1 %v729_v25 }
  0x3f   : > { %384 = vmatprep.subr.bf16.mxu0 %v730_v26  ;;  %666 = vmatprep.subr.bf16.mxu1 %v730_v26 }
  0x42   : > { %385 = vmatpush1.bf16.msra.mxu0 %v732_v27  ;;  %682 = vmatpush1.bf16.msra.mxu1 %v732_v27 }
  0x43   : > { %386 = vmatprep.subr.bf16.mxu0 %v733_v28  ;;  %667 = vmatprep.subr.bf16.mxu1 %v733_v28 }
  0x46   : > { %387 = vmatpush1.bf16.msra.mxu0 %v735_v29  ;;  %683 = vmatpush1.bf16.msra.mxu1 %v735_v29 }
  0x47   : > { %388 = vmatprep.subr.bf16.mxu0 %v736_v30  ;;  %668 = vmatprep.subr.bf16.mxu1 %v736_v30 }
  0x4a   : > { %389 = vmatpush1.bf16.msra.mxu0 %v738_v31  ;;  %684 = vmatpush1.bf16.msra.mxu1 %v738_v31 }
  0x4b   : > { %390 = vmatprep.subr.bf16.mxu0 %v739_v32  ;;  %669 = vmatprep.subr.bf16.mxu1 %v739_v32 }
  0x4e   : > { %391 = vmatpush1.bf16.msra.mxu0 %v741_v33  ;;  %685 = vmatpush1.bf16.msra.mxu1 %v741_v33 }
  0x51   : > { %393 = vmatmul.mubr.bf16.vlgmr.msra.gmra.mrb[0].mxu0 %v742_v34  ;;  %403 = vmatmul.mubr.bf16.vlgmr.msra.gmra.mrb[0].mxu1 %v745_v35 }
 0x124   : > { %v394_v36 = vpop.f32.mrb[0].mxu0  ;;  %v404_v37 = vpop.f32.mrb[0].mxu1 }
 0x125   : > { %v396_v38 = vpop.f32.mrb[1].mxu0  ;;  %v406_v39 = vpop.f32.mrb[1].mxu1 }
 0x126   : > { %v398_v40 = vpop.f32.mrb[2].mxu0  ;;  %v408_v41 = vpop.f32.mrb[2].mxu1  ;;  %v422_v42 = vsel %vm413_vm0, %v406_v39, 0.0  ;;  %v414_v43 = vsel %vm413_vm0, %v396_v38, 0.0 }
 0x127   : > { %v400_v44 = vpop.f32.mrb[3].mxu0  ;;  %v410_v45 = vpop.f32.mrb[3].mxu1  ;;  %v423_v46 = vadd.f32 %v422_v42, %v404_v37  ;;  %v415_v47 = vadd.f32 %v414_v43, %v394_v36 }
 0x128   : > { %v418_v48 = vsel %vm413_vm0, %v400_v44, 0.0  ;;  %v426_v49 = vsel %vm413_vm0, %v410_v45, 0.0 }
 0x129   : > { %424 = vadd.xlane.f32.xlu1 %v423_v46  ;;  %416 = vadd.xlane.f32.xlu0 %v415_v47  ;;  %v427_v50 = vadd.f32 %v426_v49, %v408_v41  ;;  %v419_v51 = vadd.f32 %v418_v48, %v398_v40 }
 0x12d   : > { %428 = vadd.xlane.f32.xlu1 %v427_v50  ;;  %420 = vadd.xlane.f32.xlu0 %v419_v51 }
 0x1b6   : > { %v425_v52 = vpop.xlane.xlu1 %424  ;;  %v417_v53 = vpop.xlane.xlu0 %416 }
 0x1b7   : > { %v433_v54 = vmul.f32 0.0044444446, %v425_v52  ;;  %v431_v55 = vmul.f32 0.0044444446, %v417_v53 }
 0x1b9   : > { %v843_v56 = vsub.f32 %v406_v39, %v433_v54  ;;  %v435_v57 = vsub.f32 %v394_v36, %v431_v55  ;;  %v436_v58 = vsub.f32 %v396_v38, %v431_v55  ;;  %v845_v59 = vsub.f32 %v404_v37, %v433_v54 }
 0x1ba   : > { %v429_v60 = vpop.xlane.xlu1 %428  ;;  %v421_v61 = vpop.xlane.xlu0 %420 }
 0x1bb   : > { %v434_v62 = vmul.f32 0.0044444446, %v429_v60  ;;  %v432_v63 = vmul.f32 0.0044444446, %v421_v61  ;;  %v443_v0 = vmul.f32 %v435_v57, %v435_v57  ;;  %v444_v1 = vmul.f32 %v436_v58, %v436_v58 }
 0x1bc   : > { %v448_v2 = vmul.f32 %v843_v56, %v843_v56  ;;  %v447_v9 = vmul.f32 %v845_v59, %v845_v59 }
 0x1bd   : > { %v849_v3 = vsub.f32 %v410_v45, %v434_v62  ;;  %v437_v4 = vsub.f32 %v398_v40, %v432_v63  ;;  %v438_v5 = vsub.f32 %v400_v44, %v432_v63  ;;  %v851_v6 = vsub.f32 %v408_v41, %v434_v62 }
 0x1be   : > { %v451_v7 = vsel %vm413_vm0, %v444_v1, 0.0  ;;  %v459_v12 = vsel %vm413_vm0, %v448_v2, 0.0 }
 0x1bf   : > { %v452_v8 = vadd.f32 %v451_v7, %v443_v0  ;;  %v445_v10 = vmul.f32 %v437_v4, %v437_v4  ;;  %v446_v11 = vmul.f32 %v438_v5, %v438_v5  ;;  %v450_v13 = vmul.f32 %v849_v3, %v849_v3 }
 0x1c0   : > { %v449_v16 = vmul.f32 %v851_v6, %v851_v6  ;;  %v460_v17 = vadd.f32 %v459_v12, %v447_v9 }
 0x1c1   : > { %453 = vadd.xlane.f32.xlu0 %v452_v8  ;;  %v455_v14 = vsel %vm413_vm0, %v446_v11, 0.0  ;;  %v463_v18 = vsel %vm413_vm0, %v450_v13, 0.0 }
 0x1c2   : > { %v456_v15 = vadd.f32 %v455_v14, %v445_v10  ;;  %v464_v19 = vadd.f32 %v463_v18, %v449_v16 }
 0x1c4   : > { %457 = vadd.xlane.f32.xlu1 %v456_v15 }
 0x1c5   : > { %461 = vadd.xlane.f32.xlu0 %v460_v17 }
 0x1c8   : > { %465 = vadd.xlane.f32.xlu1 %v464_v19 }
 0x24e   : > { %v454_v20 = vpop.xlane.xlu0 %453 }
 0x24f   : > { %v467_v21 = vmul.f32 0.0044444446, %v454_v20 }
 0x251   : > { %v471_v22 = vadd.f32 1e-05, %v467_v21  ;;  %v458_v23 = vpop.xlane.xlu1 %457 }
 0x252   : > { %v468_v24 = vmul.f32 0.0044444446, %v458_v23  ;;  %v462_v25 = vpop.xlane.xlu0 %461 }
 0x253   : > { %748 = vrsqrt.f32 %v471_v22  ;;  %v469_v26 = vmul.f32 0.0044444446, %v462_v25 }
 0x254   : > { %v472_v27 = vadd.f32 1e-05, %v468_v24 }
 0x255   : > { %v473_v28 = vadd.f32 1e-05, %v469_v26  ;;  %v466_v29 = vpop.xlane.xlu1 %465 }
 0x256   : > { %750 = vrsqrt.f32 %v472_v27  ;;  %v470_v30 = vmul.f32 0.0044444446, %v466_v29 }
 0x257   : > { %752 = vrsqrt.f32 %v473_v28 }
 0x258   : > { %v474_v31 = vadd.f32 1e-05, %v470_v30 }
 0x25a   : > { %754 = vrsqrt.f32 %v474_v31 }
 0x25d   : > { %v749_v32 = vpop.eup %748 }
 0x25e   : > { %v479_v33 = vmul.f32 %v749_v32, %v435_v57  ;;  %v480_v34 = vmul.f32 %v749_v32, %v436_v58 }
 0x260   : > { %v751_v35 = vpop.eup %750  ;;  %vm487_vm3 = vcmp.ge.f32.partialorder %v479_v33, 0.0  ;;  %vm488_vm4 = vcmp.ge.f32.partialorder %v480_v34, 0.0  ;;  %v495_v36 = vmul.f32 0.2, %v479_v33  ;;  %v496_v37 = vmul.f32 0.2, %v480_v34 }
 0x261   : > { %v753_v38 = vpop.eup %752  ;;  %v481_v39 = vmul.f32 %v751_v35, %v437_v4  ;;  %v482_v40 = vmul.f32 %v751_v35, %v438_v5 }
 0x262   : > { %v503_v42 = vsel %vm487_vm3, %v479_v33, %v495_v36  ;;  %v504_v43 = vsel %vm488_vm4, %v480_v34, %v496_v37  ;;  %v483_v44 = vmul.f32 %v753_v38, %v845_v59  ;;  %v484_v45 = vmul.f32 %v753_v38, %v843_v56 }
 0x263   : > { %v650_v46 = vpack.c.bf16 %v504_v43, %v503_v42  ;;  %vm489_vm6 = vcmp.ge.f32.partialorder %v481_v39, 0.0  ;;  %vm490_vm7 = vcmp.ge.f32.partialorder %v482_v40, 0.0  ;;  %v497_v47 = vmul.f32 0.2, %v481_v39 }
 0x264   : > { %v755_v48 = vpop.eup %754  ;;  %v498_v49 = vmul.f32 0.2, %v482_v40  ;;  %vm491_vm8 = vcmp.ge.f32.partialorder %v483_v44, 0.0  ;;  %vm492_vm9 = vcmp.ge.f32.partialorder %v484_v45, 0.0  ;;  %v499_v50 = vmul.f32 0.2, %v483_v44 }
 0x265   : > { %538 = vst.msk [vmem:[%s867_s26] sm:$0xff] %vm869_vm5, %v650_v46  ;;  %v505_v51 = vsel %vm489_vm6, %v481_v39, %v497_v47  ;;  %v500_v52 = vmul.f32 0.2, %v484_v45  ;;  %v485_v53 = vmul.f32 %v755_v48, %v851_v6  ;;  %v486_v54 = vmul.f32 %v755_v48, %v849_v3 }
 0x266   : > { %v506_v55 = vsel %vm490_vm7, %v482_v40, %v498_v49  ;;  %v507_v56 = vsel %vm491_vm8, %v483_v44, %v499_v50 }
 0x267   : > { %v651_v57 = vpack.c.bf16 %v506_v55, %v505_v51  ;;  %v508_v58 = vsel %vm492_vm9, %v484_v45, %v500_v52  ;;  %vm493_vm10 = vcmp.ge.f32.partialorder %v485_v53, 0.0  ;;  %vm494_vm11 = vcmp.ge.f32.partialorder %v486_v54, 0.0 }
 0x268   : > { %v652_v59 = vpack.c.bf16 %v508_v58, %v507_v56  ;;  %v501_v60 = vmul.f32 0.2, %v485_v53  ;;  %v502_v61 = vmul.f32 0.2, %v486_v54 }
 0x269   : > { %539 = vst.msk [vmem:[%s867_s26 + $0x8] sm:$0xff] %vm869_vm5, %v651_v57 }
 0x26a   : > { %540 = vst.msk [vmem:[%s867_s26 + $0x10] sm:$0xff] %vm869_vm5, %v652_v59  ;;  %v509_v62 = vsel %vm493_vm10, %v485_v53, %v501_v60  ;;  %v510_v63 = vsel %vm494_vm11, %v486_v54, %v502_v61 }
 0x26b   : > { %v653_v0 = vpack.c.bf16 %v510_v63, %v509_v62 }
 0x26d   : > { %541 = vst.msk [vmem:[%s867_s26 + $0x18] sm:$0xff] %vm869_vm5, %v653_v0 }
 0x26e PF: > { %s12_s9 = sadd.s32 1, %s762_s9  }
 0x26f   : > { %p9_p4 = scmp.ge.s32.totalorder %s12_s9, 4  }
 0x271   :  { %11 = sbr.rel (!%p9_p4) target bundleno = 1 (0x1), region = 58 }

// kernel: multiscale_discriminator_forward.18
= control target key start
LH: loop header
LB: loop body
LE: loop exit
PB: predicated region body
PF: predicated region fallthrough
CT: control target
= control target key end

     0   :  { %s1370_s9 = smov 0   ;;  %s1695_s0 = inlined_call_operand.vmem [shape: bf16[2,512,144], index: 0, kind: input, shape index: {}]   ;;  %s1696_s1 = inlined_call_operand.vmem [shape: bf16[64,512], index: 1, kind: input, shape index: {}]   ;;  %s1697_s2 = inlined_call_operand.vmem [shape: bf16[2,64,144], index: 2, kind: output, shape index: {}]  }
   0x1 LB: > { %s1078_s10 = sadd.s32 4294967295, %s1353_s9   ;;  %p1082_p0 = scmp.ge.s32.totalorder %s1353_s9, 1  ;;  %s1353_s9 = sphi %s1370_s9, %s12_s9  }
   0x2   : > { %p112_p1 = scmp.lt.s32.totalorder %s1353_s9, 3 }
   0x4   : > { %p113_p2 = pnand %p1082_p0, %p112_p1 }
   0x5   : > { %p134_p3 = scmp.lt.s32.totalorder (!%p113_p2), %s1078_s10, 1  ;;  %v1309_v0 = vld [vmem:[%s1696_s1 + $0x4] ss:$16 sps:$4 sm:$0xff] (!%p113_p2)   ;;  %v1312_v1 = vld [vmem:[%s1696_s1 + $0xc] ss:$16 sps:$4 sm:$0xff] (!%p113_p2)   ;;  %vm770_vm0 = vcmask (!%p113_p2), 130048  }
   0x6   : > { %116 = sbr.rel (%p113_p2) target bundleno = 644 (0x284), region = 28  ;;  %656 = vmatprep.mubr.bf16.mxu1 (!%p113_p2), %v1309_v0  ;;  %729 = vmatprep.mubr.bf16.mxu0 (!%p113_p2), %v1312_v1  ;;  %vm1012_vm1 = vcmask (!%p113_p2), 1043456   ;;  %vm1013_vm2 = vcmask (!%p113_p2), 130052  }
   0x7   : > { %vm1650_vm5 = vmor (!%p113_p2), %vm1013_vm2, %vm1012_vm1 }
   0xd   : > { %s1701_s10 = smov (!%p134_p3, %s1078_s10), 1 }
   0xe   : > { %s1177_s15 = sshll.u32 %s1701_s10, 9  ;;  %s1178_s21 = sshll.u32 %s1701_s10, 6 }
   0xf   : > { %s1390_s18 = scalar_lea.vmem %s1695_s0, %s1177_s15  ;;  %s1648_s24 = scalar_lea.vmem %s1697_s2, %s1178_s21 }
  0x10   : > { %v1211_v2 = vld [vmem:[%s1390_s18 + $0x4] ss:$8 sps:$4 sm:$0xff]   ;;  %v1215_v4 = vld [vmem:[%s1390_s18] ss:$8 sps:$4 sm:$0xff]   ;;  %v1217_v6 = vld [vmem:[%s1390_s18 + $0x14] ss:$8 sps:$4 sm:$0xff]  }
  0x11   : > { %v1213_v3 = vld [vmem:[%s1390_s18 + $0x104] ss:$8 sps:$4 sm:$0xff]   ;;  %624 = vmatprep.subr.bf16.mxu1 %v1211_v2  ;;  %v1216_v5 = vld [vmem:[%s1390_s18 + $0x100] ss:$8 sps:$4 sm:$0xff]   ;;  %v1219_v7 = vld [vmem:[%s1390_s18 + $0x114] ss:$8 sps:$4 sm:$0xff]  }
  0x12   : > { %697 = vmatprep.subr.bf16.mxu0 %v1213_v3  ;;  %625 = vmatpush1.bf16.msra.mxu1 %v1215_v4  ;;  %v1221_v8 = vld [vmem:[%s1390_s18 + $0x10] ss:$8 sps:$4 sm:$0xff]   ;;  %v1223_v10 = vld [vmem:[%s1390_s18 + $0x24] ss:$8 sps:$4 sm:$0xff]   ;;  %v1227_v12 = vld [vmem:[%s1390_s18 + $0x20] ss:$8 sps:$4 sm:$0xff]  }
  0x13   : > { %698 = vmatpush1.bf16.msra.mxu0 %v1216_v5  ;;  %626 = vmatprep.subr.bf16.mxu1 %v1217_v6  ;;  %v1222_v9 = vld [vmem:[%s1390_s18 + $0x110] ss:$8 sps:$4 sm:$0xff]   ;;  %v1225_v11 = vld [vmem:[%s1390_s18 + $0x124] ss:$8 sps:$4 sm:$0xff]   ;;  %v1228_v13 = vld [vmem:[%s1390_s18 + $0x120] ss:$8 sps:$4 sm:$0xff]  }
  0x14   : > { %699 = vmatprep.subr.bf16.mxu0 %v1219_v7  ;;  %v1229_v14 = vld [vmem:[%s1390_s18 + $0x34] ss:$8 sps:$4 sm:$0xff]   ;;  %v1233_v16 = vld [vmem:[%s1390_s18 + $0x30] ss:$8 sps:$4 sm:$0xff]   ;;  %v1235_v18 = vld [vmem:[%s1390_s18 + $0x44] ss:$8 sps:$4 sm:$0xff]  }
  0x15   : > { %v1231_v15 = vld [vmem:[%s1390_s18 + $0x134] ss:$8 sps:$4 sm:$0xff]   ;;  %v1234_v17 = vld [vmem:[%s1390_s18 + $0x130] ss:$8 sps:$4 sm:$0xff]   ;;  %v1237_v19 = vld [vmem:[%s1390_s18 + $0x144] ss:$8 sps:$4 sm:$0xff]  }
  0x16   : > { %627 = vmatpush1.bf16.msra.mxu1 %v1221_v8  ;;  %v1239_v20 = vld [vmem:[%s1390_s18 + $0x40] ss:$8 sps:$4 sm:$0xff]   ;;  %v1241_v22 = vld [vmem:[%s1390_s18 + $0x54] ss:$8 sps:$4 sm:$0xff]   ;;  %v1245_v24 = vld [vmem:[%s1390_s18 + $0x50] ss:$8 sps:$4 sm:$0xff]  }
  0x17   : > { %700 = vmatpush1.bf16.msra.mxu0 %v1222_v9  ;;  %628 = vmatprep.subr.bf16.mxu1 %v1223_v10  ;;  %v1240_v21 = vld [vmem:[%s1390_s18 + $0x140] ss:$8 sps:$4 sm:$0xff]   ;;  %v1243_v23 = vld [vmem:[%s1390_s18 + $0x154] ss:$8 sps:$4 sm:$0xff]   ;;  %v1246_v25 = vld [vmem:[%s1390_s18 + $0x150] ss:$8 sps:$4 sm:$0xff]  }
  0x18   : > { %701 = vmatprep.subr.bf16.mxu0 %v1225_v11  ;;  %v1247_v26 = vld [vmem:[%s1390_s18 + $0x64] ss:$8 sps:$4 sm:$0xff]   ;;  %v1251_v28 = vld [vmem:[%s1390_s18 + $0x60] ss:$8 sps:$4 sm:$0xff]   ;;  %v1253_v30 = vld [vmem:[%s1390_s18 + $0x74] ss:$8 sps:$4 sm:$0xff]  }
  0x19   : > { %v1249_v27 = vld [vmem:[%s1390_s18 + $0x164] ss:$8 sps:$4 sm:$0xff]   ;;  %v1252_v29 = vld [vmem:[%s1390_s18 + $0x160] ss:$8 sps:$4 sm:$0xff]   ;;  %v1255_v31 = vld [vmem:[%s1390_s18 + $0x174] ss:$8 sps:$4 sm:$0xff]  }
  0x1a   : > { %629 = vmatpush1.bf16.msra.mxu1 %v1227_v12  ;;  %v1257_v32 = vld [vmem:[%s1390_s18 + $0x70] ss:$8 sps:$4 sm:$0xff]   ;;  %v1259_v34 = vld [vmem:[%s1390_s18 + $0x84] ss:$8 sps:$4 sm:$0xff]   ;;  %v1263_v36 = vld [vmem:[%s1390_s18 + $0x80] ss:$8 sps:$4 sm:$0xff]  }
  0x1b   : > { %702 = vmatpush1.bf16.msra.mxu0 %v1228_v13  ;;  %630 = vmatprep.subr.bf16.mxu1 %v1229_v14  ;;  %v1258_v33 = vld [vmem:[%s1390_s18 + $0x170] ss:$8 sps:$4 sm:$0xff]   ;;  %v1261_v35 = vld [vmem:[%s1390_s18 + $0x184] ss:$8 sps:$4 sm:$0xff]   ;;  %v1264_v37 = vld [vmem:[%s1390_s18 + $0x180] ss:$8 sps:$4 sm:$0xff]  }
  0x1c   : > { %703 = vmatprep.subr.bf16.mxu0 %v1231_v15  ;;  %v1265_v38 = vld [vmem:[%s1390_s18 + $0x94] ss:$8 sps:$4 sm:$0xff]   ;;  %v1269_v40 = vld [vmem:[%s1390_s18 + $0x90] ss:$8 sps:$4 sm:$0xff]   ;;  %v1271_v42 = vld [vmem:[%s1390_s18 + $0xa4] ss:$8 sps:$4 sm:$0xff]  }
  0x1d   : > { %v1267_v39 = vld [vmem:[%s1390_s18 + $0x194] ss:$8 sps:$4 sm:$0xff]   ;;  %v1270_v41 = vld [vmem:[%s1390_s18 + $0x190] ss:$8 sps:$4 sm:$0xff]   ;;  %v1273_v43 = vld [vmem:[%s1390_s18 + $0x1a4] ss:$8 sps:$4 sm:$0xff]  }
  0x1e   : > { %631 = vmatpush1.bf16.msra.mxu1 %v1233_v16  ;;  %v1275_v44 = vld [vmem:[%s1390_s18 + $0xa0] ss:$8 sps:$4 sm:$0xff]   ;;  %v1277_v46 = vld [vmem:[%s1390_s18 + $0xb4] ss:$8 sps:$4 sm:$0xff]   ;;  %v1281_v48 = vld [vmem:[%s1390_s18 + $0xb0] ss:$8 sps:$4 sm:$0xff]  }
  0x1f   : > { %704 = vmatpush1.bf16.msra.mxu0 %v1234_v17  ;;  %632 = vmatprep.subr.bf16.mxu1 %v1235_v18  ;;  %v1276_v45 = vld [vmem:[%s1390_s18 + $0x1a0] ss:$8 sps:$4 sm:$0xff]   ;;  %v1279_v47 = vld [vmem:[%s1390_s18 + $0x1b4] ss:$8 sps:$4 sm:$0xff]   ;;  %v1282_v49 = vld [vmem:[%s1390_s18 + $0x1b0] ss:$8 sps:$4 sm:$0xff]  }
  0x20   : > { %705 = vmatprep.subr.bf16.mxu0 %v1237_v19  ;;  %v1283_v50 = vld [vmem:[%s1390_s18 + $0xc4] ss:$8 sps:$4 sm:$0xff]   ;;  %v1287_v52 = vld [vmem:[%s1390_s18 + $0xc0] ss:$8 sps:$4 sm:$0xff]   ;;  %v1289_v54 = vld [vmem:[%s1390_s18 + $0xd4] ss:$8 sps:$4 sm:$0xff]  }
  0x21   : > { %v1285_v51 = vld [vmem:[%s1390_s18 + $0x1c4] ss:$8 sps:$4 sm:$0xff]   ;;  %v1288_v53 = vld [vmem:[%s1390_s18 + $0x1c0] ss:$8 sps:$4 sm:$0xff]   ;;  %v1291_v55 = vld [vmem:[%s1390_s18 + $0x1d4] ss:$8 sps:$4 sm:$0xff]  }
  0x22   : > { %633 = vmatpush1.bf16.msra.mxu1 %v1239_v20  ;;  %v1293_v56 = vld [vmem:[%s1390_s18 + $0xd0] ss:$8 sps:$4 sm:$0xff]   ;;  %v1295_v58 = vld [vmem:[%s1390_s18 + $0xe4] ss:$8 sps:$4 sm:$0xff]   ;;  %v1299_v60 = vld [vmem:[%s1390_s18 + $0xe0] ss:$8 sps:$4 sm:$0xff]  }
  0x23   : > { %706 = vmatpush1.bf16.msra.mxu0 %v1240_v21  ;;  %634 = vmatprep.subr.bf16.mxu1 %v1241_v22  ;;  %v1294_v57 = vld [vmem:[%s1390_s18 + $0x1d0] ss:$8 sps:$4 sm:$0xff]   ;;  %v1297_v59 = vld [vmem:[%s1390_s18 + $0x1e4] ss:$8 sps:$4 sm:$0xff]   ;;  %v1300_v61 = vld [vmem:[%s1390_s18 + $0x1e0] ss:$8 sps:$4 sm:$0xff]  }
  0x24   : > { %707 = vmatprep.subr.bf16.mxu0 %v1243_v23  ;;  %v1301_v62 = vld [vmem:[%s1390_s18 + $0xf4] ss:$8 sps:$4 sm:$0xff]   ;;  %v1305_v0 = vld [vmem:[%s1390_s18 + $0xf0] ss:$8 sps:$4 sm:$0xff]  }
  0x25   : > { %v1303_v63 = vld [vmem:[%s1390_s18 + $0x1f4] ss:$8 sps:$4 sm:$0xff]   ;;  %v1306_v1 = vld [vmem:[%s1390_s18 + $0x1f0] ss:$8 sps:$4 sm:$0xff]  }
  0x26   : > { %635 = vmatpush1.bf16.msra.mxu1 %v1245_v24  ;;  %v1307_v2 = vld [vmem:[%s1696_s1] ss:$16 sps:$4 sm:$0xff]   ;;  %v1310_v3 = vld [vmem:[%s1696_s1 + $0x8] ss:$16 sps:$4 sm:$0xff]   ;;  %v1313_v4 = vld [vmem:[%s1696_s1 + $0x24] ss:$16 sps:$4 sm:$0xff]  }
  0x27   : > { %708 = vmatpush1.bf16.msra.mxu0 %v1246_v25  ;;  %636 = vmatprep.subr.bf16.mxu1 %v1247_v26  ;;  %v1315_v5 = vld [vmem:[%s1696_s1 + $0x2c] ss:$16 sps:$4 sm:$0xff]   ;;  %v1317_v6 = vld [vmem:[%s1696_s1 + $0x20] ss:$16 sps:$4 sm:$0xff]   ;;  %v1318_v7 = vld [vmem:[%s1696_s1 + $0x28] ss:$16 sps:$4 sm:$0xff]  }
  0x28   : > { %709 = vmatprep.subr.bf16.mxu0 %v1249_v27  ;;  %v1319_v8 = vld [vmem:[%s1696_s1 + $0x44] ss:$16 sps:$4 sm:$0xff]   ;;  %v1321_v9 = vld [vmem:[%s1696_s1 + $0x4c] ss:$16 sps:$4 sm:$0xff]   ;;  %v1323_v10 = vld [vmem:[%s1696_s1 + $0x40] ss:$16 sps:$4 sm:$0xff]  }
  0x29   : > { %v1324_v11 = vld [vmem:[%s1696_s1 + $0x48] ss:$16 sps:$4 sm:$0xff]   ;;  %v1325_v12 = vld [vmem:[%s1696_s1 + $0x64] ss:$16 sps:$4 sm:$0xff]   ;;  %v1327_v13 = vld [vmem:[%s1696_s1 + $0x6c] ss:$16 sps:$4 sm:$0xff]  }
  0x2a   : > { %637 = vmatpush1.bf16.msra.mxu1 %v1251_v28  ;;  %v1329_v14 = vld [vmem:[%s1696_s1 + $0x60] ss:$16 sps:$4 sm:$0xff]   ;;  %v1330_v15 = vld [vmem:[%s1696_s1 + $0x68] ss:$16 sps:$4 sm:$0xff]  }
  0x2b   : > { %710 = vmatpush1.bf16.msra.mxu0 %v1252_v29  ;;  %638 = vmatprep.subr.bf16.mxu1 %v1253_v30 }
  0x2c   : > { %711 = vmatprep.subr.bf16.mxu0 %v1255_v31 }
  0x2e   : > { %639 = vmatpush1.bf16.msra.mxu1 %v1257_v32 }
  0x2f   : > { %712 = vmatpush1.bf16.msra.mxu0 %v1258_v33  ;;  %640 = vmatprep.subr.bf16.mxu1 %v1259_v34 }
  0x30   : > { %713 = vmatprep.subr.bf16.mxu0 %v1261_v35 }
  0x32   : > { %641 = vmatpush1.bf16.msra.mxu1 %v1263_v36 }
  0x33   : > { %714 = vmatpush1.bf16.msra.mxu0 %v1264_v37  ;;  %642 = vmatprep.subr.bf16.mxu1 %v1265_v38 }
  0x34   : > { %715 = vmatprep.subr.bf16.mxu0 %v1267_v39 }
  0x36   : > { %643 = vmatpush1.bf16.msra.mxu1 %v1269_v40 }
  0x37   : > { %716 = vmatpush1.bf16.msra.mxu0 %v1270_v41  ;;  %644 = vmatprep.subr.bf16.mxu1 %v1271_v42 }
  0x38   : > { %717 = vmatprep.subr.bf16.mxu0 %v1273_v43 }
  0x3a   : > { %645 = vmatpush1.bf16.msra.mxu1 %v1275_v44 }
  0x3b   : > { %718 = vmatpush1.bf16.msra.mxu0 %v1276_v45  ;;  %646 = vmatprep.subr.bf16.mxu1 %v1277_v46 }
  0x3c   : > { %719 = vmatprep.subr.bf16.mxu0 %v1279_v47 }
  0x3e   : > { %647 = vmatpush1.bf16.msra.mxu1 %v1281_v48 }
  0x3f   : > { %720 = vmatpush1.bf16.msra.mxu0 %v1282_v49  ;;  %648 = vmatprep.subr.bf16.mxu1 %v1283_v50 }
  0x40   : > { %721 = vmatprep.subr.bf16.mxu0 %v1285_v51 }
  0x42   : > { %649 = vmatpush1.bf16.msra.mxu1 %v1287_v52 }
  0x43   : > { %722 = vmatpush1.bf16.msra.mxu0 %v1288_v53  ;;  %650 = vmatprep.subr.bf16.mxu1 %v1289_v54 }
  0x44   : > { %723 = vmatprep.subr.bf16.mxu0 %v1291_v55 }
  0x46   : > { %651 = vmatpush1.bf16.msra.mxu1 %v1293_v56 }
  0x47   : > { %724 = vmatpush1.bf16.msra.mxu0 %v1294_v57  ;;  %652 = vmatprep.subr.bf16.mxu1 %v1295_v58 }
  0x48   : > { %725 = vmatprep.subr.bf16.mxu0 %v1297_v59 }
  0x4a   : > { %653 = vmatpush1.bf16.msra.mxu1 %v1299_v60 }
  0x4b   : > { %726 = vmatpush1.bf16.msra.mxu0 %v1300_v61  ;;  %654 = vmatprep.subr.bf16.mxu1 %v1301_v62 }
  0x4c   : > { %727 = vmatprep.subr.bf16.mxu0 %v1303_v63 }
  0x4e   : > { %655 = vmatpush1.bf16.msra.mxu1 %v1305_v0 }
  0x4f   : > { %728 = vmatpush1.bf16.msra.mxu0 %v1306_v1 }
  0x51   : > { %657 = vmatmul.mubr.bf16.vlgmr.msra.gmra.mrb[0].mxu1 %v1307_v2 }
  0x52   : > { %730 = vmatmul.mubr.bf16.vlgmr.msra.gmra.mrb[0].mxu0 %v1310_v3  ;;  %666 = vmatprep.mubr.bf16.mxu1 %v1313_v4 }
  0x53   : > { %739 = vmatprep.mubr.bf16.mxu0 %v1315_v5 }
  0x59   : > { %667 = vmatmul.mubr.bf16.gmra.mrb[4].mxu1 %v1317_v6 }
  0x5a   : > { %740 = vmatmul.mubr.bf16.gmra.mrb[4].mxu0 %v1318_v7  ;;  %676 = vmatprep.mubr.bf16.mxu1 %v1319_v8 }
  0x5b   : > { %749 = vmatprep.mubr.bf16.mxu0 %v1321_v9 }
  0x61   : > { %677 = vmatmul.mubr.bf16.gmra.mrb[8].mxu1 %v1323_v10 }
  0x62   : > { %750 = vmatmul.mubr.bf16.gmra.mrb[8].mxu0 %v1324_v11  ;;  %686 = vmatprep.mubr.bf16.mxu1 %v1325_v12 }
  0x63   : > { %759 = vmatprep.mubr.bf16.mxu0 %v1327_v13 }
  0x69   : > { %687 = vmatmul.mubr.bf16.gmra.mrb[12].mxu1 %v1329_v14 }
  0x6a   : > { %760 = vmatmul.mubr.bf16.gmra.mrb[12].mxu0 %v1330_v15 }
 0x124   : > { %v658_v16 = vpop.f32.mrb[0].mxu1 }
 0x125   : > { %v731_v17 = vpop.f32.mrb[0].mxu0  ;;  %v660_v19 = vpop.f32.mrb[1].mxu1 }
 0x126   : > { %v1498_v18 = vadd.f32 %v731_v17, %v658_v16  ;;  %v733_v20 = vpop.f32.mrb[1].mxu0  ;;  %v662_v22 = vpop.f32.mrb[2].mxu1 }
 0x127   : > { %v1500_v21 = vadd.f32 %v733_v20, %v660_v19  ;;  %v735_v23 = vpop.f32.mrb[2].mxu0  ;;  %v664_v25 = vpop.f32.mrb[3].mxu1 }
 0x128   : > { %v1502_v24 = vadd.f32 %v735_v23, %v662_v22  ;;  %v737_v26 = vpop.f32.mrb[3].mxu0 }
 0x129   : > { %v1504_v27 = vadd.f32 %v737_v26, %v664_v25  ;;  %v771_v28 = vsel %vm770_vm0, %v1500_v21, 0.0 }
 0x12a   : > { %v772_v29 = vadd.f32 %v771_v28, %v1498_v18 }
 0x12b   : > { %v775_v30 = vsel %vm770_vm0, %v1504_v27, 0.0 }
 0x12c   : > { %773 = vadd.xlane.f32.xlu0 %v772_v29  ;;  %v668_v31 = vpop.f32.mrb[4].mxu1  ;;  %v776_v36 = vadd.f32 %v775_v30, %v1502_v24 }
 0x12d   : > { %v741_v32 = vpop.f32.mrb[4].mxu0  ;;  %v670_v34 = vpop.f32.mrb[5].mxu1 }
 0x12e   : > { %v1511_v33 = vadd.f32 %v741_v32, %v668_v31  ;;  %v743_v35 = vpop.f32.mrb[5].mxu0  ;;  %v672_v38 = vpop.f32.mrb[6].mxu1 }
 0x12f   : > { %v1514_v37 = vadd.f32 %v743_v35, %v670_v34  ;;  %v745_v39 = vpop.f32.mrb[6].mxu0  ;;  %v674_v42 = vpop.f32.mrb[7].mxu1 }
 0x130   : > { %v1516_v40 = vadd.f32 %v745_v39, %v672_v38  ;;  %v747_v41 = vpop.f32.mrb[7].mxu0  ;;  %777 = vadd.xlane.f32.xlu0 %v776_v36 }
 0x131   : > { %v1518_v43 = vadd.f32 %v747_v41, %v674_v42  ;;  %v779_v44 = vsel %vm770_vm0, %v1514_v37, 0.0 }
 0x132   : > { %v780_v45 = vadd.f32 %v779_v44, %v1511_v33 }
 0x133   : > { %v783_v46 = vsel %vm770_vm0, %v1518_v43, 0.0 }
 0x134   : > { %781 = vadd.xlane.f32.xlu1 %v780_v45  ;;  %v678_v47 = vpop.f32.mrb[8].mxu1  ;;  %v784_v52 = vadd.f32 %v783_v46, %v1516_v40 }
 0x135   : > { %v751_v48 = vpop.f32.mrb[8].mxu0  ;;  %v680_v50 = vpop.f32.mrb[9].mxu1 }
 0x136   : > { %v1525_v49 = vadd.f32 %v751_v48, %v678_v47  ;;  %v753_v51 = vpop.f32.mrb[9].mxu0  ;;  %v682_v54 = vpop.f32.mrb[10].mxu1 }
 0x137   : > { %v1528_v53 = vadd.f32 %v753_v51, %v680_v50  ;;  %v755_v55 = vpop.f32.mrb[10].mxu0  ;;  %v684_v58 = vpop.f32.mrb[11].mxu1 }
 0x138   : > { %v1530_v56 = vadd.f32 %v755_v55, %v682_v54  ;;  %v757_v57 = vpop.f32.mrb[11].mxu0  ;;  %785 = vadd.xlane.f32.xlu1 %v784_v52 }
 0x139   : > { %v1532_v59 = vadd.f32 %v757_v57, %v684_v58  ;;  %v787_v60 = vsel %vm770_vm0, %v1528_v53, 0.0 }
 0x13a   : > { %v788_v61 = vadd.f32 %v787_v60, %v1525_v49 }
 0x13b   : > { %v791_v62 = vsel %vm770_vm0, %v1532_v59, 0.0 }
 0x13c   : > { %789 = vadd.xlane.f32.xlu0 %v788_v61  ;;  %v792_v63 = vadd.f32 %v791_v62, %v1530_v56  ;;  %v688_v0 = vpop.f32.mrb[12].mxu1 }
 0x13d   : > { %v761_v1 = vpop.f32.mrb[12].mxu0  ;;  %v690_v4 = vpop.f32.mrb[13].mxu1 }
 0x13e   : > { %v1540_v2 = vadd.f32 %v761_v1, %v688_v0  ;;  %v763_v3 = vpop.f32.mrb[13].mxu0  ;;  %793 = vadd.xlane.f32.xlu1 %v792_v63  ;;  %v692_v6 = vpop.f32.mrb[14].mxu1 }
 0x13f   : > { %v1542_v5 = vadd.f32 %v763_v3, %v690_v4  ;;  %v765_v7 = vpop.f32.mrb[14].mxu0  ;;  %v694_v9 = vpop.f32.mrb[15].mxu1 }
 0x140   : > { %v1544_v8 = vadd.f32 %v765_v7, %v692_v6  ;;  %v767_v10 = vpop.f32.mrb[15].mxu0 }
 0x141   : > { %v1546_v11 = vadd.f32 %v767_v10, %v694_v9  ;;  %v795_v12 = vsel %vm770_vm0, %v1542_v5, 0.0 }
 0x142   : > { %v796_v13 = vadd.f32 %v795_v12, %v1540_v2 }
 0x143   : > { %v799_v14 = vsel %vm770_vm0, %v1546_v11, 0.0 }
 0x144   : > { %797 = vadd.xlane.f32.xlu0 %v796_v13  ;;  %v800_v15 = vadd.f32 %v799_v14, %v1544_v8 }
 0x146   : > { %801 = vadd.xlane.f32.xlu1 %v800_v15 }
 0x1b9   : > { %v774_v16 = vpop.xlane.xlu0 %773 }
 0x1ba   : > { %v804_v17 = vmul.f32 0.0069444445, %v774_v16 }
 0x1bc   : > { %v1555_v19 = vsub.f32 %v1498_v18, %v804_v17  ;;  %v1558_v20 = vsub.f32 %v1500_v21, %v804_v17 }
 0x1bd   : > { %v778_v22 = vpop.xlane.xlu0 %777 }
 0x1be   : > { %v805_v23 = vmul.f32 0.0069444445, %v778_v22  ;;  %v828_v25 = vmul.f32 %v1555_v19, %v1555_v19  ;;  %v829_v26 = vmul.f32 %v1558_v20, %v1558_v20 }
 0x1c0   : > { %v1565_v28 = vsub.f32 %v1502_v24, %v805_v23  ;;  %v1568_v29 = vsub.f32 %v1504_v27, %v805_v23  ;;  %v844_v18 = vsel %vm770_vm0, %v829_v26, 0.0 }
 0x1c1   : > { %v782_v30 = vpop.xlane.xlu1 %781  ;;  %v845_v31 = vadd.f32 %v844_v18, %v828_v25 }
 0x1c2   : > { %v806_v21 = vmul.f32 0.0069444445, %v782_v30  ;;  %v830_v32 = vmul.f32 %v1565_v28, %v1565_v28  ;;  %v831_v34 = vmul.f32 %v1568_v29, %v1568_v29 }
 0x1c3   : > { %846 = vadd.xlane.f32.xlu0 %v845_v31 }
 0x1c4   : > { %v1576_v35 = vsub.f32 %v1511_v33, %v806_v21  ;;  %v1579_v24 = vsub.f32 %v1514_v37, %v806_v21  ;;  %v848_v27 = vsel %vm770_vm0, %v831_v34, 0.0 }
 0x1c5   : > { %v786_v36 = vpop.xlane.xlu1 %785  ;;  %v849_v38 = vadd.f32 %v848_v27, %v830_v32 }
 0x1c6   : > { %v807_v39 = vmul.f32 0.0069444445, %v786_v36  ;;  %v832_v41 = vmul.f32 %v1576_v35, %v1576_v35  ;;  %v833_v42 = vmul.f32 %v1579_v24, %v1579_v24 }
 0x1c7   : > { %850 = vadd.xlane.f32.xlu1 %v849_v38 }
 0x1c8   : > { %v1587_v44 = vsub.f32 %v1516_v40, %v807_v39  ;;  %v1590_v33 = vsub.f32 %v1518_v43, %v807_v39  ;;  %v852_v37 = vsel %vm770_vm0, %v833_v42, 0.0 }
 0x1c9   : > { %v790_v45 = vpop.xlane.xlu0 %789  ;;  %v853_v46 = vadd.f32 %v852_v37, %v832_v41 }
 0x1ca   : > { %v808_v47 = vmul.f32 0.0069444445, %v790_v45  ;;  %v834_v48 = vmul.f32 %v1587_v44, %v1587_v44  ;;  %v835_v50 = vmul.f32 %v1590_v33, %v1590_v33 }
 0x1cb   : > { %v794_v51 = vpop.xlane.xlu1 %793  ;;  %854 = vadd.xlane.f32.xlu0 %v853_v46 }
 0x1cc   : > { %v1598_v52 = vsub.f32 %v1525_v49, %v808_v47  ;;  %v1601_v40 = vsub.f32 %v1528_v53, %v808_v47  ;;  %v809_v43 = vmul.f32 0.0069444445, %v794_v51  ;;  %v856_v54 = vsel %vm770_vm0, %v835_v50, 0.0 }
 0x1cd   : > { %v857_v55 = vadd.f32 %v856_v54, %v834_v48 }
 0x1ce   : > { %v1605_v57 = vsub.f32 %v1530_v56, %v809_v43  ;;  %v1608_v58 = vsub.f32 %v1532_v59, %v809_v43  ;;  %v836_v60 = vmul.f32 %v1598_v52, %v1598_v52  ;;  %v837_v49 = vmul.f32 %v1601_v40, %v1601_v40 }
 0x1cf   : > { %858 = vadd.xlane.f32.xlu1 %v857_v55 }
 0x1d0   : > { %v860_v53 = vsel %vm770_vm0, %v837_v49, 0.0  ;;  %v838_v61 = vmul.f32 %v1605_v57, %v1605_v57  ;;  %v839_v62 = vmul.f32 %v1608_v58, %v1608_v58 }
 0x1d1   : > { %v798_v56 = vpop.xlane.xlu0 %797  ;;  %v861_v63 = vadd.f32 %v860_v53, %v836_v60 }
 0x1d2   : > { %v810_v0 = vmul.f32 0.0069444445, %v798_v56  ;;  %v864_v59 = vsel %vm770_vm0, %v839_v62, 0.0 }
 0x1d3   : > { %862 = vadd.xlane.f32.xlu0 %v861_v63  ;;  %v802_v1 = vpop.xlane.xlu1 %801  ;;  %v865_v3 = vadd.f32 %v864_v59, %v838_v61 }
 0x1d4   : > { %v1621_v4 = vsub.f32 %v1540_v2, %v810_v0  ;;  %v1624_v6 = vsub.f32 %v1542_v5, %v810_v0  ;;  %v811_v7 = vmul.f32 0.0069444445, %v802_v1 }
 0x1d5   : > { %866 = vadd.xlane.f32.xlu1 %v865_v3 }
 0x1d6   : > { %v1627_v9 = vsub.f32 %v1544_v8, %v811_v7  ;;  %v1630_v10 = vsub.f32 %v1546_v11, %v811_v7  ;;  %v840_v12 = vmul.f32 %v1621_v4, %v1621_v4  ;;  %v841_v13 = vmul.f32 %v1624_v6, %v1624_v6 }
 0x1d8   : > { %v868_v2 = vsel %vm770_vm0, %v841_v13, 0.0  ;;  %v842_v5 = vmul.f32 %v1627_v9, %v1627_v9  ;;  %v843_v14 = vmul.f32 %v1630_v10, %v1630_v10 }
 0x1d9   : > { %v869_v15 = vadd.f32 %v868_v2, %v840_v12 }
 0x1da   : > { %v872_v8 = vsel %vm770_vm0, %v843_v14, 0.0 }
 0x1db   : > { %870 = vadd.xlane.f32.xlu0 %v869_v15  ;;  %v873_v11 = vadd.f32 %v872_v8, %v842_v5 }
 0x1dd   : > { %874 = vadd.xlane.f32.xlu1 %v873_v11 }
 0x250   : > { %v847_v16 = vpop.xlane.xlu0 %846 }
 0x251   : > { %v876_v17 = vmul.f32 0.0069444445, %v847_v16 }
 0x253   : > { %v884_v22 = vadd.f32 1e-05, %v876_v17 }
 0x254   : > { %v851_v23 = vpop.xlane.xlu1 %850 }
 0x255   : > { %1331 = vrsqrt.f32 %v884_v22  ;;  %v877_v25 = vmul.f32 0.0069444445, %v851_v23 }
 0x257   : > { %v885_v26 = vadd.f32 1e-05, %v877_v25 }
 0x258   : > { %v855_v18 = vpop.xlane.xlu0 %854 }
 0x259   : > { %1333 = vrsqrt.f32 %v885_v26  ;;  %v878_v30 = vmul.f32 0.0069444445, %v855_v18 }
 0x25b   : > { %v886_v31 = vadd.f32 1e-05, %v878_v30 }
 0x25c   : > { %v859_v21 = vpop.xlane.xlu1 %858 }
 0x25d   : > { %1335 = vrsqrt.f32 %v886_v31  ;;  %v879_v32 = vmul.f32 0.0069444445, %v859_v21 }
 0x25f   : > { %v1332_v34 = vpop.eup %1331  ;;  %v887_v27 = vadd.f32 1e-05, %v879_v32 }
 0x260   : > { %v900_v36 = vmul.f32 %v1332_v34, %v1555_v19  ;;  %v901_v38 = vmul.f32 %v1332_v34, %v1558_v20  ;;  %v863_v39 = vpop.xlane.xlu0 %862 }
 0x261   : > { %1337 = vrsqrt.f32 %v887_v27  ;;  %v880_v41 = vmul.f32 0.0069444445, %v863_v39 }
 0x262   : > { %vm916_vm3 = vcmp.ge.f32.partialorder %v900_v36, 0.0  ;;  %vm917_vm4 = vcmp.ge.f32.partialorder %v901_v38, 0.0  ;;  %v932_v42 = vmul.f32 0.2, %v900_v36  ;;  %v933_v37 = vmul.f32 0.2, %v901_v38  ;;  %v867_v45 = vpop.xlane.xlu1 %866 }
 0x263   : > { %v1334_v46 = vpop.eup %1333  ;;  %v888_v47 = vadd.f32 1e-05, %v880_v41  ;;  %v881_v48 = vmul.f32 0.0069444445, %v867_v45 }
 0x264   : > { %v948_v20 = vsel %vm916_vm3, %v900_v36, %v932_v42  ;;  %v949_v50 = vsel %vm917_vm4, %v901_v38, %v933_v37  ;;  %v902_v51 = vmul.f32 %v1334_v46, %v1565_v28  ;;  %v903_v43 = vmul.f32 %v1334_v46, %v1568_v29 }
 0x265   : > { %v1179_v54 = vpack.c.bf16 %v949_v50, %v948_v20  ;;  %1339 = vrsqrt.f32 %v888_v47  ;;  %v889_v55 = vadd.f32 1e-05, %v881_v48 }
 0x266   : > { %vm918_vm6 = vcmp.ge.f32.partialorder %v902_v51, 0.0  ;;  %vm919_vm7 = vcmp.ge.f32.partialorder %v903_v43, 0.0  ;;  %v934_v60 = vmul.f32 0.2, %v902_v51  ;;  %v935_v49 = vmul.f32 0.2, %v903_v43 }
 0x267   : > { %v1336_v53 = vpop.eup %1335  ;;  %1015 = vst.msk [vmem:[%s1648_s24] sm:$0xff] %vm1650_vm5, %v1179_v54  ;;  %1341 = vrsqrt.f32 %v889_v55 }
 0x268   : > { %v950_v61 = vsel %vm918_vm6, %v902_v51, %v934_v60  ;;  %v951_v62 = vsel %vm919_vm7, %v903_v43, %v935_v49  ;;  %v904_v56 = vmul.f32 %v1336_v53, %v1576_v35  ;;  %v905_v28 = vmul.f32 %v1336_v53, %v1579_v24  ;;  %v871_v29 = vpop.xlane.xlu0 %870 }
 0x269   : > { %v1180_v63 = vpack.c.bf16 %v951_v62, %v950_v61  ;;  %v882_v0 = vmul.f32 0.0069444445, %v871_v29 }
 0x26a   : > { %vm920_vm8 = vcmp.ge.f32.partialorder %v904_v56, 0.0  ;;  %vm921_vm9 = vcmp.ge.f32.partialorder %v905_v28, 0.0  ;;  %v936_v59 = vmul.f32 0.2, %v904_v56  ;;  %v937_v1 = vmul.f32 0.2, %v905_v28  ;;  %v875_v3 = vpop.xlane.xlu1 %874 }
 0x26b   : > { %v1338_v7 = vpop.eup %1337  ;;  %1016 = vst.msk [vmem:[%s1648_s24 + $0x8] sm:$0xff] %vm1650_vm5, %v1180_v63  ;;  %v890_v12 = vadd.f32 1e-05, %v882_v0  ;;  %v883_v13 = vmul.f32 0.0069444445, %v875_v3 }
 0x26c   : > { %v952_v2 = vsel %vm920_vm8, %v904_v56, %v936_v59  ;;  %v953_v5 = vsel %vm921_vm9, %v905_v28, %v937_v1  ;;  %v906_v35 = vmul.f32 %v1338_v7, %v1587_v44  ;;  %v907_v24 = vmul.f32 %v1338_v7, %v1590_v33 }
 0x26d   : > { %v1181_v14 = vpack.c.bf16 %v953_v5, %v952_v2  ;;  %1343 = vrsqrt.f32 %v890_v12  ;;  %v891_v15 = vadd.f32 1e-05, %v883_v13 }
 0x26e   : > { %vm922_vm10 = vcmp.ge.f32.partialorder %v906_v35, 0.0  ;;  %vm923_vm11 = vcmp.ge.f32.partialorder %v907_v24, 0.0  ;;  %v938_v8 = vmul.f32 0.2, %v906_v35  ;;  %v939_v11 = vmul.f32 0.2, %v907_v24 }
 0x26f   : > { %v1340_v16 = vpop.eup %1339  ;;  %1017 = vst.msk [vmem:[%s1648_s24 + $0x10] sm:$0xff] %vm1650_vm5, %v1181_v14  ;;  %1345 = vrsqrt.f32 %v891_v15 }
 0x270   : > { %v954_v17 = vsel %vm922_vm10, %v906_v35, %v938_v8  ;;  %v955_v22 = vsel %vm923_vm11, %v907_v24, %v939_v11  ;;  %v908_v23 = vmul.f32 %v1340_v16, %v1598_v52  ;;  %v909_v44 = vmul.f32 %v1340_v16, %v1601_v40 }
 0x271   : > { %v1342_v33 = vpop.eup %1341  ;;  %v1182_v25 = vpack.c.bf16 %v955_v22, %v954_v17 }
 0x272   : > { %vm924_vm12 = vcmp.ge.f32.partialorder %v908_v23, 0.0  ;;  %vm925_vm13 = vcmp.ge.f32.partialorder %v909_v44, 0.0  ;;  %v940_v26 = vmul.f32 0.2, %v908_v23  ;;  %v941_v18 = vmul.f32 0.2, %v909_v44 }
 0x273   : > { %1018 = vst.msk [vmem:[%s1648_s24 + $0x18] sm:$0xff] %vm1650_vm5, %v1182_v25  ;;  %v910_v30 = vmul.f32 %v1342_v33, %v1605_v57  ;;  %v911_v31 = vmul.f32 %v1342_v33, %v1608_v58 }
 0x274   : > { %v956_v21 = vsel %vm924_vm12, %v908_v23, %v940_v26  ;;  %v957_v32 = vsel %vm925_vm13, %v909_v44, %v941_v18 }
 0x275   : > { %v1183_v34 = vpack.c.bf16 %v957_v32, %v956_v21  ;;  %vm926_vm14 = vcmp.ge.f32.partialorder %v910_v30, 0.0  ;;  %vm927_vm15 = vcmp.ge.f32.partialorder %v911_v31, 0.0  ;;  %v942_v52 = vmul.f32 0.2, %v910_v30 }
 0x276   : > { %v943_v40 = vmul.f32 0.2, %v911_v31 }
 0x277   : > { %v1344_v27 = vpop.eup %1343  ;;  %1019 = vst.msk [vmem:[%s1648_s24 + $0x20] sm:$0xff] %vm1650_vm5, %v1183_v34  ;;  %v958_v36 = vsel %vm926_vm14, %v910_v30, %v942_v52 }
 0x278   : > { %v959_v38 = vsel %vm927_vm15, %v911_v31, %v943_v40  ;;  %v912_v39 = vmul.f32 %v1344_v27, %v1621_v4  ;;  %v913_v57 = vmul.f32 %v1344_v27, %v1624_v6 }
 0x279   : > { %v1346_v41 = vpop.eup %1345  ;;  %v1184_v58 = vpack.c.bf16 %v959_v38, %v958_v36 }
 0x27a   : > { %vm928_vm0 = vcmp.ge.f32.partialorder %v912_v39, 0.0  ;;  %vm929_vm1 = vcmp.ge.f32.partialorder %v913_v57, 0.0  ;;  %v944_v42 = vmul.f32 0.2, %v912_v39  ;;  %v945_v37 = vmul.f32 0.2, %v913_v57 }
 0x27b   : > { %1020 = vst.msk [vmem:[%s1648_s24 + $0x28] sm:$0xff] %vm1650_vm5, %v1184_v58  ;;  %v914_v45 = vmul.f32 %v1346_v41, %v1627_v9  ;;  %v915_v46 = vmul.f32 %v1346_v41, %v1630_v10 }
 0x27c   : > { %v960_v47 = vsel %vm928_vm0, %v912_v39, %v944_v42  ;;  %v961_v48 = vsel %vm929_vm1, %v913_v57, %v945_v37 }
 0x27d   : > { %v1185_v4 = vpack.c.bf16 %v961_v48, %v960_v47  ;;  %vm930_vm2 = vcmp.ge.f32.partialorder %v914_v45, 0.0  ;;  %vm931_vm3 = vcmp.ge.f32.partialorder %v915_v46, 0.0  ;;  %v946_v6 = vmul.f32 0.2, %v914_v45 }
 0x27e   : > { %v947_v20 = vmul.f32 0.2, %v915_v46 }
 0x27f   : > { %1021 = vst.msk [vmem:[%s1648_s24 + $0x30] sm:$0xff] %vm1650_vm5, %v1185_v4  ;;  %v962_v50 = vsel %vm930_vm2, %v914_v45, %v946_v6 }
 0x280   : > { %v963_v51 = vsel %vm931_vm3, %v915_v46, %v947_v20 }
 0x281   : > { %v1186_v43 = vpack.c.bf16 %v963_v51, %v962_v50 }
 0x283   : > { %1022 = vst.msk [vmem:[%s1648_s24 + $0x38] sm:$0xff] %vm1650_vm5, %v1186_v43 }
 0x284 PF: > { %s12_s9 = sadd.s32 1, %s1353_s9  }
 0x285   : > { %p9_p4 = scmp.ge.s32.totalorder %s12_s9, 4  }
 0x287   :  { %11 = sbr.rel (!%p9_p4) target bundleno = 1 (0x1), region = 58 }

// kernel: multiscale_discriminator_forward.19
= control target key start
LH: loop header
LB: loop body
LE: loop exit
PB: predicated region body
PF: predicated region fallthrough
CT: control target
= control target key end

     0   :  { %s1386_s25 = smov 0   ;;  %s1505_s0 = inlined_call_operand.vmem [shape: bf16[2,1024,81], index: 0, kind: input, shape index: {}]   ;;  %s1506_s1 = inlined_call_operand.vmem [shape: bf16[1,1024], index: 1, kind: input, shape index: {}]   ;;  %s1507_s2 = inlined_call_operand.<no memory space> [shape: f32[1,1], index: 2, kind: input, shape index: {}]   ;;  %s1508_s3 = inlined_call_operand.vmem [shape: f32[1,81], index: 3, kind: input, shape index: {}]   ;;  %s1509_s5 = inlined_call_operand.vmem [shape: f32[2,1,81], index: 5, kind: output, shape index: {0}]   ;;  %s1510_s6 = inlined_call_operand.vmem [shape: f32[2,1,1], index: 6, kind: output, shape index: {1}]   ;;  %s1511_s4 = inlined_call_operand.<no memory space> [shape: f32[1,1], index: 4, kind: input, shape index: {}]  }
   0x1   :  { %v12_v0 = vstv %s1507_s2  ;;  %v14_v1 = vstv %s1511_s4 }
   0x2   :  { %13 = vst [vmem:[#allocation2] sm:$0x1] %v12_v0  ;;  %15 = vst [vmem:[#allocation3] sm:$0x1] %v14_v1 }
   0x3 LB: > { %s1092_s26 = sadd.s32 4294967295, %s1341_s25   ;;  %p1096_p0 = scmp.ge.s32.totalorder %s1341_s25, 1  ;;  %s1341_s25 = sphi %s1386_s25, %s21_s25  }
   0x4   : > { %p219_p1 = scmp.lt.s32.totalorder %s1341_s25, 3 }
   0x6   : > { %p220_p2 = pnand %p1096_p0, %p219_p1 }
   0x7   : > { %p250_p3 = scmp.lt.s32.totalorder (!%p220_p2), %s1092_s26, 1  ;;  %v397_v2 = vlaneseq (!%p220_p2)  ;;  %v1343_v3 = vmov (!%p220_p2), 1966171168   ;;  %v1344_v5 = vmov (!%p220_p2), 0   ;;  %v390_v9 = vld [vmem:[%s1506_s1] sm:$0xff] (!%p220_p2)  ;;  %vm1003_vm0 = vcmask (!%p220_p2), 655360  }
   0x8   : > { %223 = sbr.rel (%p220_p2) target bundleno = 477 (0x1dd), region = 40  ;;  %v404_v4 = vunpack.c.l.s4 (!%p220_p2), %v1343_v3  ;;  %1265 = vset.pattern.permute.xlu0 (!%p220_p2), %v1344_v5  ;;  %v402_v34 = vcombine.high (!%p220_p2), %v390_v9, %v390_v9  ;;  %vm1018_vm1 = vcmask (!%p220_p2), 0  }
   0x9   : > { %v391_v6 = vld [vmem:[#allocation2] sm:$0x1] (!%p220_p2)  ;;  %v1396_v7 = vshrl.u32 (!%p220_p2), %v397_v2, 7 }
   0xa   : > { %394 = vperm.xlu0 (!%p220_p2), %1265, %v391_v6   ;;  %v405_v8 = vunpack.c.0.s8 (!%p220_p2), %v404_v4 }
   0xc   : > { %v1408_v10 = vsub.s32 (!%p220_p2), %v405_v8, %v1396_v7 }
   0xe   : > { %v1413_v13 = vrot.slane (!%p220_p2), %v390_v9, %v1408_v10  ;;  %v1440_v39 = vrot.slane (!%p220_p2), %v402_v34, %v1408_v10 }
   0xf   : > { %s1513_s26 = smov (!%p250_p3, %s1092_s26), 1 }
  0x10   : > { %s1166_s2 = sshll.u32 %s1513_s26, 9  ;;  %v417_v16 = vcombine.high %v1413_v13, %v1413_v13  ;;  %v418_v44 = vcombine.high %v1440_v39, %v1440_v39  ;;  %v425_v47 = vrot.slane %v1413_v13, %v1408_v10  ;;  %s257_s9 = scalar_lea.vmem %s1509_s5, %s1513_s26 }
  0x11   : > { %s1405_s30 = scalar_lea.vmem %s1505_s0, %s1166_s2  ;;  %s260_s14 = scalar_lea.vmem %s1510_s6, %s1513_s26 }
  0x12   : > { %v1266_v11 = vld [vmem:[%s1405_s30 + $0x40] sm:$0xff]   ;;  %v1270_v17 = vld [vmem:[%s1405_s30 + $0x48] sm:$0xff]   ;;  %v439_v19 = vrot.slane %v417_v16, %v1408_v10  ;;  %v1274_v23 = vld [vmem:[%s1405_s30 + $0x50] sm:$0xff]   ;;  %v446_v50 = vrot.slane %v418_v44, %v1408_v10  ;;  %v447_v52 = vcombine.high %v425_v47, %v425_v47 }
  0x13   : > { %v1267_v12 = vld [vmem:[%s1405_s30 + $0xc0] sm:$0xff]   ;;  %1167 = vmatprep.subr.bf16.mxu0 %v1266_v11  ;;  %v1271_v18 = vld [vmem:[%s1405_s30 + $0xc8] sm:$0xff]   ;;  %v1275_v24 = vld [vmem:[%s1405_s30 + $0xd0] sm:$0xff]  }
  0x14   : > { %v1268_v14 = vld [vmem:[%s1405_s30] sm:$0xff]   ;;  %1189 = vmatprep.subr.bf16.mxu1 %v1267_v12  ;;  %v1272_v20 = vld [vmem:[%s1405_s30 + $0x8] sm:$0xff]   ;;  %875 = vmatprep.mubr.bf16.mxu0 %v439_v19  ;;  %v449_v22 = vcombine.high %v439_v19, %v439_v19  ;;  %v1276_v25 = vld [vmem:[%s1405_s30 + $0x10] sm:$0xff]   ;;  %v450_v56 = vcombine.high %v446_v50, %v446_v50 }
  0x15   : > { %v1269_v15 = vld [vmem:[%s1405_s30 + $0x80] sm:$0xff]   ;;  %1168 = vmatpush3.bf16.msra.mxu0 %v1268_v14  ;;  %v1273_v21 = vld [vmem:[%s1405_s30 + $0x88] sm:$0xff]   ;;  %v1277_v26 = vld [vmem:[%s1405_s30 + $0x90] sm:$0xff]  }
  0x16   : > { %1190 = vmatpush3.bf16.msra.mxu1 %v1269_v15  ;;  %1169 = vmatprep.subr.bf16.mxu0 %v1270_v17  ;;  %v1278_v27 = vld [vmem:[%s1405_s30 + $0x58] sm:$0xff]   ;;  %v1282_v31 = vld [vmem:[%s1405_s30 + $0x60] sm:$0xff]   ;;  %v1286_v36 = vld [vmem:[%s1405_s30 + $0x68] sm:$0xff]  }
  0x17   : > { %1191 = vmatprep.subr.bf16.mxu1 %v1271_v18  ;;  %915 = vmatprep.mubr.bf16.mxu1 %v449_v22  ;;  %v1279_v28 = vld [vmem:[%s1405_s30 + $0xd8] sm:$0xff]   ;;  %v1283_v32 = vld [vmem:[%s1405_s30 + $0xe0] sm:$0xff]   ;;  %v1287_v37 = vld [vmem:[%s1405_s30 + $0xe8] sm:$0xff]  }
  0x18   : > { %v1280_v29 = vld [vmem:[%s1405_s30 + $0x18] sm:$0xff]   ;;  %v1284_v33 = vld [vmem:[%s1405_s30 + $0x20] sm:$0xff]   ;;  %v1288_v38 = vld [vmem:[%s1405_s30 + $0x28] sm:$0xff]  }
  0x19   : > { %1170 = vmatpush3.bf16.msra.mxu0 %v1272_v20  ;;  %v1281_v30 = vld [vmem:[%s1405_s30 + $0x98] sm:$0xff]   ;;  %v1285_v35 = vld [vmem:[%s1405_s30 + $0xa0] sm:$0xff]   ;;  %v1289_v40 = vld [vmem:[%s1405_s30 + $0xa8] sm:$0xff]  }
  0x1a   : > { %1192 = vmatpush3.bf16.msra.mxu1 %v1273_v21  ;;  %1171 = vmatprep.subr.bf16.mxu0 %v1274_v23  ;;  %v1290_v41 = vld [vmem:[%s1405_s30 + $0x70] sm:$0xff]   ;;  %v1294_v46 = vld [vmem:[%s1405_s30 + $0x78] sm:$0xff]   ;;  %v1299_v53 = vld [vmem:[%s1405_s30 + $0x140] sm:$0xff]   ;;  %v432_v21 = vrot.slane %v1440_v39, %v1408_v10 }
  0x1b   : > { %1193 = vmatprep.subr.bf16.mxu1 %v1275_v24  ;;  %v1291_v42 = vld [vmem:[%s1405_s30 + $0xf0] sm:$0xff]   ;;  %v1295_v48 = vld [vmem:[%s1405_s30 + $0xf8] sm:$0xff]   ;;  %v1300_v54 = vld [vmem:[%s1405_s30 + $0x1c0] sm:$0xff]  }
  0x1c   : > { %v1292_v43 = vld [vmem:[%s1405_s30 + $0x30] sm:$0xff]   ;;  %v1296_v49 = vld [vmem:[%s1405_s30 + $0x38] sm:$0xff]   ;;  %v1301_v55 = vld [vmem:[%s1405_s30 + $0x100] sm:$0xff]  }
  0x1d   : > { %1172 = vmatpush3.bf16.msra.mxu0 %v1276_v25  ;;  %v1293_v45 = vld [vmem:[%s1405_s30 + $0xb0] sm:$0xff]   ;;  %v1297_v51 = vld [vmem:[%s1405_s30 + $0xb8] sm:$0xff]   ;;  %v1302_v57 = vld [vmem:[%s1405_s30 + $0x180] sm:$0xff]   ;;  %v448_v25 = vcombine.high %v432_v21, %v432_v21 }
  0x1e   : > { %1194 = vmatpush3.bf16.msra.mxu1 %v1277_v26  ;;  %1173 = vmatprep.subr.bf16.mxu0 %v1278_v27  ;;  %v1303_v58 = vld [vmem:[%s1405_s30 + $0x148] sm:$0xff]   ;;  %v1307_v62 = vld [vmem:[%s1405_s30 + $0x150] sm:$0xff]   ;;  %v1311_v2 = vld [vmem:[%s1405_s30 + $0x158] sm:$0xff]   ;;  %v399_v26 = vsub.s32 0, %v1396_v7 }
  0x1f   : > { %1195 = vmatprep.subr.bf16.mxu1 %v1279_v28  ;;  %v1304_v59 = vld [vmem:[%s1405_s30 + $0x1c8] sm:$0xff]   ;;  %v1308_v63 = vld [vmem:[%s1405_s30 + $0x1d0] sm:$0xff]   ;;  %v1312_v3 = vld [vmem:[%s1405_s30 + $0x1d8] sm:$0xff]  }
  0x20   : > { %v1305_v60 = vld [vmem:[%s1405_s30 + $0x108] sm:$0xff]   ;;  %v1309_v0 = vld [vmem:[%s1405_s30 + $0x110] sm:$0xff]   ;;  %v1313_v4 = vld [vmem:[%s1405_s30 + $0x118] sm:$0xff]  }
  0x21   : > { %1174 = vmatpush3.bf16.msra.mxu0 %v1280_v29  ;;  %v1306_v61 = vld [vmem:[%s1405_s30 + $0x188] sm:$0xff]   ;;  %v1310_v1 = vld [vmem:[%s1405_s30 + $0x190] sm:$0xff]   ;;  %v1314_v5 = vld [vmem:[%s1405_s30 + $0x198] sm:$0xff]  }
  0x22   : > { %1196 = vmatpush3.bf16.msra.mxu1 %v1281_v30  ;;  %1175 = vmatprep.subr.bf16.mxu0 %v1282_v31  ;;  %v1315_v6 = vld [vmem:[%s1405_s30 + $0x160] sm:$0xff]   ;;  %v1319_v12 = vld [vmem:[%s1405_s30 + $0x168] sm:$0xff]   ;;  %v1323_v16 = vld [vmem:[%s1405_s30 + $0x170] sm:$0xff]  }
  0x23   : > { %1197 = vmatprep.subr.bf16.mxu1 %v1283_v32  ;;  %v1316_v8 = vld [vmem:[%s1405_s30 + $0x1e0] sm:$0xff]   ;;  %v1320_v13 = vld [vmem:[%s1405_s30 + $0x1e8] sm:$0xff]   ;;  %v1324_v17 = vld [vmem:[%s1405_s30 + $0x1f0] sm:$0xff]  }
  0x24   : > { %v1317_v9 = vld [vmem:[%s1405_s30 + $0x120] sm:$0xff]   ;;  %v1321_v14 = vld [vmem:[%s1405_s30 + $0x128] sm:$0xff]   ;;  %v1325_v18 = vld [vmem:[%s1405_s30 + $0x130] sm:$0xff]  }
  0x25   : > { %1176 = vmatpush3.bf16.msra.mxu0 %v1284_v33  ;;  %v1318_v11 = vld [vmem:[%s1405_s30 + $0x1a0] sm:$0xff]   ;;  %v1322_v15 = vld [vmem:[%s1405_s30 + $0x1a8] sm:$0xff]   ;;  %v1326_v19 = vld [vmem:[%s1405_s30 + $0x1b0] sm:$0xff]  }
  0x26   : > { %1198 = vmatpush3.bf16.msra.mxu1 %v1285_v35  ;;  %1177 = vmatprep.subr.bf16.mxu0 %v1286_v36  ;;  %v1327_v20 = vld [vmem:[%s1405_s30 + $0x178] sm:$0xff]  }
  0x27   : > { %1199 = vmatprep.subr.bf16.mxu1 %v1287_v37  ;;  %v1328_v22 = vld [vmem:[%s1405_s30 + $0x1f8] sm:$0xff]  }
  0x28   : > { %v1329_v23 = vld [vmem:[%s1405_s30 + $0x138] sm:$0xff]  }
  0x29   : > { %1178 = vmatpush3.bf16.msra.mxu0 %v1288_v38  ;;  %v1330_v24 = vld [vmem:[%s1405_s30 + $0x1b8] sm:$0xff]  }
  0x2a   : > { %1200 = vmatpush3.bf16.msra.mxu1 %v1289_v40  ;;  %1179 = vmatprep.subr.bf16.mxu0 %v1290_v41 }
  0x2b   : > { %1201 = vmatprep.subr.bf16.mxu1 %v1291_v42 }
  0x2d   : > { %1180 = vmatpush3.bf16.msra.mxu0 %v1292_v43 }
  0x2e   : > { %1202 = vmatpush3.bf16.msra.mxu1 %v1293_v45  ;;  %1181 = vmatprep.subr.bf16.mxu0 %v1294_v46 }
  0x2f   : > { %1203 = vmatprep.subr.bf16.mxu1 %v1295_v48 }
  0x31   : > { %1182 = vmatpush3.bf16.msra.mxu0 %v1296_v49 }
  0x32   : > { %1204 = vmatpush3.bf16.msra.mxu1 %v1297_v51  ;;  %1211 = vmatprep.subr.bf16.mxu0 %v1299_v53 }
  0x33   : > { %1233 = vmatprep.subr.bf16.mxu1 %v1300_v54  ;;  %v1010_v54 = vld [vmem:[#allocation3] sm:$0x1] }
  0x34   : > { %876 = vmatmul.mubr.bf16.vlgmr.msra.gmra.mrb[0].mxu0 %v425_v47 }
  0x35   : > { %916 = vmatmul.mubr.bf16.vlgmr.msra.gmra.mrb[0].mxu1 %v447_v52  ;;  %1212 = vmatpush3.bf16.msra.mxu0 %v1301_v55 }
  0x36   : > { %1234 = vmatpush3.bf16.msra.mxu1 %v1302_v57  ;;  %955 = vmatprep.mubr.bf16.mxu0 %v446_v50  ;;  %v1005_v50 = vld [vmem:[%s1508_s3] sm:$0x1] }
  0x37   : > { %1213 = vmatprep.subr.bf16.mxu0 %v1303_v58  ;;  %995 = vmatprep.mubr.bf16.mxu1 %v450_v56 }
  0x38   : > { %1235 = vmatprep.subr.bf16.mxu1 %v1304_v59 }
  0x39   : > { %1214 = vmatpush3.bf16.msra.mxu0 %v1305_v60 }
  0x3a   : > { %1236 = vmatpush3.bf16.msra.mxu1 %v1306_v61  ;;  %1215 = vmatprep.subr.bf16.mxu0 %v1307_v62 }
  0x3b   : > { %1237 = vmatprep.subr.bf16.mxu1 %v1308_v63 }
  0x3d   : > { %1216 = vmatpush3.bf16.msra.mxu0 %v1309_v0 }
  0x3e   : > { %1238 = vmatpush3.bf16.msra.mxu1 %v1310_v1  ;;  %1217 = vmatprep.subr.bf16.mxu0 %v1311_v2 }
  0x3f   : > { %1239 = vmatprep.subr.bf16.mxu1 %v1312_v3 }
  0x41   : > { %1218 = vmatpush3.bf16.msra.mxu0 %v1313_v4 }
  0x42   : > { %1240 = vmatpush3.bf16.msra.mxu1 %v1314_v5  ;;  %1219 = vmatprep.subr.bf16.mxu0 %v1315_v6 }
  0x43   : > { %1241 = vmatprep.subr.bf16.mxu1 %v1316_v8 }
  0x45   : > { %1220 = vmatpush3.bf16.msra.mxu0 %v1317_v9 }
  0x46   : > { %1242 = vmatpush3.bf16.msra.mxu1 %v1318_v11  ;;  %1221 = vmatprep.subr.bf16.mxu0 %v1319_v12 }
  0x47   : > { %1243 = vmatprep.subr.bf16.mxu1 %v1320_v13 }
  0x49   : > { %1222 = vmatpush3.bf16.msra.mxu0 %v1321_v14 }
  0x4a   : > { %1244 = vmatpush3.bf16.msra.mxu1 %v1322_v15  ;;  %1223 = vmatprep.subr.bf16.mxu0 %v1323_v16 }
  0x4b   : > { %1245 = vmatprep.subr.bf16.mxu1 %v1324_v17 }
  0x4d   : > { %1224 = vmatpush3.bf16.msra.mxu0 %v1325_v18 }
  0x4e   : > { %1246 = vmatpush3.bf16.msra.mxu1 %v1326_v19  ;;  %1225 = vmatprep.subr.bf16.mxu0 %v1327_v20 }
  0x4f   : > { %1247 = vmatprep.subr.bf16.mxu1 %v1328_v22 }
  0x51   : > { %1226 = vmatpush3.bf16.msra.mxu0 %v1329_v23 }
  0x52   : > { %1248 = vmatpush3.bf16.msra.mxu1 %v1330_v24 }
  0x54   : > { %956 = vmatmul.mubr.bf16.vlgmr.msra.gmra.mrb[4].mxu0 %v432_v21 }
  0x55   : > { %996 = vmatmul.mubr.bf16.vlgmr.msra.gmra.mrb[4].mxu1 %v448_v25 }
  0x89   : > { %v395_v27 = vpop.permute.xlu0 %394 }
  0x8a   : > { %v400_v29 = vrot.slane %v395_v27, %v399_v26 }
 0x107   : > { %v1183_v28 = vpop.f32.mrb[0].mxu0 }
 0x108   : > { %v1205_v30 = vpop.f32.mrb[0].mxu1  ;;  %v1184_v31 = vpop.f32.mrb[1].mxu0 }
 0x109   : > { %v1185_v32 = vadd.f32 %v1184_v31, %v1183_v28  ;;  %v1206_v10 = vpop.f32.mrb[1].mxu1  ;;  %v1186_v33 = vpop.f32.mrb[2].mxu0 }
 0x10a   : > { %v1207_v34 = vadd.f32 %v1206_v10, %v1205_v30  ;;  %v1208_v35 = vpop.f32.mrb[2].mxu1  ;;  %v1187_v36 = vpop.f32.mrb[3].mxu0 }
 0x10b   : > { %v878_v37 = vadd.f32 %v1185_v32, %v400_v29  ;;  %v1209_v38 = vpop.f32.mrb[3].mxu1 }
 0x10d   : > { %v918_v39 = vadd.f32 %v1207_v34, %v878_v37 }
 0x127   : > { %v1227_v40 = vpop.f32.mrb[4].mxu0 }
 0x128   : > { %v1249_v41 = vpop.f32.mrb[4].mxu1  ;;  %v1228_v42 = vpop.f32.mrb[5].mxu0 }
 0x129   : > { %v1229_v43 = vadd.f32 %v1228_v42, %v1227_v40  ;;  %v1250_v7 = vpop.f32.mrb[5].mxu1  ;;  %v1230_v44 = vpop.f32.mrb[6].mxu0 }
 0x12a   : > { %v1251_v45 = vadd.f32 %v1250_v7, %v1249_v41  ;;  %v1252_v46 = vpop.f32.mrb[6].mxu1  ;;  %v1231_v47 = vpop.f32.mrb[7].mxu0 }
 0x12b   : > { %v958_v48 = vadd.f32 %v1229_v43, %v918_v39  ;;  %v1253_v49 = vpop.f32.mrb[7].mxu1 }
 0x12d   : > { %v998_v51 = vadd.f32 %v1251_v45, %v958_v48 }
 0x12f   : > { %v1006_v52 = vmul.f32 %v1005_v50, %v998_v51  ;;  %1004 = vst.msk [vmem:[%s257_s9] sm:$0x1] %vm1003_vm0, %v998_v51 }
 0x131   : > { %v1007_v53 = vsel %vm1003_vm0, %v1006_v52, 0.0 }
 0x132   : > { %1008 = vadd.xlane.f32.xlu0 %v1007_v53 }
 0x1bf   : > { %v1009_v55 = vpop.xlane.xlu0 %1008 }
 0x1c0   : > { %v1011_v56 = vadd.f32 %v1010_v54, %v1009_v55 }
 0x1c2   : > { %v1163_v57 = vmul.f32 -1.442695, %v1011_v56 }
 0x1c4   : > { %1331 = vpow2.f32 %v1163_v57 }
 0x1ce   : > { %v1332_v58 = vpop.eup %1331 }
 0x1cf   : > { %v1015_v59 = vadd.f32 1.0, %v1332_v58 }
 0x1d1   : > { %1333 = vrcp.f32 %v1015_v59 }
 0x1db   : > { %v1334_v60 = vpop.eup %1333 }
 0x1dc   : > { %1019 = vst.msk [vmem:[%s260_s14] sm:$0x1] %vm1018_vm1, %v1334_v60 }
 0x1dd PF: > { %s21_s25 = sadd.s32 1, %s1341_s25  }
 0x1de   : > { %p18_p4 = scmp.ge.s32.totalorder %s21_s25, 4  }
 0x1e0   :  { %20 = sbr.rel (!%p18_p4) target bundleno = 3 (0x3), region = 82 }

// kernel: multiscale_discriminator_forward.10
= control target key start
LH: loop header
LB: loop body
LE: loop exit
PB: predicated region body
PF: predicated region fallthrough
CT: control target
= control target key end

     0   :  { %s3372_s0 = inlined_call_operand.vmem [shape: bf16[2,48,1156], index: 0, kind: input, shape index: {}]   ;;  %s3373_s1 = inlined_call_operand.vmem [shape: bf16[8,48], index: 1, kind: input, shape index: {}]   ;;  %s3374_s2 = inlined_call_operand.vmem [shape: f32[8,1], index: 2, kind: input, shape index: {}]   ;;  %s3375_s3 = inlined_call_operand.vmem [shape: bf16[2,8,1156], index: 3, kind: output, shape index: {}]  }
   0x1   :  { %3378 = sst [smem:[#allocation6_spill]] %s3372_s0 }
   0x2   :  { %s2475_s12 = smov 0   ;;  %s2477_s13 = smov 0  }
   0x3   :  { %s2479_s14 = smov 0   ;;  %s2481_s15 = smov 0  }
   0x4   :  { %s2483_s16 = smov 0   ;;  %s2485_s17 = smov 0  }
   0x5   :  { %s2487_s18 = smov 0  }
   0x6 LB: > { %s22_s19 = sadd.s32 1, %s2312_s16  ;;  %s25_s20 = sadd.s32 1, %s2316_s17  ;;  %s2320_s18 = sphi %s2487_s18, %s13_s18   ;;  %s2316_s17 = sphi %s2485_s17, %s3416_s17   ;;  %s2312_s16 = sphi %s2483_s16, %s3415_s16   ;;  %s2308_s15 = sphi %s2481_s15, %s3414_s15   ;;  %s2304_s14 = sphi %s2479_s14, %s3413_s14   ;;  %s2300_s13 = sphi %s2477_s13, %s3412_s13   ;;  %s2296_s12 = sphi %s2475_s12, %s3411_s12  }
   0x7   : > { %p23_p0 = scmp.ge.s32.totalorder %s22_s19, 2  ;;  %s1712_s21 = sadd.s32 4294967295, %s2320_s18  }
   0x8   : > { %p41_p1 = scmp.ne.s32.totalorder %s2300_s13, %s2296_s12  ;;  %p42_p2 = scmp.eq.s32.totalorder %s2320_s18, 0 }
   0x9   : > { %s3418_s19 = smov (%p23_p0, %s22_s19), 0  ;;  %s3420_s20 = smov (!%p23_p0, %s25_s20), %s2316_s17 }
   0xa   : > { %3379 = sst [smem:[#allocation4_spill]] %s3418_s19  ;;  %p27_p3 = scmp.ge.s32.totalorder %s3420_s20, 2 }
   0xb   : > { %p115_p4 = scmp.eq.s32.totalorder %s1712_s21, 3  ;;  %s30_s22 = ssub.s32 %s2312_s16, %s3418_s19 }
   0xc   : > { %p43_p5 = por %p42_p2, %p41_p1  ;;  %s3422_s20 = smov (%p27_p3, %s3420_s20), 0 }
   0xd   : > { %3380 = sst [smem:[#allocation5_spill]] %s3422_s20  ;;  %p2523_p6 = por %p115_p4, %p41_p1 }
   0xe   : > { %s29_s24 = ssub.s32 %s2316_s17, %s3422_s20  ;;  %s34_s26 = sadd.s32 1, %s2300_s13 }
   0xf   : > { %s31_s25 = sor.u32 %s30_s22, %s29_s24  ;;  %p1715_p8 = scmp.ge.s32.totalorder %s2320_s18, 4 }
  0x10   : > { %p32_p7 = scmp.eq.s32.totalorder %s31_s25, 0 }
  0x11   : > { %143 = sbr.rel (%p1715_p8) target bundleno = 202 (0xca), region = 24 }
  0x12   : > { %s2531_s27 = scalar_select %p32_p7, %s2300_s13, %s34_s26  }
  0x18   : > { %146 = sbr.rel (!%p43_p5) target bundleno = 202 (0xca), region = 28  ;;  %s148_s28 = sand.u32 (%p43_p5), 1, %s2300_s13  }
  0x19   : > { %s1716_s29 = sshll.u32 (%p43_p5), %s2312_s16, 3  ;;  %s1806_s30 = smul.u32 (%p43_p5), 192, %s148_s28 }
  0x1a   : > { %s152_s4 = ssub.s32 (%p43_p5), 10, %s1716_s29  ;;  %s1807_s5 = smul.u32 (%p43_p5), 60, %s2316_s17 }
  0x1b   : > { %p153_p9 = scmp.lt.s32.totalorder (%p43_p5), %s152_s4, 8  ;;  %s3382_s0 = sld [smem:[#allocation6_spill]] (%p43_p5) }
  0x1c   : > { %s158_s6 = sadd.s32 (%p43_p5), %s1807_s5, %s1716_s29  ;;  %s2544_s22 = scalar_lea.vmem (%p43_p5), [#allocation2], %s1806_s30  }
  0x1d   : > { %s1718_s8 = sshll.u32 (%p43_p5), %s158_s6, 2 }
  0x1f   : > { %s3424_s4 = smov (!%p153_p9, %s152_s4), 8 }
  0x20   : > { %s155_s7 = smul.u32 384, %s3424_s4  ;;  %s2542_s21 = sshll.u32 %s3424_s4, 2 }
  0x21   : > { %s2540_s11 = scalar_lea.vmem %s3382_s0, %s1718_s8  }
  0x22   : > { %p1720_p10 = scmp.eq.s32.totalorder %s155_s7, 0 }
  0x23   : > { %p165_p11 = scmp.lt.u32.totalorder (!%p1720_p10), %s2542_s21, 8 }
  0x24   : > { %164 = sbr.rel (%p1720_p10) target bundleno = 202 (0xca), region = 32 }
  0x2b   : > { %168 = sbr.rel (%p165_p11) target bundleno = 193 (0xc1), region = 36  ;;  %s2548_s24 = sand.u32 (!%p165_p11), 7, %s2542_s21  }
  0x2c   : > { %p194_p12 = scmp.eq.s32.totalorder (!%p165_p11), %s2548_s24, 0  ;;  %p1721_p13 = scmp.ne.s32.totalorder (!%p165_p11), %s2548_s24, 0 }
  0x32   : > { %197 = sbr.rel (%p1721_p13) target bundleno = 117 (0x75), region = 51  ;;  %s198_s25 = sshrl.u32 (!%p1721_p13), %s2542_s21, 3 }
  0x33   : > { %2129 = sdivrem.u32 (!%p1721_p13), %s198_s25, 12 }
  0x3c   : > { %s2555_s26 = spop.drf %2129 }
  0x3d   : > { %p1722_p0 = scmp.le.s32.totalorder %s2555_s26, 0 }
  0x3e   : > { %s3383_s28 = smov (!%p1722_p0), %s2544_s22  ;;  %s3384_s29 = smov (!%p1722_p0), %s2540_s11 }
  0x3f   : > { %1573 = sbr.rel (%p1722_p0) target bundleno = 88 (0x58), region = 229  ;;  %s2564_s30 = smov (!%p1722_p0), 0  }
  0x40   : > { %s2566_s4 = smov (!%p1722_p0), 0  }
  0x46 LB: >> { %v232_v0 = vld [vmem:[%s2328_s29 + $0x50] sm:$0xff]  ;;  %v234_v1 = vld [vmem:[%s2328_s29 + $0x58] sm:$0xff]  ;;  %v258_v3 = vld [vmem:[%s2328_s29 + $0x80] sm:$0xff]  ;;  %s356_s5 = sadd.s32 1, %s2332_s30  ;;  %s206_s4 = sadd.s32 1, %s2336_s4   ;;  %s2336_s4 = sphi %s2566_s4, %s206_s4   ;;  %s2332_s30 = sphi %s2564_s30, %s3387_s30   ;;  %s2328_s29 = sphi %s3384_s29, %s3386_s29   ;;  %s2324_s28 = sphi %s3383_s28, %s3385_s28  }
  0x47   : >> { %v256_v2 = vld [vmem:[%s2328_s29 + $0x78] sm:$0xff]  ;;  %v280_v4 = vld [vmem:[%s2328_s29 + $0xa0] sm:$0xff]  ;;  %v282_v5 = vld [vmem:[%s2328_s29 + $0xa8] sm:$0xff]  ;;  %261 = vst [vmem:[%s2324_s28 + $0x40] sm:$0xff] %v232_v0  ;;  %p357_p1 = scmp.ge.s32.totalorder %s356_s5, %s2555_s26  ;;  %p205_p2 = scmp.ge.s32.totalorder %s206_s4, %s2555_s26 }
  0x48   : >> { %263 = vst [vmem:[%s2324_s28 + $0x48] sm:$0xff] %v234_v1  ;;  %285 = vst [vmem:[%s2324_s28 + $0x60] sm:$0xff] %v256_v2  ;;  %v304_v6 = vld [vmem:[%s2328_s29 + $0xc8] sm:$0xff]  ;;  %v306_v7 = vld [vmem:[%s2328_s29 + $0xd0] sm:$0xff] }
  0x49   : >> { %v222_v8 = vld [vmem:[%s2328_s29 + $0x28] sm:$0xff]  ;;  %287 = vst [vmem:[%s2324_s28 + $0x68] sm:$0xff] %v258_v3  ;;  %309 = vst [vmem:[%s2324_s28 + $0x80] sm:$0xff] %v280_v4  ;;  %v224_v9 = vld [vmem:[%s2328_s29 + $0x30] sm:$0xff]  ;;  %s3426_s5 = smov (%p357_p1, %s356_s5), 0 }
  0x4a   : >> { %311 = vst [vmem:[%s2324_s28 + $0x88] sm:$0xff] %v282_v5  ;;  %v226_v10 = vld [vmem:[%s2328_s29 + $0x38] sm:$0xff]  ;;  %v250_v11 = vld [vmem:[%s2328_s29 + $0x60] sm:$0xff]  ;;  %237 = vst [vmem:[%s2324_s28 + $0x20] sm:$0xff] %v222_v8  ;;  %s359_s6 = smul.u32 96, %s3426_s5  ;;  %s3387_s30 = smov %s3426_s5 }
  0x4b   : >> { %333 = vst [vmem:[%s2324_s28 + $0xa0] sm:$0xff] %v304_v6  ;;  %335 = vst [vmem:[%s2324_s28 + $0xa8] sm:$0xff] %v306_v7  ;;  %v274_v12 = vld [vmem:[%s2328_s29 + $0x88] sm:$0xff]  ;;  %v298_v13 = vld [vmem:[%s2328_s29 + $0xb0] sm:$0xff] }
  0x4c   : >> { %v322_v14 = vld [vmem:[%s2328_s29 + $0xd8] sm:$0xff]  ;;  %239 = vst [vmem:[%s2324_s28 + $0x28] sm:$0xff] %v224_v9  ;;  %241 = vst [vmem:[%s2324_s28 + $0x30] sm:$0xff] %v226_v10  ;;  %v324_v15 = vld [vmem:[%s2328_s29 + $0xe0] sm:$0xff]  ;;  %s361_s7 = scalar_lea.vmem %s2540_s11, %s359_s6   ;;  %s362_s8 = scalar_lea.vmem %s2544_s22, %s359_s6 [#allocation2]  }
  0x4d   : >> { %265 = vst [vmem:[%s2324_s28 + $0x50] sm:$0xff] %v250_v11  ;;  %v326_v16 = vld [vmem:[%s2328_s29 + $0xe8] sm:$0xff]  ;;  %v328_v17 = vld [vmem:[%s2328_s29 + $0xf0] sm:$0xff]  ;;  %289 = vst [vmem:[%s2324_s28 + $0x70] sm:$0xff] %v274_v12 }
  0x4e   : >> { %313 = vst [vmem:[%s2324_s28 + $0x90] sm:$0xff] %v298_v13  ;;  %337 = vst [vmem:[%s2324_s28 + $0xb0] sm:$0xff] %v322_v14  ;;  %v330_v18 = vld [vmem:[%s2328_s29 + $0xf8] sm:$0xff]  ;;  %v212_v19 = vld [vmem:[%s2328_s29] sm:$0xff] }
  0x4f   : >> { %v214_v20 = vld [vmem:[%s2328_s29 + $0x8] sm:$0xff]  ;;  %339 = vst [vmem:[%s2324_s28 + $0xb8] sm:$0xff] %v324_v15  ;;  %341 = vst [vmem:[%s2324_s28 + $0xc0] sm:$0xff] %v326_v16  ;;  %v216_v21 = vld [vmem:[%s2328_s29 + $0x10] sm:$0xff] }
  0x50   : >> { %343 = vst [vmem:[%s2324_s28 + $0xc8] sm:$0xff] %v328_v17  ;;  %213 = vst [vmem:[%s2324_s28] sm:$0xff] %v212_v19  ;;  %v218_v22 = vld [vmem:[%s2328_s29 + $0x18] sm:$0xff]  ;;  %v242_v23 = vld [vmem:[%s2328_s29 + $0x40] sm:$0xff] }
  0x51   : >> { %215 = vst [vmem:[%s2324_s28 + $0x8] sm:$0xff] %v214_v20  ;;  %345 = vst [vmem:[%s2324_s28 + $0xd0] sm:$0xff] %v330_v18  ;;  %v266_v24 = vld [vmem:[%s2328_s29 + $0x68] sm:$0xff]  ;;  %v290_v25 = vld [vmem:[%s2328_s29 + $0x90] sm:$0xff]  ;;  %208 = sbr.rel (!%p205_p2) target bundleno = 70 (0x46), region = 235 }
  0x52   : >> { %217 = vst [vmem:[%s2324_s28 + $0x10] sm:$0xff] %v216_v21  ;;  %219 = vst [vmem:[%s2324_s28 + $0x18] sm:$0xff] %v218_v22  ;;  %v314_v26 = vld [vmem:[%s2328_s29 + $0xb8] sm:$0xff]  ;;  %v346_v27 = vld [vmem:[%s2328_s29 + $0x100] sm:$0xff] }
  0x53   : >> { %243 = vst [vmem:[%s2324_s28 + $0x38] sm:$0xff] %v242_v23  ;;  %267 = vst [vmem:[%s2324_s28 + $0x58] sm:$0xff] %v266_v24  ;;  %v348_v28 = vld [vmem:[%s2328_s29 + $0x108] sm:$0xff]  ;;  %v350_v29 = vld [vmem:[%s2328_s29 + $0x110] sm:$0xff] }
  0x54   : >> { %291 = vst [vmem:[%s2324_s28 + $0x78] sm:$0xff] %v290_v25  ;;  %315 = vst [vmem:[%s2324_s28 + $0x98] sm:$0xff] %v314_v26  ;;  %v352_v30 = vld [vmem:[%s2328_s29 + $0x118] sm:$0xff]  ;;  %v354_v31 = vld [vmem:[%s2328_s29 + $0x120] sm:$0xff]  ;;  %s3386_s29 = smov %s361_s7 }
  0x55   : >> { %347 = vst [vmem:[%s2324_s28 + $0xd8] sm:$0xff] %v346_v27  ;;  %349 = vst [vmem:[%s2324_s28 + $0xe0] sm:$0xff] %v348_v28 }
  0x56   : >> { %351 = vst [vmem:[%s2324_s28 + $0xe8] sm:$0xff] %v350_v29  ;;  %353 = vst [vmem:[%s2324_s28 + $0xf0] sm:$0xff] %v352_v30 }
  0x57   : >> { %355 = vst [vmem:[%s2324_s28 + $0xf8] sm:$0xff] %v354_v31  ;;  %s3385_s28 = smov %s362_s8 }
  0x58 PF: > { %2131 = sdivrem.u32 %s198_s25, 12 }
  0x59   : > { %s1723_s9 = smul.u32 1536, %s2555_s26 }
  0x5b   : > { %s367_s10 = sshra.s32 %s1723_s9, 4 }
  0x5c   : > { %s2666_s6 = scalar_lea.vmem %s2540_s11, %s367_s10   ;;  %s2669_s0 = scalar_lea.vmem %s2544_s22, %s367_s10 [#allocation2]  }
  0x61   : > { %s2671_s8 = spop.drf %2131 }
  0x62   : > { %p1725_p3 = scmp.le.s32.totalorder %s2671_s8, 0 }
  0x63   : > { %s3388_s28 = smov (!%p1725_p3), %s2669_s0  ;;  %s3389_s29 = smov (!%p1725_p3), %s2666_s6 }
  0x64   : > { %1587 = sbr.rel (%p1725_p3) target bundleno = 117 (0x75), region = 240  ;;  %s2680_s30 = smov (!%p1725_p3), 0  }
  0x65   : > { %s2682_s25 = smov (!%p1725_p3), 0  }
  0x6b LB: >> { %v383_v32 = vld [vmem:[%s2344_s29] sm:$0xff]  ;;  %v385_v33 = vld [vmem:[%s2344_s29 + $0x28] sm:$0xff]  ;;  %v387_v34 = vld [vmem:[%s2344_s29 + $0x50] sm:$0xff]  ;;  %s395_s26 = sadd.s32 1, %s2348_s30  ;;  %s377_s25 = sadd.s32 1, %s2352_s25   ;;  %s2352_s25 = sphi %s2682_s25, %s377_s25   ;;  %s2348_s30 = sphi %s2680_s30, %s3390_s30   ;;  %s2344_s29 = sphi %s3389_s29, %s400_s29   ;;  %s2340_s28 = sphi %s3388_s28, %s401_s28  }
  0x6c   : >> { %384 = vst [vmem:[%s2340_s28] sm:$0xff] %v383_v32  ;;  %386 = vst [vmem:[%s2340_s28 + $0x20] sm:$0xff] %v385_v33  ;;  %v389_v35 = vld [vmem:[%s2344_s29 + $0x78] sm:$0xff]  ;;  %v391_v36 = vld [vmem:[%s2344_s29 + $0xa0] sm:$0xff]  ;;  %p396_p4 = scmp.ge.s32.totalorder %s395_s26, %s2671_s8  ;;  %p376_p5 = scmp.ge.s32.totalorder %s377_s25, %s2671_s8 }
  0x6d   : >> { %388 = vst [vmem:[%s2340_s28 + $0x40] sm:$0xff] %v387_v34  ;;  %v393_v37 = vld [vmem:[%s2344_s29 + $0xc8] sm:$0xff]  ;;  %390 = vst [vmem:[%s2340_s28 + $0x60] sm:$0xff] %v389_v35 }
  0x6e   : >> { %392 = vst [vmem:[%s2340_s28 + $0x80] sm:$0xff] %v391_v36  ;;  %394 = vst [vmem:[%s2340_s28 + $0xa0] sm:$0xff] %v393_v37  ;;  %s3428_s26 = smov (%p396_p4, %s395_s26), 0  ;;  %379 = sbr.rel (!%p376_p5) target bundleno = 107 (0x6b), region = 246 }
  0x6f   : >> { %s1726_s4 = sshll.u32 %s3428_s26, 3  ;;  %s3390_s30 = smov %s3428_s26 }
  0x70   : >> { %s400_s29 = scalar_lea.vmem %s2666_s6, %s1726_s4   ;;  %s401_s28 = scalar_lea.vmem %s2669_s0, %s1726_s4 [#allocation2]  }
  0x75 PF: > { %404 = sbr.rel (%p194_p12) target bundleno = 193 (0xc1), region = 69  ;;  %s406_s5 = ssub.s32 (!%p194_p12), %s2542_s21, %s2548_s24 }
  0x76   : > { %s410_s7 = sshrl.u32 (!%p194_p12), %s2542_s21, 3  ;;  %s2706_s9 = scalar_lea.vmem (!%p194_p12), %s2540_s11, %s406_s5 }
  0x77   : > { %s2709_s10 = scalar_lea.vmem (!%p194_p12), %s2544_s22, %s406_s5 [#allocation2]  ;;  %2133 = sdivrem.u32 (!%p194_p12), %s410_s7, 12 }
  0x80   : > { %s2713_s25 = spop.drf %2133 }
  0x81   : > { %p1728_p7 = scmp.le.s32.totalorder %s2713_s25, 0 }
  0x82   : > { %s3391_s0 = smov (!%p1728_p7), %s2544_s22  ;;  %s3392_s6 = smov (!%p1728_p7), %s2540_s11 }
  0x83   : > { %1601 = sbr.rel (%p1728_p7) target bundleno = 156 (0x9c), region = 251  ;;  %s2722_s8 = smov (!%p1728_p7), 0  }
  0x84   : > { %s2724_s28 = smov (!%p1728_p7), 0  }
  0x8a LB: >> { %v444_v38 = vld [vmem:[%s2360_s6 + $0x50] sm:$0xff]  ;;  %v446_v39 = vld [vmem:[%s2360_s6 + $0x58] sm:$0xff]  ;;  %v470_v41 = vld [vmem:[%s2360_s6 + $0x80] sm:$0xff]  ;;  %s568_s29 = sadd.s32 1, %s2364_s8  ;;  %s418_s28 = sadd.s32 1, %s2368_s28   ;;  %s2368_s28 = sphi %s2724_s28, %s418_s28   ;;  %s2364_s8 = sphi %s2722_s8, %s3395_s8   ;;  %s2360_s6 = sphi %s3392_s6, %s3394_s6   ;;  %s2356_s0 = sphi %s3391_s0, %s3393_s0  }
  0x8b   : >> { %v468_v40 = vld [vmem:[%s2360_s6 + $0x78] sm:$0xff]  ;;  %v492_v42 = vld [vmem:[%s2360_s6 + $0xa0] sm:$0xff]  ;;  %v494_v43 = vld [vmem:[%s2360_s6 + $0xa8] sm:$0xff]  ;;  %473 = vst [vmem:[%s2356_s0 + $0x40] sm:$0xff] %v444_v38  ;;  %p569_p8 = scmp.ge.s32.totalorder %s568_s29, %s2713_s25  ;;  %p417_p9 = scmp.ge.s32.totalorder %s418_s28, %s2713_s25 }
  0x8c   : >> { %475 = vst [vmem:[%s2356_s0 + $0x48] sm:$0xff] %v446_v39  ;;  %497 = vst [vmem:[%s2356_s0 + $0x60] sm:$0xff] %v468_v40  ;;  %v516_v44 = vld [vmem:[%s2360_s6 + $0xc8] sm:$0xff]  ;;  %v518_v45 = vld [vmem:[%s2360_s6 + $0xd0] sm:$0xff] }
  0x8d   : >> { %v434_v46 = vld [vmem:[%s2360_s6 + $0x28] sm:$0xff]  ;;  %499 = vst [vmem:[%s2356_s0 + $0x68] sm:$0xff] %v470_v41  ;;  %521 = vst [vmem:[%s2356_s0 + $0x80] sm:$0xff] %v492_v42  ;;  %v436_v47 = vld [vmem:[%s2360_s6 + $0x30] sm:$0xff]  ;;  %s3430_s29 = smov (%p569_p8, %s568_s29), 0 }
  0x8e   : >> { %523 = vst [vmem:[%s2356_s0 + $0x88] sm:$0xff] %v494_v43  ;;  %v438_v48 = vld [vmem:[%s2360_s6 + $0x38] sm:$0xff]  ;;  %v462_v49 = vld [vmem:[%s2360_s6 + $0x60] sm:$0xff]  ;;  %449 = vst [vmem:[%s2356_s0 + $0x20] sm:$0xff] %v434_v46  ;;  %s571_s30 = smul.u32 96, %s3430_s29  ;;  %s3395_s8 = smov %s3430_s29 }
  0x8f   : >> { %545 = vst [vmem:[%s2356_s0 + $0xa0] sm:$0xff] %v516_v44  ;;  %547 = vst [vmem:[%s2356_s0 + $0xa8] sm:$0xff] %v518_v45  ;;  %v486_v50 = vld [vmem:[%s2360_s6 + $0x88] sm:$0xff]  ;;  %v510_v51 = vld [vmem:[%s2360_s6 + $0xb0] sm:$0xff] }
  0x90   : >> { %v534_v52 = vld [vmem:[%s2360_s6 + $0xd8] sm:$0xff]  ;;  %451 = vst [vmem:[%s2356_s0 + $0x28] sm:$0xff] %v436_v47  ;;  %453 = vst [vmem:[%s2356_s0 + $0x30] sm:$0xff] %v438_v48  ;;  %v536_v53 = vld [vmem:[%s2360_s6 + $0xe0] sm:$0xff]  ;;  %s573_s26 = scalar_lea.vmem %s2540_s11, %s571_s30   ;;  %s574_s4 = scalar_lea.vmem %s2544_s22, %s571_s30 [#allocation2]  }
  0x91   : >> { %477 = vst [vmem:[%s2356_s0 + $0x50] sm:$0xff] %v462_v49  ;;  %v538_v54 = vld [vmem:[%s2360_s6 + $0xe8] sm:$0xff]  ;;  %v540_v55 = vld [vmem:[%s2360_s6 + $0xf0] sm:$0xff]  ;;  %501 = vst [vmem:[%s2356_s0 + $0x70] sm:$0xff] %v486_v50 }
  0x92   : >> { %525 = vst [vmem:[%s2356_s0 + $0x90] sm:$0xff] %v510_v51  ;;  %549 = vst [vmem:[%s2356_s0 + $0xb0] sm:$0xff] %v534_v52  ;;  %v542_v56 = vld [vmem:[%s2360_s6 + $0xf8] sm:$0xff]  ;;  %v424_v57 = vld [vmem:[%s2360_s6] sm:$0xff] }
  0x93   : >> { %v426_v58 = vld [vmem:[%s2360_s6 + $0x8] sm:$0xff]  ;;  %551 = vst [vmem:[%s2356_s0 + $0xb8] sm:$0xff] %v536_v53  ;;  %553 = vst [vmem:[%s2356_s0 + $0xc0] sm:$0xff] %v538_v54  ;;  %v428_v59 = vld [vmem:[%s2360_s6 + $0x10] sm:$0xff] }
  0x94   : >> { %555 = vst [vmem:[%s2356_s0 + $0xc8] sm:$0xff] %v540_v55  ;;  %425 = vst [vmem:[%s2356_s0] sm:$0xff] %v424_v57  ;;  %v430_v60 = vld [vmem:[%s2360_s6 + $0x18] sm:$0xff]  ;;  %v454_v61 = vld [vmem:[%s2360_s6 + $0x40] sm:$0xff] }
  0x95   : >> { %427 = vst [vmem:[%s2356_s0 + $0x8] sm:$0xff] %v426_v58  ;;  %557 = vst [vmem:[%s2356_s0 + $0xd0] sm:$0xff] %v542_v56  ;;  %v478_v62 = vld [vmem:[%s2360_s6 + $0x68] sm:$0xff]  ;;  %v502_v63 = vld [vmem:[%s2360_s6 + $0x90] sm:$0xff]  ;;  %420 = sbr.rel (!%p417_p9) target bundleno = 138 (0x8a), region = 257 }
  0x96   : >> { %429 = vst [vmem:[%s2356_s0 + $0x10] sm:$0xff] %v428_v59  ;;  %431 = vst [vmem:[%s2356_s0 + $0x18] sm:$0xff] %v430_v60  ;;  %v526_v0 = vld [vmem:[%s2360_s6 + $0xb8] sm:$0xff]  ;;  %v558_v1 = vld [vmem:[%s2360_s6 + $0x100] sm:$0xff] }
  0x97   : >> { %455 = vst [vmem:[%s2356_s0 + $0x38] sm:$0xff] %v454_v61  ;;  %479 = vst [vmem:[%s2356_s0 + $0x58] sm:$0xff] %v478_v62  ;;  %v560_v2 = vld [vmem:[%s2360_s6 + $0x108] sm:$0xff]  ;;  %v562_v3 = vld [vmem:[%s2360_s6 + $0x110] sm:$0xff] }
  0x98   : >> { %503 = vst [vmem:[%s2356_s0 + $0x78] sm:$0xff] %v502_v63  ;;  %527 = vst [vmem:[%s2356_s0 + $0x98] sm:$0xff] %v526_v0  ;;  %v564_v4 = vld [vmem:[%s2360_s6 + $0x118] sm:$0xff]  ;;  %v566_v5 = vld [vmem:[%s2360_s6 + $0x120] sm:$0xff]  ;;  %s3394_s6 = smov %s573_s26 }
  0x99   : >> { %559 = vst [vmem:[%s2356_s0 + $0xd8] sm:$0xff] %v558_v1  ;;  %561 = vst [vmem:[%s2356_s0 + $0xe0] sm:$0xff] %v560_v2 }
  0x9a   : >> { %563 = vst [vmem:[%s2356_s0 + $0xe8] sm:$0xff] %v562_v3  ;;  %565 = vst [vmem:[%s2356_s0 + $0xf0] sm:$0xff] %v564_v4 }
  0x9b   : >> { %567 = vst [vmem:[%s2356_s0 + $0xf8] sm:$0xff] %v566_v5  ;;  %s3393_s0 = smov %s574_s4 }
  0x9c PF: > { %2135 = sdivrem.u32 %s410_s7, 12 }
  0x9d   : > { %s1729_s5 = smul.u32 1536, %s2713_s25 }
  0x9f   : > { %s579_s30 = sshra.s32 %s1729_s5, 4 }
  0xa0   : > { %s2824_s20 = scalar_lea.vmem %s2540_s11, %s579_s30   ;;  %s2827_s19 = scalar_lea.vmem %s2544_s22, %s579_s30 [#allocation2]  }
  0xa5   : > { %s2829_s4 = spop.drf %2135 }
  0xa6   : > { %p1731_p10 = scmp.le.s32.totalorder %s2829_s4, 0 }
  0xa7   : > { %s3396_s0 = smov (!%p1731_p10), %s2827_s19  ;;  %s3397_s6 = smov (!%p1731_p10), %s2824_s20 }
  0xa8   : > { %1615 = sbr.rel (%p1731_p10) target bundleno = 185 (0xb9), region = 262  ;;  %s2838_s8 = smov (!%p1731_p10), 0  }
  0xa9   : > { %s2840_s7 = smov (!%p1731_p10), 0  }
  0xaf LB: >> { %v595_v6 = vld [vmem:[%s2376_s6] sm:$0xff]  ;;  %v597_v7 = vld [vmem:[%s2376_s6 + $0x28] sm:$0xff]  ;;  %v599_v8 = vld [vmem:[%s2376_s6 + $0x50] sm:$0xff]  ;;  %s607_s25 = sadd.s32 1, %s2380_s8  ;;  %s589_s7 = sadd.s32 1, %s2384_s7   ;;  %s2384_s7 = sphi %s2840_s7, %s589_s7   ;;  %s2380_s8 = sphi %s2838_s8, %s3398_s8   ;;  %s2376_s6 = sphi %s3397_s6, %s612_s6   ;;  %s2372_s0 = sphi %s3396_s0, %s613_s0  }
  0xb0   : >> { %596 = vst [vmem:[%s2372_s0] sm:$0xff] %v595_v6  ;;  %598 = vst [vmem:[%s2372_s0 + $0x20] sm:$0xff] %v597_v7  ;;  %v601_v9 = vld [vmem:[%s2376_s6 + $0x78] sm:$0xff]  ;;  %v603_v10 = vld [vmem:[%s2376_s6 + $0xa0] sm:$0xff]  ;;  %p608_p11 = scmp.ge.s32.totalorder %s607_s25, %s2829_s4  ;;  %p588_p12 = scmp.ge.s32.totalorder %s589_s7, %s2829_s4 }
  0xb1   : >> { %600 = vst [vmem:[%s2372_s0 + $0x40] sm:$0xff] %v599_v8  ;;  %v605_v11 = vld [vmem:[%s2376_s6 + $0xc8] sm:$0xff]  ;;  %602 = vst [vmem:[%s2372_s0 + $0x60] sm:$0xff] %v601_v9 }
  0xb2   : >> { %604 = vst [vmem:[%s2372_s0 + $0x80] sm:$0xff] %v603_v10  ;;  %606 = vst [vmem:[%s2372_s0 + $0xa0] sm:$0xff] %v605_v11  ;;  %s3432_s25 = smov (%p608_p11, %s607_s25), 0  ;;  %591 = sbr.rel (!%p588_p12) target bundleno = 175 (0xaf), region = 268 }
  0xb3   : >> { %s1732_s28 = sshll.u32 %s3432_s25, 3  ;;  %s3398_s8 = smov %s3432_s25 }
  0xb4   : >> { %s612_s6 = scalar_lea.vmem %s2824_s20, %s1732_s28   ;;  %s613_s0 = scalar_lea.vmem %s2827_s19, %s1732_s28 [#allocation2]  }
  0xb9 PF: > { %s2450_s29 = smov 0  }
  0xba   : > { %s614_s26 = sshllo.u32 %s2450_s29, %s2548_s24 }
  0xbb   : > { %v623_v12 = vld [vmem:[%s2706_s9] sm:%s614_s26]  ;;  %v625_v13 = vld [vmem:[%s2706_s9 + $0x28] sm:%s614_s26] }
  0xbc   : > { %624 = vst [vmem:[%s2709_s10] sm:%s614_s26] %v623_v12  ;;  %626 = vst [vmem:[%s2709_s10 + $0x20] sm:%s614_s26] %v625_v13 }
  0xbd   : > { %v627_v14 = vld [vmem:[%s2706_s9 + $0x50] sm:%s614_s26]  ;;  %v629_v15 = vld [vmem:[%s2706_s9 + $0x78] sm:%s614_s26] }
  0xbe   : > { %628 = vst [vmem:[%s2709_s10 + $0x40] sm:%s614_s26] %v627_v14  ;;  %630 = vst [vmem:[%s2709_s10 + $0x60] sm:%s614_s26] %v629_v15 }
  0xbf   : > { %v631_v16 = vld [vmem:[%s2706_s9 + $0xa0] sm:%s614_s26]  ;;  %v633_v17 = vld [vmem:[%s2706_s9 + $0xc8] sm:%s614_s26] }
  0xc0   : > { %632 = vst [vmem:[%s2709_s10 + $0x80] sm:%s614_s26] %v631_v16  ;;  %634 = vst [vmem:[%s2709_s10 + $0xa0] sm:%s614_s26] %v633_v17 }
  0xc1 PF: > { %p1734_p13 = scmp.ge.u32.totalorder %s2542_s21, 8 }
  0xc2   : > { %s2451_s19 = smov (!%p1734_p13), 0  }
  0xc3   : > { %171 = sbr.rel (%p1734_p13) target bundleno = 202 (0xca), region = 40  ;;  %s172_s20 = sshllo.u32 (!%p1734_p13), %s2451_s19, %s2542_s21 }
  0xc4   : > { %v181_v18 = vld [vmem:[%s2540_s11] sm:%s172_s20] (!%p1734_p13)  ;;  %v183_v19 = vld [vmem:[%s2540_s11 + $0x28] sm:%s172_s20] (!%p1734_p13) }
  0xc5   : > { %182 = vst [vmem:[%s2544_s22] sm:%s172_s20] (!%p1734_p13), %v181_v18  ;;  %184 = vst [vmem:[%s2544_s22 + $0x20] sm:%s172_s20] (!%p1734_p13), %v183_v19 }
  0xc6   : > { %v185_v20 = vld [vmem:[%s2540_s11 + $0x50] sm:%s172_s20] (!%p1734_p13)  ;;  %v187_v21 = vld [vmem:[%s2540_s11 + $0x78] sm:%s172_s20] (!%p1734_p13) }
  0xc7   : > { %186 = vst [vmem:[%s2544_s22 + $0x40] sm:%s172_s20] (!%p1734_p13), %v185_v20  ;;  %188 = vst [vmem:[%s2544_s22 + $0x60] sm:%s172_s20] (!%p1734_p13), %v187_v21 }
  0xc8   : > { %v189_v22 = vld [vmem:[%s2540_s11 + $0xa0] sm:%s172_s20] (!%p1734_p13)  ;;  %v191_v23 = vld [vmem:[%s2540_s11 + $0xc8] sm:%s172_s20] (!%p1734_p13) }
  0xc9   : > { %190 = vst [vmem:[%s2544_s22 + $0x80] sm:%s172_s20] (!%p1734_p13), %v189_v22  ;;  %192 = vst [vmem:[%s2544_s22 + $0xa0] sm:%s172_s20] (!%p1734_p13), %v191_v23 }
  0xca PF: > { %p1735_p0 = scmp.ge.s32.totalorder %s2320_s18, 1  ;;  %p637_p1 = scmp.lt.s32.totalorder %s2320_s18, 5 }
  0xcc   : > { %p638_p2 = pnand %p1735_p0, %p637_p1 }
  0xcd   : > { %s644_s21 = sand.u32 (!%p638_p2), 1, %s2296_s12   ;;  %v702_v24 = vld [vmem:[%s3374_s2] sm:$0xff] (!%p638_p2)  ;;  %v2452_v25 = vmov (!%p638_p2), 0   ;;  %vm828_vm0 = vcmask (!%p638_p2), 392192  }
  0xce   : > { %641 = sbr.rel (%p638_p2) target bundleno = 626 (0x272), region = 94  ;;  %864 = vmatprep.mubr.bf16.mxu0 (!%p638_p2), %v2452_v25  ;;  %905 = vmatprep.mubr.bf16.mxu1 (!%p638_p2), %v2452_v25  ;;  %v701_v60 = vld [vmem:[%s3373_s1] sm:$0xf] (!%p638_p2)  ;;  %s1736_s30 = sshll.u32 (!%p638_p2), %s644_s21, 5 }
  0xcf   : > { %s1808_s11 = smul.u32 (!%p638_p2), 192, %s644_s21  ;;  %2137 = vset.pattern.permute.xlu0 (!%p638_p2), %v2452_v25  ;;  %s2933_s4 = scalar_lea.vmem (!%p638_p2), [#allocation3], %s1736_s30  }
  0xd0   : > { %705 = vperm.xlu0 (!%p638_p2), %2137, %v702_v24  }
  0xd1   : > { %s2896_s22 = scalar_lea.vmem (!%p638_p2), [#allocation2], %s1808_s11 }
  0xd2   : > { %v677_v26 = vld [vmem:[%s2896_s22] sm:$0xff] (!%p638_p2)  ;;  %v678_v28 = vld [vmem:[%s2896_s22 + $0x8] sm:$0xff] (!%p638_p2)  ;;  %v679_v48 = vld [vmem:[%s2896_s22 + $0x10] sm:$0xff] (!%p638_p2) }
  0xd3   : > { %v681_v27 = vld [vmem:[%s2896_s22 + $0x20] sm:$0xff] (!%p638_p2)  ;;  %v682_v30 = vld [vmem:[%s2896_s22 + $0x28] sm:$0xff] (!%p638_p2)  ;;  %v683_v49 = vld [vmem:[%s2896_s22 + $0x30] sm:$0xff] (!%p638_p2) }
  0xd4   : > { %v1738_v29 = vcombine.high (!%p638_p2), %v677_v26, %v681_v27  ;;  %v1737_v31 = vcombine.low (!%p638_p2), %v677_v26, %v681_v27  ;;  %v685_v32 = vld [vmem:[%s2896_s22 + $0x40] sm:$0xff] (!%p638_p2)  ;;  %v1740_v34 = vcombine.high (!%p638_p2), %v678_v28, %v682_v30  ;;  %v1739_v35 = vcombine.low (!%p638_p2), %v678_v28, %v682_v30  ;;  %v686_v37 = vld [vmem:[%s2896_s22 + $0x48] sm:$0xff] (!%p638_p2)  ;;  %v680_v50 = vld [vmem:[%s2896_s22 + $0x18] sm:$0xff] (!%p638_p2) }
  0xd5   : > { %v689_v33 = vld [vmem:[%s2896_s22 + $0x60] sm:$0xff]  ;;  %v690_v38 = vld [vmem:[%s2896_s22 + $0x68] sm:$0xff]  ;;  %v684_v51 = vld [vmem:[%s2896_s22 + $0x38] sm:$0xff]  ;;  %v1742_v54 = vcombine.high %v679_v48, %v683_v49  ;;  %v1741_v61 = vcombine.low %v679_v48, %v683_v49  ;;  %s1770_s12 = sshll.u32 (%p2523_p6), %s2304_s14, 3  ;;  %s1809_s0 = smul.u32 (%p2523_p6), 10, %s2308_s15 }
  0xd6   : > { %v1746_v36 = vcombine.high %v685_v32, %v689_v33  ;;  %v693_v39 = vld [vmem:[%s2896_s22 + $0x80] sm:$0xff]  ;;  %832 = vmatprep.subr.bf16.mxu0 %v1738_v29  ;;  %v1748_v40 = vcombine.high %v686_v37, %v690_v38  ;;  %v694_v42 = vld [vmem:[%s2896_s22 + $0x88] sm:$0xff]  ;;  %873 = vmatprep.subr.bf16.mxu1 %v1740_v34  ;;  %v1745_v44 = vcombine.low %v685_v32, %v689_v33  ;;  %v687_v56 = vld [vmem:[%s2896_s22 + $0x50] sm:$0xff]  ;;  %s1064_s6 = ssub.s32 (%p2523_p6), 10, %s1770_s12 }
  0xd7   : > { %v697_v41 = vld [vmem:[%s2896_s22 + $0xa0] sm:$0xff]  ;;  %v698_v43 = vld [vmem:[%s2896_s22 + $0xa8] sm:$0xff]  ;;  %833 = vmatpush1.bf16.msra.mxu0 %v1737_v31  ;;  %874 = vmatpush1.bf16.msra.mxu1 %v1739_v35  ;;  %v1747_v45 = vcombine.low %v686_v37, %v690_v38  ;;  %v1744_v55 = vcombine.high %v680_v50, %v684_v51  ;;  %v691_v57 = vld [vmem:[%s2896_s22 + $0x70] sm:$0xff]  ;;  %v1743_v62 = vcombine.low %v680_v50, %v684_v51  ;;  %p1065_p3 = scmp.lt.s32.totalorder (%p2523_p6), %s1064_s6, 8  ;;  %s1070_s8 = sadd.s32 (%p2523_p6), %s1809_s0, %s1770_s12 }
  0xd8   : > { %834 = vmatprep.subr.bf16.mxu0 %v1746_v36  ;;  %v1754_v46 = vcombine.high %v693_v39, %v697_v41  ;;  %875 = vmatprep.subr.bf16.mxu1 %v1748_v40  ;;  %v1756_v47 = vcombine.high %v694_v42, %v698_v43  ;;  %v1753_v52 = vcombine.low %v693_v39, %v697_v41  ;;  %v688_v58 = vld [vmem:[%s2896_s22 + $0x58] sm:$0xff]  ;;  %v695_v1 = vld [vmem:[%s2896_s22 + $0x90] sm:$0xff]  ;;  %s1773_s7 = sshll.u32 (%p2523_p6), %s1070_s8, 2 }
  0xd9   : > { %v1755_v53 = vcombine.low %v694_v42, %v698_v43  ;;  %v692_v59 = vld [vmem:[%s2896_s22 + $0x78] sm:$0xff]  ;;  %v1750_v63 = vcombine.high %v687_v56, %v691_v57  ;;  %v699_v2 = vld [vmem:[%s2896_s22 + $0xb0] sm:$0xff]  ;;  %v1749_v5 = vcombine.low %v687_v56, %v691_v57  ;;  %s2946_s29 = scalar_lea.vmem (%p2523_p6), %s3375_s3, %s1773_s7  }
  0xda   : > { %v1752_v0 = vcombine.high %v688_v58, %v692_v59  ;;  %v696_v3 = vld [vmem:[%s2896_s22 + $0x98] sm:$0xff]  ;;  %v1751_v6 = vcombine.low %v688_v58, %v692_v59  ;;  %v1758_v7 = vcombine.high %v695_v1, %v699_v2  ;;  %v1757_v9 = vcombine.low %v695_v1, %v699_v2 }
  0xdb   : > { %835 = vmatpush1.bf16.msra.mxu0 %v1745_v44  ;;  %876 = vmatpush1.bf16.msra.mxu1 %v1747_v45  ;;  %v700_v4 = vld [vmem:[%s2896_s22 + $0xb8] sm:$0xff] }
  0xdc   : > { %836 = vmatprep.subr.bf16.mxu0 %v1754_v46  ;;  %877 = vmatprep.subr.bf16.mxu1 %v1756_v47  ;;  %v1760_v8 = vcombine.high %v696_v3, %v700_v4  ;;  %v1759_v10 = vcombine.low %v696_v3, %v700_v4 }
  0xdf   : > { %837 = vmatpush1.bf16.msra.mxu0 %v1753_v52  ;;  %878 = vmatpush1.bf16.msra.mxu1 %v1755_v53 }
  0xe0   : > { %914 = vmatprep.subr.bf16.mxu0 %v1742_v54  ;;  %955 = vmatprep.subr.bf16.mxu1 %v1744_v55 }
  0xe2   : > { %1761 = vmatmul.mubr.msk.bf16.vlgmr.msra.gmra.mrb[0].mxu0 %vm828_vm0, %v701_v60  ;;  %1762 = vmatmul.mubr.msk.bf16.vlgmr.msra.gmra.mrb[0].mxu1 %vm828_vm0, %v701_v60 }
  0xe3   : > { %915 = vmatpush1.bf16.msra.mxu0 %v1741_v61  ;;  %956 = vmatpush1.bf16.msra.mxu1 %v1743_v62 }
  0xe4   : > { %916 = vmatprep.subr.bf16.mxu0 %v1750_v63  ;;  %957 = vmatprep.subr.bf16.mxu1 %v1752_v0 }
  0xe5   : > { %946 = vmatprep.mubr.bf16.mxu0 %v2452_v25  ;;  %987 = vmatprep.mubr.bf16.mxu1 %v2452_v25 }
  0xe7   : > { %917 = vmatpush1.bf16.msra.mxu0 %v1749_v5  ;;  %958 = vmatpush1.bf16.msra.mxu1 %v1751_v6 }
  0xe8   : > { %918 = vmatprep.subr.bf16.mxu0 %v1758_v7  ;;  %959 = vmatprep.subr.bf16.mxu1 %v1760_v8 }
  0xeb   : > { %919 = vmatpush1.bf16.msra.mxu0 %v1757_v9  ;;  %960 = vmatpush1.bf16.msra.mxu1 %v1759_v10 }
  0xee   : > { %1763 = vmatmul.mubr.msk.bf16.vlgmr.msra.gmra.mrb[4].mxu0 %vm828_vm0, %v701_v60  ;;  %1764 = vmatmul.mubr.msk.bf16.vlgmr.msra.gmra.mrb[4].mxu1 %vm828_vm0, %v701_v60 }
 0x14f   : > { %v706_v11 = vpop.permute.xlu0 %705 }
 0x1b5   : > { %v866_v12 = vpop.f32.mrb[0].mxu0  ;;  %v907_v14 = vpop.f32.mrb[0].mxu1 }
 0x1b6   : > { %v867_v13 = vadd.f32 %v866_v12, %v706_v11  ;;  %v868_v15 = vpop.f32.mrb[1].mxu0  ;;  %v908_v16 = vadd.f32 %v907_v14, %v706_v11  ;;  %v909_v18 = vpop.f32.mrb[1].mxu1 }
 0x1b7   : > { %v869_v17 = vadd.f32 %v868_v15, %v706_v11  ;;  %v870_v19 = vpop.f32.mrb[2].mxu0  ;;  %v910_v21 = vadd.f32 %v909_v18, %v706_v11  ;;  %v911_v22 = vpop.f32.mrb[2].mxu1 }
 0x1b8   : > { %vm996_vm1 = vcmp.ge.f32.partialorder %v867_v13, 0.0  ;;  %v1004_v20 = vmul.f32 0.2, %v867_v13  ;;  %v871_v23 = vpop.f32.mrb[3].mxu0  ;;  %vm998_vm2 = vcmp.ge.f32.partialorder %v908_v16, 0.0  ;;  %v912_v28 = vpop.f32.mrb[3].mxu1 }
 0x1b9   : > { %v1006_v24 = vmul.f32 0.2, %v908_v16  ;;  %vm997_vm3 = vcmp.ge.f32.partialorder %v869_v17, 0.0  ;;  %v1005_v25 = vmul.f32 0.2, %v869_v17  ;;  %vm999_vm4 = vcmp.ge.f32.partialorder %v910_v21, 0.0 }
 0x1ba   : > { %v1012_v26 = vsel %vm996_vm1, %v867_v13, %v1004_v20  ;;  %v1007_v27 = vmul.f32 0.2, %v910_v21 }
 0x1bb   : > { %v1014_v29 = vsel %vm998_vm2, %v908_v16, %v1006_v24  ;;  %v1013_v30 = vsel %vm997_vm3, %v869_v17, %v1005_v25 }
 0x1bc   : > { %v1798_v31 = vpack.c.bf16 %v1013_v30, %v1012_v26  ;;  %v1015_v32 = vsel %vm999_vm4, %v910_v21, %v1007_v27 }
 0x1bd   : > { %v1799_v33 = vpack.c.bf16 %v1015_v32, %v1014_v29 }
 0x1be   : > { %1052 = vst [vmem:[%s2933_s4] sm:$0xff] %v1798_v31 }
 0x1bf   : > { %1053 = vst [vmem:[%s2933_s4 + $0x8] sm:$0xff] %v1799_v33 }
 0x1c1   : > { %v948_v34 = vpop.f32.mrb[4].mxu0  ;;  %v989_v36 = vpop.f32.mrb[4].mxu1 }
 0x1c2   : > { %v949_v35 = vadd.f32 %v948_v34, %v706_v11  ;;  %v950_v37 = vpop.f32.mrb[5].mxu0  ;;  %v990_v38 = vadd.f32 %v989_v36, %v706_v11  ;;  %v991_v40 = vpop.f32.mrb[5].mxu1 }
 0x1c3   : > { %v951_v39 = vadd.f32 %v950_v37, %v706_v11  ;;  %v952_v41 = vpop.f32.mrb[6].mxu0  ;;  %v992_v43 = vadd.f32 %v991_v40, %v706_v11  ;;  %v993_v44 = vpop.f32.mrb[6].mxu1 }
 0x1c4   : > { %vm1000_vm5 = vcmp.ge.f32.partialorder %v949_v35, 0.0  ;;  %v1008_v42 = vmul.f32 0.2, %v949_v35  ;;  %v953_v45 = vpop.f32.mrb[7].mxu0  ;;  %vm1002_vm6 = vcmp.ge.f32.partialorder %v990_v38, 0.0  ;;  %v994_v50 = vpop.f32.mrb[7].mxu1 }
 0x1c5   : > { %v1010_v46 = vmul.f32 0.2, %v990_v38  ;;  %vm1001_vm7 = vcmp.ge.f32.partialorder %v951_v39, 0.0  ;;  %v1009_v47 = vmul.f32 0.2, %v951_v39  ;;  %vm1003_vm8 = vcmp.ge.f32.partialorder %v992_v43, 0.0 }
 0x1c6   : > { %v1016_v48 = vsel %vm1000_vm5, %v949_v35, %v1008_v42  ;;  %v1011_v49 = vmul.f32 0.2, %v992_v43  ;;  %1062 = sbr.rel (!%p2523_p6) target bundleno = 626 (0x272), region = 102 }
 0x1c7   : > { %v1018_v51 = vsel %vm1002_vm6, %v990_v38, %v1010_v46  ;;  %v1017_v52 = vsel %vm1001_vm7, %v951_v39, %v1009_v47 }
 0x1c8   : > { %v1800_v53 = vpack.c.bf16 %v1017_v52, %v1016_v48  ;;  %v1019_v54 = vsel %vm1003_vm8, %v992_v43, %v1011_v49 }
 0x1c9   : > { %v1801_v55 = vpack.c.bf16 %v1019_v54, %v1018_v51 }
 0x1ca   : > { %1054 = vst [vmem:[%s2933_s4 + $0x10] sm:$0xff] %v1800_v53 }
 0x1cb   : > { %1055 = vst [vmem:[%s2933_s4 + $0x18] sm:$0xff] %v1801_v55 }
 0x1cd   : > { %s3434_s6 = smov (!%p1065_p3, %s1064_s6), 8 }
 0x1ce   : > { %s1771_s26 = sshll.u32 %s3434_s6, 6  ;;  %s2948_s19 = sshll.u32 %s3434_s6, 2 }
 0x1cf   : > { %p1775_p4 = scmp.eq.s32.totalorder %s1771_s26, 0 }
 0x1d0   : > { %p1077_p6 = scmp.lt.u32.totalorder (!%p1775_p4), %s2948_s19, 8 }
 0x1d1   : > { %1076 = sbr.rel (%p1775_p4) target bundleno = 626 (0x272), region = 106 }
 0x1d8   : > { %1080 = sbr.rel (%p1077_p6) target bundleno = 617 (0x269), region = 110  ;;  %s2952_s14 = sand.u32 (!%p1077_p6), 7, %s2948_s19  }
 0x1d9   : > { %p1096_p5 = scmp.eq.s32.totalorder (!%p1077_p6), %s2952_s14, 0  ;;  %p1776_p7 = scmp.ne.s32.totalorder (!%p1077_p6), %s2952_s14, 0 }
 0x1df   : > { %1099 = sbr.rel (%p1776_p7) target bundleno = 546 (0x222), region = 125  ;;  %s1100_s15 = sshrl.u32 (!%p1776_p7), %s2948_s19, 3 }
 0x1e0   : > { %s2959_s23 = sshrl.u32 (!%p1776_p7), %s1100_s15, 6 }
 0x1e1   : > { %p1777_p8 = scmp.le.s32.totalorder (!%p1776_p7), %s2959_s23, 0 }
 0x1e6   : > { %1629 = sbr.rel (%p1777_p8) target bundleno = 526 (0x20e), region = 273  ;;  %s3399_s20 = smov (!%p1777_p8), %s2946_s29 }
 0x1e7   : > { %s3400_s21 = smov (!%p1777_p8), %s2933_s4  ;;  %s2968_s24 = smov (!%p1777_p8), 0  }
 0x1e8   : > { %s2970_s9 = smov (!%p1777_p8), 0  }
 0x1ed LB: >> { %v1113_v56 = vld [vmem:[%s2392_s21] sm:$0xff]  ;;  %v1115_v57 = vld [vmem:[%s2392_s21 + $0x8] sm:$0xff]  ;;  %v1117_v58 = vld [vmem:[%s2392_s21 + $0x10] sm:$0xff]  ;;  %s1241_s11 = sadd.s32 1, %s2396_s24  ;;  %s1107_s9 = sadd.s32 1, %s2400_s9   ;;  %s2400_s9 = sphi %s2970_s9, %s1107_s9   ;;  %s2396_s24 = sphi %s2968_s24, %s3403_s24   ;;  %s2392_s21 = sphi %s3400_s21, %s3402_s21   ;;  %s2388_s20 = sphi %s3399_s20, %s3401_s20  }
 0x1ee   : >> { %1114 = vst [vmem:[%s2388_s20] sm:$0xff] %v1113_v56  ;;  %1116 = vst [vmem:[%s2388_s20 + $0x8] sm:$0xff] %v1115_v57  ;;  %v1119_v59 = vld [vmem:[%s2392_s21 + $0x18] sm:$0xff]  ;;  %v1121_v60 = vld [vmem:[%s2392_s21 + $0x20] sm:$0xff]  ;;  %p1242_p9 = scmp.ge.s32.totalorder %s1241_s11, %s2959_s23  ;;  %p1106_p10 = scmp.ge.s32.totalorder %s1107_s9, %s2959_s23 }
 0x1ef   : >> { %1118 = vst [vmem:[%s2388_s20 + $0x10] sm:$0xff] %v1117_v58  ;;  %v1123_v61 = vld [vmem:[%s2392_s21 + $0x28] sm:$0xff]  ;;  %1120 = vst [vmem:[%s2388_s20 + $0x18] sm:$0xff] %v1119_v59  ;;  %v1125_v62 = vld [vmem:[%s2392_s21 + $0x30] sm:$0xff] }
 0x1f0   : >> { %1122 = vst [vmem:[%s2388_s20 + $0x20] sm:$0xff] %v1121_v60  ;;  %1124 = vst [vmem:[%s2388_s20 + $0x28] sm:$0xff] %v1123_v61  ;;  %v1127_v63 = vld [vmem:[%s2392_s21 + $0x38] sm:$0xff]  ;;  %v1129_v0 = vld [vmem:[%s2392_s21 + $0x40] sm:$0xff]  ;;  %s3436_s11 = smov (%p1242_p9, %s1241_s11), 0 }
 0x1f1   : >> { %1126 = vst [vmem:[%s2388_s20 + $0x30] sm:$0xff] %v1125_v62  ;;  %1128 = vst [vmem:[%s2388_s20 + $0x38] sm:$0xff] %v1127_v63  ;;  %v1131_v1 = vld [vmem:[%s2392_s21 + $0x48] sm:$0xff]  ;;  %v1133_v2 = vld [vmem:[%s2392_s21 + $0x50] sm:$0xff]  ;;  %s1778_s22 = sshll.u32 %s3436_s11, 9  ;;  %s3403_s24 = smov %s3436_s11 }
 0x1f2   : >> { %1130 = vst [vmem:[%s2388_s20 + $0x40] sm:$0xff] %v1129_v0  ;;  %v1135_v3 = vld [vmem:[%s2392_s21 + $0x58] sm:$0xff]  ;;  %1132 = vst [vmem:[%s2388_s20 + $0x48] sm:$0xff] %v1131_v1  ;;  %v1137_v4 = vld [vmem:[%s2392_s21 + $0x60] sm:$0xff]  ;;  %s3026_s10 = scalar_lea.vmem %s2933_s4, %s1778_s22 [#allocation3]   ;;  %s3029_s5 = scalar_lea.vmem %s2946_s29, %s1778_s22  }
 0x1f3   : >> { %1134 = vst [vmem:[%s2388_s20 + $0x50] sm:$0xff] %v1133_v2  ;;  %1136 = vst [vmem:[%s2388_s20 + $0x58] sm:$0xff] %v1135_v3  ;;  %v1139_v5 = vld [vmem:[%s2392_s21 + $0x68] sm:$0xff]  ;;  %v1141_v6 = vld [vmem:[%s2392_s21 + $0x70] sm:$0xff] }
 0x1f4   : >> { %1138 = vst [vmem:[%s2388_s20 + $0x60] sm:$0xff] %v1137_v4  ;;  %1140 = vst [vmem:[%s2388_s20 + $0x68] sm:$0xff] %v1139_v5  ;;  %v1143_v7 = vld [vmem:[%s2392_s21 + $0x78] sm:$0xff]  ;;  %v1145_v8 = vld [vmem:[%s2392_s21 + $0x80] sm:$0xff] }
 0x1f5   : >> { %1142 = vst [vmem:[%s2388_s20 + $0x70] sm:$0xff] %v1141_v6  ;;  %v1147_v9 = vld [vmem:[%s2392_s21 + $0x88] sm:$0xff]  ;;  %1144 = vst [vmem:[%s2388_s20 + $0x78] sm:$0xff] %v1143_v7  ;;  %v1149_v10 = vld [vmem:[%s2392_s21 + $0x90] sm:$0xff] }
 0x1f6   : >> { %1146 = vst [vmem:[%s2388_s20 + $0x80] sm:$0xff] %v1145_v8  ;;  %1148 = vst [vmem:[%s2388_s20 + $0x88] sm:$0xff] %v1147_v9  ;;  %v1151_v11 = vld [vmem:[%s2392_s21 + $0x98] sm:$0xff]  ;;  %v1153_v12 = vld [vmem:[%s2392_s21 + $0xa0] sm:$0xff] }
 0x1f7   : >> { %1150 = vst [vmem:[%s2388_s20 + $0x90] sm:$0xff] %v1149_v10  ;;  %1152 = vst [vmem:[%s2388_s20 + $0x98] sm:$0xff] %v1151_v11  ;;  %v1155_v13 = vld [vmem:[%s2392_s21 + $0xa8] sm:$0xff]  ;;  %v1157_v14 = vld [vmem:[%s2392_s21 + $0xb0] sm:$0xff] }
 0x1f8   : >> { %1154 = vst [vmem:[%s2388_s20 + $0xa0] sm:$0xff] %v1153_v12  ;;  %v1159_v15 = vld [vmem:[%s2392_s21 + $0xb8] sm:$0xff]  ;;  %1156 = vst [vmem:[%s2388_s20 + $0xa8] sm:$0xff] %v1155_v13  ;;  %v1161_v16 = vld [vmem:[%s2392_s21 + $0xc0] sm:$0xff] }
 0x1f9   : >> { %1158 = vst [vmem:[%s2388_s20 + $0xb0] sm:$0xff] %v1157_v14  ;;  %1160 = vst [vmem:[%s2388_s20 + $0xb8] sm:$0xff] %v1159_v15  ;;  %v1163_v17 = vld [vmem:[%s2392_s21 + $0xc8] sm:$0xff]  ;;  %v1165_v18 = vld [vmem:[%s2392_s21 + $0xd0] sm:$0xff] }
 0x1fa   : >> { %1162 = vst [vmem:[%s2388_s20 + $0xc0] sm:$0xff] %v1161_v16  ;;  %1164 = vst [vmem:[%s2388_s20 + $0xc8] sm:$0xff] %v1163_v17  ;;  %v1167_v19 = vld [vmem:[%s2392_s21 + $0xd8] sm:$0xff]  ;;  %v1169_v20 = vld [vmem:[%s2392_s21 + $0xe0] sm:$0xff] }
 0x1fb   : >> { %1166 = vst [vmem:[%s2388_s20 + $0xd0] sm:$0xff] %v1165_v18  ;;  %v1171_v21 = vld [vmem:[%s2392_s21 + $0xe8] sm:$0xff]  ;;  %1168 = vst [vmem:[%s2388_s20 + $0xd8] sm:$0xff] %v1167_v19  ;;  %v1173_v22 = vld [vmem:[%s2392_s21 + $0xf0] sm:$0xff] }
 0x1fc   : >> { %1170 = vst [vmem:[%s2388_s20 + $0xe0] sm:$0xff] %v1169_v20  ;;  %1172 = vst [vmem:[%s2388_s20 + $0xe8] sm:$0xff] %v1171_v21  ;;  %v1175_v23 = vld [vmem:[%s2392_s21 + $0xf8] sm:$0xff]  ;;  %v1177_v24 = vld [vmem:[%s2392_s21 + $0x100] sm:$0xff] }
 0x1fd   : >> { %1174 = vst [vmem:[%s2388_s20 + $0xf0] sm:$0xff] %v1173_v22  ;;  %1176 = vst [vmem:[%s2388_s20 + $0xf8] sm:$0xff] %v1175_v23  ;;  %v1179_v25 = vld [vmem:[%s2392_s21 + $0x108] sm:$0xff]  ;;  %v1181_v26 = vld [vmem:[%s2392_s21 + $0x110] sm:$0xff] }
 0x1fe   : >> { %1178 = vst [vmem:[%s2388_s20 + $0x100] sm:$0xff] %v1177_v24  ;;  %v1183_v27 = vld [vmem:[%s2392_s21 + $0x118] sm:$0xff]  ;;  %1180 = vst [vmem:[%s2388_s20 + $0x108] sm:$0xff] %v1179_v25  ;;  %v1185_v28 = vld [vmem:[%s2392_s21 + $0x120] sm:$0xff] }
 0x1ff   : >> { %1182 = vst [vmem:[%s2388_s20 + $0x110] sm:$0xff] %v1181_v26  ;;  %1184 = vst [vmem:[%s2388_s20 + $0x118] sm:$0xff] %v1183_v27  ;;  %v1187_v29 = vld [vmem:[%s2392_s21 + $0x128] sm:$0xff]  ;;  %v1189_v30 = vld [vmem:[%s2392_s21 + $0x130] sm:$0xff] }
 0x200   : >> { %1186 = vst [vmem:[%s2388_s20 + $0x120] sm:$0xff] %v1185_v28  ;;  %1188 = vst [vmem:[%s2388_s20 + $0x128] sm:$0xff] %v1187_v29  ;;  %v1191_v31 = vld [vmem:[%s2392_s21 + $0x138] sm:$0xff]  ;;  %v1193_v32 = vld [vmem:[%s2392_s21 + $0x140] sm:$0xff] }
 0x201   : >> { %1190 = vst [vmem:[%s2388_s20 + $0x130] sm:$0xff] %v1189_v30  ;;  %v1195_v33 = vld [vmem:[%s2392_s21 + $0x148] sm:$0xff]  ;;  %1192 = vst [vmem:[%s2388_s20 + $0x138] sm:$0xff] %v1191_v31  ;;  %v1197_v34 = vld [vmem:[%s2392_s21 + $0x150] sm:$0xff] }
 0x202   : >> { %1194 = vst [vmem:[%s2388_s20 + $0x140] sm:$0xff] %v1193_v32  ;;  %1196 = vst [vmem:[%s2388_s20 + $0x148] sm:$0xff] %v1195_v33  ;;  %v1199_v35 = vld [vmem:[%s2392_s21 + $0x158] sm:$0xff]  ;;  %v1201_v36 = vld [vmem:[%s2392_s21 + $0x160] sm:$0xff] }
 0x203   : >> { %1198 = vst [vmem:[%s2388_s20 + $0x150] sm:$0xff] %v1197_v34  ;;  %1200 = vst [vmem:[%s2388_s20 + $0x158] sm:$0xff] %v1199_v35  ;;  %v1203_v37 = vld [vmem:[%s2392_s21 + $0x168] sm:$0xff]  ;;  %v1205_v38 = vld [vmem:[%s2392_s21 + $0x170] sm:$0xff] }
 0x204   : >> { %1202 = vst [vmem:[%s2388_s20 + $0x160] sm:$0xff] %v1201_v36  ;;  %v1207_v39 = vld [vmem:[%s2392_s21 + $0x178] sm:$0xff]  ;;  %1204 = vst [vmem:[%s2388_s20 + $0x168] sm:$0xff] %v1203_v37  ;;  %v1209_v40 = vld [vmem:[%s2392_s21 + $0x180] sm:$0xff] }
 0x205   : >> { %1206 = vst [vmem:[%s2388_s20 + $0x170] sm:$0xff] %v1205_v38  ;;  %1208 = vst [vmem:[%s2388_s20 + $0x178] sm:$0xff] %v1207_v39  ;;  %v1211_v41 = vld [vmem:[%s2392_s21 + $0x188] sm:$0xff]  ;;  %v1213_v42 = vld [vmem:[%s2392_s21 + $0x190] sm:$0xff] }
 0x206   : >> { %1210 = vst [vmem:[%s2388_s20 + $0x180] sm:$0xff] %v1209_v40  ;;  %1212 = vst [vmem:[%s2388_s20 + $0x188] sm:$0xff] %v1211_v41  ;;  %v1215_v43 = vld [vmem:[%s2392_s21 + $0x198] sm:$0xff]  ;;  %v1217_v44 = vld [vmem:[%s2392_s21 + $0x1a0] sm:$0xff] }
 0x207   : >> { %1214 = vst [vmem:[%s2388_s20 + $0x190] sm:$0xff] %v1213_v42  ;;  %v1219_v45 = vld [vmem:[%s2392_s21 + $0x1a8] sm:$0xff]  ;;  %1216 = vst [vmem:[%s2388_s20 + $0x198] sm:$0xff] %v1215_v43  ;;  %v1221_v46 = vld [vmem:[%s2392_s21 + $0x1b0] sm:$0xff]  ;;  %1109 = sbr.rel (!%p1106_p10) target bundleno = 493 (0x1ed), region = 279 }
 0x208   : >> { %1218 = vst [vmem:[%s2388_s20 + $0x1a0] sm:$0xff] %v1217_v44  ;;  %1220 = vst [vmem:[%s2388_s20 + $0x1a8] sm:$0xff] %v1219_v45  ;;  %v1223_v47 = vld [vmem:[%s2392_s21 + $0x1b8] sm:$0xff]  ;;  %v1225_v48 = vld [vmem:[%s2392_s21 + $0x1c0] sm:$0xff] }
 0x209   : >> { %1222 = vst [vmem:[%s2388_s20 + $0x1b0] sm:$0xff] %v1221_v46  ;;  %1224 = vst [vmem:[%s2388_s20 + $0x1b8] sm:$0xff] %v1223_v47  ;;  %v1227_v49 = vld [vmem:[%s2392_s21 + $0x1c8] sm:$0xff]  ;;  %v1229_v50 = vld [vmem:[%s2392_s21 + $0x1d0] sm:$0xff] }
 0x20a   : >> { %1226 = vst [vmem:[%s2388_s20 + $0x1c0] sm:$0xff] %v1225_v48  ;;  %v1231_v51 = vld [vmem:[%s2392_s21 + $0x1d8] sm:$0xff]  ;;  %1228 = vst [vmem:[%s2388_s20 + $0x1c8] sm:$0xff] %v1227_v49  ;;  %v1233_v52 = vld [vmem:[%s2392_s21 + $0x1e0] sm:$0xff] }
 0x20b   : >> { %1230 = vst [vmem:[%s2388_s20 + $0x1d0] sm:$0xff] %v1229_v50  ;;  %1232 = vst [vmem:[%s2388_s20 + $0x1d8] sm:$0xff] %v1231_v51  ;;  %v1235_v53 = vld [vmem:[%s2392_s21 + $0x1e8] sm:$0xff]  ;;  %v1237_v54 = vld [vmem:[%s2392_s21 + $0x1f0] sm:$0xff] }
 0x20c   : >> { %1234 = vst [vmem:[%s2388_s20 + $0x1e0] sm:$0xff] %v1233_v52  ;;  %1236 = vst [vmem:[%s2388_s20 + $0x1e8] sm:$0xff] %v1235_v53  ;;  %v1239_v55 = vld [vmem:[%s2392_s21 + $0x1f8] sm:$0xff]  ;;  %s3402_s21 = smov %s3026_s10 }
 0x20d   : >> { %1238 = vst [vmem:[%s2388_s20 + $0x1f0] sm:$0xff] %v1237_v54  ;;  %1240 = vst [vmem:[%s2388_s20 + $0x1f8] sm:$0xff] %v1239_v55  ;;  %s3401_s20 = smov %s3029_s5 }
 0x20e PF: > { %s3135_s30 = sand.u32 63, %s1100_s15   ;;  %s1802_s12 = sshll.u32 %s2959_s23, 13 }
 0x20f   : > { %s1252_s0 = sshra.s32 %s1802_s12, 4  ;;  %p1783_p11 = scmp.le.s32.totalorder %s3135_s30, 0 }
 0x210   : > { %s1253_s6 = scalar_lea.vmem %s2933_s4, %s1252_s0 [#allocation3]   ;;  %s1256_s8 = scalar_lea.vmem %s2946_s29, %s1252_s0  }
 0x211   : > { %1643 = sbr.rel (%p1783_p11) target bundleno = 546 (0x222), region = 284  ;;  %s2402_s7 = smov (!%p1783_p11), %s1256_s8  }
 0x212   : > { %s2406_s25 = smov (!%p1783_p11), %s1253_s6   ;;  %s2410_s28 = smov (!%p1783_p11), 0  }
 0x213   : > { %s2414_s26 = smov (!%p1783_p11), 0  }
 0x218 LB: >> { %v1268_v56 = vld [vmem:[%s2408_s25] sm:$0xff]  ;;  %s1270_s15 = sadd.s32 1, %s2412_s28  ;;  %s1262_s26 = sadd.s32 1, %s2416_s26   ;;  %s2416_s26 = sphi %s2414_s26, %s1262_s26   ;;  %s2412_s28 = sphi %s2410_s28, %s2411_s28   ;;  %s2408_s25 = sphi %s2406_s25, %s1275_s25   ;;  %s2404_s7 = sphi %s2402_s7, %s1276_s7  }
 0x219   : >> { %1269 = vst [vmem:[%s2404_s7] sm:$0xff] %v1268_v56  ;;  %p1271_p12 = scmp.ge.s32.totalorder %s1270_s15, %s3135_s30  ;;  %p1261_p13 = scmp.ge.s32.totalorder %s1262_s26, %s3135_s30 }
 0x21b   : >> { %s3438_s15 = smov (%p1271_p12, %s1270_s15), 0  ;;  %1264 = sbr.rel (!%p1261_p13) target bundleno = 536 (0x218), region = 290 }
 0x21c   : >> { %s1784_s23 = sshll.u32 %s3438_s15, 3  ;;  %s2411_s28 = smov %s3438_s15  }
 0x21d   : >> { %s1275_s25 = scalar_lea.vmem %s1253_s6, %s1784_s23 [#allocation3]   ;;  %s1276_s7 = scalar_lea.vmem %s1256_s8, %s1784_s23  }
 0x222 PF: > { %1279 = sbr.rel (%p1096_p5) target bundleno = 617 (0x269), region = 143  ;;  %s3147_s20 = ssub.s32 (!%p1096_p5), %s2948_s19, %s2952_s14 }
 0x223   : > { %s1285_s21 = sshrl.u32 (!%p1096_p5), %s2948_s19, 3  ;;  %s1282_s24 = scalar_lea.vmem (!%p1096_p5), %s2933_s4, %s3147_s20 [#allocation3] }
 0x224   : > { %s1284_s9 = scalar_lea.vmem (!%p1096_p5), %s2946_s29, %s3147_s20  ;;  %s3156_s11 = sshrl.u32 (!%p1096_p5), %s1285_s21, 6 }
 0x225   : > { %p1786_p0 = scmp.le.s32.totalorder (!%p1096_p5), %s3156_s11, 0 }
 0x229   : > { %1657 = sbr.rel (%p1786_p0) target bundleno = 593 (0x251), region = 295  ;;  %s3404_s22 = smov (!%p1786_p0), %s2946_s29 }
 0x22a   : > { %s3405_s10 = smov (!%p1786_p0), %s2933_s4  ;;  %s3165_s5 = smov (!%p1786_p0), 0  }
 0x22b   : > { %s3167_s30 = smov (!%p1786_p0), 0  }
 0x230 LB: >> { %v1298_v57 = vld [vmem:[%s2424_s10] sm:$0xff]  ;;  %v1300_v58 = vld [vmem:[%s2424_s10 + $0x8] sm:$0xff]  ;;  %v1302_v59 = vld [vmem:[%s2424_s10 + $0x10] sm:$0xff]  ;;  %s1426_s12 = sadd.s32 1, %s2428_s5  ;;  %s1292_s30 = sadd.s32 1, %s2432_s30   ;;  %s2432_s30 = sphi %s3167_s30, %s1292_s30   ;;  %s2428_s5 = sphi %s3165_s5, %s3408_s5   ;;  %s2424_s10 = sphi %s3405_s10, %s3407_s10   ;;  %s2420_s22 = sphi %s3404_s22, %s3406_s22  }
 0x231   : >> { %1299 = vst [vmem:[%s2420_s22] sm:$0xff] %v1298_v57  ;;  %1301 = vst [vmem:[%s2420_s22 + $0x8] sm:$0xff] %v1300_v58  ;;  %v1304_v60 = vld [vmem:[%s2424_s10 + $0x18] sm:$0xff]  ;;  %v1306_v61 = vld [vmem:[%s2424_s10 + $0x20] sm:$0xff]  ;;  %p1427_p1 = scmp.ge.s32.totalorder %s1426_s12, %s3156_s11  ;;  %p1291_p2 = scmp.ge.s32.totalorder %s1292_s30, %s3156_s11 }
 0x232   : >> { %1303 = vst [vmem:[%s2420_s22 + $0x10] sm:$0xff] %v1302_v59  ;;  %v1308_v62 = vld [vmem:[%s2424_s10 + $0x28] sm:$0xff]  ;;  %1305 = vst [vmem:[%s2420_s22 + $0x18] sm:$0xff] %v1304_v60  ;;  %v1310_v63 = vld [vmem:[%s2424_s10 + $0x30] sm:$0xff] }
 0x233   : >> { %1307 = vst [vmem:[%s2420_s22 + $0x20] sm:$0xff] %v1306_v61  ;;  %1309 = vst [vmem:[%s2420_s22 + $0x28] sm:$0xff] %v1308_v62  ;;  %v1312_v0 = vld [vmem:[%s2424_s10 + $0x38] sm:$0xff]  ;;  %v1314_v1 = vld [vmem:[%s2424_s10 + $0x40] sm:$0xff]  ;;  %s3440_s12 = smov (%p1427_p1, %s1426_s12), 0 }
 0x234   : >> { %1311 = vst [vmem:[%s2420_s22 + $0x30] sm:$0xff] %v1310_v63  ;;  %1313 = vst [vmem:[%s2420_s22 + $0x38] sm:$0xff] %v1312_v0  ;;  %v1316_v2 = vld [vmem:[%s2424_s10 + $0x48] sm:$0xff]  ;;  %v1318_v3 = vld [vmem:[%s2424_s10 + $0x50] sm:$0xff]  ;;  %s1787_s0 = sshll.u32 %s3440_s12, 9  ;;  %s3408_s5 = smov %s3440_s12 }
 0x235   : >> { %1315 = vst [vmem:[%s2420_s22 + $0x40] sm:$0xff] %v1314_v1  ;;  %v1320_v4 = vld [vmem:[%s2424_s10 + $0x58] sm:$0xff]  ;;  %1317 = vst [vmem:[%s2420_s22 + $0x48] sm:$0xff] %v1316_v2  ;;  %v1322_v5 = vld [vmem:[%s2424_s10 + $0x60] sm:$0xff]  ;;  %s3223_s6 = scalar_lea.vmem %s2933_s4, %s1787_s0 [#allocation3]   ;;  %s3226_s8 = scalar_lea.vmem %s2946_s29, %s1787_s0  }
 0x236   : >> { %1319 = vst [vmem:[%s2420_s22 + $0x50] sm:$0xff] %v1318_v3  ;;  %1321 = vst [vmem:[%s2420_s22 + $0x58] sm:$0xff] %v1320_v4  ;;  %v1324_v6 = vld [vmem:[%s2424_s10 + $0x68] sm:$0xff]  ;;  %v1326_v7 = vld [vmem:[%s2424_s10 + $0x70] sm:$0xff] }
 0x237   : >> { %1323 = vst [vmem:[%s2420_s22 + $0x60] sm:$0xff] %v1322_v5  ;;  %1325 = vst [vmem:[%s2420_s22 + $0x68] sm:$0xff] %v1324_v6  ;;  %v1328_v8 = vld [vmem:[%s2424_s10 + $0x78] sm:$0xff]  ;;  %v1330_v9 = vld [vmem:[%s2424_s10 + $0x80] sm:$0xff] }
 0x238   : >> { %1327 = vst [vmem:[%s2420_s22 + $0x70] sm:$0xff] %v1326_v7  ;;  %v1332_v10 = vld [vmem:[%s2424_s10 + $0x88] sm:$0xff]  ;;  %1329 = vst [vmem:[%s2420_s22 + $0x78] sm:$0xff] %v1328_v8  ;;  %v1334_v11 = vld [vmem:[%s2424_s10 + $0x90] sm:$0xff] }
 0x239   : >> { %1331 = vst [vmem:[%s2420_s22 + $0x80] sm:$0xff] %v1330_v9  ;;  %1333 = vst [vmem:[%s2420_s22 + $0x88] sm:$0xff] %v1332_v10  ;;  %v1336_v12 = vld [vmem:[%s2424_s10 + $0x98] sm:$0xff]  ;;  %v1338_v13 = vld [vmem:[%s2424_s10 + $0xa0] sm:$0xff] }
 0x23a   : >> { %1335 = vst [vmem:[%s2420_s22 + $0x90] sm:$0xff] %v1334_v11  ;;  %1337 = vst [vmem:[%s2420_s22 + $0x98] sm:$0xff] %v1336_v12  ;;  %v1340_v14 = vld [vmem:[%s2424_s10 + $0xa8] sm:$0xff]  ;;  %v1342_v15 = vld [vmem:[%s2424_s10 + $0xb0] sm:$0xff] }
 0x23b   : >> { %1339 = vst [vmem:[%s2420_s22 + $0xa0] sm:$0xff] %v1338_v13  ;;  %v1344_v16 = vld [vmem:[%s2424_s10 + $0xb8] sm:$0xff]  ;;  %1341 = vst [vmem:[%s2420_s22 + $0xa8] sm:$0xff] %v1340_v14  ;;  %v1346_v17 = vld [vmem:[%s2424_s10 + $0xc0] sm:$0xff] }
 0x23c   : >> { %1343 = vst [vmem:[%s2420_s22 + $0xb0] sm:$0xff] %v1342_v15  ;;  %1345 = vst [vmem:[%s2420_s22 + $0xb8] sm:$0xff] %v1344_v16  ;;  %v1348_v18 = vld [vmem:[%s2424_s10 + $0xc8] sm:$0xff]  ;;  %v1350_v19 = vld [vmem:[%s2424_s10 + $0xd0] sm:$0xff] }
 0x23d   : >> { %1347 = vst [vmem:[%s2420_s22 + $0xc0] sm:$0xff] %v1346_v17  ;;  %1349 = vst [vmem:[%s2420_s22 + $0xc8] sm:$0xff] %v1348_v18  ;;  %v1352_v20 = vld [vmem:[%s2424_s10 + $0xd8] sm:$0xff]  ;;  %v1354_v21 = vld [vmem:[%s2424_s10 + $0xe0] sm:$0xff] }
 0x23e   : >> { %1351 = vst [vmem:[%s2420_s22 + $0xd0] sm:$0xff] %v1350_v19  ;;  %v1356_v22 = vld [vmem:[%s2424_s10 + $0xe8] sm:$0xff]  ;;  %1353 = vst [vmem:[%s2420_s22 + $0xd8] sm:$0xff] %v1352_v20  ;;  %v1358_v23 = vld [vmem:[%s2424_s10 + $0xf0] sm:$0xff] }
 0x23f   : >> { %1355 = vst [vmem:[%s2420_s22 + $0xe0] sm:$0xff] %v1354_v21  ;;  %1357 = vst [vmem:[%s2420_s22 + $0xe8] sm:$0xff] %v1356_v22  ;;  %v1360_v24 = vld [vmem:[%s2424_s10 + $0xf8] sm:$0xff]  ;;  %v1362_v25 = vld [vmem:[%s2424_s10 + $0x100] sm:$0xff] }
 0x240   : >> { %1359 = vst [vmem:[%s2420_s22 + $0xf0] sm:$0xff] %v1358_v23  ;;  %1361 = vst [vmem:[%s2420_s22 + $0xf8] sm:$0xff] %v1360_v24  ;;  %v1364_v26 = vld [vmem:[%s2424_s10 + $0x108] sm:$0xff]  ;;  %v1366_v27 = vld [vmem:[%s2424_s10 + $0x110] sm:$0xff] }
 0x241   : >> { %1363 = vst [vmem:[%s2420_s22 + $0x100] sm:$0xff] %v1362_v25  ;;  %v1368_v28 = vld [vmem:[%s2424_s10 + $0x118] sm:$0xff]  ;;  %1365 = vst [vmem:[%s2420_s22 + $0x108] sm:$0xff] %v1364_v26  ;;  %v1370_v29 = vld [vmem:[%s2424_s10 + $0x120] sm:$0xff] }
 0x242   : >> { %1367 = vst [vmem:[%s2420_s22 + $0x110] sm:$0xff] %v1366_v27  ;;  %1369 = vst [vmem:[%s2420_s22 + $0x118] sm:$0xff] %v1368_v28  ;;  %v1372_v30 = vld [vmem:[%s2424_s10 + $0x128] sm:$0xff]  ;;  %v1374_v31 = vld [vmem:[%s2424_s10 + $0x130] sm:$0xff] }
 0x243   : >> { %1371 = vst [vmem:[%s2420_s22 + $0x120] sm:$0xff] %v1370_v29  ;;  %1373 = vst [vmem:[%s2420_s22 + $0x128] sm:$0xff] %v1372_v30  ;;  %v1376_v32 = vld [vmem:[%s2424_s10 + $0x138] sm:$0xff]  ;;  %v1378_v33 = vld [vmem:[%s2424_s10 + $0x140] sm:$0xff] }
 0x244   : >> { %1375 = vst [vmem:[%s2420_s22 + $0x130] sm:$0xff] %v1374_v31  ;;  %v1380_v34 = vld [vmem:[%s2424_s10 + $0x148] sm:$0xff]  ;;  %1377 = vst [vmem:[%s2420_s22 + $0x138] sm:$0xff] %v1376_v32  ;;  %v1382_v35 = vld [vmem:[%s2424_s10 + $0x150] sm:$0xff] }
 0x245   : >> { %1379 = vst [vmem:[%s2420_s22 + $0x140] sm:$0xff] %v1378_v33  ;;  %1381 = vst [vmem:[%s2420_s22 + $0x148] sm:$0xff] %v1380_v34  ;;  %v1384_v36 = vld [vmem:[%s2424_s10 + $0x158] sm:$0xff]  ;;  %v1386_v37 = vld [vmem:[%s2424_s10 + $0x160] sm:$0xff] }
 0x246   : >> { %1383 = vst [vmem:[%s2420_s22 + $0x150] sm:$0xff] %v1382_v35  ;;  %1385 = vst [vmem:[%s2420_s22 + $0x158] sm:$0xff] %v1384_v36  ;;  %v1388_v38 = vld [vmem:[%s2424_s10 + $0x168] sm:$0xff]  ;;  %v1390_v39 = vld [vmem:[%s2424_s10 + $0x170] sm:$0xff] }
 0x247   : >> { %1387 = vst [vmem:[%s2420_s22 + $0x160] sm:$0xff] %v1386_v37  ;;  %v1392_v40 = vld [vmem:[%s2424_s10 + $0x178] sm:$0xff]  ;;  %1389 = vst [vmem:[%s2420_s22 + $0x168] sm:$0xff] %v1388_v38  ;;  %v1394_v41 = vld [vmem:[%s2424_s10 + $0x180] sm:$0xff] }
 0x248   : >> { %1391 = vst [vmem:[%s2420_s22 + $0x170] sm:$0xff] %v1390_v39  ;;  %1393 = vst [vmem:[%s2420_s22 + $0x178] sm:$0xff] %v1392_v40  ;;  %v1396_v42 = vld [vmem:[%s2424_s10 + $0x188] sm:$0xff]  ;;  %v1398_v43 = vld [vmem:[%s2424_s10 + $0x190] sm:$0xff] }
 0x249   : >> { %1395 = vst [vmem:[%s2420_s22 + $0x180] sm:$0xff] %v1394_v41  ;;  %1397 = vst [vmem:[%s2420_s22 + $0x188] sm:$0xff] %v1396_v42  ;;  %v1400_v44 = vld [vmem:[%s2424_s10 + $0x198] sm:$0xff]  ;;  %v1402_v45 = vld [vmem:[%s2424_s10 + $0x1a0] sm:$0xff] }
 0x24a   : >> { %1399 = vst [vmem:[%s2420_s22 + $0x190] sm:$0xff] %v1398_v43  ;;  %v1404_v46 = vld [vmem:[%s2424_s10 + $0x1a8] sm:$0xff]  ;;  %1401 = vst [vmem:[%s2420_s22 + $0x198] sm:$0xff] %v1400_v44  ;;  %v1406_v47 = vld [vmem:[%s2424_s10 + $0x1b0] sm:$0xff]  ;;  %1294 = sbr.rel (!%p1291_p2) target bundleno = 560 (0x230), region = 301 }
 0x24b   : >> { %1403 = vst [vmem:[%s2420_s22 + $0x1a0] sm:$0xff] %v1402_v45  ;;  %1405 = vst [vmem:[%s2420_s22 + $0x1a8] sm:$0xff] %v1404_v46  ;;  %v1408_v48 = vld [vmem:[%s2424_s10 + $0x1b8] sm:$0xff]  ;;  %v1410_v49 = vld [vmem:[%s2424_s10 + $0x1c0] sm:$0xff] }
 0x24c   : >> { %1407 = vst [vmem:[%s2420_s22 + $0x1b0] sm:$0xff] %v1406_v47  ;;  %1409 = vst [vmem:[%s2420_s22 + $0x1b8] sm:$0xff] %v1408_v48  ;;  %v1412_v50 = vld [vmem:[%s2424_s10 + $0x1c8] sm:$0xff]  ;;  %v1414_v51 = vld [vmem:[%s2424_s10 + $0x1d0] sm:$0xff] }
 0x24d   : >> { %1411 = vst [vmem:[%s2420_s22 + $0x1c0] sm:$0xff] %v1410_v49  ;;  %v1416_v52 = vld [vmem:[%s2424_s10 + $0x1d8] sm:$0xff]  ;;  %1413 = vst [vmem:[%s2420_s22 + $0x1c8] sm:$0xff] %v1412_v50  ;;  %v1418_v53 = vld [vmem:[%s2424_s10 + $0x1e0] sm:$0xff] }
 0x24e   : >> { %1415 = vst [vmem:[%s2420_s22 + $0x1d0] sm:$0xff] %v1414_v51  ;;  %1417 = vst [vmem:[%s2420_s22 + $0x1d8] sm:$0xff] %v1416_v52  ;;  %v1420_v54 = vld [vmem:[%s2424_s10 + $0x1e8] sm:$0xff]  ;;  %v1422_v55 = vld [vmem:[%s2424_s10 + $0x1f0] sm:$0xff] }
 0x24f   : >> { %1419 = vst [vmem:[%s2420_s22 + $0x1e0] sm:$0xff] %v1418_v53  ;;  %1421 = vst [vmem:[%s2420_s22 + $0x1e8] sm:$0xff] %v1420_v54  ;;  %v1424_v56 = vld [vmem:[%s2424_s10 + $0x1f8] sm:$0xff]  ;;  %s3407_s10 = smov %s3223_s6 }
 0x250   : >> { %1423 = vst [vmem:[%s2420_s22 + $0x1f0] sm:$0xff] %v1422_v55  ;;  %1425 = vst [vmem:[%s2420_s22 + $0x1f8] sm:$0xff] %v1424_v56  ;;  %s3406_s22 = smov %s3226_s8 }
 0x251 PF: > { %s3332_s7 = sand.u32 63, %s1285_s21   ;;  %s1804_s25 = sshll.u32 %s3156_s11, 13 }
 0x252   : > { %s1437_s28 = sshra.s32 %s1804_s25, 4  ;;  %p1792_p3 = scmp.le.s32.totalorder %s3332_s7, 0 }
 0x253   : > { %s1438_s26 = scalar_lea.vmem %s2933_s4, %s1437_s28 [#allocation3]   ;;  %s1441_s15 = scalar_lea.vmem %s2946_s29, %s1437_s28  }
 0x254   : > { %1671 = sbr.rel (%p1792_p3) target bundleno = 613 (0x265), region = 306  ;;  %s2434_s23 = smov (!%p1792_p3), %s1441_s15  }
 0x255   : > { %s2438_s12 = smov (!%p1792_p3), %s1438_s26   ;;  %s2442_s0 = smov (!%p1792_p3), 0  }
 0x256   : > { %s2446_s30 = smov (!%p1792_p3), 0  }
 0x25b LB: >> { %v1453_v57 = vld [vmem:[%s2440_s12] sm:$0xff]  ;;  %s1455_s21 = sadd.s32 1, %s2444_s0  ;;  %s1447_s30 = sadd.s32 1, %s2448_s30   ;;  %s2448_s30 = sphi %s2446_s30, %s1447_s30   ;;  %s2444_s0 = sphi %s2442_s0, %s2443_s0   ;;  %s2440_s12 = sphi %s2438_s12, %s1460_s12   ;;  %s2436_s23 = sphi %s2434_s23, %s1461_s23  }
 0x25c   : >> { %1454 = vst [vmem:[%s2436_s23] sm:$0xff] %v1453_v57  ;;  %p1456_p4 = scmp.ge.s32.totalorder %s1455_s21, %s3332_s7  ;;  %p1446_p6 = scmp.ge.s32.totalorder %s1447_s30, %s3332_s7 }
 0x25e   : >> { %s3442_s21 = smov (%p1456_p4, %s1455_s21), 0  ;;  %1449 = sbr.rel (!%p1446_p6) target bundleno = 603 (0x25b), region = 312 }
 0x25f   : >> { %s1793_s11 = sshll.u32 %s3442_s21, 3  ;;  %s2443_s0 = smov %s3442_s21  }
 0x260   : >> { %s1460_s12 = scalar_lea.vmem %s1438_s26, %s1793_s11 [#allocation3]   ;;  %s1461_s23 = scalar_lea.vmem %s1441_s15, %s1793_s11  }
 0x265 PF: > { %s2453_s22 = smov 0  }
 0x266   : > { %s1462_s10 = sshllo.u32 %s2453_s22, %s2952_s14 }
 0x267   : > { %v1471_v58 = vld [vmem:[%s1282_s24] sm:%s1462_s10] }
 0x268   : > { %1472 = vst [vmem:[%s1284_s9] sm:%s1462_s10] %v1471_v58 }
 0x269 PF: > { %p1795_p5 = scmp.ge.u32.totalorder %s2948_s19, 8 }
 0x26a   : > { %s2454_s5 = smov (!%p1795_p5), 0  }
 0x26b   : > { %1083 = sbr.rel (%p1795_p5) target bundleno = 626 (0x272), region = 114  ;;  %s1084_s6 = sshllo.u32 (!%p1795_p5), %s2454_s5, %s2948_s19 }
 0x26c   : > { %v1093_v59 = vld [vmem:[%s2933_s4] sm:%s1084_s6] (!%p1795_p5) }
 0x26d   : > { %1094 = vst [vmem:[%s2946_s29] sm:%s1084_s6] (!%p1795_p5), %v1093_v59 }
 0x272 PF: > { %s13_s18 = sadd.s32 1, %s2320_s18   ;;  %s3409_s20 = sld [smem:[#allocation4_spill]] }
 0x273   : > { %p10_p7 = scmp.ge.s32.totalorder %s13_s18, 6   ;;  %s3410_s24 = sld [smem:[#allocation5_spill]] }
 0x274   : > { %s3411_s12 = smov %s2300_s13  ;;  %s3412_s13 = smov %s2531_s27 }
 0x275   : > { %s3413_s14 = smov %s2312_s16  ;;  %s3414_s15 = smov %s2316_s17 }
 0x276   :  { %12 = sbr.rel (!%p10_p7) target bundleno = 6 (0x6), region = 323 }
 0x278   : > { %s3415_s16 = smov %s3409_s20 }
 0x279   : > { %s3416_s17 = smov %s3410_s24 }

// kernel: multiscale_discriminator_forward.11
= control target key start
LH: loop header
LB: loop body
LE: loop exit
PB: predicated region body
PF: predicated region fallthrough
CT: control target
= control target key end

     0   :  { %s502_s9 = smov 0   ;;  %s526_s0 = inlined_call_operand.vmem [shape: bf16[2,128,256], index: 0, kind: input, shape index: {}]   ;;  %s527_s1 = inlined_call_operand.vmem [shape: bf16[16,128], index: 1, kind: input, shape index: {}]   ;;  %s528_s2 = inlined_call_operand.vmem [shape: bf16[2,16,256], index: 2, kind: output, shape index: {}]  }
   0x1 LB: > { %s406_s10 = sadd.s32 4294967295, %s484_s9   ;;  %p410_p0 = scmp.ge.s32.totalorder %s484_s9, 1  ;;  %s484_s9 = sphi %s502_s9, %s12_s9  }
   0x2   : > { %p112_p1 = scmp.lt.s32.totalorder %s484_s9, 3 }
   0x4   : > { %p113_p2 = pnand %p410_p0, %p112_p1 }
   0x5   : > { %p134_p3 = scmp.lt.s32.totalorder (!%p113_p2), %s406_s10, 1  ;;  %v486_v0 = vmov (!%p113_p2), 0   ;;  %v473_v17 = vld [vmem:[%s527_s1] sm:$0xff] (!%p113_p2)  }
   0x6   : > { %116 = sbr.rel (%p113_p2) target bundleno = 583 (0x247), region = 28  ;;  %281 = vmatprep.mubr.bf16.mxu0 (!%p113_p2), %v486_v0 }
   0xd   : > { %s530_s10 = smov (!%p134_p3, %s406_s10), 1 }
   0xe   : > { %s436_s11 = sshll.u32 %s530_s10, 7  ;;  %s437_s17 = sshll.u32 %s530_s10, 4 }
   0xf   : > { %s138_s14 = scalar_lea.vmem %s526_s0, %s436_s11  ;;  %s143_s20 = scalar_lea.vmem %s528_s2, %s437_s17 }
  0x10   : > { %v449_v1 = vld [vmem:[%s138_s14 + $0x4] ss:$8 sps:$4 sm:$0xff]   ;;  %v451_v2 = vld [vmem:[%s138_s14] ss:$8 sps:$4 sm:$0xff]   ;;  %v452_v3 = vld [vmem:[%s138_s14 + $0x14] ss:$8 sps:$4 sm:$0xff]  }
  0x11   : > { %249 = vmatprep.subr.bf16.mxu0 %v449_v1  ;;  %v454_v4 = vld [vmem:[%s138_s14 + $0x10] ss:$8 sps:$4 sm:$0xff]   ;;  %v455_v5 = vld [vmem:[%s138_s14 + $0x24] ss:$8 sps:$4 sm:$0xff]   ;;  %v457_v6 = vld [vmem:[%s138_s14 + $0x20] ss:$8 sps:$4 sm:$0xff]  }
  0x12   : > { %250 = vmatpush1.bf16.msra.mxu0 %v451_v2  ;;  %v458_v7 = vld [vmem:[%s138_s14 + $0x34] ss:$8 sps:$4 sm:$0xff]   ;;  %v460_v8 = vld [vmem:[%s138_s14 + $0x30] ss:$8 sps:$4 sm:$0xff]   ;;  %v461_v9 = vld [vmem:[%s138_s14 + $0x44] ss:$8 sps:$4 sm:$0xff]  }
  0x13   : > { %251 = vmatprep.subr.bf16.mxu0 %v452_v3  ;;  %v463_v10 = vld [vmem:[%s138_s14 + $0x40] ss:$8 sps:$4 sm:$0xff]   ;;  %v464_v11 = vld [vmem:[%s138_s14 + $0x54] ss:$8 sps:$4 sm:$0xff]   ;;  %v466_v12 = vld [vmem:[%s138_s14 + $0x50] ss:$8 sps:$4 sm:$0xff]  }
  0x14   : > { %v467_v13 = vld [vmem:[%s138_s14 + $0x64] ss:$8 sps:$4 sm:$0xff]   ;;  %v469_v14 = vld [vmem:[%s138_s14 + $0x60] ss:$8 sps:$4 sm:$0xff]   ;;  %v470_v15 = vld [vmem:[%s138_s14 + $0x74] ss:$8 sps:$4 sm:$0xff]  }
  0x15   : > { %v472_v16 = vld [vmem:[%s138_s14 + $0x70] ss:$8 sps:$4 sm:$0xff]  }
  0x16   : > { %252 = vmatpush1.bf16.msra.mxu0 %v454_v4 }
  0x17   : > { %253 = vmatprep.subr.bf16.mxu0 %v455_v5 }
  0x1a   : > { %254 = vmatpush1.bf16.msra.mxu0 %v457_v6 }
  0x1b   : > { %255 = vmatprep.subr.bf16.mxu0 %v458_v7 }
  0x1e   : > { %256 = vmatpush1.bf16.msra.mxu0 %v460_v8 }
  0x1f   : > { %257 = vmatprep.subr.bf16.mxu0 %v461_v9 }
  0x22   : > { %258 = vmatpush1.bf16.msra.mxu0 %v463_v10 }
  0x23   : > { %259 = vmatprep.subr.bf16.mxu0 %v464_v11 }
  0x26   : > { %260 = vmatpush1.bf16.msra.mxu0 %v466_v12 }
  0x27   : > { %261 = vmatprep.subr.bf16.mxu0 %v467_v13 }
  0x2a   : > { %262 = vmatpush1.bf16.msra.mxu0 %v469_v14 }
  0x2b   : > { %263 = vmatprep.subr.bf16.mxu0 %v470_v15 }
  0x2e   : > { %264 = vmatpush1.bf16.msra.mxu0 %v472_v16 }
  0x31   : > { %282 = vmatmul.mubr.bf16.vlgmr.msra.gmra.mrb[0].mxu0 %v473_v17 }
 0x104   : > { %v283_v18 = vpop.f32.mrb[0].mxu0 }
 0x105   : > { %v285_v19 = vpop.f32.mrb[1].mxu0 }
 0x106   : > { %v287_v20 = vpop.f32.mrb[2].mxu0  ;;  %v292_v21 = vadd.f32 %v285_v19, %v283_v18 }
 0x107   : > { %v289_v22 = vpop.f32.mrb[3].mxu0 }
 0x108   : > { %v295_v23 = vadd.f32 %v289_v22, %v287_v20  ;;  %293 = vadd.xlane.f32.xlu0 %v292_v21 }
 0x10c   : > { %296 = vadd.xlane.f32.xlu0 %v295_v23 }
 0x195   : > { %v294_v24 = vpop.xlane.xlu0 %293 }
 0x196   : > { %v299_v25 = vmul.f32 0.00390625, %v294_v24 }
 0x198   : > { %v301_v26 = vsub.f32 %v283_v18, %v299_v25  ;;  %v302_v27 = vsub.f32 %v285_v19, %v299_v25 }
 0x199   : > { %v297_v28 = vpop.xlane.xlu0 %296 }
 0x19a   : > { %v300_v29 = vmul.f32 0.00390625, %v297_v28  ;;  %v305_v30 = vmul.f32 %v301_v26, %v301_v26  ;;  %v306_v31 = vmul.f32 %v302_v27, %v302_v27 }
 0x19c   : > { %v303_v32 = vsub.f32 %v287_v20, %v300_v29  ;;  %v304_v33 = vsub.f32 %v289_v22, %v300_v29  ;;  %v309_v34 = vadd.f32 %v306_v31, %v305_v30 }
 0x19e   : > { %310 = vadd.xlane.f32.xlu1 %v309_v34  ;;  %v307_v35 = vmul.f32 %v303_v32, %v303_v32  ;;  %v308_v36 = vmul.f32 %v304_v33, %v304_v33 }
 0x1a0   : > { %v312_v37 = vadd.f32 %v308_v36, %v307_v35 }
 0x1a2   : > { %313 = vadd.xlane.f32.xlu1 %v312_v37 }
 0x22b   : > { %v311_v38 = vpop.xlane.xlu1 %310 }
 0x22c   : > { %v315_v39 = vmul.f32 0.00390625, %v311_v38 }
 0x22e   : > { %v317_v40 = vadd.f32 1e-05, %v315_v39 }
 0x22f   : > { %v314_v41 = vpop.xlane.xlu1 %313 }
 0x230   : > { %474 = vrsqrt.f32 %v317_v40  ;;  %v316_v42 = vmul.f32 0.00390625, %v314_v41 }
 0x232   : > { %v318_v43 = vadd.f32 1e-05, %v316_v42 }
 0x234   : > { %476 = vrsqrt.f32 %v318_v43 }
 0x23a   : > { %v475_v44 = vpop.eup %474 }
 0x23b   : > { %v321_v45 = vmul.f32 %v475_v44, %v301_v26  ;;  %v322_v46 = vmul.f32 %v475_v44, %v302_v27 }
 0x23d   : > { %vm325_vm0 = vcmp.ge.f32.partialorder %v321_v45, 0.0  ;;  %vm326_vm1 = vcmp.ge.f32.partialorder %v322_v46, 0.0  ;;  %v329_v47 = vmul.f32 0.2, %v321_v45  ;;  %v330_v48 = vmul.f32 0.2, %v322_v46 }
 0x23e   : > { %v477_v49 = vpop.eup %476 }
 0x23f   : > { %v333_v50 = vsel %vm325_vm0, %v321_v45, %v329_v47  ;;  %v334_v51 = vsel %vm326_vm1, %v322_v46, %v330_v48  ;;  %v323_v52 = vmul.f32 %v477_v49, %v303_v32  ;;  %v324_v53 = vmul.f32 %v477_v49, %v304_v33 }
 0x240   : > { %v438_v54 = vpack.c.bf16 %v334_v51, %v333_v50 }
 0x241   : > { %vm327_vm2 = vcmp.ge.f32.partialorder %v323_v52, 0.0  ;;  %vm328_vm3 = vcmp.ge.f32.partialorder %v324_v53, 0.0  ;;  %v331_v55 = vmul.f32 0.2, %v323_v52  ;;  %v332_v56 = vmul.f32 0.2, %v324_v53 }
 0x242   : > { %349 = vst [vmem:[%s143_s20] sm:$0xff] %v438_v54 }
 0x243   : > { %v335_v57 = vsel %vm327_vm2, %v323_v52, %v331_v55  ;;  %v336_v58 = vsel %vm328_vm3, %v324_v53, %v332_v56 }
 0x244   : > { %v439_v59 = vpack.c.bf16 %v336_v58, %v335_v57 }
 0x246   : > { %350 = vst [vmem:[%s143_s20 + $0x8] sm:$0xff] %v439_v59 }
 0x247 PF: > { %s12_s9 = sadd.s32 1, %s484_s9  }
 0x248   : > { %p9_p4 = scmp.ge.s32.totalorder %s12_s9, 4  }
 0x24a   :  { %11 = sbr.rel (!%p9_p4) target bundleno = 1 (0x1), region = 58 }

// kernel: multiscale_discriminator_forward.12
= control target key start
LH: loop header
LB: loop body
LE: loop exit
PB: predicated region body
PF: predicated region fallthrough
CT: control target
= control target key end

     0   :  { %s634_s9 = smov 0   ;;  %s697_s0 = inlined_call_operand.vmem [shape: bf16[2,256,49], index: 0, kind: input, shape index: {}]   ;;  %s698_s1 = inlined_call_operand.vmem [shape: bf16[32,256], index: 1, kind: input, shape index: {}]   ;;  %s699_s2 = inlined_call_operand.vmem [shape: bf16[2,32,49], index: 2, kind: output, shape index: {}]  }
   0x1 LB: > { %s488_s10 = sadd.s32 4294967295, %s617_s9   ;;  %p492_p0 = scmp.ge.s32.totalorder %s617_s9, 1  ;;  %s617_s9 = sphi %s634_s9, %s12_s9  }
   0x2   : > { %p112_p1 = scmp.lt.s32.totalorder %s617_s9, 3 }
   0x4   : > { %p113_p2 = pnand %p492_p0, %p112_p1 }
   0x5   : > { %p134_p3 = scmp.lt.s32.totalorder (!%p113_p2), %s488_s10, 1  ;;  %v599_v0 = vld [vmem:[%s698_s1 + $0x4] ss:$8 sps:$4 sm:$0xff] (!%p113_p2)   ;;  %v602_v1 = vld [vmem:[%s698_s1 + $0x14] ss:$8 sps:$4 sm:$0xff] (!%p113_p2)   ;;  %vm346_vm0 = vcmask (!%p113_p2), 400384  }
   0x6   : > { %116 = sbr.rel (%p113_p2) target bundleno = 587 (0x24b), region = 28  ;;  %329 = vmatprep.mubr.bf16.mxu0 (!%p113_p2), %v599_v0  ;;  %337 = vmatprep.mubr.bf16.mxu1 (!%p113_p2), %v602_v1  ;;  %v597_v18 = vld [vmem:[%s698_s1] ss:$8 sps:$4 sm:$0xff] (!%p113_p2)   ;;  %v600_v19 = vld [vmem:[%s698_s1 + $0x10] ss:$8 sps:$4 sm:$0xff] (!%p113_p2)   ;;  %vm428_vm2 = vcmask (!%p113_p2), 396288  }
   0xd   : > { %s701_s10 = smov (!%p134_p3, %s488_s10), 1 }
   0xe   : > { %s523_s15 = sshll.u32 %s701_s10, 7  ;;  %s524_s23 = sshll.u32 %s701_s10, 4 }
   0xf   : > { %s654_s18 = scalar_lea.vmem %s697_s0, %s523_s15  ;;  %s143_s26 = scalar_lea.vmem %s699_s2, %s524_s23 }
  0x10   : > { %v581_v2 = vld [vmem:[%s654_s18 + $0x40] sm:$0xff]   ;;  %v583_v4 = vld [vmem:[%s654_s18 + $0x48] sm:$0xff]   ;;  %v585_v6 = vld [vmem:[%s654_s18 + $0x50] sm:$0xff]  }
  0x11   : > { %v582_v3 = vld [vmem:[%s654_s18] sm:$0xff]   ;;  %529 = vmatprep.subr.bf16.mxu0 %v581_v2  ;;  %557 = vmatprep.subr.bf16.mxu1 %v581_v2  ;;  %v584_v5 = vld [vmem:[%s654_s18 + $0x8] sm:$0xff]   ;;  %v586_v7 = vld [vmem:[%s654_s18 + $0x10] sm:$0xff]  }
  0x12   : > { %530 = vmatpush3.bf16.msra.mxu0 %v582_v3  ;;  %565 = vmatpush3.bf16.msra.mxu1 %v582_v3  ;;  %v587_v8 = vld [vmem:[%s654_s18 + $0x58] sm:$0xff]   ;;  %v589_v10 = vld [vmem:[%s654_s18 + $0x60] sm:$0xff]   ;;  %v591_v12 = vld [vmem:[%s654_s18 + $0x68] sm:$0xff]  }
  0x13   : > { %531 = vmatprep.subr.bf16.mxu0 %v583_v4  ;;  %558 = vmatprep.subr.bf16.mxu1 %v583_v4  ;;  %v588_v9 = vld [vmem:[%s654_s18 + $0x18] sm:$0xff]   ;;  %v590_v11 = vld [vmem:[%s654_s18 + $0x20] sm:$0xff]   ;;  %v592_v13 = vld [vmem:[%s654_s18 + $0x28] sm:$0xff]  }
  0x14   : > { %v593_v14 = vld [vmem:[%s654_s18 + $0x70] sm:$0xff]   ;;  %v595_v16 = vld [vmem:[%s654_s18 + $0x78] sm:$0xff]  }
  0x15   : > { %v594_v15 = vld [vmem:[%s654_s18 + $0x30] sm:$0xff]   ;;  %v596_v17 = vld [vmem:[%s654_s18 + $0x38] sm:$0xff]  }
  0x16   : > { %532 = vmatpush3.bf16.msra.mxu0 %v584_v5  ;;  %566 = vmatpush3.bf16.msra.mxu1 %v584_v5 }
  0x17   : > { %533 = vmatprep.subr.bf16.mxu0 %v585_v6  ;;  %559 = vmatprep.subr.bf16.mxu1 %v585_v6 }
  0x1a   : > { %534 = vmatpush3.bf16.msra.mxu0 %v586_v7  ;;  %567 = vmatpush3.bf16.msra.mxu1 %v586_v7 }
  0x1b   : > { %535 = vmatprep.subr.bf16.mxu0 %v587_v8  ;;  %560 = vmatprep.subr.bf16.mxu1 %v587_v8 }
  0x1e   : > { %536 = vmatpush3.bf16.msra.mxu0 %v588_v9  ;;  %568 = vmatpush3.bf16.msra.mxu1 %v588_v9 }
  0x1f   : > { %537 = vmatprep.subr.bf16.mxu0 %v589_v10  ;;  %561 = vmatprep.subr.bf16.mxu1 %v589_v10 }
  0x22   : > { %538 = vmatpush3.bf16.msra.mxu0 %v590_v11  ;;  %569 = vmatpush3.bf16.msra.mxu1 %v590_v11 }
  0x23   : > { %539 = vmatprep.subr.bf16.mxu0 %v591_v12  ;;  %562 = vmatprep.subr.bf16.mxu1 %v591_v12 }
  0x26   : > { %540 = vmatpush3.bf16.msra.mxu0 %v592_v13  ;;  %570 = vmatpush3.bf16.msra.mxu1 %v592_v13 }
  0x27   : > { %541 = vmatprep.subr.bf16.mxu0 %v593_v14  ;;  %563 = vmatprep.subr.bf16.mxu1 %v593_v14 }
  0x2a   : > { %542 = vmatpush3.bf16.msra.mxu0 %v594_v15  ;;  %571 = vmatpush3.bf16.msra.mxu1 %v594_v15 }
  0x2b   : > { %543 = vmatprep.subr.bf16.mxu0 %v595_v16  ;;  %564 = vmatprep.subr.bf16.mxu1 %v595_v16 }
  0x2e   : > { %544 = vmatpush3.bf16.msra.mxu0 %v596_v17  ;;  %572 = vmatpush3.bf16.msra.mxu1 %v596_v17 }
  0x31   : > { %330 = vmatmul.mubr.bf16.vlgmr.msra.gmra.mrb[0].mxu0 %v597_v18  ;;  %338 = vmatmul.mubr.bf16.vlgmr.msra.gmra.mrb[0].mxu1 %v600_v19 }
 0x104   : > { %v545_v20 = vpop.f32.mrb[0].mxu0  ;;  %v551_v21 = vpop.f32.mrb[0].mxu1 }
 0x105   : > { %v546_v22 = vpop.f32.mrb[1].mxu0  ;;  %v552_v23 = vpop.f32.mrb[1].mxu1 }
 0x106   : > { %v547_v24 = vadd.f32 %v546_v22, %v545_v20  ;;  %v553_v25 = vadd.f32 %v552_v23, %v551_v21  ;;  %v548_v26 = vpop.f32.mrb[2].mxu0  ;;  %v554_v27 = vpop.f32.mrb[2].mxu1 }
 0x107   : > { %v549_v28 = vpop.f32.mrb[3].mxu0  ;;  %v555_v29 = vpop.f32.mrb[3].mxu1 }
 0x108   : > { %v550_v30 = vadd.f32 %v549_v28, %v548_v26  ;;  %v556_v31 = vadd.f32 %v555_v29, %v554_v27  ;;  %v353_v32 = vsel %vm346_vm0, %v553_v25, 0.0  ;;  %v347_v33 = vsel %vm346_vm0, %v547_v24, 0.0 }
 0x109   : > { %354 = vadd.xlane.f32.xlu1 %v353_v32  ;;  %348 = vadd.xlane.f32.xlu0 %v347_v33 }
 0x10a   : > { %v356_v34 = vsel %vm346_vm0, %v556_v31, 0.0  ;;  %v350_v35 = vsel %vm346_vm0, %v550_v30, 0.0 }
 0x10d   : > { %357 = vadd.xlane.f32.xlu1 %v356_v34  ;;  %351 = vadd.xlane.f32.xlu0 %v350_v35 }
 0x196   : > { %v355_v36 = vpop.xlane.xlu1 %354  ;;  %v349_v37 = vpop.xlane.xlu0 %348 }
 0x197   : > { %v362_v38 = vmul.f32 0.020408163, %v355_v36  ;;  %v360_v39 = vmul.f32 0.020408163, %v349_v37 }
 0x199   : > { %v366_v40 = vsub.f32 %v553_v25, %v362_v38  ;;  %v364_v41 = vsub.f32 %v547_v24, %v360_v39 }
 0x19a   : > { %v358_v42 = vpop.xlane.xlu1 %357  ;;  %v352_v43 = vpop.xlane.xlu0 %351 }
 0x19b   : > { %v363_v44 = vmul.f32 0.020408163, %v358_v42  ;;  %v361_v45 = vmul.f32 0.020408163, %v352_v43  ;;  %v368_v46 = vmul.f32 %v364_v41, %v364_v41  ;;  %v370_v50 = vmul.f32 %v366_v40, %v366_v40 }
 0x19d   : > { %v367_v47 = vsub.f32 %v556_v31, %v363_v44  ;;  %v365_v48 = vsub.f32 %v550_v30, %v361_v45  ;;  %v372_v49 = vsel %vm346_vm0, %v368_v46, 0.0  ;;  %v378_v52 = vsel %vm346_vm0, %v370_v50, 0.0 }
 0x19e   : > { %373 = vadd.xlane.f32.xlu0 %v372_v49 }
 0x19f   : > { %v369_v51 = vmul.f32 %v365_v48, %v365_v48  ;;  %v371_v54 = vmul.f32 %v367_v47, %v367_v47 }
 0x1a1   : > { %v375_v53 = vsel %vm346_vm0, %v369_v51, 0.0  ;;  %v381_v55 = vsel %vm346_vm0, %v371_v54, 0.0 }
 0x1a2   : > { %379 = vadd.xlane.f32.xlu0 %v378_v52  ;;  %376 = vadd.xlane.f32.xlu1 %v375_v53 }
 0x1a6   : > { %382 = vadd.xlane.f32.xlu1 %v381_v55 }
 0x22b   : > { %v374_v56 = vpop.xlane.xlu0 %373 }
 0x22c   : > { %v384_v57 = vmul.f32 0.020408163, %v374_v56 }
 0x22e   : > { %v388_v58 = vadd.f32 1e-05, %v384_v57 }
 0x22f   : > { %v377_v59 = vpop.xlane.xlu1 %376  ;;  %v380_v60 = vpop.xlane.xlu0 %379 }
 0x230   : > { %603 = vrsqrt.f32 %v388_v58  ;;  %v385_v61 = vmul.f32 0.020408163, %v377_v59  ;;  %v386_v62 = vmul.f32 0.020408163, %v380_v60 }
 0x232   : > { %v389_v63 = vadd.f32 1e-05, %v385_v61  ;;  %v390_v0 = vadd.f32 1e-05, %v386_v62 }
 0x233   : > { %v383_v1 = vpop.xlane.xlu1 %382 }
 0x234   : > { %605 = vrsqrt.f32 %v389_v63  ;;  %v387_v2 = vmul.f32 0.020408163, %v383_v1 }
 0x235   : > { %607 = vrsqrt.f32 %v390_v0 }
 0x236   : > { %v391_v3 = vadd.f32 1e-05, %v387_v2 }
 0x238   : > { %609 = vrsqrt.f32 %v391_v3 }
 0x23a   : > { %v604_v4 = vpop.eup %603 }
 0x23b   : > { %v396_v5 = vmul.f32 %v604_v4, %v364_v41 }
 0x23d   : > { %vm400_vm1 = vcmp.ge.f32.partialorder %v396_v5, 0.0  ;;  %v404_v6 = vmul.f32 0.2, %v396_v5 }
 0x23e   : > { %v606_v7 = vpop.eup %605 }
 0x23f   : > { %v608_v8 = vpop.eup %607  ;;  %v408_v9 = vsel %vm400_vm1, %v396_v5, %v404_v6  ;;  %v397_v10 = vmul.f32 %v606_v7, %v365_v48 }
 0x240   : > { %v525_v11 = vpack.c.bf16 %v408_v9, %v408_v9  ;;  %v398_v12 = vmul.f32 %v608_v8, %v366_v40 }
 0x241   : > { %vm401_vm3 = vcmp.ge.f32.partialorder %v397_v10, 0.0  ;;  %v405_v13 = vmul.f32 0.2, %v397_v10 }
 0x242   : > { %v610_v14 = vpop.eup %609  ;;  %429 = vst.msk [vmem:[%s143_s26] sm:$0xf] %vm428_vm2, %v525_v11  ;;  %vm402_vm4 = vcmp.ge.f32.partialorder %v398_v12, 0.0  ;;  %v406_v15 = vmul.f32 0.2, %v398_v12 }
 0x243   : > { %v409_v16 = vsel %vm401_vm3, %v397_v10, %v405_v13  ;;  %v399_v17 = vmul.f32 %v610_v14, %v367_v47 }
 0x244   : > { %v526_v18 = vpack.c.bf16 %v409_v16, %v409_v16  ;;  %v410_v19 = vsel %vm402_vm4, %v398_v12, %v406_v15 }
 0x245   : > { %v527_v20 = vpack.c.bf16 %v410_v19, %v410_v19  ;;  %vm403_vm5 = vcmp.ge.f32.partialorder %v399_v17, 0.0  ;;  %v407_v21 = vmul.f32 0.2, %v399_v17 }
 0x246   : > { %430 = vst.msk [vmem:[%s143_s26 + $0x4] sm:$0xf] %vm428_vm2, %v526_v18 }
 0x247   : > { %431 = vst.msk [vmem:[%s143_s26 + $0x8] sm:$0xf] %vm428_vm2, %v527_v20  ;;  %v411_v22 = vsel %vm403_vm5, %v399_v17, %v407_v21 }
 0x248   : > { %v528_v23 = vpack.c.bf16 %v411_v22, %v411_v22 }
 0x24a   : > { %432 = vst.msk [vmem:[%s143_s26 + $0xc] sm:$0xf] %vm428_vm2, %v528_v23 }
 0x24b PF: > { %s12_s9 = sadd.s32 1, %s617_s9  }
 0x24c   : > { %p9_p4 = scmp.ge.s32.totalorder %s12_s9, 4  }
 0x24e   :  { %11 = sbr.rel (!%p9_p4) target bundleno = 1 (0x1), region = 58 }

// kernel: multiscale_discriminator_forward.13
= control target key start
LH: loop header
LB: loop body
LE: loop exit
PB: predicated region body
PF: predicated region fallthrough
CT: control target
= control target key end

     0   :  { %s1113_s9 = smov 0   ;;  %s1289_s0 = inlined_call_operand.vmem [shape: bf16[2,512,16], index: 0, kind: input, shape index: {}]   ;;  %s1290_s1 = inlined_call_operand.vmem [shape: bf16[64,512], index: 1, kind: input, shape index: {}]   ;;  %s1291_s2 = inlined_call_operand.vmem [shape: bf16[2,64,16], index: 2, kind: output, shape index: {}]  }
   0x1 LB: > { %s853_s10 = sadd.s32 4294967295, %s1096_s9   ;;  %p857_p0 = scmp.ge.s32.totalorder %s1096_s9, 1  ;;  %s1096_s9 = sphi %s1113_s9, %s12_s9  }
   0x2   : > { %p112_p1 = scmp.lt.s32.totalorder %s1096_s9, 3 }
   0x4   : > { %p113_p2 = pnand %p857_p0, %p112_p1 }
   0x5   : > { %p134_p3 = scmp.lt.s32.totalorder (!%p113_p2), %s853_s10, 1  ;;  %v1052_v0 = vld [vmem:[%s1290_s1 + $0x4] ss:$16 sps:$4 sm:$0xff] (!%p113_p2)   ;;  %v1055_v1 = vld [vmem:[%s1290_s1 + $0xc] ss:$16 sps:$4 sm:$0xff] (!%p113_p2)   ;;  %vm627_vm0 = vcmask (!%p113_p2), 130048  }
   0x6   : > { %116 = sbr.rel (%p113_p2) target bundleno = 609 (0x261), region = 28  ;;  %529 = vmatprep.mubr.bf16.mxu0 (!%p113_p2), %v1052_v0  ;;  %594 = vmatprep.mubr.bf16.mxu1 (!%p113_p2), %v1055_v1  ;;  %v1050_v32 = vld [vmem:[%s1290_s1] ss:$16 sps:$4 sm:$0xff] (!%p113_p2)   ;;  %v1053_v34 = vld [vmem:[%s1290_s1 + $0x8] ss:$16 sps:$4 sm:$0xff] (!%p113_p2)   ;;  %vm789_vm2 = vcmask (!%p113_p2), 125952  }
   0x7   : > { %v1056_v36 = vld [vmem:[%s1290_s1 + $0x24] ss:$16 sps:$4 sm:$0xff] (!%p113_p2)   ;;  %v1058_v37 = vld [vmem:[%s1290_s1 + $0x2c] ss:$16 sps:$4 sm:$0xff] (!%p113_p2)   ;;  %v1060_v38 = vld [vmem:[%s1290_s1 + $0x20] ss:$16 sps:$4 sm:$0xff] (!%p113_p2)  }
   0x8   : > { %v1061_v39 = vld [vmem:[%s1290_s1 + $0x28] ss:$16 sps:$4 sm:$0xff] (!%p113_p2)   ;;  %v1062_v40 = vld [vmem:[%s1290_s1 + $0x44] ss:$16 sps:$4 sm:$0xff] (!%p113_p2)   ;;  %v1064_v41 = vld [vmem:[%s1290_s1 + $0x4c] ss:$16 sps:$4 sm:$0xff] (!%p113_p2)  }
   0x9   : > { %v1066_v42 = vld [vmem:[%s1290_s1 + $0x40] ss:$16 sps:$4 sm:$0xff] (!%p113_p2)   ;;  %v1067_v43 = vld [vmem:[%s1290_s1 + $0x48] ss:$16 sps:$4 sm:$0xff] (!%p113_p2)   ;;  %v1068_v44 = vld [vmem:[%s1290_s1 + $0x64] ss:$16 sps:$4 sm:$0xff] (!%p113_p2)  }
   0xa   : > { %v1070_v45 = vld [vmem:[%s1290_s1 + $0x6c] ss:$16 sps:$4 sm:$0xff] (!%p113_p2)   ;;  %v1072_v46 = vld [vmem:[%s1290_s1 + $0x60] ss:$16 sps:$4 sm:$0xff] (!%p113_p2)   ;;  %v1073_v47 = vld [vmem:[%s1290_s1 + $0x68] ss:$16 sps:$4 sm:$0xff] (!%p113_p2)  }
   0xd   : > { %s1293_s10 = smov (!%p134_p3, %s853_s10), 1 }
   0xe   : > { %s920_s15 = sshll.u32 %s1293_s10, 8  ;;  %s921_s21 = sshll.u32 %s1293_s10, 5 }
   0xf   : > { %s1133_s18 = scalar_lea.vmem %s1289_s0, %s920_s15  ;;  %s1261_s24 = scalar_lea.vmem %s1291_s2, %s921_s21 }
  0x10   : > { %v1018_v2 = vld [vmem:[%s1133_s18 + $0x40] sm:$0xff]   ;;  %v1022_v6 = vld [vmem:[%s1133_s18 + $0x48] sm:$0xff]   ;;  %v1026_v10 = vld [vmem:[%s1133_s18 + $0x50] sm:$0xff]  }
  0x11   : > { %v1019_v3 = vld [vmem:[%s1133_s18 + $0xc0] sm:$0xff]   ;;  %930 = vmatprep.subr.bf16.mxu0 %v1018_v2  ;;  %v1023_v7 = vld [vmem:[%s1133_s18 + $0xc8] sm:$0xff]   ;;  %v1027_v11 = vld [vmem:[%s1133_s18 + $0xd0] sm:$0xff]  }
  0x12   : > { %v1020_v4 = vld [vmem:[%s1133_s18] sm:$0xff]   ;;  %970 = vmatprep.subr.bf16.mxu1 %v1019_v3  ;;  %v1024_v8 = vld [vmem:[%s1133_s18 + $0x8] sm:$0xff]   ;;  %v1028_v12 = vld [vmem:[%s1133_s18 + $0x10] sm:$0xff]  }
  0x13   : > { %v1021_v5 = vld [vmem:[%s1133_s18 + $0x80] sm:$0xff]   ;;  %931 = vmatpush3.bf16.msra.mxu0 %v1020_v4  ;;  %v1025_v9 = vld [vmem:[%s1133_s18 + $0x88] sm:$0xff]   ;;  %v1029_v13 = vld [vmem:[%s1133_s18 + $0x90] sm:$0xff]  }
  0x14   : > { %971 = vmatpush3.bf16.msra.mxu1 %v1021_v5  ;;  %932 = vmatprep.subr.bf16.mxu0 %v1022_v6  ;;  %v1030_v14 = vld [vmem:[%s1133_s18 + $0x58] sm:$0xff]   ;;  %v1034_v18 = vld [vmem:[%s1133_s18 + $0x60] sm:$0xff]   ;;  %v1038_v22 = vld [vmem:[%s1133_s18 + $0x68] sm:$0xff]  }
  0x15   : > { %972 = vmatprep.subr.bf16.mxu1 %v1023_v7  ;;  %v1031_v15 = vld [vmem:[%s1133_s18 + $0xd8] sm:$0xff]   ;;  %v1035_v19 = vld [vmem:[%s1133_s18 + $0xe0] sm:$0xff]   ;;  %v1039_v23 = vld [vmem:[%s1133_s18 + $0xe8] sm:$0xff]  }
  0x16   : > { %v1032_v16 = vld [vmem:[%s1133_s18 + $0x18] sm:$0xff]   ;;  %v1036_v20 = vld [vmem:[%s1133_s18 + $0x20] sm:$0xff]   ;;  %v1040_v24 = vld [vmem:[%s1133_s18 + $0x28] sm:$0xff]  }
  0x17   : > { %933 = vmatpush3.bf16.msra.mxu0 %v1024_v8  ;;  %v1033_v17 = vld [vmem:[%s1133_s18 + $0x98] sm:$0xff]   ;;  %v1037_v21 = vld [vmem:[%s1133_s18 + $0xa0] sm:$0xff]   ;;  %v1041_v25 = vld [vmem:[%s1133_s18 + $0xa8] sm:$0xff]  }
  0x18   : > { %973 = vmatpush3.bf16.msra.mxu1 %v1025_v9  ;;  %934 = vmatprep.subr.bf16.mxu0 %v1026_v10  ;;  %v1042_v26 = vld [vmem:[%s1133_s18 + $0x70] sm:$0xff]   ;;  %v1046_v30 = vld [vmem:[%s1133_s18 + $0x78] sm:$0xff]  }
  0x19   : > { %974 = vmatprep.subr.bf16.mxu1 %v1027_v11  ;;  %v1043_v27 = vld [vmem:[%s1133_s18 + $0xf0] sm:$0xff]   ;;  %v1047_v31 = vld [vmem:[%s1133_s18 + $0xf8] sm:$0xff]  }
  0x1a   : > { %v1044_v28 = vld [vmem:[%s1133_s18 + $0x30] sm:$0xff]   ;;  %v1048_v33 = vld [vmem:[%s1133_s18 + $0x38] sm:$0xff]  }
  0x1b   : > { %935 = vmatpush3.bf16.msra.mxu0 %v1028_v12  ;;  %v1045_v29 = vld [vmem:[%s1133_s18 + $0xb0] sm:$0xff]   ;;  %v1049_v35 = vld [vmem:[%s1133_s18 + $0xb8] sm:$0xff]  }
  0x1c   : > { %975 = vmatpush3.bf16.msra.mxu1 %v1029_v13  ;;  %936 = vmatprep.subr.bf16.mxu0 %v1030_v14 }
  0x1d   : > { %976 = vmatprep.subr.bf16.mxu1 %v1031_v15 }
  0x1f   : > { %937 = vmatpush3.bf16.msra.mxu0 %v1032_v16 }
  0x20   : > { %977 = vmatpush3.bf16.msra.mxu1 %v1033_v17  ;;  %938 = vmatprep.subr.bf16.mxu0 %v1034_v18 }
  0x21   : > { %978 = vmatprep.subr.bf16.mxu1 %v1035_v19 }
  0x23   : > { %939 = vmatpush3.bf16.msra.mxu0 %v1036_v20 }
  0x24   : > { %979 = vmatpush3.bf16.msra.mxu1 %v1037_v21  ;;  %940 = vmatprep.subr.bf16.mxu0 %v1038_v22 }
  0x25   : > { %980 = vmatprep.subr.bf16.mxu1 %v1039_v23 }
  0x27   : > { %941 = vmatpush3.bf16.msra.mxu0 %v1040_v24 }
  0x28   : > { %981 = vmatpush3.bf16.msra.mxu1 %v1041_v25  ;;  %942 = vmatprep.subr.bf16.mxu0 %v1042_v26 }
  0x29   : > { %982 = vmatprep.subr.bf16.mxu1 %v1043_v27 }
  0x2b   : > { %943 = vmatpush3.bf16.msra.mxu0 %v1044_v28 }
  0x2c   : > { %983 = vmatpush3.bf16.msra.mxu1 %v1045_v29  ;;  %944 = vmatprep.subr.bf16.mxu0 %v1046_v30 }
  0x2d   : > { %984 = vmatprep.subr.bf16.mxu1 %v1047_v31 }
  0x2f   : > { %945 = vmatpush3.bf16.msra.mxu0 %v1048_v33 }
  0x30   : > { %985 = vmatpush3.bf16.msra.mxu1 %v1049_v35 }
  0x32   : > { %530 = vmatmul.mubr.bf16.vlgmr.msra.gmra.mrb[0].mxu0 %v1050_v32 }
  0x33   : > { %595 = vmatmul.mubr.bf16.vlgmr.msra.gmra.mrb[0].mxu1 %v1053_v34  ;;  %537 = vmatprep.mubr.bf16.mxu0 %v1056_v36 }
  0x34   : > { %602 = vmatprep.mubr.bf16.mxu1 %v1058_v37 }
  0x3a   : > { %538 = vmatmul.mubr.bf16.gmra.mrb[4].mxu0 %v1060_v38 }
  0x3b   : > { %603 = vmatmul.mubr.bf16.gmra.mrb[4].mxu1 %v1061_v39  ;;  %545 = vmatprep.mubr.bf16.mxu0 %v1062_v40 }
  0x3c   : > { %610 = vmatprep.mubr.bf16.mxu1 %v1064_v41 }
  0x42   : > { %546 = vmatmul.mubr.bf16.gmra.mrb[8].mxu0 %v1066_v42 }
  0x43   : > { %611 = vmatmul.mubr.bf16.gmra.mrb[8].mxu1 %v1067_v43  ;;  %553 = vmatprep.mubr.bf16.mxu0 %v1068_v44 }
  0x44   : > { %618 = vmatprep.mubr.bf16.mxu1 %v1070_v45 }
  0x4a   : > { %554 = vmatmul.mubr.bf16.gmra.mrb[12].mxu0 %v1072_v46 }
  0x4b   : > { %619 = vmatmul.mubr.bf16.gmra.mrb[12].mxu1 %v1073_v47 }
 0x105   : > { %v946_v48 = vpop.f32.mrb[0].mxu0 }
 0x106   : > { %v986_v49 = vpop.f32.mrb[0].mxu1  ;;  %v947_v50 = vpop.f32.mrb[1].mxu0 }
 0x107   : > { %v948_v51 = vadd.f32 %v947_v50, %v946_v48  ;;  %v987_v52 = vpop.f32.mrb[1].mxu1  ;;  %v949_v53 = vpop.f32.mrb[2].mxu0 }
 0x108   : > { %v988_v54 = vadd.f32 %v987_v52, %v986_v49  ;;  %v989_v55 = vpop.f32.mrb[2].mxu1  ;;  %v950_v56 = vpop.f32.mrb[3].mxu0 }
 0x109   : > { %v951_v57 = vadd.f32 %v950_v56, %v949_v53  ;;  %v990_v58 = vpop.f32.mrb[3].mxu1 }
 0x10a   : > { %v991_v59 = vadd.f32 %v990_v58, %v989_v55  ;;  %v597_v60 = vadd.f32 %v988_v54, %v948_v51 }
 0x10c   : > { %v628_v61 = vsel %vm627_vm0, %v597_v60, 0.0  ;;  %v1210_v62 = vadd.f32 %v991_v59, %v951_v57 }
 0x10d   : > { %629 = vadd.xlane.f32.xlu0 %v628_v61  ;;  %v952_v63 = vpop.f32.mrb[4].mxu0 }
 0x10e   : > { %v992_v0 = vpop.f32.mrb[4].mxu1  ;;  %v953_v1 = vpop.f32.mrb[5].mxu0  ;;  %v631_v8 = vsel %vm627_vm0, %v1210_v62, 0.0 }
 0x10f   : > { %v954_v2 = vadd.f32 %v953_v1, %v952_v63  ;;  %v993_v3 = vpop.f32.mrb[5].mxu1  ;;  %v955_v4 = vpop.f32.mrb[6].mxu0 }
 0x110   : > { %v994_v5 = vadd.f32 %v993_v3, %v992_v0  ;;  %v995_v6 = vpop.f32.mrb[6].mxu1  ;;  %v956_v7 = vpop.f32.mrb[7].mxu0 }
 0x111   : > { %v957_v9 = vadd.f32 %v956_v7, %v955_v4  ;;  %v996_v10 = vpop.f32.mrb[7].mxu1  ;;  %632 = vadd.xlane.f32.xlu0 %v631_v8 }
 0x112   : > { %v997_v11 = vadd.f32 %v996_v10, %v995_v6  ;;  %v605_v12 = vadd.f32 %v994_v5, %v954_v2 }
 0x114   : > { %v634_v13 = vsel %vm627_vm0, %v605_v12, 0.0  ;;  %v608_v14 = vadd.f32 %v997_v11, %v957_v9 }
 0x115   : > { %635 = vadd.xlane.f32.xlu1 %v634_v13  ;;  %v958_v15 = vpop.f32.mrb[8].mxu0 }
 0x116   : > { %v998_v16 = vpop.f32.mrb[8].mxu1  ;;  %v959_v17 = vpop.f32.mrb[9].mxu0  ;;  %v637_v24 = vsel %vm627_vm0, %v608_v14, 0.0 }
 0x117   : > { %v960_v18 = vadd.f32 %v959_v17, %v958_v15  ;;  %v999_v19 = vpop.f32.mrb[9].mxu1  ;;  %v961_v20 = vpop.f32.mrb[10].mxu0 }
 0x118   : > { %v1000_v21 = vadd.f32 %v999_v19, %v998_v16  ;;  %v1001_v22 = vpop.f32.mrb[10].mxu1  ;;  %v962_v23 = vpop.f32.mrb[11].mxu0 }
 0x119   : > { %v963_v25 = vadd.f32 %v962_v23, %v961_v20  ;;  %v1002_v26 = vpop.f32.mrb[11].mxu1  ;;  %638 = vadd.xlane.f32.xlu1 %v637_v24 }
 0x11a   : > { %v1003_v27 = vadd.f32 %v1002_v26, %v1001_v22  ;;  %v613_v28 = vadd.f32 %v1000_v21, %v960_v18 }
 0x11c   : > { %v640_v29 = vsel %vm627_vm0, %v613_v28, 0.0  ;;  %v616_v30 = vadd.f32 %v1003_v27, %v963_v25 }
 0x11d   : > { %641 = vadd.xlane.f32.xlu0 %v640_v29  ;;  %v964_v31 = vpop.f32.mrb[12].mxu0 }
 0x11e   : > { %v1004_v32 = vpop.f32.mrb[12].mxu1  ;;  %v965_v33 = vpop.f32.mrb[13].mxu0  ;;  %v643_v34 = vsel %vm627_vm0, %v616_v30, 0.0 }
 0x11f   : > { %v966_v35 = vadd.f32 %v965_v33, %v964_v31  ;;  %v1005_v36 = vpop.f32.mrb[13].mxu1  ;;  %644 = vadd.xlane.f32.xlu1 %v643_v34  ;;  %v967_v37 = vpop.f32.mrb[14].mxu0 }
 0x120   : > { %v1006_v38 = vadd.f32 %v1005_v36, %v1004_v32  ;;  %v1007_v39 = vpop.f32.mrb[14].mxu1  ;;  %v968_v40 = vpop.f32.mrb[15].mxu0 }
 0x121   : > { %v969_v41 = vadd.f32 %v968_v40, %v967_v37  ;;  %v1008_v42 = vpop.f32.mrb[15].mxu1 }
 0x122   : > { %v1009_v43 = vadd.f32 %v1008_v42, %v1007_v39  ;;  %v621_v44 = vadd.f32 %v1006_v38, %v966_v35 }
 0x124   : > { %v646_v45 = vsel %vm627_vm0, %v621_v44, 0.0  ;;  %v624_v46 = vadd.f32 %v1009_v43, %v969_v41 }
 0x125   : > { %647 = vadd.xlane.f32.xlu0 %v646_v45 }
 0x126   : > { %v649_v47 = vsel %vm627_vm0, %v624_v46, 0.0 }
 0x127   : > { %650 = vadd.xlane.f32.xlu1 %v649_v47 }
 0x19a   : > { %v630_v48 = vpop.xlane.xlu0 %629 }
 0x19b   : > { %v653_v49 = vmul.f32 0.0625, %v630_v48 }
 0x19d   : > { %v661_v50 = vsub.f32 %v597_v60, %v653_v49 }
 0x19e   : > { %v633_v51 = vpop.xlane.xlu0 %632 }
 0x19f   : > { %v654_v52 = vmul.f32 0.0625, %v633_v51  ;;  %v669_v53 = vmul.f32 %v661_v50, %v661_v50 }
 0x1a1   : > { %v1221_v54 = vsub.f32 %v1210_v62, %v654_v52  ;;  %v677_v55 = vsel %vm627_vm0, %v669_v53, 0.0 }
 0x1a2   : > { %v636_v56 = vpop.xlane.xlu1 %635  ;;  %678 = vadd.xlane.f32.xlu0 %v677_v55 }
 0x1a3   : > { %v655_v57 = vmul.f32 0.0625, %v636_v56  ;;  %v670_v58 = vmul.f32 %v1221_v54, %v1221_v54 }
 0x1a5   : > { %v1226_v59 = vsub.f32 %v605_v12, %v655_v57  ;;  %v680_v61 = vsel %vm627_vm0, %v670_v58, 0.0 }
 0x1a6   : > { %v639_v63 = vpop.xlane.xlu1 %638  ;;  %681 = vadd.xlane.f32.xlu1 %v680_v61 }
 0x1a7   : > { %v656_v60 = vmul.f32 0.0625, %v639_v63  ;;  %v671_v0 = vmul.f32 %v1226_v59, %v1226_v59 }
 0x1a9   : > { %v1231_v62 = vsub.f32 %v608_v14, %v656_v60  ;;  %v683_v1 = vsel %vm627_vm0, %v671_v0, 0.0 }
 0x1aa   : > { %684 = vadd.xlane.f32.xlu0 %v683_v1  ;;  %v642_v2 = vpop.xlane.xlu0 %641 }
 0x1ab   : > { %v657_v3 = vmul.f32 0.0625, %v642_v2  ;;  %v672_v4 = vmul.f32 %v1231_v62, %v1231_v62 }
 0x1ac   : > { %v645_v5 = vpop.xlane.xlu1 %644 }
 0x1ad   : > { %v1236_v6 = vsub.f32 %v613_v28, %v657_v3  ;;  %v658_v7 = vmul.f32 0.0625, %v645_v5  ;;  %v686_v8 = vsel %vm627_vm0, %v672_v4, 0.0 }
 0x1ae   : > { %687 = vadd.xlane.f32.xlu1 %v686_v8 }
 0x1af   : > { %v1239_v9 = vsub.f32 %v616_v30, %v658_v7  ;;  %v673_v10 = vmul.f32 %v1236_v6, %v1236_v6 }
 0x1b1   : > { %v689_v11 = vsel %vm627_vm0, %v673_v10, 0.0  ;;  %v674_v12 = vmul.f32 %v1239_v9, %v1239_v9 }
 0x1b2   : > { %690 = vadd.xlane.f32.xlu0 %v689_v11  ;;  %v648_v13 = vpop.xlane.xlu0 %647 }
 0x1b3   : > { %v659_v14 = vmul.f32 0.0625, %v648_v13  ;;  %v692_v15 = vsel %vm627_vm0, %v674_v12, 0.0 }
 0x1b4   : > { %v651_v16 = vpop.xlane.xlu1 %650  ;;  %693 = vadd.xlane.f32.xlu1 %v692_v15 }
 0x1b5   : > { %v1247_v17 = vsub.f32 %v621_v44, %v659_v14  ;;  %v660_v18 = vmul.f32 0.0625, %v651_v16 }
 0x1b7   : > { %v1249_v19 = vsub.f32 %v624_v46, %v660_v18  ;;  %v675_v20 = vmul.f32 %v1247_v17, %v1247_v17 }
 0x1b9   : > { %v695_v21 = vsel %vm627_vm0, %v675_v20, 0.0  ;;  %v676_v22 = vmul.f32 %v1249_v19, %v1249_v19 }
 0x1ba   : > { %696 = vadd.xlane.f32.xlu0 %v695_v21 }
 0x1bb   : > { %v698_v23 = vsel %vm627_vm0, %v676_v22, 0.0 }
 0x1bc   : > { %699 = vadd.xlane.f32.xlu1 %v698_v23 }
 0x22f   : > { %v679_v24 = vpop.xlane.xlu0 %678 }
 0x230   : > { %v701_v25 = vmul.f32 0.0625, %v679_v24 }
 0x232   : > { %v709_v26 = vadd.f32 1e-05, %v701_v25 }
 0x233   : > { %v682_v27 = vpop.xlane.xlu1 %681 }
 0x234   : > { %1074 = vrsqrt.f32 %v709_v26  ;;  %v702_v28 = vmul.f32 0.0625, %v682_v27 }
 0x236   : > { %v710_v29 = vadd.f32 1e-05, %v702_v28 }
 0x237   : > { %v685_v30 = vpop.xlane.xlu0 %684 }
 0x238   : > { %1076 = vrsqrt.f32 %v710_v29  ;;  %v703_v31 = vmul.f32 0.0625, %v685_v30 }
 0x23a   : > { %v711_v32 = vadd.f32 1e-05, %v703_v31 }
 0x23b   : > { %v688_v33 = vpop.xlane.xlu1 %687 }
 0x23c   : > { %1078 = vrsqrt.f32 %v711_v32  ;;  %v704_v34 = vmul.f32 0.0625, %v688_v33 }
 0x23e   : > { %v1075_v35 = vpop.eup %1074  ;;  %v712_v36 = vadd.f32 1e-05, %v704_v34 }
 0x23f   : > { %v725_v37 = vmul.f32 %v1075_v35, %v661_v50  ;;  %v691_v38 = vpop.xlane.xlu0 %690 }
 0x240   : > { %1080 = vrsqrt.f32 %v712_v36  ;;  %v705_v39 = vmul.f32 0.0625, %v691_v38 }
 0x241   : > { %vm733_vm1 = vcmp.ge.f32.partialorder %v725_v37, 0.0  ;;  %v741_v40 = vmul.f32 0.2, %v725_v37  ;;  %v694_v41 = vpop.xlane.xlu1 %693 }
 0x242   : > { %v1077_v42 = vpop.eup %1076  ;;  %v713_v43 = vadd.f32 1e-05, %v705_v39  ;;  %v706_v44 = vmul.f32 0.0625, %v694_v41 }
 0x243   : > { %v749_v45 = vsel %vm733_vm1, %v725_v37, %v741_v40  ;;  %v726_v46 = vmul.f32 %v1077_v42, %v1221_v54 }
 0x244   : > { %v922_v47 = vpack.c.bf16 %v749_v45, %v749_v45  ;;  %1082 = vrsqrt.f32 %v713_v43  ;;  %v714_v48 = vadd.f32 1e-05, %v706_v44 }
 0x245   : > { %vm734_vm3 = vcmp.ge.f32.partialorder %v726_v46, 0.0  ;;  %v742_v49 = vmul.f32 0.2, %v726_v46 }
 0x246   : > { %v1079_v50 = vpop.eup %1078  ;;  %790 = vst.msk [vmem:[%s1261_s24] sm:$0xf] %vm789_vm2, %v922_v47  ;;  %1084 = vrsqrt.f32 %v714_v48 }
 0x247   : > { %v750_v51 = vsel %vm734_vm3, %v726_v46, %v742_v49  ;;  %v727_v52 = vmul.f32 %v1079_v50, %v1226_v59  ;;  %v697_v53 = vpop.xlane.xlu0 %696 }
 0x248   : > { %v923_v55 = vpack.c.bf16 %v750_v51, %v750_v51  ;;  %v707_v56 = vmul.f32 0.0625, %v697_v53 }
 0x249   : > { %vm735_vm4 = vcmp.ge.f32.partialorder %v727_v52, 0.0  ;;  %v743_v57 = vmul.f32 0.2, %v727_v52  ;;  %v700_v54 = vpop.xlane.xlu1 %699 }
 0x24a   : > { %v1081_v58 = vpop.eup %1080  ;;  %791 = vst.msk [vmem:[%s1261_s24 + $0x4] sm:$0xf] %vm789_vm2, %v923_v55  ;;  %v715_v61 = vadd.f32 1e-05, %v707_v56  ;;  %v708_v63 = vmul.f32 0.0625, %v700_v54 }
 0x24b   : > { %v751_v60 = vsel %vm735_vm4, %v727_v52, %v743_v57  ;;  %v728_v0 = vmul.f32 %v1081_v58, %v1231_v62 }
 0x24c   : > { %v924_v1 = vpack.c.bf16 %v751_v60, %v751_v60  ;;  %1086 = vrsqrt.f32 %v715_v61  ;;  %v716_v2 = vadd.f32 1e-05, %v708_v63 }
 0x24d   : > { %vm736_vm5 = vcmp.ge.f32.partialorder %v728_v0, 0.0  ;;  %v744_v59 = vmul.f32 0.2, %v728_v0 }
 0x24e   : > { %v1083_v3 = vpop.eup %1082  ;;  %792 = vst.msk [vmem:[%s1261_s24 + $0x8] sm:$0xf] %vm789_vm2, %v924_v1  ;;  %1088 = vrsqrt.f32 %v716_v2 }
 0x24f   : > { %v752_v4 = vsel %vm736_vm5, %v728_v0, %v744_v59  ;;  %v729_v5 = vmul.f32 %v1083_v3, %v1236_v6 }
 0x250   : > { %v1085_v7 = vpop.eup %1084  ;;  %v925_v8 = vpack.c.bf16 %v752_v4, %v752_v4 }
 0x251   : > { %vm737_vm6 = vcmp.ge.f32.partialorder %v729_v5, 0.0  ;;  %v745_v10 = vmul.f32 0.2, %v729_v5  ;;  %v730_v62 = vmul.f32 %v1085_v7, %v1239_v9 }
 0x252   : > { %793 = vst.msk [vmem:[%s1261_s24 + $0xc] sm:$0xf] %vm789_vm2, %v925_v8 }
 0x253   : > { %v753_v11 = vsel %vm737_vm6, %v729_v5, %v745_v10  ;;  %vm738_vm7 = vcmp.ge.f32.partialorder %v730_v62, 0.0  ;;  %v746_v12 = vmul.f32 0.2, %v730_v62 }
 0x254   : > { %v926_v13 = vpack.c.bf16 %v753_v11, %v753_v11 }
 0x255   : > { %v754_v14 = vsel %vm738_vm7, %v730_v62, %v746_v12 }
 0x256   : > { %v1087_v15 = vpop.eup %1086  ;;  %794 = vst.msk [vmem:[%s1261_s24 + $0x10] sm:$0xf] %vm789_vm2, %v926_v13  ;;  %v927_v6 = vpack.c.bf16 %v754_v14, %v754_v14 }
 0x257   : > { %v731_v16 = vmul.f32 %v1087_v15, %v1247_v17 }
 0x258   : > { %v1089_v18 = vpop.eup %1088  ;;  %795 = vst.msk [vmem:[%s1261_s24 + $0x14] sm:$0xf] %vm789_vm2, %v927_v6 }
 0x259   : > { %vm739_vm8 = vcmp.ge.f32.partialorder %v731_v16, 0.0  ;;  %v747_v9 = vmul.f32 0.2, %v731_v16  ;;  %v732_v20 = vmul.f32 %v1089_v18, %v1249_v19 }
 0x25b   : > { %v755_v21 = vsel %vm739_vm8, %v731_v16, %v747_v9  ;;  %vm740_vm9 = vcmp.ge.f32.partialorder %v732_v20, 0.0  ;;  %v748_v22 = vmul.f32 0.2, %v732_v20 }
 0x25c   : > { %v928_v23 = vpack.c.bf16 %v755_v21, %v755_v21 }
 0x25d   : > { %v756_v24 = vsel %vm740_vm9, %v732_v20, %v748_v22 }
 0x25e   : > { %796 = vst.msk [vmem:[%s1261_s24 + $0x18] sm:$0xf] %vm789_vm2, %v928_v23  ;;  %v929_v25 = vpack.c.bf16 %v756_v24, %v756_v24 }
 0x260   : > { %797 = vst.msk [vmem:[%s1261_s24 + $0x1c] sm:$0xf] %vm789_vm2, %v929_v25 }
 0x261 PF: > { %s12_s9 = sadd.s32 1, %s1096_s9  }
 0x262   : > { %p9_p4 = scmp.ge.s32.totalorder %s12_s9, 4  }
 0x264   :  { %11 = sbr.rel (!%p9_p4) target bundleno = 1 (0x1), region = 58 }

// kernel: multiscale_discriminator_forward.14
= control target key start
LH: loop header
LB: loop body
LE: loop exit
PB: predicated region body
PF: predicated region fallthrough
CT: control target
= control target key end

     0   :  { %s1376_s27 = smov 0   ;;  %s1488_s0 = inlined_call_operand.vmem [shape: bf16[2,1024,1], index: 0, kind: input, shape index: {}]   ;;  %s1489_s1 = inlined_call_operand.vmem [shape: bf16[1,1024], index: 1, kind: input, shape index: {}]   ;;  %s1490_s2 = inlined_call_operand.<no memory space> [shape: f32[1,1], index: 2, kind: input, shape index: {}]   ;;  %s1491_s5 = inlined_call_operand.vmem [shape: f32[2,1,1], index: 5, kind: output, shape index: {0}]   ;;  %s1492_s6 = inlined_call_operand.vmem [shape: f32[2,1,1], index: 6, kind: output, shape index: {1}]   ;;  %s1493_s3 = inlined_call_operand.<no memory space> [shape: f32[1,1], index: 3, kind: input, shape index: {}]   ;;  %s1494_s4 = inlined_call_operand.<no memory space> [shape: f32[1,1], index: 4, kind: input, shape index: {}]  }
   0x1   :  { %v12_v0 = vstv %s1490_s2  ;;  %v14_v1 = vstv %s1493_s3  ;;  %v16_v2 = vstv %s1494_s4 }
   0x2   :  { %13 = vst [vmem:[#allocation2] sm:$0x1] %v12_v0  ;;  %15 = vst [vmem:[#allocation3] sm:$0x1] %v14_v1 }
   0x3   :  { %17 = vst [vmem:[#allocation4] sm:$0x1] %v16_v2 }
   0x4 LB: > { %s1082_s2 = sadd.s32 4294967295, %s1329_s27   ;;  %p1086_p0 = scmp.ge.s32.totalorder %s1329_s27, 1  ;;  %s1329_s27 = sphi %s1376_s27, %s23_s27  }
   0x5   : > { %p221_p1 = scmp.lt.s32.totalorder %s1329_s27, 3 }
   0x7   : > { %p222_p2 = pnand %p1086_p0, %p221_p1 }
   0x8   : > { %p252_p3 = scmp.lt.s32.totalorder (!%p222_p2), %s1082_s2, 1  ;;  %v399_v3 = vlaneseq (!%p222_p2)  ;;  %v1331_v4 = vmov (!%p222_p2), 1966171168   ;;  %v392_v8 = vld [vmem:[%s1489_s1] sm:$0xff] (!%p222_p2)  ;;  %vm996_vm0 = vcmask (!%p222_p2), 0  }
   0x9   : > { %225 = sbr.rel (%p222_p2) target bundleno = 335 (0x14f), region = 40  ;;  %v397_v5 = vunpack.c.l.s4 (!%p222_p2), %v1331_v4  ;;  %v395_v33 = vcombine.high (!%p222_p2), %v392_v8, %v392_v8 }
   0xa   : > { %v400_v6 = vshrl.u32 (!%p222_p2), %v399_v3, 7 }
   0xb   : > { %v398_v7 = vunpack.c.0.s8 (!%p222_p2), %v397_v5 }
   0xd   : > { %v1395_v9 = vsub.s32 (!%p222_p2), %v398_v7, %v400_v6 }
   0xf   : > { %v1400_v12 = vrot.slane (!%p222_p2), %v392_v8, %v1395_v9  ;;  %v1427_v38 = vrot.slane (!%p222_p2), %v395_v33, %v1395_v9 }
  0x10   : > { %s1496_s2 = smov (!%p252_p3, %s1082_s2), 1 }
  0x11   : > { %s1156_s3 = sshll.u32 %s1496_s2, 9  ;;  %v410_v15 = vcombine.high %v1400_v12, %v1400_v12  ;;  %v411_v43 = vcombine.high %v1427_v38, %v1427_v38  ;;  %v418_v46 = vrot.slane %v1400_v12, %v1395_v9  ;;  %s259_s10 = scalar_lea.vmem %s1491_s5, %s1496_s2 }
  0x12   : > { %s1393_s7 = scalar_lea.vmem %s1488_s0, %s1156_s3  ;;  %s262_s13 = scalar_lea.vmem %s1492_s6, %s1496_s2 }
  0x13   : > { %v1254_v10 = vld [vmem:[%s1393_s7 + $0x40] sm:$0xff]   ;;  %v1258_v16 = vld [vmem:[%s1393_s7 + $0x48] sm:$0xff]   ;;  %v432_v18 = vrot.slane %v410_v15, %v1395_v9  ;;  %v1262_v22 = vld [vmem:[%s1393_s7 + $0x50] sm:$0xff]   ;;  %v439_v49 = vrot.slane %v411_v43, %v1395_v9  ;;  %v440_v51 = vcombine.high %v418_v46, %v418_v46 }
  0x14   : > { %v1255_v11 = vld [vmem:[%s1393_s7 + $0xc0] sm:$0xff]   ;;  %1157 = vmatprep.subr.bf16.mxu0 %v1254_v10  ;;  %v1259_v17 = vld [vmem:[%s1393_s7 + $0xc8] sm:$0xff]   ;;  %v1263_v23 = vld [vmem:[%s1393_s7 + $0xd0] sm:$0xff]  }
  0x15   : > { %v1256_v13 = vld [vmem:[%s1393_s7] sm:$0xff]   ;;  %1179 = vmatprep.subr.bf16.mxu1 %v1255_v11  ;;  %v1260_v19 = vld [vmem:[%s1393_s7 + $0x8] sm:$0xff]   ;;  %868 = vmatprep.mubr.bf16.mxu0 %v432_v18  ;;  %v442_v21 = vcombine.high %v432_v18, %v432_v18  ;;  %v1264_v24 = vld [vmem:[%s1393_s7 + $0x10] sm:$0xff]   ;;  %v443_v55 = vcombine.high %v439_v49, %v439_v49 }
  0x16   : > { %v1257_v14 = vld [vmem:[%s1393_s7 + $0x80] sm:$0xff]   ;;  %1158 = vmatpush3.bf16.msra.mxu0 %v1256_v13  ;;  %v1261_v20 = vld [vmem:[%s1393_s7 + $0x88] sm:$0xff]   ;;  %v1265_v25 = vld [vmem:[%s1393_s7 + $0x90] sm:$0xff]  }
  0x17   : > { %1180 = vmatpush3.bf16.msra.mxu1 %v1257_v14  ;;  %1159 = vmatprep.subr.bf16.mxu0 %v1258_v16  ;;  %v1266_v26 = vld [vmem:[%s1393_s7 + $0x58] sm:$0xff]   ;;  %v1270_v30 = vld [vmem:[%s1393_s7 + $0x60] sm:$0xff]   ;;  %v1274_v35 = vld [vmem:[%s1393_s7 + $0x68] sm:$0xff]  }
  0x18   : > { %1181 = vmatprep.subr.bf16.mxu1 %v1259_v17  ;;  %908 = vmatprep.mubr.bf16.mxu1 %v442_v21  ;;  %v1267_v27 = vld [vmem:[%s1393_s7 + $0xd8] sm:$0xff]   ;;  %v1271_v31 = vld [vmem:[%s1393_s7 + $0xe0] sm:$0xff]   ;;  %v1275_v36 = vld [vmem:[%s1393_s7 + $0xe8] sm:$0xff]  }
  0x19   : > { %v1268_v28 = vld [vmem:[%s1393_s7 + $0x18] sm:$0xff]   ;;  %v1272_v32 = vld [vmem:[%s1393_s7 + $0x20] sm:$0xff]   ;;  %v1276_v37 = vld [vmem:[%s1393_s7 + $0x28] sm:$0xff]  }
  0x1a   : > { %1160 = vmatpush3.bf16.msra.mxu0 %v1260_v19  ;;  %v1269_v29 = vld [vmem:[%s1393_s7 + $0x98] sm:$0xff]   ;;  %v1273_v34 = vld [vmem:[%s1393_s7 + $0xa0] sm:$0xff]   ;;  %v1277_v39 = vld [vmem:[%s1393_s7 + $0xa8] sm:$0xff]   ;;  %v425_v19 = vrot.slane %v1427_v38, %v1395_v9 }
  0x1b   : > { %1182 = vmatpush3.bf16.msra.mxu1 %v1261_v20  ;;  %1161 = vmatprep.subr.bf16.mxu0 %v1262_v22  ;;  %v1278_v40 = vld [vmem:[%s1393_s7 + $0x70] sm:$0xff]   ;;  %v1282_v45 = vld [vmem:[%s1393_s7 + $0x78] sm:$0xff]   ;;  %v1287_v52 = vld [vmem:[%s1393_s7 + $0x140] sm:$0xff]  }
  0x1c   : > { %1183 = vmatprep.subr.bf16.mxu1 %v1263_v23  ;;  %v1279_v41 = vld [vmem:[%s1393_s7 + $0xf0] sm:$0xff]   ;;  %v1283_v47 = vld [vmem:[%s1393_s7 + $0xf8] sm:$0xff]   ;;  %v1288_v53 = vld [vmem:[%s1393_s7 + $0x1c0] sm:$0xff]   ;;  %v441_v23 = vcombine.high %v425_v19, %v425_v19 }
  0x1d   : > { %v1280_v42 = vld [vmem:[%s1393_s7 + $0x30] sm:$0xff]   ;;  %v1284_v48 = vld [vmem:[%s1393_s7 + $0x38] sm:$0xff]   ;;  %v1289_v54 = vld [vmem:[%s1393_s7 + $0x100] sm:$0xff]  }
  0x1e   : > { %1162 = vmatpush3.bf16.msra.mxu0 %v1264_v24  ;;  %v1281_v44 = vld [vmem:[%s1393_s7 + $0xb0] sm:$0xff]   ;;  %v1285_v50 = vld [vmem:[%s1393_s7 + $0xb8] sm:$0xff]   ;;  %v1290_v56 = vld [vmem:[%s1393_s7 + $0x180] sm:$0xff]  }
  0x1f   : > { %1184 = vmatpush3.bf16.msra.mxu1 %v1265_v25  ;;  %1163 = vmatprep.subr.bf16.mxu0 %v1266_v26  ;;  %v1291_v57 = vld [vmem:[%s1393_s7 + $0x148] sm:$0xff]   ;;  %v1295_v61 = vld [vmem:[%s1393_s7 + $0x150] sm:$0xff]   ;;  %v1299_v1 = vld [vmem:[%s1393_s7 + $0x158] sm:$0xff]  }
  0x20   : > { %1185 = vmatprep.subr.bf16.mxu1 %v1267_v27  ;;  %v1292_v58 = vld [vmem:[%s1393_s7 + $0x1c8] sm:$0xff]   ;;  %v1296_v62 = vld [vmem:[%s1393_s7 + $0x1d0] sm:$0xff]   ;;  %v1300_v2 = vld [vmem:[%s1393_s7 + $0x1d8] sm:$0xff]  }
  0x21   : > { %v1293_v59 = vld [vmem:[%s1393_s7 + $0x108] sm:$0xff]   ;;  %v1297_v63 = vld [vmem:[%s1393_s7 + $0x110] sm:$0xff]   ;;  %v1301_v3 = vld [vmem:[%s1393_s7 + $0x118] sm:$0xff]  }
  0x22   : > { %1164 = vmatpush3.bf16.msra.mxu0 %v1268_v28  ;;  %v1294_v60 = vld [vmem:[%s1393_s7 + $0x188] sm:$0xff]   ;;  %v1298_v0 = vld [vmem:[%s1393_s7 + $0x190] sm:$0xff]   ;;  %v1302_v4 = vld [vmem:[%s1393_s7 + $0x198] sm:$0xff]  }
  0x23   : > { %1186 = vmatpush3.bf16.msra.mxu1 %v1269_v29  ;;  %1165 = vmatprep.subr.bf16.mxu0 %v1270_v30  ;;  %v1303_v5 = vld [vmem:[%s1393_s7 + $0x160] sm:$0xff]   ;;  %v1307_v10 = vld [vmem:[%s1393_s7 + $0x168] sm:$0xff]   ;;  %v1311_v14 = vld [vmem:[%s1393_s7 + $0x170] sm:$0xff]  }
  0x24   : > { %1187 = vmatprep.subr.bf16.mxu1 %v1271_v31  ;;  %v1304_v6 = vld [vmem:[%s1393_s7 + $0x1e0] sm:$0xff]   ;;  %v1308_v11 = vld [vmem:[%s1393_s7 + $0x1e8] sm:$0xff]   ;;  %v1312_v15 = vld [vmem:[%s1393_s7 + $0x1f0] sm:$0xff]  }
  0x25   : > { %v1305_v7 = vld [vmem:[%s1393_s7 + $0x120] sm:$0xff]   ;;  %v1309_v12 = vld [vmem:[%s1393_s7 + $0x128] sm:$0xff]   ;;  %v1313_v16 = vld [vmem:[%s1393_s7 + $0x130] sm:$0xff]  }
  0x26   : > { %1166 = vmatpush3.bf16.msra.mxu0 %v1272_v32  ;;  %v1306_v8 = vld [vmem:[%s1393_s7 + $0x1a0] sm:$0xff]   ;;  %v1310_v13 = vld [vmem:[%s1393_s7 + $0x1a8] sm:$0xff]   ;;  %v1314_v17 = vld [vmem:[%s1393_s7 + $0x1b0] sm:$0xff]  }
  0x27   : > { %1188 = vmatpush3.bf16.msra.mxu1 %v1273_v34  ;;  %1167 = vmatprep.subr.bf16.mxu0 %v1274_v35  ;;  %v1315_v18 = vld [vmem:[%s1393_s7 + $0x178] sm:$0xff]   ;;  %v393_v26 = vld [vmem:[#allocation2] sm:$0x1] }
  0x28   : > { %1189 = vmatprep.subr.bf16.mxu1 %v1275_v36  ;;  %v1316_v20 = vld [vmem:[%s1393_s7 + $0x1f8] sm:$0xff]  }
  0x29   : > { %v1317_v21 = vld [vmem:[%s1393_s7 + $0x138] sm:$0xff]  }
  0x2a   : > { %1168 = vmatpush3.bf16.msra.mxu0 %v1276_v37  ;;  %v1318_v22 = vld [vmem:[%s1393_s7 + $0x1b8] sm:$0xff]  }
  0x2b   : > { %1190 = vmatpush3.bf16.msra.mxu1 %v1277_v39  ;;  %1169 = vmatprep.subr.bf16.mxu0 %v1278_v40 }
  0x2c   : > { %1191 = vmatprep.subr.bf16.mxu1 %v1279_v41 }
  0x2e   : > { %1170 = vmatpush3.bf16.msra.mxu0 %v1280_v42 }
  0x2f   : > { %1192 = vmatpush3.bf16.msra.mxu1 %v1281_v44  ;;  %1171 = vmatprep.subr.bf16.mxu0 %v1282_v45 }
  0x30   : > { %1193 = vmatprep.subr.bf16.mxu1 %v1283_v47  ;;  %v998_v47 = vld [vmem:[#allocation3] sm:$0x1] }
  0x32   : > { %1172 = vmatpush3.bf16.msra.mxu0 %v1284_v48 }
  0x33   : > { %1194 = vmatpush3.bf16.msra.mxu1 %v1285_v50  ;;  %1201 = vmatprep.subr.bf16.mxu0 %v1287_v52 }
  0x34   : > { %1223 = vmatprep.subr.bf16.mxu1 %v1288_v53 }
  0x35   : > { %869 = vmatmul.mubr.bf16.vlgmr.msra.gmra.mrb[0].mxu0 %v418_v46 }
  0x36   : > { %909 = vmatmul.mubr.bf16.vlgmr.msra.gmra.mrb[0].mxu1 %v440_v51  ;;  %1202 = vmatpush3.bf16.msra.mxu0 %v1289_v54 }
  0x37   : > { %1224 = vmatpush3.bf16.msra.mxu1 %v1290_v56  ;;  %948 = vmatprep.mubr.bf16.mxu0 %v439_v49  ;;  %v1001_v49 = vld [vmem:[#allocation4] sm:$0x1] }
  0x38   : > { %1203 = vmatprep.subr.bf16.mxu0 %v1291_v57  ;;  %988 = vmatprep.mubr.bf16.mxu1 %v443_v55 }
  0x39   : > { %1225 = vmatprep.subr.bf16.mxu1 %v1292_v58 }
  0x3a   : > { %1204 = vmatpush3.bf16.msra.mxu0 %v1293_v59 }
  0x3b   : > { %1226 = vmatpush3.bf16.msra.mxu1 %v1294_v60  ;;  %1205 = vmatprep.subr.bf16.mxu0 %v1295_v61 }
  0x3c   : > { %1227 = vmatprep.subr.bf16.mxu1 %v1296_v62 }
  0x3e   : > { %1206 = vmatpush3.bf16.msra.mxu0 %v1297_v63 }
  0x3f   : > { %1228 = vmatpush3.bf16.msra.mxu1 %v1298_v0  ;;  %1207 = vmatprep.subr.bf16.mxu0 %v1299_v1 }
  0x40   : > { %1229 = vmatprep.subr.bf16.mxu1 %v1300_v2 }
  0x42   : > { %1208 = vmatpush3.bf16.msra.mxu0 %v1301_v3 }
  0x43   : > { %1230 = vmatpush3.bf16.msra.mxu1 %v1302_v4  ;;  %1209 = vmatprep.subr.bf16.mxu0 %v1303_v5 }
  0x44   : > { %1231 = vmatprep.subr.bf16.mxu1 %v1304_v6 }
  0x46   : > { %1210 = vmatpush3.bf16.msra.mxu0 %v1305_v7 }
  0x47   : > { %1232 = vmatpush3.bf16.msra.mxu1 %v1306_v8  ;;  %1211 = vmatprep.subr.bf16.mxu0 %v1307_v10 }
  0x48   : > { %1233 = vmatprep.subr.bf16.mxu1 %v1308_v11 }
  0x4a   : > { %1212 = vmatpush3.bf16.msra.mxu0 %v1309_v12 }
  0x4b   : > { %1234 = vmatpush3.bf16.msra.mxu1 %v1310_v13  ;;  %1213 = vmatprep.subr.bf16.mxu0 %v1311_v14 }
  0x4c   : > { %1235 = vmatprep.subr.bf16.mxu1 %v1312_v15 }
  0x4e   : > { %1214 = vmatpush3.bf16.msra.mxu0 %v1313_v16 }
  0x4f   : > { %1236 = vmatpush3.bf16.msra.mxu1 %v1314_v17  ;;  %1215 = vmatprep.subr.bf16.mxu0 %v1315_v18 }
  0x50   : > { %1237 = vmatprep.subr.bf16.mxu1 %v1316_v20 }
  0x52   : > { %1216 = vmatpush3.bf16.msra.mxu0 %v1317_v21 }
  0x53   : > { %1238 = vmatpush3.bf16.msra.mxu1 %v1318_v22 }
  0x55   : > { %949 = vmatmul.mubr.bf16.vlgmr.msra.gmra.mrb[4].mxu0 %v425_v19 }
  0x56   : > { %989 = vmatmul.mubr.bf16.vlgmr.msra.gmra.mrb[4].mxu1 %v441_v23 }
 0x108   : > { %v1173_v24 = vpop.f32.mrb[0].mxu0 }
 0x109   : > { %v1195_v25 = vpop.f32.mrb[0].mxu1  ;;  %v1174_v27 = vpop.f32.mrb[1].mxu0 }
 0x10a   : > { %v1175_v28 = vadd.f32 %v1174_v27, %v1173_v24  ;;  %v1196_v29 = vpop.f32.mrb[1].mxu1  ;;  %v1176_v30 = vpop.f32.mrb[2].mxu0 }
 0x10b   : > { %v1197_v31 = vadd.f32 %v1196_v29, %v1195_v25  ;;  %v1198_v9 = vpop.f32.mrb[2].mxu1  ;;  %v1177_v32 = vpop.f32.mrb[3].mxu0 }
 0x10c   : > { %v871_v33 = vadd.f32 %v1175_v28, %v393_v26  ;;  %v1199_v34 = vpop.f32.mrb[3].mxu1 }
 0x10e   : > { %v911_v35 = vadd.f32 %v1197_v31, %v871_v33 }
 0x128   : > { %v1217_v36 = vpop.f32.mrb[4].mxu0 }
 0x129   : > { %v1239_v37 = vpop.f32.mrb[4].mxu1  ;;  %v1218_v38 = vpop.f32.mrb[5].mxu0 }
 0x12a   : > { %v1219_v39 = vadd.f32 %v1218_v38, %v1217_v36  ;;  %v1240_v40 = vpop.f32.mrb[5].mxu1  ;;  %v1220_v41 = vpop.f32.mrb[6].mxu0 }
 0x12b   : > { %v1241_v42 = vadd.f32 %v1240_v40, %v1239_v37  ;;  %v1242_v43 = vpop.f32.mrb[6].mxu1  ;;  %v1221_v44 = vpop.f32.mrb[7].mxu0 }
 0x12c   : > { %v951_v45 = vadd.f32 %v1219_v39, %v911_v35  ;;  %v1243_v46 = vpop.f32.mrb[7].mxu1 }
 0x12e   : > { %v991_v48 = vadd.f32 %v1241_v42, %v951_v45 }
 0x130   : > { %997 = vst.msk [vmem:[%s259_s10] sm:$0x1] %vm996_vm0, %v991_v48  ;;  %v999_v50 = vmul.f32 %v998_v47, %v991_v48 }
 0x132   : > { %v1002_v51 = vadd.f32 %v1001_v49, %v999_v50 }
 0x134   : > { %v1153_v52 = vmul.f32 -1.442695, %v1002_v51 }
 0x136   : > { %1319 = vpow2.f32 %v1153_v52 }
 0x140   : > { %v1320_v53 = vpop.eup %1319 }
 0x141   : > { %v1006_v54 = vadd.f32 1.0, %v1320_v53 }
 0x143   : > { %1321 = vrcp.f32 %v1006_v54 }
 0x14d   : > { %v1322_v55 = vpop.eup %1321 }
 0x14e   : > { %1009 = vst.msk [vmem:[%s262_s13] sm:$0x1] %vm996_vm0, %v1322_v55 }
 0x14f PF: > { %s23_s27 = sadd.s32 1, %s1329_s27  }
 0x150   : > { %p20_p4 = scmp.ge.s32.totalorder %s23_s27, 4  }
 0x152   :  { %22 = sbr.rel (!%p20_p4) target bundleno = 4 (0x4), region = 82 }

</bundles_post_ra>
